<compile_context>
chip_gen: v6e
topology: v6e:2x2x1
jax: 0.10.0
libtpu: 0.0.40
codegen_flags: <defaults>
</compile_context>

<pallas_src>
import functools

import jax
import jax.numpy as jnp
from jax.experimental import pallas as pl
from jax.experimental.pallas import tpu as pltpu

NUM_FEATURES = 1000   # backbone feature dim (EfficientNet-B0 logits)
NUM_CLASSES = 20      # Temporal_Attention num_class

F_PAD = 1024          # lane-dense padded feature dim (multiple of 128)
C_PAD = 128           # lane-dense padded class dim   (multiple of 128)
TK = 2048             # K-tile over the flattened frame dim D (review: 512 -> 2048)
TF = 1024             # F-tile (all of padded F; weights stream exactly once)


def _round_up(x, m):
    return ((x + m - 1) // m) * m


# -----------------------------------------------------------------------------
# Fused kernel: backbone projection + Temporal_Attention head.
#
# grid = (nF, nK)  with the K (reduction over D) axis LAST.
#   xm_ref   : (M_pad, D_pad)  bf16  group-averaged flattened frames (VMEM-resident)
#   wbb_ref  : (TK, TF)        bf16  backbone weight tile (streamed)
#   bbb_ref  : (1, TF)         bf16  backbone bias tile
#   wa_ref   : (1, TF)         bf16  attention score weight tile
#   wcls_ref : (TF, C_PAD)     bf16  classifier weight tile
#   bcls_ref : (1, C_PAD)      bf16  classifier bias
#   ba_ref   : (1,)            f32   attention score bias (SMEM scalar)
#   o_ref    : (B, C_PAD)      f32   padded logits (written once, last grid step)
# scratch:
#   acc_ref   : (M_pad, TF)    f32   K-accumulator for the current F tile
#   score_ref : (M_pad, 1)     f32   attention scores, accumulated across F tiles
#   flog_ref  : (M_pad, C_PAD) f32   per-frame classifier logits, accumulated
# -----------------------------------------------------------------------------
def fused_kernel(xm_ref, wbb_ref, bbb_ref, wa_ref, wcls_ref, bcls_ref, ba_ref,
                 o_ref, acc_ref, score_ref, flog_ref, *, bsz, nseg):
    f = pl.program_id(0)
    k = pl.program_id(1)
    n_f = pl.num_programs(0)
    n_k = pl.num_programs(1)

    # Zero the cross-F-tile accumulators at the very first grid step.
    @pl.when(jnp.logical_and(f == 0, k == 0))
    def _():
        score_ref[...] = jnp.zeros_like(score_ref)
        flog_ref[...] = jnp.zeros_like(flog_ref)

    # Zero the K accumulator at the start of each F tile.
    @pl.when(k == 0)
    def _():
        acc_ref[...] = jnp.zeros_like(acc_ref)

    # Hot loop: bf16 streaming matmul, f32 MXU accumulation.  xm is resident in
    # VMEM; only the w_bb tile is DMA'd per step (one descriptor / step).
    k_off = pl.multiple_of(k * TK, TK)
    xk = xm_ref[:, pl.ds(k_off, TK)]                          # (M_pad, TK) bf16
    acc_ref[...] += jnp.dot(xk, wbb_ref[...],
                            preferred_element_type=jnp.float32)

    # End of the K reduction: finalize this F tile's backbone features and fold
    # them into the (tiny) attention-head accumulators.
    @pl.when(k == n_k - 1)
    def _():
        feat = acc_ref[...] + bbb_ref[...].astype(jnp.float32)   # (M_pad, TF) f32
        # Attention score contribution: VPU broadcast-mul + lane (XLU) reduce
        # instead of a 1-lane-wide MXU matmul.
        score_ref[...] += jnp.sum(feat * wa_ref[...].astype(jnp.float32),
                                  axis=-1, keepdims=True)
        # Per-frame classifier logits. The classifier is linear, so its F-tile
        # contributions can be accumulated before the attention weighting.
        flog_ref[...] += jnp.dot(feat.astype(jnp.bfloat16), wcls_ref[...],
                                 preferred_element_type=jnp.float32)

    # Very last grid step: segment softmax over the n_seg axis per batch
    # element, attention-weighted pooling of the per-frame logits, bias, store.
    # (Static unroll: perf-neutral at toy bsz — runs once under DMA epilogue.)
    @pl.when(jnp.logical_and(f == n_f - 1, k == n_k - 1))
    def _():
        scores = score_ref[...] + ba_ref[0]                      # (M_pad, 1)
        bias = bcls_ref[...].astype(jnp.float32)                 # (1, C_PAD)
        for b in range(bsz):                                     # static unroll
            sb = scores[b * nseg:(b + 1) * nseg, :]              # (T, 1)
            mb = jnp.max(sb, axis=0, keepdims=True)
            eb = jnp.exp(sb - mb)
            attn = eb * pl.reciprocal(jnp.sum(eb, axis=0, keepdims=True),
                                      approx=True)               # (T, 1)
            flb = flog_ref[b * nseg:(b + 1) * nseg, :]            # (T, C_PAD)
            o_ref[b:b + 1, :] = (jnp.sum(attn * flb, axis=0, keepdims=True)
                                 + bias)


def _fused_forward(xm, w_bb, b_bb, w_attn, w_cls, b_cls, b_attn, *, bsz, nseg,
                   m_pad, d_pad):
    n_f = F_PAD // TF
    n_k = d_pad // TK

    kernel = functools.partial(fused_kernel, bsz=bsz, nseg=nseg)

    cost = pl.CostEstimate(
        flops=2 * m_pad * d_pad * F_PAD + 2 * m_pad * F_PAD * C_PAD,
        transcendentals=bsz * nseg,
        bytes_accessed=(m_pad * d_pad * 2                      # xm (bf16)
                        + d_pad * F_PAD * 2                    # w_bb (bf16)
                        + (F_PAD * C_PAD + 3 * F_PAD + C_PAD) * 2  # head (bf16)
                        + bsz * C_PAD * 4),                    # logits (f32)
    )

    return pl.pallas_call(
        kernel,
        out_shape=jax.ShapeDtypeStruct((bsz, C_PAD), jnp.float32),
        grid_spec=pltpu.PrefetchScalarGridSpec(
            num_scalar_prefetch=0,
            grid=(n_f, n_k),                                   # K (reduction) last
            in_specs=[
                # xm: fully VMEM-resident (constant block index -> no re-DMA).
                pl.BlockSpec((m_pad, d_pad), lambda f, k: (0, 0)),   # xm
                pl.BlockSpec((TK, TF), lambda f, k: (k, f)),         # w_bb
                pl.BlockSpec((1, TF), lambda f, k: (0, f)),          # b_bb
                pl.BlockSpec((1, TF), lambda f, k: (0, f)),          # w_attn
                pl.BlockSpec((TF, C_PAD), lambda f, k: (f, 0)),      # w_cls
                pl.BlockSpec((1, C_PAD), lambda f, k: (0, 0)),       # b_cls
                pl.BlockSpec(memory_space=pltpu.MemorySpace.SMEM),   # b_attn scalar
            ],
            out_specs=pl.BlockSpec((bsz, C_PAD), lambda f, k: (0, 0)),
            scratch_shapes=[
                pltpu.VMEM((m_pad, TF), jnp.float32),     # acc
                pltpu.VMEM((m_pad, 1), jnp.float32),      # attention scores
                pltpu.VMEM((m_pad, C_PAD), jnp.float32),  # per-frame logits
            ],
        ),
        compiler_params=pltpu.CompilerParams(
            # Output + head accumulators are carried across BOTH axes, so both
            # are sequential ("arbitrary"); budget sized for v5e scoped default
            # and v7x's smaller 64 MiB physical VMEM.
            dimension_semantics=("arbitrary", "arbitrary"),
            vmem_limit_bytes=32 * 1024 * 1024,
        ),
        cost_estimate=cost,
    )(xm, w_bb, b_bb, w_attn, w_cls, b_cls, b_attn)


# -----------------------------------------------------------------------------
# Full NEW_MYNET forward (layout plumbing in plain JAX, hot path in Pallas).
# -----------------------------------------------------------------------------
def new_mynet_forward(rgb, params, sequence_size):
    B = rgb.shape[0]
    n_seg, G, C, H, W = rgb.shape[1:]
    assert n_seg == sequence_size // 3
    D = C * H * W
    M = B * n_seg

    # rgb.mean(2) done outside the kernel in f32 (removes the G=3 sublane-padded
    # axis + cross-sublane reduce from the hot loop), then cast to bf16.
    xm = jnp.mean(rgb.astype(jnp.float32), axis=2).reshape(M, D)

    d_pad = _round_up(D, TK)
    m_pad = _round_up(max(M, 16), 16)        # bf16 packs 16 rows per vreg tile
    xm = jnp.pad(xm, ((0, m_pad - M), (0, d_pad - D))).astype(jnp.bfloat16)

    assert params["w_bb"].shape == (d_pad, F_PAD)

    logits_pad = _fused_forward(
        xm, params["w_bb"], params["b_bb"], params["w_attn"],
        params["w_cls"], params["b_cls"], params["b_attn"],
        bsz=B, nseg=n_seg, m_pad=m_pad, d_pad=d_pad)

    return logits_pad[:, :NUM_CLASSES]


def init_params(key, D):
    k1, k2, k3 = jax.random.split(key, 3)
    d_pad = _round_up(D, TK)

    # NOTE: padded regions MUST stay zero — the fused kernel reduces over all
    # F_PAD lanes / C_PAD classes and relies on this contract.
    w_bb = jnp.zeros((d_pad, F_PAD), jnp.float32)
    w_bb = w_bb.at[:D, :NUM_FEATURES].set(
        jax.random.normal(k1, (D, NUM_FEATURES), jnp.float32) * 0.02)

    w_attn = jnp.zeros((1, F_PAD), jnp.float32)
    w_attn = w_attn.at[0, :NUM_FEATURES].set(
        jax.random.normal(k2, (NUM_FEATURES,), jnp.float32) * 0.05)

    w_cls = jnp.zeros((F_PAD, C_PAD), jnp.float32)
    w_cls = w_cls.at[:NUM_FEATURES, :NUM_CLASSES].set(
        jax.random.normal(k3, (NUM_FEATURES, NUM_CLASSES), jnp.float32) * 0.05)

    return {
        # All weights streamed in bf16 (bandwidth-bound kernel); f32 accumulation.
        "w_bb": w_bb.astype(jnp.bfloat16),
        "b_bb": jnp.zeros((1, F_PAD), jnp.bfloat16),
        "w_attn": w_attn.astype(jnp.bfloat16),
        "b_attn": jnp.zeros((1,), jnp.float32),     # softmax-shift-invariant bias
        "w_cls": w_cls.astype(jnp.bfloat16),
        "b_cls": jnp.zeros((1, C_PAD), jnp.bfloat16),
    }


if __name__ == "__main__":
    key = jax.random.PRNGKey(0)
    k_x, k_p = jax.random.split(key)

    # Small shapes consistent with the module: sequence_size=6 -> 2 segments of
    # 3 frames, 3-channel 32x32 frames (stand-in for 320x320), batch=2.
    B = 2
    sequence_size = 6
    n_seg = sequence_size // 3
    G, C, H, W = 3, 3, 32, 32
    D = C * H * W

    rgb = jax.random.normal(k_x, (B, n_seg, G, C, H, W), jnp.float32)
    params = init_params(k_p, D)

    logits = new_mynet_forward(rgb, params, sequence_size)
    jax.block_until_ready(logits)
    assert logits.shape == (B, NUM_CLASSES)
    print("KERNEL_OK")
</pallas_src>

<mosaic_0001>
module attributes {stable_mosaic.version = 11 : i64} {
  func.func @fused_kernel(%arg0: i32, %arg1: i32, %arg2: memref<16x4096xbf16, #tpu.memory_space<vmem>>, %arg3: memref<2048x1024xbf16, #tpu.memory_space<vmem>>, %arg4: memref<1x1024xbf16, #tpu.memory_space<vmem>>, %arg5: memref<1x1024xbf16, #tpu.memory_space<vmem>>, %arg6: memref<1024x128xbf16, #tpu.memory_space<vmem>>, %arg7: memref<1x128xbf16, #tpu.memory_space<vmem>>, %arg8: memref<1xf32, #tpu.memory_space<smem>>, %arg9: memref<2x128xf32, #tpu.memory_space<vmem>>, %arg10: memref<16x1024xf32, #tpu.memory_space<vmem>>, %arg11: memref<16x1xf32, #tpu.memory_space<vmem>>, %arg12: memref<16x128xf32, #tpu.memory_space<vmem>>) attributes {dimension_semantics = [#tpu.dimension_semantics<arbitrary>, #tpu.dimension_semantics<arbitrary>], iteration_bounds = array<i64: 1, 2>, scalar_prefetch = 0 : i64, scratch_operands = 3 : i64, tpu.core_type = #tpu.core_type<tc>, window_params = [{pipeline_mode = #tpu.pipeline_mode<synchronous>, transform_indices = @transform_0, window_bounds = array<i64: 16, 4096>}, {transform_indices = @transform_1, window_bounds = array<i64: 2048, 1024>}, {transform_indices = @transform_2, window_bounds = array<i64: 1, 1024>}, {transform_indices = @transform_3, window_bounds = array<i64: 1, 1024>}, {transform_indices = @transform_4, window_bounds = array<i64: 1024, 128>}, {pipeline_mode = #tpu.pipeline_mode<synchronous>, transform_indices = @transform_5, window_bounds = array<i64: 1, 128>}, {transform_indices = @transform_6, window_bounds = array<i64: 1>}, {pipeline_mode = #tpu.pipeline_mode<synchronous>, transform_indices = @transform_7, window_bounds = array<i64: 2, 128>}]} {
    %c0_i32 = arith.constant 0 : i32
    %0 = arith.cmpi eq, %arg0, %c0_i32 : i32
    %c0_i32_0 = arith.constant 0 : i32
    %1 = arith.cmpi eq, %arg1, %c0_i32_0 : i32
    %2 = arith.andi %0, %1 : i1
    %3 = arith.extui %2 : i1 to i32
    %c0_i32_1 = arith.constant 0 : i32
    %4 = arith.cmpi ne, %3, %c0_i32_1 : i32
    scf.if %4 {
      %cst_14 = arith.constant 0.000000e+00 : f32
      %25 = vector.broadcast %cst_14 : f32 to vector<16x1xf32>
      %c0_15 = arith.constant 0 : index
      %c0_16 = arith.constant 0 : index
      %26 = vector.load %arg11[%c0_15, %c0_16] : memref<16x1xf32, #tpu.memory_space<vmem>>, vector<16x1xf32>
      tpu.vector_store %arg11[%c0_15, %c0_16], %25 {strides = array<i32>} : memref<16x1xf32, #tpu.memory_space<vmem>>, vector<16x1xf32>,
      %cst_17 = arith.constant 0.000000e+00 : f32
      %27 = vector.broadcast %cst_17 : f32 to vector<16x128xf32>
      %c0_18 = arith.constant 0 : index
      %c0_19 = arith.constant 0 : index
      %28 = vector.load %arg12[%c0_18, %c0_19] : memref<16x128xf32, #tpu.memory_space<vmem>>, vector<16x128xf32>
      tpu.vector_store %arg12[%c0_18, %c0_19], %27 {strides = array<i32>} : memref<16x128xf32, #tpu.memory_space<vmem>>, vector<16x128xf32>,
    } else {
    }
    %c0_i32_2 = arith.constant 0 : i32
    %5 = arith.cmpi eq, %arg1, %c0_i32_2 : i32
    %6 = arith.extui %5 : i1 to i32
    %c0_i32_3 = arith.constant 0 : i32
    %7 = arith.cmpi ne, %6, %c0_i32_3 : i32
    scf.if %7 {
      %cst_14 = arith.constant 0.000000e+00 : f32
      %25 = vector.broadcast %cst_14 : f32 to vector<16x1024xf32>
      %c0_15 = arith.constant 0 : index
      %c0_16 = arith.constant 0 : index
      %26 = vector.load %arg10[%c0_15, %c0_16] : memref<16x1024xf32, #tpu.memory_space<vmem>>, vector<16x1024xf32>
      tpu.vector_store %arg10[%c0_15, %c0_16], %25 {strides = array<i32>} : memref<16x1024xf32, #tpu.memory_space<vmem>>, vector<16x1024xf32>,
    } else {
    }
    %c2048_i32 = arith.constant 2048 : i32
    %8 = arith.muli %arg1, %c2048_i32 : i32
    %9 = tpu.assume_multiple %8, 2048 : i32
    %c0 = arith.constant 0 : index
    %10 = arith.index_cast %9 : i32 to index
    %11 = vector.load %arg2[%c0, %10] : memref<16x4096xbf16, #tpu.memory_space<vmem>>, vector<16x2048xbf16>
    %c0_4 = arith.constant 0 : index
    %c0_5 = arith.constant 0 : index
    %12 = vector.load %arg10[%c0_4, %c0_5] : memref<16x1024xf32, #tpu.memory_space<vmem>>, vector<16x1024xf32>
    %c0_6 = arith.constant 0 : index
    %c0_7 = arith.constant 0 : index
    %13 = vector.load %arg3[%c0_6, %c0_7] : memref<2048x1024xbf16, #tpu.memory_space<vmem>>, vector<2048x1024xbf16>
    %cst = arith.constant dense<0.000000e+00> : vector<16x1024xf32>
    %14 = tpu.matmul %11, %13, %cst {dimension_numbers = #tpu.dot_dimension_numbers<[1], [0], [0], [1], [0, 0, 1, 1], [], []>} : vector<16x2048xbf16>, vector<2048x1024xbf16>, vector<16x1024xf32> -> vector<16x1024xf32>
    %15 = arith.addf %12, %14 : vector<16x1024xf32>
    %c0_8 = arith.constant 0 : index
    %c0_9 = arith.constant 0 : index
    %16 = vector.load %arg10[%c0_8, %c0_9] : memref<16x1024xf32, #tpu.memory_space<vmem>>, vector<16x1024xf32>
    tpu.vector_store %arg10[%c0_8, %c0_9], %15 {strides = array<i32>} : memref<16x1024xf32, #tpu.memory_space<vmem>>, vector<16x1024xf32>,
    %c1_i32 = arith.constant 1 : i32
    %17 = arith.cmpi eq, %arg1, %c1_i32 : i32
    %18 = arith.extui %17 : i1 to i32
    %c0_i32_10 = arith.constant 0 : i32
    %19 = arith.cmpi ne, %18, %c0_i32_10 : i32
    scf.if %19 {
      %c0_14 = arith.constant 0 : index
      %c0_15 = arith.constant 0 : index
      %25 = vector.load %arg10[%c0_14, %c0_15] : memref<16x1024xf32, #tpu.memory_space<vmem>>, vector<16x1024xf32>
      %c0_16 = arith.constant 0 : index
      %c0_17 = arith.constant 0 : index
      %26 = vector.load %arg4[%c0_16, %c0_17] : memref<1x1024xbf16, #tpu.memory_space<vmem>>, vector<1x1024xbf16>
      %27 = arith.extf %26 : vector<1x1024xbf16> to vector<1x1024xf32>
      %28 = vector.broadcast %27 : vector<1x1024xf32> to vector<16x1024xf32>
      %29 = arith.addf %25, %28 : vector<16x1024xf32>
      %c0_18 = arith.constant 0 : index
      %c0_19 = arith.constant 0 : index
      %30 = vector.load %arg11[%c0_18, %c0_19] : memref<16x1xf32, #tpu.memory_space<vmem>>, vector<16x1xf32>
      %c0_20 = arith.constant 0 : index
      %c0_21 = arith.constant 0 : index
      %31 = vector.load %arg5[%c0_20, %c0_21] : memref<1x1024xbf16, #tpu.memory_space<vmem>>, vector<1x1024xbf16>
      %32 = arith.extf %31 : vector<1x1024xbf16> to vector<1x1024xf32>
      %33 = vector.broadcast %32 : vector<1x1024xf32> to vector<16x1024xf32>
      %34 = arith.mulf %29, %33 : vector<16x1024xf32>
      %cst_22 = arith.constant dense<0.000000e+00> : vector<16xf32>
      %35 = vector.multi_reduction <add>, %34, %cst_22 [1] : vector<16x1024xf32> to vector<16xf32>
      %36 = vector.shape_cast %35 : vector<16xf32> to vector<16x1xf32>
      %37 = arith.addf %30, %36 : vector<16x1xf32>
      %c0_23 = arith.constant 0 : index
      %c0_24 = arith.constant 0 : index
      %38 = vector.load %arg11[%c0_23, %c0_24] : memref<16x1xf32, #tpu.memory_space<vmem>>, vector<16x1xf32>
      tpu.vector_store %arg11[%c0_23, %c0_24], %37 {strides = array<i32>} : memref<16x1xf32, #tpu.memory_space<vmem>>, vector<16x1xf32>,
      %c0_25 = arith.constant 0 : index
      %c0_26 = arith.constant 0 : index
      %39 = vector.load %arg12[%c0_25, %c0_26] : memref<16x128xf32, #tpu.memory_space<vmem>>, vector<16x128xf32>
      %40 = arith.truncf %29 : vector<16x1024xf32> to vector<16x1024xbf16>
      %c0_27 = arith.constant 0 : index
      %c0_28 = arith.constant 0 : index
      %41 = vector.load %arg6[%c0_27, %c0_28] : memref<1024x128xbf16, #tpu.memory_space<vmem>>, vector<1024x128xbf16>
      %cst_29 = arith.constant dense<0.000000e+00> : vector<16x128xf32>
      %42 = tpu.matmul %40, %41, %cst_29 {dimension_numbers = #tpu.dot_dimension_numbers<[1], [0], [0], [1], [0, 0, 1, 1], [], []>} : vector<16x1024xbf16>, vector<1024x128xbf16>, vector<16x128xf32> -> vector<16x128xf32>
      %43 = arith.addf %39, %42 : vector<16x128xf32>
      %c0_30 = arith.constant 0 : index
      %c0_31 = arith.constant 0 : index
      %44 = vector.load %arg12[%c0_30, %c0_31] : memref<16x128xf32, #tpu.memory_space<vmem>>, vector<16x128xf32>
      tpu.vector_store %arg12[%c0_30, %c0_31], %43 {strides = array<i32>} : memref<16x128xf32, #tpu.memory_space<vmem>>, vector<16x128xf32>,
    } else {
    }
    %c0_i32_11 = arith.constant 0 : i32
    %20 = arith.cmpi eq, %arg0, %c0_i32_11 : i32
    %c1_i32_12 = arith.constant 1 : i32
    %21 = arith.cmpi eq, %arg1, %c1_i32_12 : i32
    %22 = arith.andi %20, %21 : i1
    %23 = arith.extui %22 : i1 to i32
    %c0_i32_13 = arith.constant 0 : i32
    %24 = arith.cmpi ne, %23, %c0_i32_13 : i32
    scf.if %24 {
      %c0_14 = arith.constant 0 : index
      %c0_15 = arith.constant 0 : index
      %25 = vector.load %arg11[%c0_14, %c0_15] : memref<16x1xf32, #tpu.memory_space<vmem>>, vector<16x1xf32>
      %c0_16 = arith.constant 0 : index
      %26 = memref.load %arg8[%c0_16] : memref<1xf32, #tpu.memory_space<smem>>
      %27 = vector.broadcast %26 : f32 to vector<16x1xf32>
      %28 = arith.addf %25, %27 : vector<16x1xf32>
      %c0_17 = arith.constant 0 : index
      %c0_18 = arith.constant 0 : index
      %29 = vector.load %arg7[%c0_17, %c0_18] : memref<1x128xbf16, #tpu.memory_space<vmem>>, vector<1x128xbf16>
      %30 = arith.extf %29 : vector<1x128xbf16> to vector<1x128xf32>
      %31 = vector.extract_strided_slice %28 {offsets = [0, 0], sizes = [2, 1], strides = [1, 1]} : vector<16x1xf32> to vector<2x1xf32>
      %cst_19 = arith.constant dense<0xFF800000> : vector<1xf32>
      %32 = vector.multi_reduction <maximumf>, %31, %cst_19 [0] : vector<2x1xf32> to vector<1xf32>
      %33 = vector.shape_cast %32 : vector<1xf32> to vector<1x1xf32>
      %34 = vector.broadcast %33 : vector<1x1xf32> to vector<2x1xf32>
      %35 = arith.subf %31, %34 : vector<2x1xf32>
      %36 = math.exp %35 : vector<2x1xf32>
      %cst_20 = arith.constant dense<0.000000e+00> : vector<1xf32>
      %37 = vector.multi_reduction <add>, %36, %cst_20 [0] : vector<2x1xf32> to vector<1xf32>
      %38 = vector.shape_cast %37 : vector<1xf32> to vector<1x1xf32>
      %39 = tpu.reciprocal %38 {approx = true} : vector<1x1xf32> -> vector<1x1xf32>
      %40 = vector.broadcast %39 : vector<1x1xf32> to vector<2x1xf32>
      %41 = arith.mulf %36, %40 : vector<2x1xf32>
      %c0_21 = arith.constant 0 : index
      %c0_22 = arith.constant 0 : index
      %42 = vector.load %arg12[%c0_21, %c0_22] : memref<16x128xf32, #tpu.memory_space<vmem>>, vector<2x128xf32>
      %43 = vector.broadcast %41 : vector<2x1xf32> to vector<2x128xf32>
      %44 = arith.mulf %43, %42 : vector<2x128xf32>
      %cst_23 = arith.constant dense<0.000000e+00> : vector<128xf32>
      %45 = vector.multi_reduction <add>, %44, %cst_23 [0] : vector<2x128xf32> to vector<128xf32>
      %46 = vector.shape_cast %45 : vector<128xf32> to vector<1x128xf32>
      %47 = arith.addf %46, %30 : vector<1x128xf32>
      %c0_24 = arith.constant 0 : index
      %c0_25 = arith.constant 0 : index
      %48 = vector.load %arg9[%c0_24, %c0_25] : memref<2x128xf32, #tpu.memory_space<vmem>>, vector<1x128xf32>
      tpu.vector_store %arg9[%c0_24, %c0_25], %47 {strides = array<i32>} : memref<2x128xf32, #tpu.memory_space<vmem>>, vector<1x128xf32>,
      %49 = vector.extract_strided_slice %28 {offsets = [2, 0], sizes = [2, 1], strides = [1, 1]} : vector<16x1xf32> to vector<2x1xf32>
      %cst_26 = arith.constant dense<0xFF800000> : vector<1xf32>
      %50 = vector.multi_reduction <maximumf>, %49, %cst_26 [0] : vector<2x1xf32> to vector<1xf32>
      %51 = vector.shape_cast %50 : vector<1xf32> to vector<1x1xf32>
      %52 = vector.broadcast %51 : vector<1x1xf32> to vector<2x1xf32>
      %53 = arith.subf %49, %52 : vector<2x1xf32>
      %54 = math.exp %53 : vector<2x1xf32>
      %cst_27 = arith.constant dense<0.000000e+00> : vector<1xf32>
      %55 = vector.multi_reduction <add>, %54, %cst_27 [0] : vector<2x1xf32> to vector<1xf32>
      %56 = vector.shape_cast %55 : vector<1xf32> to vector<1x1xf32>
      %57 = tpu.reciprocal %56 {approx = true} : vector<1x1xf32> -> vector<1x1xf32>
      %58 = vector.broadcast %57 : vector<1x1xf32> to vector<2x1xf32>
      %59 = arith.mulf %54, %58 : vector<2x1xf32>
      %c2 = arith.constant 2 : index
      %c0_28 = arith.constant 0 : index
      %60 = vector.load %arg12[%c2, %c0_28] : memref<16x128xf32, #tpu.memory_space<vmem>>, vector<2x128xf32>
      %61 = vector.broadcast %59 : vector<2x1xf32> to vector<2x128xf32>
      %62 = arith.mulf %61, %60 : vector<2x128xf32>
      %cst_29 = arith.constant dense<0.000000e+00> : vector<128xf32>
      %63 = vector.multi_reduction <add>, %62, %cst_29 [0] : vector<2x128xf32> to vector<128xf32>
      %64 = vector.shape_cast %63 : vector<128xf32> to vector<1x128xf32>
      %65 = arith.addf %64, %30 : vector<1x128xf32>
      %c1 = arith.constant 1 : index
      %c0_30 = arith.constant 0 : index
      %66 = vector.load %arg9[%c1, %c0_30] : memref<2x128xf32, #tpu.memory_space<vmem>>, vector<1x128xf32>
      tpu.vector_store %arg9[%c1, %c0_30], %65 {strides = array<i32>} : memref<2x128xf32, #tpu.memory_space<vmem>>, vector<1x128xf32>,
    } else {
    }
    return
  }
  func.func @transform_0(%arg0: i32, %arg1: i32) -> (i32, i32) {
    %c0_i32 = arith.constant 0 : i32
    %c0_i32_0 = arith.constant 0 : i32
    %c0_i32_1 = arith.constant 0 : i32
    return %c0_i32, %c0_i32_0 : i32, i32
  }
  func.func @transform_1(%arg0: i32, %arg1: i32) -> (i32, i32) {
    %c0_i32 = arith.constant 0 : i32
    return %arg1, %arg0 : i32, i32
  }
  func.func @transform_2(%arg0: i32, %arg1: i32) -> (i32, i32) {
    %c0_i32 = arith.constant 0 : i32
    %c0_i32_0 = arith.constant 0 : i32
    return %c0_i32, %arg0 : i32, i32
  }
  func.func @transform_3(%arg0: i32, %arg1: i32) -> (i32, i32) {
    %c0_i32 = arith.constant 0 : i32
    %c0_i32_0 = arith.constant 0 : i32
    return %c0_i32, %arg0 : i32, i32
  }
  func.func @transform_4(%arg0: i32, %arg1: i32) -> (i32, i32) {
    %c0_i32 = arith.constant 0 : i32
    %c0_i32_0 = arith.constant 0 : i32
    return %arg0, %c0_i32 : i32, i32
  }
  func.func @transform_5(%arg0: i32, %arg1: i32) -> (i32, i32) {
    %c0_i32 = arith.constant 0 : i32
    %c0_i32_0 = arith.constant 0 : i32
    %c0_i32_1 = arith.constant 0 : i32
    return %c0_i32, %c0_i32_0 : i32, i32
  }
  func.func @transform_6(%arg0: i32, %arg1: i32) -> i32 {
    %c0_i32 = arith.constant 0 : i32
    %c0_i32_0 = arith.constant 0 : i32
    return %c0_i32 : i32
  }
  func.func @transform_7(%arg0: i32, %arg1: i32) -> (i32, i32) {
    %c0_i32 = arith.constant 0 : i32
    %c0_i32_0 = arith.constant 0 : i32
    %c0_i32_1 = arith.constant 0 : i32
    return %c0_i32, %c0_i32_0 : i32, i32
  }
}

</mosaic_0001>

<bundles_post_ra>
// kernel: tpu_custom_call.1
= control target key start
LH: loop header
LB: loop body
LE: loop exit
PB: predicated region body
PF: predicated region fallthrough
CT: control target
= control target key end

     0   :  { %s12542_s0 = inlined_call_operand.hbm [shape: bf16[16,4096], index: 0, kind: input, shape index: {}]   ;;  %s12543_s1 = inlined_call_operand.hbm [shape: bf16[4096,1024], index: 1, kind: input, shape index: {}]   ;;  %s12544_s2 = inlined_call_operand.hbm [shape: bf16[1,1024], index: 2, kind: input, shape index: {}]   ;;  %s12545_s3 = inlined_call_operand.hbm [shape: bf16[1,1024], index: 3, kind: input, shape index: {}]   ;;  %s12546_s4 = inlined_call_operand.hbm [shape: bf16[1024,128], index: 4, kind: input, shape index: {}]   ;;  %s12547_s5 = inlined_call_operand.hbm [shape: bf16[1,128], index: 5, kind: input, shape index: {}]   ;;  %s12548_s6 = inlined_call_operand.<no memory space> [shape: f32[1], index: 6, kind: input, shape index: {}]   ;;  %s12549_s7 = inlined_call_operand.hbm [shape: f32[2,128], index: 7, kind: output, shape index: {}]  }
   0x1   :  { %12 = sst [smem:[#allocation5]] %s12548_s6 }
   0x2   :  { %13 = vsyncpa [#allocation7], 0 }
   0x3   :  { %14 = vsyncpa [#allocation10], 0 }
   0x4   :  { %16 = vsyncpa [#allocation10 + $0x1], 0 }
   0x5   :  { %17 = vsyncpa [#allocation13], 0 }
   0x6   :  { %18 = vsyncpa [#allocation16], 0 }
   0x7   :  { %19 = vsyncpa [#allocation8], 0  ;;  %s10972_s26 = smov 0   ;;  %s10974_s27 = smov 0  }
   0x8   :  { %s10976_s28 = smov 0   ;;  %s10978_s29 = smov 0  }
   0x9   :  { %s10980_s30 = smov 0   ;;  %s10982_s8 = smov 0  }
   0xa LB: > { %s11001_s6 = sadd.s32 4294967295, %s10911_s8   ;;  %p80_p0 = scmp.ne.s32.totalorder %s10895_s27, %s10891_s26  ;;  %s10911_s8 = sphi %s10982_s8, %s25_s8   ;;  %s10907_s30 = sphi %s10980_s30, %s12572_s30   ;;  %s10903_s29 = sphi %s10978_s29, %s12571_s29   ;;  %s10899_s28 = sphi %s10976_s28, %s12570_s28   ;;  %s10895_s27 = sphi %s10974_s27, %s12569_s27   ;;  %s10891_s26 = sphi %s10972_s26, %s12568_s26  }
   0xb   : > { %p12550_p1 = scmp.eq.s32.totalorder %s11001_s6, 0  ;;  %p9240_p2 = scmp.ge.s32.totalorder %s10911_s8, 1 }
   0xc   : > { %p232_p3 = scmp.lt.s32.totalorder %s10911_s8, 3  ;;  %s10913_s11 = smov [#allocation11]  }
   0xd   : > { %p11009_p4 = por %p12550_p1, %p80_p0  ;;  %s261_s12 = sshll.u32 %s10913_s11, 4  ;;  %s262_s12 = int_to_ptr.vmem [resolvable:$true] %s261_s12 }
   0xe   : > { %p11013_p5 = pnand %p9240_p2, %p232_p3  ;;  %s10914_s13 = smov [#allocation12]  }
   0xf   : > { %s12553_s9 = scalar_select %p11009_p4, 1, 0 }
  0x10   : > { %s12554_s10 = scalar_select %p11013_p5, 1, 0 }
  0x11   : > { %p10490_p6 = pneg %p11013_p5  ;;  %s275_s14 = sshll.u32 %s10914_s13, 4  ;;  %s276_s14 = int_to_ptr.vmem [resolvable:$true] %s275_s14 }
  0x12   : > { %s10915_s16 = smov [#allocation6]   ;;  %s10670_s19 = scalar_lea.vmem %s262_s12, 128 }
  0x13   : > { %p11021_p7 = pnand %p10490_p6, %p12550_p1  ;;  %s244_s17 = sshll.u32 %s10915_s16, 4  ;;  %s245_s17 = int_to_ptr.vmem [resolvable:$true] %s244_s17 }
  0x14   : > { %p10671_p9 = scmp.ne.s32.totalorder %s262_s12, %s10670_s19  ;;  %p10678_p12 = scmp.lt.s32.totalorder %s262_s12, %s262_s12 }
  0x15   : > { %p11027_p8 = pneg %p11021_p7  ;;  %p10679_p13 = scmp.lt.s32.totalorder %s10670_s19, %s10670_s19 }
  0x17   : > { %p10673_p10 = pnand %p10671_p9, %p11027_p8  ;;  %p10680_p0 = por %p10679_p13, %p10678_p12 }
  0x19   : > { %p10674_p11 = pneg %p10673_p10 }
  0x1b   : > { %p10681_p2 = pnand %p10680_p0, %p10674_p11 }
  0x1d   : > { %10684 = shalt.err (!%p10681_p2)
}
  0x1e   : > { %10496 = dma.hbm_to_vmem [thread:$0]  (!%p11021_p7), %s12544_s2, 128, %s262_s12, [#allocation10]  }
  0x1f   : > { %s10696_s22 = scalar_lea.vmem %s276_s14, 128  ;;  %p10704_p4 = scmp.lt.s32.totalorder %s276_s14, %s276_s14 }
  0x20   : > { %p10697_p3 = scmp.ne.s32.totalorder %s276_s14, %s10696_s22  ;;  %p10705_p9 = scmp.lt.s32.totalorder %s10696_s22, %s10696_s22 }
  0x22   : > { %p10699_p6 = pnand %p10697_p3, %p11027_p8  ;;  %p10706_p10 = por %p10705_p9, %p10704_p4 }
  0x24   : > { %p10700_p1 = pneg %p10699_p6 }
  0x26   : > { %p10707_p5 = pnand %p10706_p10, %p10700_p1 }
  0x28   : > { %10710 = shalt.err (!%p10707_p5)
}
  0x29   : > { %10499 = dma.hbm_to_vmem [thread:$0]  (!%p11021_p7), %s12545_s3, 128, %s276_s14, [#allocation13]  }
  0x2a   : > { %s10722_s25 = scalar_lea.vmem %s245_s17, 4096  ;;  %p10730_p0 = scmp.lt.s32.totalorder %s245_s17, %s245_s17 }
  0x2b   : > { %p10723_p11 = scmp.ne.s32.totalorder %s245_s17, %s10722_s25  ;;  %p10731_p2 = scmp.lt.s32.totalorder %s10722_s25, %s10722_s25 }
  0x2d   : > { %p10725_p12 = pnand %p10723_p11, %p11027_p8  ;;  %p10732_p3 = por %p10731_p2, %p10730_p0 }
  0x2f   : > { %p10726_p13 = pneg %p10725_p12 }
  0x31   : > { %p10733_p6 = pnand %p10732_p3, %p10726_p13 }
  0x33   : > { %10736 = shalt.err (!%p10733_p6)
}
  0x34   : > { %s10916_s26 = smov 2048   ;;  %s10917_s11 = smov 128  }
  0x35   : > { %10493 = dma.hbm_to_vmem [thread:$0]  (!%p11021_p7), %s12542_s0, 4096, %s245_s17, [#allocation7], %s10916_s26, %s10916_s26, %s10917_s11  }
  0x36   : > { %s10918_s14 = smov [#allocation14]  }
  0x37   : > { %s288_s16 = sshll.u32 %s10918_s14, 4  ;;  %s289_s16 = int_to_ptr.vmem [resolvable:$true] %s288_s16 }
  0x38   : > { %s10748_s19 = scalar_lea.vmem %s289_s16, 8192  ;;  %p10756_p9 = scmp.lt.s32.totalorder %s289_s16, %s289_s16 }
  0x39   : > { %p10749_p1 = scmp.ne.s32.totalorder %s289_s16, %s10748_s19  ;;  %p10757_p10 = scmp.lt.s32.totalorder %s10748_s19, %s10748_s19 }
  0x3b   : > { %p10751_p4 = pnand %p10749_p1, %p11027_p8  ;;  %p10758_p11 = por %p10757_p10, %p10756_p9 }
  0x3d   : > { %p10752_p5 = pneg %p10751_p4 }
  0x3f   : > { %p10759_p12 = pnand %p10758_p11, %p10752_p5 }
  0x41   : > { %10762 = shalt.err (!%p10759_p12)
}
  0x42   : > { %s10919_s20 = smov 64   ;;  %s10920_s21 = smov 4  }
  0x43   : > { %10502 = dma.hbm_to_vmem [thread:$0]  (!%p11021_p7), %s12546_s4, 8192, %s289_s16, [#allocation13], %s10919_s20, %s10919_s20, %s10920_s21  }
  0x44   : > { %s10921_s23 = smov [#allocation15]  }
  0x45   : > { %s302_s24 = sshll.u32 %s10921_s23, 4  ;;  %s303_s24 = int_to_ptr.vmem [resolvable:$true] %s302_s24 }
  0x46   : > { %s10774_s25 = scalar_lea.vmem %s303_s24, 16  ;;  %s10781_s26 = scalar_lea.vmem %s303_s24, 32 }
  0x47   : > { %p10775_p13 = scmp.ne.s32.totalorder %s303_s24, %s10774_s25  ;;  %p10782_p3 = scmp.lt.s32.totalorder %s303_s24, %s303_s24 }
  0x48   : > { %p10783_p6 = scmp.lt.s32.totalorder %s10781_s26, %s10774_s25 }
  0x49   : > { %p10777_p0 = pnand %p10775_p13, %p11027_p8 }
  0x4a   : > { %p10784_p1 = por %p10783_p6, %p10782_p3 }
  0x4b   : > { %p10778_p2 = pneg %p10777_p0 }
  0x4d   : > { %p10785_p4 = pnand %p10784_p1, %p10778_p2 }
  0x4f   : > { %10788 = shalt.err (!%p10785_p4)
}
  0x50   : > { %10505 = dma.hbm_to_vmem [thread:$0]  (!%p11021_p7), %s12547_s5, 16, %s303_s24, [#allocation16]  }
  0x51   : > { %s34_s18 = sadd.s32 1, %s10907_s30  ;;  %s67_s13 = sadd.s32 1, %s10899_s28 }
  0x52   : > { %p35_p8 = scmp.ge.s32.totalorder %s34_s18, 2  ;;  %p74_p5 = scmp.ne.s32.totalorder %s10899_s28, %s10895_s27 }
  0x53   : > { %p75_p9 = scmp.eq.s32.totalorder %s10911_s8, 0  ;;  %p10515_p11 = scmp.lt.s32.totalorder %s10911_s8, 2 }
  0x54   : > { %s12574_s18 = smov (%p35_p8, %s34_s18), 0  ;;  %s316_s14 = sand.u32 1, %s10911_s8  }
  0x55   : > { %p76_p10 = por %p75_p9, %p74_p5  ;;  %s62_s15 = ssub.s32 %s10907_s30, %s12574_s18 }
  0x56   : > { %p65_p12 = scmp.eq.s32.totalorder %s62_s15, 0  ;;  %s318_s16 = sand.u32 1, %s10899_s28  }
  0x57   : > { %s10373_s19 = sshll.u32 %s10907_s30, 17  ;;  %s9247_s21 = sshll.u32 %s318_s16, 13 }
  0x58   : > { %s11080_s20 = scalar_select %p65_p12, %s10899_s28, %s67_s13  }
  0x59   : > { %s329_s23 = scalar_lea.hbm %s12543_s1, %s10373_s19  ;;  %p11085_p7 = pnand %p10515_p11, %p76_p10 }
  0x5a   : > { %s320_s25 = scalar_lea.vmem [#allocation9], %s9247_s21  ;;  %s317_s11 = scalar_lea.sflag [#allocation10], %s316_s14 }
  0x5b   : > { %s330_s26 = sshll.u32 %s320_s25, 4  ;;  %p10791_p13 = pneg %p11085_p7  ;;  %s331_s26 = int_to_ptr.vmem [resolvable:$true] %s330_s26 }
  0x5c   : > { %s10802_s12 = scalar_lea.vmem %s331_s26, 131072  ;;  %s10922_s13 = smov [#allocation9]  }
  0x5d   : > { %p10803_p0 = scmp.ne.s32.totalorder %s331_s26, %s10802_s12  ;;  %s10807_s15 = sshll.u32 %s10922_s13, 4  ;;  %s10808_s15 = int_to_ptr.vmem [resolvable:$false] %s10807_s15 }
  0x5e   : > { %s10809_s16 = scalar_lea.vmem %s10808_s15, 262144  ;;  %p10810_p6 = scmp.lt.s32.totalorder %s331_s26, %s10808_s15 }
  0x5f   : > { %p10805_p2 = pnand %p10803_p0, %p10791_p13  ;;  %p10811_p1 = scmp.lt.s32.totalorder %s10809_s16, %s10802_s12 }
  0x61   : > { %p10806_p3 = pneg %p10805_p2  ;;  %p10812_p4 = por %p10811_p1, %p10810_p6 }
  0x63   : > { %p10813_p8 = pnand %p10812_p4, %p10806_p3 }
  0x65   : > { %10816 = shalt.err (!%p10813_p8)
}
  0x66   : > { %s10923_s19 = smov 512   ;;  %s10924_s21 = smov 32  }
  0x67   : > { %10509 = dma.hbm_to_vmem [thread:$0]  (!%p11085_p7), %s329_s23, 131072, %s331_s26, %s317_s11, %s10923_s19, %s10923_s19, %s10924_s21  }
  0x68   : > { %p12558_p5 = scmp.ne.s32.totalorder %s12554_s10, 0 }
  0x69   : > { %p12559_p9 = scmp.eq.s32.totalorder (!%p12558_p5), %s11001_s6, 0 }
  0x6a   : > { %342 = sbr.rel (%p12558_p5) target bundleno = 1893 (0x765), region = 48 }
  0x6f   : > { %10866 = dma.done.wait (%p12559_p9), [#allocation7], 4096   ;;  %p12560_p10 = pmov %p12559_p9 }
  0x70   : > { %s348_s14 = sand.u32 1, %s11001_s6   ;;  %s350_s22 = sand.u32 1, %s10895_s27  }
  0x71   : > { %10868 = vsyncadd (%p12560_p10), [#allocation7], 4294963200  ;;  %s9253_s17 = sshll.u32 %s350_s22, 13  ;;  %s349_s25 = scalar_lea.sflag [#allocation10], %s348_s14 }
  0x72   : > { %s11101_s12 = scalar_lea.vmem [#allocation9], %s9253_s17  ;;  %p12561_p11 = scmp.ne.s32.totalorder %s12553_s9, 0 }
  0x74   : > { %10870 = dma.done.wait (%p12561_p11), %s349_s25, 131072  }
  0x75   : > { %10872 = vsyncadd (%p12561_p11), %s349_s25, 4294836224  ;;  %p12562_p12 = pmov %p12559_p9 }
  0x76   : > { %p12563_p7 = pmov %p12559_p9 }
  0x77   : > { %10874 = dma.done.wait (%p12562_p12), [#allocation10], 128  }
  0x78   : > { %10876 = vsyncadd (%p12563_p7), [#allocation10], 4294967168  ;;  %p12564_p13 = pmov %p12563_p7 }
  0x79   : > { %p12565_p0 = pmov %p12563_p7 }
  0x7a   : > { %10878 = dma.done.wait (%p12564_p13), [#allocation13], 8320  }
  0x7b   : > { %10880 = vsyncadd (%p12565_p0), [#allocation13], 4294958976  ;;  %p12566_p2 = pmov %p12565_p0 }
  0x7c   : > { %p12567_p3 = pmov %p12565_p0 }
  0x7d   : > { %10882 = dma.done.wait (%p12566_p2), [#allocation16], 16  }
  0x7e   : > { %10884 = vsyncadd (%p12567_p3), [#allocation16], 4294967280  ;;  %p401_p6 = scmp.eq.s32.totalorder %s10903_s29, 0 }
  0x7f   : > { %vm406_vm0 = vcmask (%p401_p6), 7168   ;;  %v10925_v0 = vmov (%p401_p6), 0.0  }
  0x80   : > { %405 = sbr.rel (!%p401_p6) target bundleno = 133 (0x85), region = 76  ;;  %407 = vst.msk [vmem:[#allocation3] sm:$0xff] (%p401_p6), %vm406_vm0, %v10925_v0  ;;  %408 = vst.msk [vmem:[#allocation3 + $0x8] sm:$0xff] (%p401_p6), %vm406_vm0, %v10925_v0 }
  0x81   : > { %409 = vst [vmem:[#allocation4] sm:$0xff] (%p401_p6), %v10925_v0  ;;  %410 = vst [vmem:[#allocation4 + $0x8] sm:$0xff] (%p401_p6), %v10925_v0 }
  0x85 PF: > { %p9259_p1 = scmp.ne.s32.totalorder %s10903_s29, 0 }
  0x87   : > { %413 = sbr.rel (%p9259_p1) target bundleno = 149 (0x95), region = 80 }
  0x8c   : > { %v10926_v1 = vmov 0.0  }
  0x8d   : > { %414 = vst [vmem:[#allocation2 + $0x30] sm:$0xff] %v10926_v1  ;;  %415 = vst [vmem:[#allocation2] sm:$0xff] %v10926_v1 }
  0x8e   : > { %416 = vst [vmem:[#allocation2 + $0x58] sm:$0xff] %v10926_v1  ;;  %417 = vst [vmem:[#allocation2 + $0x18] sm:$0xff] %v10926_v1 }
  0x8f   : > { %418 = vst [vmem:[#allocation2 + $0x50] sm:$0xff] %v10926_v1  ;;  %419 = vst [vmem:[#allocation2 + $0x68] sm:$0xff] %v10926_v1 }
  0x90   : > { %420 = vst [vmem:[#allocation2 + $0x8] sm:$0xff] %v10926_v1  ;;  %421 = vst [vmem:[#allocation2 + $0x48] sm:$0xff] %v10926_v1 }
  0x91   : > { %422 = vst [vmem:[#allocation2 + $0x40] sm:$0xff] %v10926_v1  ;;  %423 = vst [vmem:[#allocation2 + $0x20] sm:$0xff] %v10926_v1 }
  0x92   : > { %424 = vst [vmem:[#allocation2 + $0x10] sm:$0xff] %v10926_v1  ;;  %425 = vst [vmem:[#allocation2 + $0x38] sm:$0xff] %v10926_v1 }
  0x93   : > { %426 = vst [vmem:[#allocation2 + $0x60] sm:$0xff] %v10926_v1  ;;  %427 = vst [vmem:[#allocation2 + $0x70] sm:$0xff] %v10926_v1 }
  0x94   : > { %428 = vst [vmem:[#allocation2 + $0x78] sm:$0xff] %v10926_v1  ;;  %429 = vst [vmem:[#allocation2 + $0x28] sm:$0xff] %v10926_v1 }
  0x95 PF: > { %v523_v2 = vld [vmem:[%s11101_s12 + $0x1c0] sm:$0xff]  ;;  %s9260_s9 = sshll.u32 %s10903_s29, 11  ;;  %p8099_p4 = scmp.eq.s32.totalorder %s10903_s29, 1 }
  0x96   : > { %v527_v3 = vld [vmem:[%s11101_s12 + $0x1e0] sm:$0xff]  ;;  %s11142_s10 = sshra.s32 %s9260_s9, 7  ;;  %p10302_p8 = scmp.ne.s32.totalorder %s10903_s29, 1 }
  0x97   : > { %v651_v4 = vld [vmem:[%s11101_s12 + $0x5c0] sm:$0xff]  ;;  %v9335_v5 = vcombine.high %v523_v2, %v527_v3  ;;  %v9334_v7 = vcombine.low %v523_v2, %v527_v3  ;;  %s9261_s23 = sshll.u32 %s11142_s10, 2 }
  0x98   : > { %v655_v6 = vld [vmem:[%s11101_s12 + $0x5e0] sm:$0xff]  ;;  %s11154_s24 = scalar_lea.vmem [#allocation6], %s9261_s23 }
  0x99   : > { %v515_v8 = vld [vmem:[%s11101_s12 + $0x180] sm:$0xff]  ;;  %v9463_v10 = vcombine.high %v651_v4, %v655_v6  ;;  %v9462_v11 = vcombine.low %v651_v4, %v655_v6  ;;  %6691 = vmatprep.subr.bf16.mxu0 %v9335_v5  ;;  %v11168_v61 = vld [vmem:[%s11154_s24 + $0x8] sm:$0xff] }
  0x9a   : > { %v519_v9 = vld [vmem:[%s11101_s12 + $0x1a0] sm:$0xff]  ;;  %6692 = vmatpush1.bf16.msra.mxu0 %v9334_v7  ;;  %v11171_v62 = vld [vmem:[%s11154_s24 + $0x88] sm:$0xff] }
  0x9b   : > { %v9327_v12 = vcombine.high %v515_v8, %v519_v9  ;;  %v643_v13 = vld [vmem:[%s11101_s12 + $0x580] sm:$0xff]  ;;  %6734 = vmatprep.subr.bf16.mxu1 %v9463_v10  ;;  %v9326_v20 = vcombine.low %v515_v8, %v519_v9  ;;  %v11177_v1 = vcombine.high %v11168_v61, %v11171_v62 }
  0x9c   : > { %v647_v14 = vld [vmem:[%s11101_s12 + $0x5a0] sm:$0xff]  ;;  %6735 = vmatpush1.bf16.msra.mxu1 %v9462_v11 }
  0x9d   : > { %v507_v15 = vld [vmem:[%s11101_s12 + $0x140] sm:$0xff]  ;;  %v9455_v16 = vcombine.high %v643_v13, %v647_v14  ;;  %6693 = vmatprep.subr.bf16.mxu0 %v9327_v12  ;;  %v9454_v21 = vcombine.low %v643_v13, %v647_v14  ;;  %6766 = vmatprep.mubr.bf16.mxu1 %v11177_v1 }
  0x9e   : > { %v511_v17 = vld [vmem:[%s11101_s12 + $0x160] sm:$0xff]  ;;  %6694 = vmatpush1.bf16.msra.mxu0 %v9326_v20 }
  0x9f   : > { %v635_v18 = vld [vmem:[%s11101_s12 + $0x540] sm:$0xff]  ;;  %v9319_v22 = vcombine.high %v507_v15, %v511_v17  ;;  %6736 = vmatprep.subr.bf16.mxu1 %v9455_v16  ;;  %v9318_v28 = vcombine.low %v507_v15, %v511_v17 }
  0xa0   : > { %v639_v19 = vld [vmem:[%s11101_s12 + $0x560] sm:$0xff]  ;;  %6737 = vmatpush1.bf16.msra.mxu1 %v9454_v21 }
  0xa1   : > { %v9447_v23 = vcombine.high %v635_v18, %v639_v19  ;;  %v499_v24 = vld [vmem:[%s11101_s12 + $0x100] sm:$0xff]  ;;  %6695 = vmatprep.subr.bf16.mxu0 %v9319_v22  ;;  %v9446_v29 = vcombine.low %v635_v18, %v639_v19 }
  0xa2   : > { %v503_v25 = vld [vmem:[%s11101_s12 + $0x120] sm:$0xff]  ;;  %6696 = vmatpush1.bf16.msra.mxu0 %v9318_v28 }
  0xa3   : > { %v627_v26 = vld [vmem:[%s11101_s12 + $0x500] sm:$0xff]  ;;  %v9311_v30 = vcombine.high %v499_v24, %v503_v25  ;;  %6738 = vmatprep.subr.bf16.mxu1 %v9447_v23  ;;  %v9310_v36 = vcombine.low %v499_v24, %v503_v25 }
  0xa4   : > { %v631_v27 = vld [vmem:[%s11101_s12 + $0x520] sm:$0xff]  ;;  %6739 = vmatpush1.bf16.msra.mxu1 %v9446_v29 }
  0xa5   : > { %v9439_v31 = vcombine.high %v627_v26, %v631_v27  ;;  %v491_v32 = vld [vmem:[%s11101_s12 + $0xc0] sm:$0xff]  ;;  %6697 = vmatprep.subr.bf16.mxu0 %v9311_v30  ;;  %v9438_v37 = vcombine.low %v627_v26, %v631_v27 }
  0xa6   : > { %v495_v33 = vld [vmem:[%s11101_s12 + $0xe0] sm:$0xff]  ;;  %6698 = vmatpush1.bf16.msra.mxu0 %v9310_v36 }
  0xa7   : > { %v619_v34 = vld [vmem:[%s11101_s12 + $0x4c0] sm:$0xff]  ;;  %v9303_v38 = vcombine.high %v491_v32, %v495_v33  ;;  %6740 = vmatprep.subr.bf16.mxu1 %v9439_v31  ;;  %v9302_v44 = vcombine.low %v491_v32, %v495_v33 }
  0xa8   : > { %v623_v35 = vld [vmem:[%s11101_s12 + $0x4e0] sm:$0xff]  ;;  %6741 = vmatpush1.bf16.msra.mxu1 %v9438_v37 }
  0xa9   : > { %v9431_v39 = vcombine.high %v619_v34, %v623_v35  ;;  %v483_v40 = vld [vmem:[%s11101_s12 + $0x80] sm:$0xff]  ;;  %6699 = vmatprep.subr.bf16.mxu0 %v9303_v38  ;;  %v9430_v45 = vcombine.low %v619_v34, %v623_v35 }
  0xaa   : > { %v487_v41 = vld [vmem:[%s11101_s12 + $0xa0] sm:$0xff]  ;;  %6700 = vmatpush1.bf16.msra.mxu0 %v9302_v44 }
  0xab   : > { %v611_v42 = vld [vmem:[%s11101_s12 + $0x480] sm:$0xff]  ;;  %v9295_v46 = vcombine.high %v483_v40, %v487_v41  ;;  %6742 = vmatprep.subr.bf16.mxu1 %v9431_v39  ;;  %v9294_v52 = vcombine.low %v483_v40, %v487_v41 }
  0xac   : > { %v615_v43 = vld [vmem:[%s11101_s12 + $0x4a0] sm:$0xff]  ;;  %6743 = vmatpush1.bf16.msra.mxu1 %v9430_v45 }
  0xad   : > { %v9423_v47 = vcombine.high %v611_v42, %v615_v43  ;;  %v475_v48 = vld [vmem:[%s11101_s12 + $0x40] sm:$0xff]  ;;  %6701 = vmatprep.subr.bf16.mxu0 %v9295_v46  ;;  %v9422_v53 = vcombine.low %v611_v42, %v615_v43 }
  0xae   : > { %v479_v49 = vld [vmem:[%s11101_s12 + $0x60] sm:$0xff]  ;;  %6702 = vmatpush1.bf16.msra.mxu0 %v9294_v52 }
  0xaf   : > { %v603_v50 = vld [vmem:[%s11101_s12 + $0x440] sm:$0xff]  ;;  %v9287_v54 = vcombine.high %v475_v48, %v479_v49  ;;  %6744 = vmatprep.subr.bf16.mxu1 %v9423_v47  ;;  %v9286_v2 = vcombine.low %v475_v48, %v479_v49 }
  0xb0   : > { %v607_v51 = vld [vmem:[%s11101_s12 + $0x460] sm:$0xff]  ;;  %6745 = vmatpush1.bf16.msra.mxu1 %v9422_v53 }
  0xb1   : > { %v467_v55 = vld [vmem:[%s11101_s12] sm:$0xff]  ;;  %v9415_v58 = vcombine.high %v603_v50, %v607_v51  ;;  %6703 = vmatprep.subr.bf16.mxu0 %v9287_v54  ;;  %v9414_v3 = vcombine.low %v603_v50, %v607_v51 }
  0xb2   : > { %v11157_v56 = vld [vmem:[%s11154_s24] sm:$0xff]  ;;  %6704 = vmatpush1.bf16.msra.mxu0 %v9286_v2 }
  0xb3   : > { %v11160_v57 = vld [vmem:[%s11154_s24 + $0x80] sm:$0xff]  ;;  %6746 = vmatprep.subr.bf16.mxu1 %v9415_v58 }
  0xb4   : > { %v471_v59 = vld [vmem:[%s11101_s12 + $0x20] sm:$0xff]  ;;  %v11165_v60 = vcombine.high %v11157_v56, %v11160_v57  ;;  %6747 = vmatpush1.bf16.msra.mxu1 %v9414_v3 }
  0xb5   : > { %v595_v63 = vld [vmem:[%s11101_s12 + $0x400] sm:$0xff]  ;;  %v9279_v4 = vcombine.high %v467_v55, %v471_v59  ;;  %v9278_v10 = vcombine.low %v467_v55, %v471_v59 }
  0xb6   : > { %v599_v0 = vld [vmem:[%s11101_s12 + $0x420] sm:$0xff]  ;;  %6723 = vmatprep.mubr.bf16.mxu0 %v11165_v60 }
  0xb7   : > { %v9407_v5 = vcombine.high %v595_v63, %v599_v0  ;;  %v587_v6 = vld [vmem:[%s11101_s12 + $0x3c0] sm:$0xff]  ;;  %6705 = vmatprep.subr.bf16.mxu0 %v9279_v4  ;;  %v9406_v11 = vcombine.low %v595_v63, %v599_v0 }
  0xb8   : > { %v591_v7 = vld [vmem:[%s11101_s12 + $0x3e0] sm:$0xff]  ;;  %6706 = vmatpush1.bf16.msra.mxu0 %v9278_v10 }
  0xb9   : > { %v715_v8 = vld [vmem:[%s11101_s12 + $0x7c0] sm:$0xff]  ;;  %v9399_v12 = vcombine.high %v587_v6, %v591_v7  ;;  %6748 = vmatprep.subr.bf16.mxu1 %v9407_v5  ;;  %v9398_v18 = vcombine.low %v587_v6, %v591_v7 }
  0xba   : > { %v719_v9 = vld [vmem:[%s11101_s12 + $0x7e0] sm:$0xff]  ;;  %6749 = vmatpush1.bf16.msra.mxu1 %v9406_v11 }
  0xbb   : > { %v9527_v13 = vcombine.high %v715_v8, %v719_v9  ;;  %v579_v14 = vld [vmem:[%s11101_s12 + $0x380] sm:$0xff]  ;;  %6707 = vmatprep.subr.bf16.mxu0 %v9399_v12  ;;  %v9526_v19 = vcombine.low %v715_v8, %v719_v9 }
  0xbc   : > { %v583_v15 = vld [vmem:[%s11101_s12 + $0x3a0] sm:$0xff]  ;;  %6708 = vmatpush2.bf16.msra.mxu0 %v9398_v18 }
  0xbd   : > { %v707_v16 = vld [vmem:[%s11101_s12 + $0x780] sm:$0xff]  ;;  %v9391_v20 = vcombine.high %v579_v14, %v583_v15  ;;  %6750 = vmatprep.subr.bf16.mxu1 %v9527_v13  ;;  %v9390_v26 = vcombine.low %v579_v14, %v583_v15 }
  0xbe   : > { %v711_v17 = vld [vmem:[%s11101_s12 + $0x7a0] sm:$0xff]  ;;  %6751 = vmatpush2.bf16.msra.mxu1 %v9526_v19 }
  0xbf   : > { %v9519_v21 = vcombine.high %v707_v16, %v711_v17  ;;  %v571_v22 = vld [vmem:[%s11101_s12 + $0x340] sm:$0xff]  ;;  %6709 = vmatprep.subr.bf16.mxu0 %v9391_v20  ;;  %v9518_v27 = vcombine.low %v707_v16, %v711_v17 }
  0xc0   : > { %v575_v23 = vld [vmem:[%s11101_s12 + $0x360] sm:$0xff]  ;;  %6710 = vmatpush2.bf16.msra.mxu0 %v9390_v26  ;;  %v11229_v26 = vld [vmem:[%s11154_s24 + $0x90] sm:$0xff] }
  0xc1   : > { %v699_v24 = vld [vmem:[%s11101_s12 + $0x740] sm:$0xff]  ;;  %v9383_v28 = vcombine.high %v571_v22, %v575_v23  ;;  %6752 = vmatprep.subr.bf16.mxu1 %v9519_v21  ;;  %v9382_v34 = vcombine.low %v571_v22, %v575_v23  ;;  %v11222_v23 = vcombine.low %v11157_v56, %v11160_v57 }
  0xc2   : > { %v703_v25 = vld [vmem:[%s11101_s12 + $0x760] sm:$0xff]  ;;  %6753 = vmatpush2.bf16.msra.mxu1 %v9518_v27  ;;  %v11233_v27 = vcombine.low %v11168_v61, %v11171_v62 }
  0xc3   : > { %v9511_v29 = vcombine.high %v699_v24, %v703_v25  ;;  %v563_v30 = vld [vmem:[%s11101_s12 + $0x300] sm:$0xff]  ;;  %6711 = vmatprep.subr.bf16.mxu0 %v9383_v28  ;;  %v9510_v35 = vcombine.low %v699_v24, %v703_v25  ;;  %v11226_v25 = vld [vmem:[%s11154_s24 + $0x10] sm:$0xff] }
  0xc4   : > { %v567_v31 = vld [vmem:[%s11101_s12 + $0x320] sm:$0xff]  ;;  %6712 = vmatpush2.bf16.msra.mxu0 %v9382_v34  ;;  %v11245_v34 = vcombine.high %v11226_v25, %v11229_v26 }
  0xc5   : > { %v691_v32 = vld [vmem:[%s11101_s12 + $0x700] sm:$0xff]  ;;  %v9375_v36 = vcombine.high %v563_v30, %v567_v31  ;;  %6754 = vmatprep.subr.bf16.mxu1 %v9511_v29  ;;  %v9374_v42 = vcombine.low %v563_v30, %v567_v31  ;;  %v11236_v29 = vld [vmem:[%s11154_s24 + $0x18] sm:$0xff] }
  0xc6   : > { %v695_v33 = vld [vmem:[%s11101_s12 + $0x720] sm:$0xff]  ;;  %6755 = vmatpush2.bf16.msra.mxu1 %v9510_v35  ;;  %v11239_v30 = vld [vmem:[%s11154_s24 + $0x98] sm:$0xff] }
  0xc7   : > { %v9503_v37 = vcombine.high %v691_v32, %v695_v33  ;;  %v555_v38 = vld [vmem:[%s11101_s12 + $0x2c0] sm:$0xff]  ;;  %6713 = vmatprep.subr.bf16.mxu0 %v9375_v36  ;;  %v9502_v43 = vcombine.low %v691_v32, %v695_v33  ;;  %v11252_v35 = vcombine.high %v11236_v29, %v11239_v30 }
  0xc8   : > { %v559_v39 = vld [vmem:[%s11101_s12 + $0x2e0] sm:$0xff]  ;;  %6714 = vmatpush2.bf16.msra.mxu0 %v9374_v42 }
  0xc9   : > { %v683_v40 = vld [vmem:[%s11101_s12 + $0x6c0] sm:$0xff]  ;;  %v9367_v44 = vcombine.high %v555_v38, %v559_v39  ;;  %6756 = vmatprep.subr.bf16.mxu1 %v9503_v37  ;;  %v9366_v50 = vcombine.low %v555_v38, %v559_v39 }
  0xca   : > { %v687_v41 = vld [vmem:[%s11101_s12 + $0x6e0] sm:$0xff]  ;;  %6757 = vmatpush2.bf16.msra.mxu1 %v9502_v43 }
  0xcb   : > { %v9495_v45 = vcombine.high %v683_v40, %v687_v41  ;;  %v547_v46 = vld [vmem:[%s11101_s12 + $0x280] sm:$0xff]  ;;  %6715 = vmatprep.subr.bf16.mxu0 %v9367_v44  ;;  %v9494_v51 = vcombine.low %v683_v40, %v687_v41 }
  0xcc   : > { %v551_v47 = vld [vmem:[%s11101_s12 + $0x2a0] sm:$0xff]  ;;  %6716 = vmatpush2.bf16.msra.mxu0 %v9366_v50 }
  0xcd   : > { %v675_v48 = vld [vmem:[%s11101_s12 + $0x680] sm:$0xff]  ;;  %v9359_v52 = vcombine.high %v547_v46, %v551_v47  ;;  %6758 = vmatprep.subr.bf16.mxu1 %v9495_v45  ;;  %v9358_v63 = vcombine.low %v547_v46, %v551_v47 }
  0xce   : > { %v679_v49 = vld [vmem:[%s11101_s12 + $0x6a0] sm:$0xff]  ;;  %6759 = vmatpush2.bf16.msra.mxu1 %v9494_v51 }
  0xcf   : > { %v9487_v53 = vcombine.high %v675_v48, %v679_v49  ;;  %v539_v54 = vld [vmem:[%s11101_s12 + $0x240] sm:$0xff]  ;;  %6717 = vmatprep.subr.bf16.mxu0 %v9359_v52  ;;  %v9486_v0 = vcombine.low %v675_v48, %v679_v49 }
  0xd0   : > { %v543_v55 = vld [vmem:[%s11101_s12 + $0x260] sm:$0xff]  ;;  %6718 = vmatpush2.bf16.msra.mxu0 %v9358_v63 }
  0xd1   : > { %v667_v58 = vld [vmem:[%s11101_s12 + $0x640] sm:$0xff]  ;;  %v9351_v2 = vcombine.high %v539_v54, %v543_v55  ;;  %6760 = vmatprep.subr.bf16.mxu1 %v9487_v53  ;;  %v9350_v8 = vcombine.low %v539_v54, %v543_v55 }
  0xd2   : > { %v671_v59 = vld [vmem:[%s11101_s12 + $0x660] sm:$0xff]  ;;  %6761 = vmatpush2.bf16.msra.mxu1 %v9486_v0 }
  0xd3   : > { %v9479_v3 = vcombine.high %v667_v58, %v671_v59  ;;  %v531_v4 = vld [vmem:[%s11101_s12 + $0x200] sm:$0xff]  ;;  %6719 = vmatprep.subr.bf16.mxu0 %v9351_v2  ;;  %v9478_v9 = vcombine.low %v667_v58, %v671_v59 }
  0xd4   : > { %v535_v5 = vld [vmem:[%s11101_s12 + $0x220] sm:$0xff]  ;;  %6720 = vmatpush2.bf16.msra.mxu0 %v9350_v8 }
  0xd5   : > { %v659_v6 = vld [vmem:[%s11101_s12 + $0x600] sm:$0xff]  ;;  %v9343_v10 = vcombine.high %v531_v4, %v535_v5  ;;  %6762 = vmatprep.subr.bf16.mxu1 %v9479_v3  ;;  %v9342_v16 = vcombine.low %v531_v4, %v535_v5 }
  0xd6   : > { %v663_v7 = vld [vmem:[%s11101_s12 + $0x620] sm:$0xff]  ;;  %6763 = vmatpush2.bf16.msra.mxu1 %v9478_v9 }
  0xd7   : > { %v9471_v11 = vcombine.high %v659_v6, %v663_v7  ;;  %v779_v12 = vld [vmem:[%s11101_s12 + $0x9c0] sm:$0xff]  ;;  %6721 = vmatprep.subr.bf16.mxu0 %v9343_v10  ;;  %v9470_v17 = vcombine.low %v659_v6, %v663_v7 }
  0xd8   : > { %v783_v13 = vld [vmem:[%s11101_s12 + $0x9e0] sm:$0xff]  ;;  %6722 = vmatpush2.bf16.msra.mxu0 %v9342_v16 }
  0xd9   : > { %v907_v14 = vld [vmem:[%s11101_s12 + $0xdc0] sm:$0xff]  ;;  %v9591_v18 = vcombine.high %v779_v12, %v783_v13  ;;  %6764 = vmatprep.subr.bf16.mxu1 %v9471_v11  ;;  %v9590_v28 = vcombine.low %v779_v12, %v783_v13 }
  0xda   : > { %v911_v15 = vld [vmem:[%s11101_s12 + $0xde0] sm:$0xff]  ;;  %6765 = vmatpush2.bf16.msra.mxu1 %v9470_v17 }
  0xdb   : > { %v9719_v19 = vcombine.high %v907_v14, %v911_v15  ;;  %v771_v20 = vld [vmem:[%s11101_s12 + $0x980] sm:$0xff]  ;;  %6777 = vmatprep.subr.bf16.mxu0 %v9591_v18  ;;  %v9718_v56 = vcombine.low %v907_v14, %v911_v15  ;;  %6724 = vmatmul.mubr.bf16.vlgmr.msra.gmra.mxu0 %v11222_v23 }
  0xdc   : > { %v775_v21 = vld [vmem:[%s11101_s12 + $0x9a0] sm:$0xff]  ;;  %6778 = vmatpush1.bf16.msra.mxu0 %v9590_v28  ;;  %6809 = vmatprep.mubr.bf16.mxu0 %v11245_v34 }
  0xdd   : > { %v899_v22 = vld [vmem:[%s11101_s12 + $0xd80] sm:$0xff]  ;;  %v9583_v57 = vcombine.high %v771_v20, %v775_v21  ;;  %6820 = vmatprep.subr.bf16.mxu1 %v9719_v19  ;;  %6767 = vmatmul.mubr.bf16.vlgmr.msra.gmra.mxu1 %v11233_v27  ;;  %v9582_v36 = vcombine.low %v771_v20, %v775_v21 }
  0xde   : > { %v903_v24 = vld [vmem:[%s11101_s12 + $0xda0] sm:$0xff]  ;;  %6821 = vmatpush1.bf16.msra.mxu1 %v9718_v56  ;;  %6852 = vmatprep.mubr.bf16.mxu1 %v11252_v35 }
  0xdf   : > { %v9711_v31 = vcombine.high %v899_v22, %v903_v24  ;;  %v763_v32 = vld [vmem:[%s11101_s12 + $0x940] sm:$0xff]  ;;  %6779 = vmatprep.subr.bf16.mxu0 %v9583_v57  ;;  %v9710_v37 = vcombine.low %v899_v22, %v903_v24 }
  0xe0   : > { %v767_v33 = vld [vmem:[%s11101_s12 + $0x960] sm:$0xff]  ;;  %6780 = vmatpush1.bf16.msra.mxu0 %v9582_v36 }
  0xe1   : > { %v891_v61 = vld [vmem:[%s11101_s12 + $0xd40] sm:$0xff]  ;;  %v9575_v38 = vcombine.high %v763_v32, %v767_v33  ;;  %6822 = vmatprep.subr.bf16.mxu1 %v9711_v31  ;;  %v9574_v44 = vcombine.low %v763_v32, %v767_v33 }
  0xe2   : > { %v895_v62 = vld [vmem:[%s11101_s12 + $0xd60] sm:$0xff]  ;;  %6823 = vmatpush1.bf16.msra.mxu1 %v9710_v37 }
  0xe3   : > { %v9703_v39 = vcombine.high %v891_v61, %v895_v62  ;;  %v755_v40 = vld [vmem:[%s11101_s12 + $0x900] sm:$0xff]  ;;  %6781 = vmatprep.subr.bf16.mxu0 %v9575_v38  ;;  %v9702_v45 = vcombine.low %v891_v61, %v895_v62 }
  0xe4   : > { %v759_v41 = vld [vmem:[%s11101_s12 + $0x920] sm:$0xff]  ;;  %6782 = vmatpush1.bf16.msra.mxu0 %v9574_v44 }
  0xe5   : > { %v883_v42 = vld [vmem:[%s11101_s12 + $0xd00] sm:$0xff]  ;;  %v9567_v46 = vcombine.high %v755_v40, %v759_v41  ;;  %6824 = vmatprep.subr.bf16.mxu1 %v9703_v39  ;;  %v9566_v52 = vcombine.low %v755_v40, %v759_v41 }
  0xe6   : > { %v887_v43 = vld [vmem:[%s11101_s12 + $0xd20] sm:$0xff]  ;;  %6825 = vmatpush1.bf16.msra.mxu1 %v9702_v45 }
  0xe7   : > { %v9695_v47 = vcombine.high %v883_v42, %v887_v43  ;;  %v747_v48 = vld [vmem:[%s11101_s12 + $0x8c0] sm:$0xff]  ;;  %6783 = vmatprep.subr.bf16.mxu0 %v9567_v46  ;;  %v9694_v53 = vcombine.low %v883_v42, %v887_v43 }
  0xe8   : > { %v751_v49 = vld [vmem:[%s11101_s12 + $0x8e0] sm:$0xff]  ;;  %6784 = vmatpush1.bf16.msra.mxu0 %v9566_v52 }
  0xe9   : > { %v875_v50 = vld [vmem:[%s11101_s12 + $0xcc0] sm:$0xff]  ;;  %v9559_v54 = vcombine.high %v747_v48, %v751_v49  ;;  %6826 = vmatprep.subr.bf16.mxu1 %v9695_v47  ;;  %v9558_v2 = vcombine.low %v747_v48, %v751_v49 }
  0xea   : > { %v879_v51 = vld [vmem:[%s11101_s12 + $0xce0] sm:$0xff]  ;;  %6827 = vmatpush1.bf16.msra.mxu1 %v9694_v53 }
  0xeb   : > { %v9687_v55 = vcombine.high %v875_v50, %v879_v51  ;;  %v739_v58 = vld [vmem:[%s11101_s12 + $0x880] sm:$0xff]  ;;  %6785 = vmatprep.subr.bf16.mxu0 %v9559_v54  ;;  %v9686_v3 = vcombine.low %v875_v50, %v879_v51 }
  0xec   : > { %v743_v59 = vld [vmem:[%s11101_s12 + $0x8a0] sm:$0xff]  ;;  %6786 = vmatpush1.bf16.msra.mxu0 %v9558_v2 }
  0xed   : > { %v867_v63 = vld [vmem:[%s11101_s12 + $0xc80] sm:$0xff]  ;;  %v9551_v4 = vcombine.high %v739_v58, %v743_v59  ;;  %6828 = vmatprep.subr.bf16.mxu1 %v9687_v55  ;;  %v9550_v10 = vcombine.low %v739_v58, %v743_v59 }
  0xee   : > { %v871_v0 = vld [vmem:[%s11101_s12 + $0xca0] sm:$0xff]  ;;  %6829 = vmatpush1.bf16.msra.mxu1 %v9686_v3 }
  0xef   : > { %v9679_v5 = vcombine.high %v867_v63, %v871_v0  ;;  %v731_v6 = vld [vmem:[%s11101_s12 + $0x840] sm:$0xff]  ;;  %6787 = vmatprep.subr.bf16.mxu0 %v9551_v4  ;;  %v9678_v11 = vcombine.low %v867_v63, %v871_v0 }
  0xf0   : > { %v735_v7 = vld [vmem:[%s11101_s12 + $0x860] sm:$0xff]  ;;  %6788 = vmatpush1.bf16.msra.mxu0 %v9550_v10 }
  0xf1   : > { %v859_v8 = vld [vmem:[%s11101_s12 + $0xc40] sm:$0xff]  ;;  %v9543_v12 = vcombine.high %v731_v6, %v735_v7  ;;  %6830 = vmatprep.subr.bf16.mxu1 %v9679_v5  ;;  %v9542_v18 = vcombine.low %v731_v6, %v735_v7 }
  0xf2   : > { %v863_v9 = vld [vmem:[%s11101_s12 + $0xc60] sm:$0xff]  ;;  %6831 = vmatpush1.bf16.msra.mxu1 %v9678_v11 }
  0xf3   : > { %v9671_v13 = vcombine.high %v859_v8, %v863_v9  ;;  %v723_v14 = vld [vmem:[%s11101_s12 + $0x800] sm:$0xff]  ;;  %6789 = vmatprep.subr.bf16.mxu0 %v9543_v12  ;;  %v9670_v19 = vcombine.low %v859_v8, %v863_v9 }
  0xf4   : > { %v727_v15 = vld [vmem:[%s11101_s12 + $0x820] sm:$0xff]  ;;  %6790 = vmatpush1.bf16.msra.mxu0 %v9542_v18 }
  0xf5   : > { %v851_v16 = vld [vmem:[%s11101_s12 + $0xc00] sm:$0xff]  ;;  %v9535_v20 = vcombine.high %v723_v14, %v727_v15  ;;  %6832 = vmatprep.subr.bf16.mxu1 %v9671_v13  ;;  %v9534_v57 = vcombine.low %v723_v14, %v727_v15 }
  0xf6   : > { %v855_v17 = vld [vmem:[%s11101_s12 + $0xc20] sm:$0xff]  ;;  %6833 = vmatpush1.bf16.msra.mxu1 %v9670_v19 }
  0xf7   : > { %v9663_v21 = vcombine.high %v851_v16, %v855_v17  ;;  %v843_v22 = vld [vmem:[%s11101_s12 + $0xbc0] sm:$0xff]  ;;  %6791 = vmatprep.subr.bf16.mxu0 %v9535_v20  ;;  %v9662_v31 = vcombine.low %v851_v16, %v855_v17 }
  0xf8   : > { %v847_v24 = vld [vmem:[%s11101_s12 + $0xbe0] sm:$0xff]  ;;  %6792 = vmatpush1.bf16.msra.mxu0 %v9534_v57 }
  0xf9   : > { %v971_v28 = vld [vmem:[%s11101_s12 + $0xfc0] sm:$0xff]  ;;  %v9655_v32 = vcombine.high %v843_v22, %v847_v24  ;;  %6834 = vmatprep.subr.bf16.mxu1 %v9663_v21  ;;  %v9654_v38 = vcombine.low %v843_v22, %v847_v24 }
  0xfa   : > { %v975_v56 = vld [vmem:[%s11101_s12 + $0xfe0] sm:$0xff]  ;;  %6835 = vmatpush1.bf16.msra.mxu1 %v9662_v31 }
  0xfb   : > { %v9783_v33 = vcombine.high %v971_v28, %v975_v56  ;;  %v835_v61 = vld [vmem:[%s11101_s12 + $0xb80] sm:$0xff]  ;;  %6793 = vmatprep.subr.bf16.mxu0 %v9655_v32  ;;  %v9782_v39 = vcombine.low %v971_v28, %v975_v56 }
  0xfc   : > { %v839_v62 = vld [vmem:[%s11101_s12 + $0xba0] sm:$0xff]  ;;  %6794 = vmatpush2.bf16.msra.mxu0 %v9654_v38 }
  0xfd   : > { %v963_v36 = vld [vmem:[%s11101_s12 + $0xf80] sm:$0xff]  ;;  %v9647_v40 = vcombine.high %v835_v61, %v839_v62  ;;  %6836 = vmatprep.subr.bf16.mxu1 %v9783_v33  ;;  %v9646_v46 = vcombine.low %v835_v61, %v839_v62 }
  0xfe   : > { %v967_v37 = vld [vmem:[%s11101_s12 + $0xfa0] sm:$0xff]  ;;  %6837 = vmatpush2.bf16.msra.mxu1 %v9782_v39 }
  0xff   : > { %v9775_v41 = vcombine.high %v963_v36, %v967_v37  ;;  %v827_v42 = vld [vmem:[%s11101_s12 + $0xb40] sm:$0xff]  ;;  %6795 = vmatprep.subr.bf16.mxu0 %v9647_v40  ;;  %v9774_v47 = vcombine.low %v963_v36, %v967_v37 }
 0x100   : > { %v831_v43 = vld [vmem:[%s11101_s12 + $0xb60] sm:$0xff]  ;;  %6796 = vmatpush2.bf16.msra.mxu0 %v9646_v46 }
 0x101   : > { %v955_v44 = vld [vmem:[%s11101_s12 + $0xf40] sm:$0xff]  ;;  %v9639_v48 = vcombine.high %v827_v42, %v831_v43  ;;  %6838 = vmatprep.subr.bf16.mxu1 %v9775_v41  ;;  %v9638_v54 = vcombine.low %v827_v42, %v831_v43 }
 0x102   : > { %v959_v45 = vld [vmem:[%s11101_s12 + $0xf60] sm:$0xff]  ;;  %6839 = vmatpush2.bf16.msra.mxu1 %v9774_v47  ;;  %v11318_v47 = vcombine.low %v11226_v25, %v11229_v26 }
 0x103   : > { %v9767_v49 = vcombine.high %v955_v44, %v959_v45  ;;  %v819_v50 = vld [vmem:[%s11101_s12 + $0xb00] sm:$0xff]  ;;  %6797 = vmatprep.subr.bf16.mxu0 %v9639_v48  ;;  %v9766_v55 = vcombine.low %v955_v44, %v959_v45 }
 0x104   : > { %v823_v51 = vld [vmem:[%s11101_s12 + $0xb20] sm:$0xff]  ;;  %6798 = vmatpush2.bf16.msra.mxu0 %v9638_v54  ;;  %v11335_v54 = vld [vmem:[%s11154_s24 + $0xa8] sm:$0xff] }
 0x105   : > { %v947_v52 = vld [vmem:[%s11101_s12 + $0xf00] sm:$0xff]  ;;  %v9631_v58 = vcombine.high %v819_v50, %v823_v51  ;;  %6840 = vmatprep.subr.bf16.mxu1 %v9767_v49  ;;  %v9630_v4 = vcombine.low %v819_v50, %v823_v51  ;;  %v11329_v51 = vcombine.low %v11236_v29, %v11239_v30 }
 0x106   : > { %v951_v53 = vld [vmem:[%s11101_s12 + $0xf20] sm:$0xff]  ;;  %6841 = vmatpush2.bf16.msra.mxu1 %v9766_v55 }
 0x107   : > { %v9759_v59 = vcombine.high %v947_v52, %v951_v53  ;;  %v811_v63 = vld [vmem:[%s11101_s12 + $0xac0] sm:$0xff]  ;;  %6799 = vmatprep.subr.bf16.mxu0 %v9631_v58  ;;  %v9758_v5 = vcombine.low %v947_v52, %v951_v53  ;;  %v11332_v53 = vld [vmem:[%s11154_s24 + $0x28] sm:$0xff] }
 0x108   : > { %v815_v0 = vld [vmem:[%s11101_s12 + $0xae0] sm:$0xff]  ;;  %6800 = vmatpush2.bf16.msra.mxu0 %v9630_v4 }
 0x109   : > { %v939_v2 = vld [vmem:[%s11101_s12 + $0xec0] sm:$0xff]  ;;  %v9623_v6 = vcombine.high %v811_v63, %v815_v0  ;;  %6842 = vmatprep.subr.bf16.mxu1 %v9759_v59  ;;  %v9622_v12 = vcombine.low %v811_v63, %v815_v0  ;;  %v11348_v0 = vcombine.high %v11332_v53, %v11335_v54 }
 0x10a   : > { %v943_v3 = vld [vmem:[%s11101_s12 + $0xee0] sm:$0xff]  ;;  %6843 = vmatpush2.bf16.msra.mxu1 %v9758_v5 }
 0x10b   : > { %v9751_v7 = vcombine.high %v939_v2, %v943_v3  ;;  %v803_v8 = vld [vmem:[%s11101_s12 + $0xa80] sm:$0xff]  ;;  %6801 = vmatprep.subr.bf16.mxu0 %v9623_v6  ;;  %v9750_v13 = vcombine.low %v939_v2, %v943_v3 }
 0x10c   : > { %v807_v9 = vld [vmem:[%s11101_s12 + $0xaa0] sm:$0xff]  ;;  %6802 = vmatpush2.bf16.msra.mxu0 %v9622_v12 }
 0x10d   : > { %v931_v10 = vld [vmem:[%s11101_s12 + $0xe80] sm:$0xff]  ;;  %v9615_v14 = vcombine.high %v803_v8, %v807_v9  ;;  %6844 = vmatprep.subr.bf16.mxu1 %v9751_v7  ;;  %v9614_v20 = vcombine.low %v803_v8, %v807_v9 }
 0x10e   : > { %v935_v11 = vld [vmem:[%s11101_s12 + $0xea0] sm:$0xff]  ;;  %6845 = vmatpush2.bf16.msra.mxu1 %v9750_v13 }
 0x10f   : > { %v9743_v15 = vcombine.high %v931_v10, %v935_v11  ;;  %v795_v16 = vld [vmem:[%s11101_s12 + $0xa40] sm:$0xff]  ;;  %6803 = vmatprep.subr.bf16.mxu0 %v9615_v14  ;;  %v9742_v21 = vcombine.low %v931_v10, %v935_v11 }
 0x110   : > { %v799_v17 = vld [vmem:[%s11101_s12 + $0xa60] sm:$0xff]  ;;  %6804 = vmatpush2.bf16.msra.mxu0 %v9614_v20 }
 0x111   : > { %v923_v18 = vld [vmem:[%s11101_s12 + $0xe40] sm:$0xff]  ;;  %v9607_v22 = vcombine.high %v795_v16, %v799_v17  ;;  %6846 = vmatprep.subr.bf16.mxu1 %v9743_v15  ;;  %v9606_v32 = vcombine.low %v795_v16, %v799_v17 }
 0x112   : > { %v927_v19 = vld [vmem:[%s11101_s12 + $0xe60] sm:$0xff]  ;;  %6847 = vmatpush2.bf16.msra.mxu1 %v9742_v21 }
 0x113   : > { %v9735_v24 = vcombine.high %v923_v18, %v927_v19  ;;  %v787_v28 = vld [vmem:[%s11101_s12 + $0xa00] sm:$0xff]  ;;  %6805 = vmatprep.subr.bf16.mxu0 %v9607_v22  ;;  %v9734_v33 = vcombine.low %v923_v18, %v927_v19 }
 0x114   : > { %v791_v56 = vld [vmem:[%s11101_s12 + $0xa20] sm:$0xff]  ;;  %6806 = vmatpush2.bf16.msra.mxu0 %v9606_v32 }
 0x115   : > { %v915_v57 = vld [vmem:[%s11101_s12 + $0xe00] sm:$0xff]  ;;  %v9599_v61 = vcombine.high %v787_v28, %v791_v56  ;;  %6848 = vmatprep.subr.bf16.mxu1 %v9735_v24  ;;  %v9598_v40 = vcombine.low %v787_v28, %v791_v56 }
 0x116   : > { %v919_v31 = vld [vmem:[%s11101_s12 + $0xe20] sm:$0xff]  ;;  %6849 = vmatpush2.bf16.msra.mxu1 %v9734_v33 }
 0x117   : > { %v9727_v62 = vcombine.high %v915_v57, %v919_v31  ;;  %v1035_v36 = vld [vmem:[%s11101_s12 + $0x11c0] sm:$0xff]  ;;  %6807 = vmatprep.subr.bf16.mxu0 %v9599_v61  ;;  %v9726_v41 = vcombine.low %v915_v57, %v919_v31 }
 0x118   : > { %v1039_v37 = vld [vmem:[%s11101_s12 + $0x11e0] sm:$0xff]  ;;  %6808 = vmatpush2.bf16.msra.mxu0 %v9598_v40 }
 0x119   : > { %v1163_v38 = vld [vmem:[%s11101_s12 + $0x15c0] sm:$0xff]  ;;  %v9847_v42 = vcombine.high %v1035_v36, %v1039_v37  ;;  %6850 = vmatprep.subr.bf16.mxu1 %v9727_v62  ;;  %v9846_v52 = vcombine.low %v1035_v36, %v1039_v37 }
 0x11a   : > { %v1167_v39 = vld [vmem:[%s11101_s12 + $0x15e0] sm:$0xff]  ;;  %6851 = vmatpush2.bf16.msra.mxu1 %v9726_v41 }
 0x11b   : > { %v9975_v43 = vcombine.high %v1163_v38, %v1167_v39  ;;  %v1027_v44 = vld [vmem:[%s11101_s12 + $0x1180] sm:$0xff]  ;;  %6863 = vmatprep.subr.bf16.mxu0 %v9847_v42  ;;  %v9974_v25 = vcombine.low %v1163_v38, %v1167_v39  ;;  %6810 = vmatmul.mubr.bf16.vlgmr.msra.gmra.mxu0 %v11318_v47 }
 0x11c   : > { %v1031_v45 = vld [vmem:[%s11101_s12 + $0x11a0] sm:$0xff]  ;;  %6864 = vmatpush1.bf16.msra.mxu0 %v9846_v52 }
 0x11d   : > { %v1155_v46 = vld [vmem:[%s11101_s12 + $0x1580] sm:$0xff]  ;;  %v9839_v26 = vcombine.high %v1027_v44, %v1031_v45  ;;  %6906 = vmatprep.subr.bf16.mxu1 %v9975_v43  ;;  %6853 = vmatmul.mubr.bf16.vlgmr.msra.gmra.mxu1 %v11329_v51  ;;  %v9838_v2 = vcombine.low %v1027_v44, %v1031_v45 }
 0x11e   : > { %v1159_v48 = vld [vmem:[%s11101_s12 + $0x15a0] sm:$0xff]  ;;  %6907 = vmatpush1.bf16.msra.mxu1 %v9974_v25  ;;  %6938 = vmatprep.mubr.bf16.mxu1 %v11348_v0 }
 0x11f   : > { %v11322_v49 = vld [vmem:[%s11154_s24 + $0x20] sm:$0xff]  ;;  %v9967_v55 = vcombine.high %v1155_v46, %v1159_v48  ;;  %6865 = vmatprep.subr.bf16.mxu0 %v9839_v26  ;;  %v9966_v3 = vcombine.low %v1155_v46, %v1159_v48 }
 0x120   : > { %v11325_v50 = vld [vmem:[%s11154_s24 + $0xa0] sm:$0xff]  ;;  %6866 = vmatpush1.bf16.msra.mxu0 %v9838_v2 }
 0x121   : > { %v1019_v58 = vld [vmem:[%s11101_s12 + $0x1140] sm:$0xff]  ;;  %v11341_v63 = vcombine.high %v11322_v49, %v11325_v50  ;;  %6908 = vmatprep.subr.bf16.mxu1 %v9967_v55 }
 0x122   : > { %v1023_v59 = vld [vmem:[%s11101_s12 + $0x1160] sm:$0xff]  ;;  %6909 = vmatpush1.bf16.msra.mxu1 %v9966_v3 }
 0x123   : > { %v1147_v29 = vld [vmem:[%s11101_s12 + $0x1540] sm:$0xff]  ;;  %v9831_v4 = vcombine.high %v1019_v58, %v1023_v59  ;;  %6895 = vmatprep.mubr.bf16.mxu0 %v11341_v63  ;;  %v9830_v10 = vcombine.low %v1019_v58, %v1023_v59 }
 0x124   : > { %v1151_v30 = vld [vmem:[%s11101_s12 + $0x1560] sm:$0xff] }
 0x125   : > { %v9959_v5 = vcombine.high %v1147_v29, %v1151_v30  ;;  %v1011_v6 = vld [vmem:[%s11101_s12 + $0x1100] sm:$0xff]  ;;  %6867 = vmatprep.subr.bf16.mxu0 %v9831_v4  ;;  %v9958_v11 = vcombine.low %v1147_v29, %v1151_v30 }
 0x126   : > { %v1015_v7 = vld [vmem:[%s11101_s12 + $0x1120] sm:$0xff]  ;;  %6868 = vmatpush1.bf16.msra.mxu0 %v9830_v10 }
 0x127   : > { %v1139_v8 = vld [vmem:[%s11101_s12 + $0x1500] sm:$0xff]  ;;  %v9823_v12 = vcombine.high %v1011_v6, %v1015_v7  ;;  %6910 = vmatprep.subr.bf16.mxu1 %v9959_v5  ;;  %v9822_v18 = vcombine.low %v1011_v6, %v1015_v7 }
 0x128   : > { %v1143_v9 = vld [vmem:[%s11101_s12 + $0x1520] sm:$0xff]  ;;  %6911 = vmatpush1.bf16.msra.mxu1 %v9958_v11 }
 0x129   : > { %v9951_v13 = vcombine.high %v1139_v8, %v1143_v9  ;;  %v1003_v14 = vld [vmem:[%s11101_s12 + $0x10c0] sm:$0xff]  ;;  %6869 = vmatprep.subr.bf16.mxu0 %v9823_v12  ;;  %v9950_v19 = vcombine.low %v1139_v8, %v1143_v9 }
 0x12a   : > { %v1007_v15 = vld [vmem:[%s11101_s12 + $0x10e0] sm:$0xff]  ;;  %6870 = vmatpush1.bf16.msra.mxu0 %v9822_v18 }
 0x12b   : > { %v1131_v16 = vld [vmem:[%s11101_s12 + $0x14c0] sm:$0xff]  ;;  %v9815_v20 = vcombine.high %v1003_v14, %v1007_v15  ;;  %6912 = vmatprep.subr.bf16.mxu1 %v9951_v13  ;;  %v9814_v57 = vcombine.low %v1003_v14, %v1007_v15 }
 0x12c   : > { %v1135_v17 = vld [vmem:[%s11101_s12 + $0x14e0] sm:$0xff]  ;;  %6913 = vmatpush1.bf16.msra.mxu1 %v9950_v19 }
 0x12d   : > { %v9943_v21 = vcombine.high %v1131_v16, %v1135_v17  ;;  %v995_v22 = vld [vmem:[%s11101_s12 + $0x1080] sm:$0xff]  ;;  %6871 = vmatprep.subr.bf16.mxu0 %v9815_v20  ;;  %v9942_v31 = vcombine.low %v1131_v16, %v1135_v17 }
 0x12e   : > { %v999_v24 = vld [vmem:[%s11101_s12 + $0x10a0] sm:$0xff]  ;;  %6872 = vmatpush1.bf16.msra.mxu0 %v9814_v57 }
 0x12f   : > { %v1123_v28 = vld [vmem:[%s11101_s12 + $0x1480] sm:$0xff]  ;;  %v9807_v32 = vcombine.high %v995_v22, %v999_v24  ;;  %6914 = vmatprep.subr.bf16.mxu1 %v9943_v21  ;;  %v9806_v38 = vcombine.low %v995_v22, %v999_v24 }
 0x130   : > { %v1127_v56 = vld [vmem:[%s11101_s12 + $0x14a0] sm:$0xff]  ;;  %6915 = vmatpush1.bf16.msra.mxu1 %v9942_v31 }
 0x131   : > { %v9935_v33 = vcombine.high %v1123_v28, %v1127_v56  ;;  %v987_v61 = vld [vmem:[%s11101_s12 + $0x1040] sm:$0xff]  ;;  %6873 = vmatprep.subr.bf16.mxu0 %v9807_v32  ;;  %v9934_v39 = vcombine.low %v1123_v28, %v1127_v56 }
 0x132   : > { %v991_v62 = vld [vmem:[%s11101_s12 + $0x1060] sm:$0xff]  ;;  %6874 = vmatpush1.bf16.msra.mxu0 %v9806_v38 }
 0x133   : > { %v1115_v36 = vld [vmem:[%s11101_s12 + $0x1440] sm:$0xff]  ;;  %v9799_v40 = vcombine.high %v987_v61, %v991_v62  ;;  %6916 = vmatprep.subr.bf16.mxu1 %v9935_v33  ;;  %v9798_v46 = vcombine.low %v987_v61, %v991_v62 }
 0x134   : > { %v1119_v37 = vld [vmem:[%s11101_s12 + $0x1460] sm:$0xff]  ;;  %6917 = vmatpush1.bf16.msra.mxu1 %v9934_v39 }
 0x135   : > { %v9927_v41 = vcombine.high %v1115_v36, %v1119_v37  ;;  %v979_v42 = vld [vmem:[%s11101_s12 + $0x1000] sm:$0xff]  ;;  %6875 = vmatprep.subr.bf16.mxu0 %v9799_v40  ;;  %v9926_v48 = vcombine.low %v1115_v36, %v1119_v37 }
 0x136   : > { %v983_v43 = vld [vmem:[%s11101_s12 + $0x1020] sm:$0xff]  ;;  %6876 = vmatpush1.bf16.msra.mxu0 %v9798_v46 }
 0x137   : > { %v1107_v44 = vld [vmem:[%s11101_s12 + $0x1400] sm:$0xff]  ;;  %v9791_v52 = vcombine.high %v979_v42, %v983_v43  ;;  %6918 = vmatprep.subr.bf16.mxu1 %v9927_v41  ;;  %v9790_v29 = vcombine.low %v979_v42, %v983_v43 }
 0x138   : > { %v1111_v45 = vld [vmem:[%s11101_s12 + $0x1420] sm:$0xff]  ;;  %6919 = vmatpush1.bf16.msra.mxu1 %v9926_v48 }
 0x139   : > { %v9919_v25 = vcombine.high %v1107_v44, %v1111_v45  ;;  %v1099_v26 = vld [vmem:[%s11101_s12 + $0x13c0] sm:$0xff]  ;;  %6877 = vmatprep.subr.bf16.mxu0 %v9791_v52  ;;  %v9918_v30 = vcombine.low %v1107_v44, %v1111_v45 }
 0x13a   : > { %v1103_v55 = vld [vmem:[%s11101_s12 + $0x13e0] sm:$0xff]  ;;  %6878 = vmatpush1.bf16.msra.mxu0 %v9790_v29 }
 0x13b   : > { %v1227_v58 = vld [vmem:[%s11101_s12 + $0x17c0] sm:$0xff]  ;;  %v9911_v2 = vcombine.high %v1099_v26, %v1103_v55  ;;  %6920 = vmatprep.subr.bf16.mxu1 %v9919_v25  ;;  %v9910_v8 = vcombine.low %v1099_v26, %v1103_v55 }
 0x13c   : > { %v1231_v59 = vld [vmem:[%s11101_s12 + $0x17e0] sm:$0xff]  ;;  %6921 = vmatpush1.bf16.msra.mxu1 %v9918_v30 }
 0x13d   : > { %v10039_v3 = vcombine.high %v1227_v58, %v1231_v59  ;;  %v1091_v4 = vld [vmem:[%s11101_s12 + $0x1380] sm:$0xff]  ;;  %6879 = vmatprep.subr.bf16.mxu0 %v9911_v2  ;;  %v10038_v9 = vcombine.low %v1227_v58, %v1231_v59 }
 0x13e   : > { %v1095_v5 = vld [vmem:[%s11101_s12 + $0x13a0] sm:$0xff]  ;;  %6880 = vmatpush2.bf16.msra.mxu0 %v9910_v8 }
 0x13f   : > { %v1219_v6 = vld [vmem:[%s11101_s12 + $0x1780] sm:$0xff]  ;;  %v9903_v10 = vcombine.high %v1091_v4, %v1095_v5  ;;  %6922 = vmatprep.subr.bf16.mxu1 %v10039_v3  ;;  %v9902_v16 = vcombine.low %v1091_v4, %v1095_v5 }
 0x140   : > { %v1223_v7 = vld [vmem:[%s11101_s12 + $0x17a0] sm:$0xff]  ;;  %6923 = vmatpush2.bf16.msra.mxu1 %v10038_v9 }
 0x141   : > { %v10031_v11 = vcombine.high %v1219_v6, %v1223_v7  ;;  %v1083_v12 = vld [vmem:[%s11101_s12 + $0x1340] sm:$0xff]  ;;  %6881 = vmatprep.subr.bf16.mxu0 %v9903_v10  ;;  %v10030_v17 = vcombine.low %v1219_v6, %v1223_v7 }
 0x142   : > { %v1087_v13 = vld [vmem:[%s11101_s12 + $0x1360] sm:$0xff]  ;;  %6882 = vmatpush2.bf16.msra.mxu0 %v9902_v16 }
 0x143   : > { %v1211_v14 = vld [vmem:[%s11101_s12 + $0x1740] sm:$0xff]  ;;  %v9895_v18 = vcombine.high %v1083_v12, %v1087_v13  ;;  %6924 = vmatprep.subr.bf16.mxu1 %v10031_v11  ;;  %v9894_v28 = vcombine.low %v1083_v12, %v1087_v13 }
 0x144   : > { %v1215_v15 = vld [vmem:[%s11101_s12 + $0x1760] sm:$0xff]  ;;  %6925 = vmatpush2.bf16.msra.mxu1 %v10030_v17 }
 0x145   : > { %v10023_v19 = vcombine.high %v1211_v14, %v1215_v15  ;;  %v1075_v20 = vld [vmem:[%s11101_s12 + $0x1300] sm:$0xff]  ;;  %6883 = vmatprep.subr.bf16.mxu0 %v9895_v18  ;;  %v10022_v56 = vcombine.low %v1211_v14, %v1215_v15 }
 0x146   : > { %v1079_v21 = vld [vmem:[%s11101_s12 + $0x1320] sm:$0xff]  ;;  %6884 = vmatpush2.bf16.msra.mxu0 %v9894_v28  ;;  %v11421_v28 = vld [vmem:[%s11154_s24 + $0xb0] sm:$0xff] }
 0x147   : > { %v1203_v22 = vld [vmem:[%s11101_s12 + $0x1700] sm:$0xff]  ;;  %v9887_v57 = vcombine.high %v1075_v20, %v1079_v21  ;;  %6926 = vmatprep.subr.bf16.mxu1 %v10023_v19  ;;  %v9886_v36 = vcombine.low %v1075_v20, %v1079_v21  ;;  %v11414_v21 = vcombine.low %v11322_v49, %v11325_v50 }
 0x148   : > { %v1207_v24 = vld [vmem:[%s11101_s12 + $0x1720] sm:$0xff]  ;;  %6927 = vmatpush2.bf16.msra.mxu1 %v10022_v56  ;;  %v11425_v56 = vcombine.low %v11332_v53, %v11335_v54 }
 0x149   : > { %v10015_v31 = vcombine.high %v1203_v22, %v1207_v24  ;;  %v1067_v32 = vld [vmem:[%s11101_s12 + $0x12c0] sm:$0xff]  ;;  %6885 = vmatprep.subr.bf16.mxu0 %v9887_v57  ;;  %v10014_v37 = vcombine.low %v1203_v22, %v1207_v24  ;;  %v11418_v24 = vld [vmem:[%s11154_s24 + $0x30] sm:$0xff] }
 0x14a   : > { %v1071_v33 = vld [vmem:[%s11101_s12 + $0x12e0] sm:$0xff]  ;;  %6886 = vmatpush2.bf16.msra.mxu0 %v9886_v36  ;;  %v11437_v36 = vcombine.high %v11418_v24, %v11421_v28 }
 0x14b   : > { %v1195_v61 = vld [vmem:[%s11101_s12 + $0x16c0] sm:$0xff]  ;;  %v9879_v38 = vcombine.high %v1067_v32, %v1071_v33  ;;  %6928 = vmatprep.subr.bf16.mxu1 %v10015_v31  ;;  %v9878_v44 = vcombine.low %v1067_v32, %v1071_v33  ;;  %v11428_v31 = vld [vmem:[%s11154_s24 + $0x38] sm:$0xff] }
 0x14c   : > { %v1199_v62 = vld [vmem:[%s11101_s12 + $0x16e0] sm:$0xff]  ;;  %6929 = vmatpush2.bf16.msra.mxu1 %v10014_v37  ;;  %v11431_v32 = vld [vmem:[%s11154_s24 + $0xb8] sm:$0xff] }
 0x14d   : > { %v10007_v39 = vcombine.high %v1195_v61, %v1199_v62  ;;  %v1059_v40 = vld [vmem:[%s11101_s12 + $0x1280] sm:$0xff]  ;;  %6887 = vmatprep.subr.bf16.mxu0 %v9879_v38  ;;  %v10006_v45 = vcombine.low %v1195_v61, %v1199_v62  ;;  %v11444_v37 = vcombine.high %v11428_v31, %v11431_v32 }
 0x14e   : > { %v1063_v41 = vld [vmem:[%s11101_s12 + $0x12a0] sm:$0xff]  ;;  %6888 = vmatpush2.bf16.msra.mxu0 %v9878_v44 }
 0x14f   : > { %v1187_v42 = vld [vmem:[%s11101_s12 + $0x1680] sm:$0xff]  ;;  %v9871_v46 = vcombine.high %v1059_v40, %v1063_v41  ;;  %6930 = vmatprep.subr.bf16.mxu1 %v10007_v39  ;;  %v9870_v58 = vcombine.low %v1059_v40, %v1063_v41 }
 0x150   : > { %v1191_v43 = vld [vmem:[%s11101_s12 + $0x16a0] sm:$0xff]  ;;  %6931 = vmatpush2.bf16.msra.mxu1 %v10006_v45 }
 0x151   : > { %v9999_v48 = vcombine.high %v1187_v42, %v1191_v43  ;;  %v1051_v52 = vld [vmem:[%s11101_s12 + $0x1240] sm:$0xff]  ;;  %6889 = vmatprep.subr.bf16.mxu0 %v9871_v46  ;;  %v9998_v59 = vcombine.low %v1187_v42, %v1191_v43 }
 0x152   : > { %v1055_v25 = vld [vmem:[%s11101_s12 + $0x1260] sm:$0xff]  ;;  %6890 = vmatpush2.bf16.msra.mxu0 %v9870_v58 }
 0x153   : > { %v1179_v26 = vld [vmem:[%s11101_s12 + $0x1640] sm:$0xff]  ;;  %v9863_v29 = vcombine.high %v1051_v52, %v1055_v25  ;;  %6932 = vmatprep.subr.bf16.mxu1 %v9999_v48  ;;  %v9862_v6 = vcombine.low %v1051_v52, %v1055_v25 }
 0x154   : > { %v1183_v55 = vld [vmem:[%s11101_s12 + $0x1660] sm:$0xff]  ;;  %6933 = vmatpush2.bf16.msra.mxu1 %v9998_v59 }
 0x155   : > { %v9991_v30 = vcombine.high %v1179_v26, %v1183_v55  ;;  %v1043_v2 = vld [vmem:[%s11101_s12 + $0x1200] sm:$0xff]  ;;  %6891 = vmatprep.subr.bf16.mxu0 %v9863_v29  ;;  %v9990_v7 = vcombine.low %v1179_v26, %v1183_v55 }
 0x156   : > { %v1047_v3 = vld [vmem:[%s11101_s12 + $0x1220] sm:$0xff]  ;;  %6892 = vmatpush2.bf16.msra.mxu0 %v9862_v6 }
 0x157   : > { %v1171_v4 = vld [vmem:[%s11101_s12 + $0x1600] sm:$0xff]  ;;  %v9855_v8 = vcombine.high %v1043_v2, %v1047_v3  ;;  %6934 = vmatprep.subr.bf16.mxu1 %v9991_v30  ;;  %v9854_v14 = vcombine.low %v1043_v2, %v1047_v3 }
 0x158   : > { %v1175_v5 = vld [vmem:[%s11101_s12 + $0x1620] sm:$0xff]  ;;  %6935 = vmatpush2.bf16.msra.mxu1 %v9990_v7 }
 0x159   : > { %v9983_v9 = vcombine.high %v1171_v4, %v1175_v5  ;;  %v1291_v10 = vld [vmem:[%s11101_s12 + $0x19c0] sm:$0xff]  ;;  %6893 = vmatprep.subr.bf16.mxu0 %v9855_v8  ;;  %v9982_v15 = vcombine.low %v1171_v4, %v1175_v5 }
 0x15a   : > { %v1295_v11 = vld [vmem:[%s11101_s12 + $0x19e0] sm:$0xff]  ;;  %6894 = vmatpush2.bf16.msra.mxu0 %v9854_v14 }
 0x15b   : > { %v1419_v12 = vld [vmem:[%s11101_s12 + $0x1dc0] sm:$0xff]  ;;  %v10103_v16 = vcombine.high %v1291_v10, %v1295_v11  ;;  %6936 = vmatprep.subr.bf16.mxu1 %v9983_v9  ;;  %v10102_v57 = vcombine.low %v1291_v10, %v1295_v11 }
 0x15c   : > { %v1423_v13 = vld [vmem:[%s11101_s12 + $0x1de0] sm:$0xff]  ;;  %6937 = vmatpush2.bf16.msra.mxu1 %v9982_v15 }
 0x15d   : > { %v10231_v17 = vcombine.high %v1419_v12, %v1423_v13  ;;  %v1283_v18 = vld [vmem:[%s11101_s12 + $0x1980] sm:$0xff]  ;;  %6949 = vmatprep.subr.bf16.mxu0 %v10103_v16  ;;  %v10230_v49 = vcombine.low %v1419_v12, %v1423_v13  ;;  %6896 = vmatmul.mubr.bf16.vlgmr.msra.gmra.mxu0 %v11414_v21 }
 0x15e   : > { %v1287_v19 = vld [vmem:[%s11101_s12 + $0x19a0] sm:$0xff]  ;;  %6950 = vmatpush1.bf16.msra.mxu0 %v10102_v57  ;;  %6981 = vmatprep.mubr.bf16.mxu0 %v11437_v36 }
 0x15f   : > { %v1411_v20 = vld [vmem:[%s11101_s12 + $0x1d80] sm:$0xff]  ;;  %v10095_v50 = vcombine.high %v1283_v18, %v1287_v19  ;;  %6992 = vmatprep.subr.bf16.mxu1 %v10231_v17  ;;  %6939 = vmatmul.mubr.bf16.vlgmr.msra.gmra.mxu1 %v11425_v56  ;;  %v10094_v38 = vcombine.low %v1283_v18, %v1287_v19 }
 0x160   : > { %v1415_v22 = vld [vmem:[%s11101_s12 + $0x1da0] sm:$0xff]  ;;  %6993 = vmatpush1.bf16.msra.mxu1 %v10230_v49  ;;  %7024 = vmatprep.mubr.bf16.mxu1 %v11444_v37 }
 0x161   : > { %v10223_v33 = vcombine.high %v1411_v20, %v1415_v22  ;;  %v1275_v61 = vld [vmem:[%s11101_s12 + $0x1940] sm:$0xff]  ;;  %6951 = vmatprep.subr.bf16.mxu0 %v10095_v50  ;;  %v10222_v39 = vcombine.low %v1411_v20, %v1415_v22 }
 0x162   : > { %v1279_v62 = vld [vmem:[%s11101_s12 + $0x1960] sm:$0xff]  ;;  %6952 = vmatpush1.bf16.msra.mxu0 %v10094_v38 }
 0x163   : > { %v1403_v53 = vld [vmem:[%s11101_s12 + $0x1d40] sm:$0xff]  ;;  %v10087_v40 = vcombine.high %v1275_v61, %v1279_v62  ;;  %6994 = vmatprep.subr.bf16.mxu1 %v10223_v33  ;;  %v10086_v46 = vcombine.low %v1275_v61, %v1279_v62 }
 0x164   : > { %v1407_v54 = vld [vmem:[%s11101_s12 + $0x1d60] sm:$0xff]  ;;  %6995 = vmatpush1.bf16.msra.mxu1 %v10222_v39 }
 0x165   : > { %v10215_v41 = vcombine.high %v1403_v53, %v1407_v54  ;;  %v1267_v42 = vld [vmem:[%s11101_s12 + $0x1900] sm:$0xff]  ;;  %6953 = vmatprep.subr.bf16.mxu0 %v10087_v40  ;;  %v10214_v48 = vcombine.low %v1403_v53, %v1407_v54 }
 0x166   : > { %v1271_v43 = vld [vmem:[%s11101_s12 + $0x1920] sm:$0xff]  ;;  %6954 = vmatpush1.bf16.msra.mxu0 %v10086_v46 }
 0x167   : > { %v1395_v44 = vld [vmem:[%s11101_s12 + $0x1d00] sm:$0xff]  ;;  %v10079_v52 = vcombine.high %v1267_v42, %v1271_v43  ;;  %6996 = vmatprep.subr.bf16.mxu1 %v10215_v41  ;;  %v10078_v29 = vcombine.low %v1267_v42, %v1271_v43 }
 0x168   : > { %v1399_v45 = vld [vmem:[%s11101_s12 + $0x1d20] sm:$0xff]  ;;  %6997 = vmatpush1.bf16.msra.mxu1 %v10214_v48 }
 0x169   : > { %v10207_v25 = vcombine.high %v1395_v44, %v1399_v45  ;;  %v1259_v26 = vld [vmem:[%s11101_s12 + $0x18c0] sm:$0xff]  ;;  %6955 = vmatprep.subr.bf16.mxu0 %v10079_v52  ;;  %v10206_v30 = vcombine.low %v1395_v44, %v1399_v45 }
 0x16a   : > { %v1263_v55 = vld [vmem:[%s11101_s12 + $0x18e0] sm:$0xff]  ;;  %6956 = vmatpush1.bf16.msra.mxu0 %v10078_v29 }
 0x16b   : > { %v1387_v58 = vld [vmem:[%s11101_s12 + $0x1cc0] sm:$0xff]  ;;  %v10071_v2 = vcombine.high %v1259_v26, %v1263_v55  ;;  %6998 = vmatprep.subr.bf16.mxu1 %v10207_v25  ;;  %v10070_v8 = vcombine.low %v1259_v26, %v1263_v55 }
 0x16c   : > { %v1391_v59 = vld [vmem:[%s11101_s12 + $0x1ce0] sm:$0xff]  ;;  %6999 = vmatpush1.bf16.msra.mxu1 %v10206_v30 }
 0x16d   : > { %v10199_v3 = vcombine.high %v1387_v58, %v1391_v59  ;;  %v1251_v4 = vld [vmem:[%s11101_s12 + $0x1880] sm:$0xff]  ;;  %6957 = vmatprep.subr.bf16.mxu0 %v10071_v2  ;;  %v10198_v9 = vcombine.low %v1387_v58, %v1391_v59 }
 0x16e   : > { %v1255_v5 = vld [vmem:[%s11101_s12 + $0x18a0] sm:$0xff]  ;;  %6958 = vmatpush1.bf16.msra.mxu0 %v10070_v8 }
 0x16f   : > { %v1379_v6 = vld [vmem:[%s11101_s12 + $0x1c80] sm:$0xff]  ;;  %v10063_v10 = vcombine.high %v1251_v4, %v1255_v5  ;;  %7000 = vmatprep.subr.bf16.mxu1 %v10199_v3  ;;  %v10062_v16 = vcombine.low %v1251_v4, %v1255_v5 }
 0x170   : > { %v1383_v7 = vld [vmem:[%s11101_s12 + $0x1ca0] sm:$0xff]  ;;  %7001 = vmatpush1.bf16.msra.mxu1 %v10198_v9 }
 0x171   : > { %v10191_v11 = vcombine.high %v1379_v6, %v1383_v7  ;;  %v1243_v12 = vld [vmem:[%s11101_s12 + $0x1840] sm:$0xff]  ;;  %6959 = vmatprep.subr.bf16.mxu0 %v10063_v10  ;;  %v10190_v17 = vcombine.low %v1379_v6, %v1383_v7 }
 0x172   : > { %v1247_v13 = vld [vmem:[%s11101_s12 + $0x1860] sm:$0xff]  ;;  %6960 = vmatpush1.bf16.msra.mxu0 %v10062_v16 }
 0x173   : > { %v1371_v14 = vld [vmem:[%s11101_s12 + $0x1c40] sm:$0xff]  ;;  %v10055_v18 = vcombine.high %v1243_v12, %v1247_v13  ;;  %7002 = vmatprep.subr.bf16.mxu1 %v10191_v11  ;;  %v10054_v50 = vcombine.low %v1243_v12, %v1247_v13 }
 0x174   : > { %v1375_v15 = vld [vmem:[%s11101_s12 + $0x1c60] sm:$0xff]  ;;  %7003 = vmatpush1.bf16.msra.mxu1 %v10190_v17 }
 0x175   : > { %v10183_v19 = vcombine.high %v1371_v14, %v1375_v15  ;;  %v1235_v20 = vld [vmem:[%s11101_s12 + $0x1800] sm:$0xff]  ;;  %6961 = vmatprep.subr.bf16.mxu0 %v10055_v18  ;;  %v10182_v33 = vcombine.low %v1371_v14, %v1375_v15 }
 0x176   : > { %v1239_v22 = vld [vmem:[%s11101_s12 + $0x1820] sm:$0xff]  ;;  %6962 = vmatpush1.bf16.msra.mxu0 %v10054_v50 }
 0x177   : > { %v1363_v57 = vld [vmem:[%s11101_s12 + $0x1c00] sm:$0xff]  ;;  %v10047_v61 = vcombine.high %v1235_v20, %v1239_v22  ;;  %7004 = vmatprep.subr.bf16.mxu1 %v10183_v19  ;;  %v10046_v40 = vcombine.low %v1235_v20, %v1239_v22 }
 0x178   : > { %v1367_v49 = vld [vmem:[%s11101_s12 + $0x1c20] sm:$0xff]  ;;  %7005 = vmatpush1.bf16.msra.mxu1 %v10182_v33 }
 0x179   : > { %v10175_v62 = vcombine.high %v1363_v57, %v1367_v49  ;;  %v1355_v53 = vld [vmem:[%s11101_s12 + $0x1bc0] sm:$0xff]  ;;  %6963 = vmatprep.subr.bf16.mxu0 %v10047_v61  ;;  %v10174_v41 = vcombine.low %v1363_v57, %v1367_v49 }
 0x17a   : > { %v1359_v54 = vld [vmem:[%s11101_s12 + $0x1be0] sm:$0xff]  ;;  %6964 = vmatpush1.bf16.msra.mxu0 %v10046_v40 }
 0x17b   : > { %v1483_v38 = vld [vmem:[%s11101_s12 + $0x1fc0] sm:$0xff]  ;;  %v10167_v42 = vcombine.high %v1355_v53, %v1359_v54  ;;  %7006 = vmatprep.subr.bf16.mxu1 %v10175_v62  ;;  %v10166_v52 = vcombine.low %v1355_v53, %v1359_v54 }
 0x17c   : > { %v1487_v39 = vld [vmem:[%s11101_s12 + $0x1fe0] sm:$0xff]  ;;  %7007 = vmatpush1.bf16.msra.mxu1 %v10174_v41 }
 0x17d   : > { %v10295_v43 = vcombine.high %v1483_v38, %v1487_v39  ;;  %v1347_v44 = vld [vmem:[%s11101_s12 + $0x1b80] sm:$0xff]  ;;  %6965 = vmatprep.subr.bf16.mxu0 %v10167_v42  ;;  %v10294_v25 = vcombine.low %v1483_v38, %v1487_v39 }
 0x17e   : > { %v1351_v45 = vld [vmem:[%s11101_s12 + $0x1ba0] sm:$0xff]  ;;  %6966 = vmatpush2.bf16.msra.mxu0 %v10166_v52 }
 0x17f   : > { %v1475_v46 = vld [vmem:[%s11101_s12 + $0x1f80] sm:$0xff]  ;;  %v10159_v26 = vcombine.high %v1347_v44, %v1351_v45  ;;  %7008 = vmatprep.subr.bf16.mxu1 %v10295_v43  ;;  %v10158_v2 = vcombine.low %v1347_v44, %v1351_v45 }
 0x180   : > { %v1479_v48 = vld [vmem:[%s11101_s12 + $0x1fa0] sm:$0xff]  ;;  %7009 = vmatpush2.bf16.msra.mxu1 %v10294_v25 }
 0x181   : > { %v10287_v55 = vcombine.high %v1475_v46, %v1479_v48  ;;  %v1339_v58 = vld [vmem:[%s11101_s12 + $0x1b40] sm:$0xff]  ;;  %6967 = vmatprep.subr.bf16.mxu0 %v10159_v26  ;;  %v10286_v3 = vcombine.low %v1475_v46, %v1479_v48 }
 0x182   : > { %v1343_v59 = vld [vmem:[%s11101_s12 + $0x1b60] sm:$0xff]  ;;  %6968 = vmatpush2.bf16.msra.mxu0 %v10158_v2  ;;  %v652_v2 = vld [vmem:[%s11101_s12 + $0x5c8] sm:$0xff] }
 0x183   : > { %v1467_v29 = vld [vmem:[%s11101_s12 + $0x1f40] sm:$0xff]  ;;  %v10151_v4 = vcombine.high %v1339_v58, %v1343_v59  ;;  %7010 = vmatprep.subr.bf16.mxu1 %v10287_v55  ;;  %v10150_v10 = vcombine.low %v1339_v58, %v1343_v59 }
 0x184   : > { %v1471_v30 = vld [vmem:[%s11101_s12 + $0x1f60] sm:$0xff]  ;;  %7011 = vmatpush2.bf16.msra.mxu1 %v10286_v3  ;;  %v656_v3 = vld [vmem:[%s11101_s12 + $0x5e8] sm:$0xff] }
 0x185   : > { %v10279_v5 = vcombine.high %v1467_v29, %v1471_v30  ;;  %v1331_v6 = vld [vmem:[%s11101_s12 + $0x1b00] sm:$0xff]  ;;  %6969 = vmatprep.subr.bf16.mxu0 %v10151_v4  ;;  %v10278_v11 = vcombine.low %v1467_v29, %v1471_v30  ;;  %v524_v29 = vld [vmem:[%s11101_s12 + $0x1c8] sm:$0xff] }
 0x186   : > { %v1335_v7 = vld [vmem:[%s11101_s12 + $0x1b20] sm:$0xff]  ;;  %6970 = vmatpush2.bf16.msra.mxu0 %v10150_v10  ;;  %v528_v30 = vld [vmem:[%s11101_s12 + $0x1e8] sm:$0xff]  ;;  %v11509_v10 = vcombine.low %v11418_v24, %v11421_v28 }
 0x187   : > { %v1459_v8 = vld [vmem:[%s11101_s12 + $0x1f00] sm:$0xff]  ;;  %v10143_v12 = vcombine.high %v1331_v6, %v1335_v7  ;;  %7012 = vmatprep.subr.bf16.mxu1 %v10279_v5  ;;  %v10142_v18 = vcombine.low %v1331_v6, %v1335_v7  ;;  %v9337_v6 = vcombine.high %v524_v29, %v528_v30  ;;  %v9465_v7 = vcombine.high %v652_v2, %v656_v3  ;;  %v512_v24 = vld [vmem:[%s11101_s12 + $0x168] sm:$0xff] }
 0x188   : > { %v1463_v9 = vld [vmem:[%s11101_s12 + $0x1f20] sm:$0xff]  ;;  %7013 = vmatpush2.bf16.msra.mxu1 %v10278_v11  ;;  %v644_v11 = vld [vmem:[%s11101_s12 + $0x588] sm:$0xff] }
 0x189   : > { %v10271_v13 = vcombine.high %v1459_v8, %v1463_v9  ;;  %v1323_v14 = vld [vmem:[%s11101_s12 + $0x1ac0] sm:$0xff]  ;;  %6971 = vmatprep.subr.bf16.mxu0 %v10143_v12  ;;  %v10270_v19 = vcombine.low %v1459_v8, %v1463_v9  ;;  %v516_v8 = vld [vmem:[%s11101_s12 + $0x188] sm:$0xff] }
 0x18a   : > { %v1327_v15 = vld [vmem:[%s11101_s12 + $0x1ae0] sm:$0xff]  ;;  %6972 = vmatpush2.bf16.msra.mxu0 %v10142_v18  ;;  %v520_v9 = vld [vmem:[%s11101_s12 + $0x1a8] sm:$0xff] }
 0x18b   : > { %v1451_v16 = vld [vmem:[%s11101_s12 + $0x1ec0] sm:$0xff]  ;;  %v10135_v20 = vcombine.high %v1323_v14, %v1327_v15  ;;  %7014 = vmatprep.subr.bf16.mxu1 %v10271_v13  ;;  %v10134_v61 = vcombine.low %v1323_v14, %v1327_v15  ;;  %v648_v12 = vld [vmem:[%s11101_s12 + $0x5a8] sm:$0xff]  ;;  %v11515_v13 = vcombine.low %v11428_v31, %v11431_v32  ;;  %v9336_v14 = vcombine.low %v524_v29, %v528_v30 }
 0x18c   : > { %v1455_v17 = vld [vmem:[%s11101_s12 + $0x1ee0] sm:$0xff]  ;;  %7015 = vmatpush2.bf16.msra.mxu1 %v10270_v19  ;;  %v9464_v15 = vcombine.low %v652_v2, %v656_v3  ;;  %v508_v18 = vld [vmem:[%s11101_s12 + $0x148] sm:$0xff]  ;;  %v9328_v31 = vcombine.low %v516_v8, %v520_v9  ;;  %v9456_v32 = vcombine.low %v644_v11, %v648_v12 }
 0x18d   : > { %v10263_v22 = vcombine.high %v1451_v16, %v1455_v17  ;;  %v1315_v57 = vld [vmem:[%s11101_s12 + $0x1a80] sm:$0xff]  ;;  %6973 = vmatprep.subr.bf16.mxu0 %v10135_v20  ;;  %v10262_v62 = vcombine.low %v1451_v16, %v1455_v17  ;;  %v9329_v16 = vcombine.high %v516_v8, %v520_v9  ;;  %v9457_v17 = vcombine.high %v644_v11, %v648_v12  ;;  %v636_v28 = vld [vmem:[%s11101_s12 + $0x548] sm:$0xff] }
 0x18e   : > { %v1319_v49 = vld [vmem:[%s11101_s12 + $0x1aa0] sm:$0xff]  ;;  %6974 = vmatpush2.bf16.msra.mxu0 %v10134_v61  ;;  %v640_v19 = vld [vmem:[%s11101_s12 + $0x568] sm:$0xff]  ;;  %v9321_v20 = vcombine.high %v508_v18, %v512_v24  ;;  %v9320_v61 = vcombine.low %v508_v18, %v512_v24 }
 0x18f   : > { %v1443_v50 = vld [vmem:[%s11101_s12 + $0x1e80] sm:$0xff]  ;;  %v10127_v53 = vcombine.high %v1315_v57, %v1319_v49  ;;  %7016 = vmatprep.subr.bf16.mxu1 %v10263_v22  ;;  %v10126_v42 = vcombine.low %v1315_v57, %v1319_v49  ;;  %v9449_v22 = vcombine.high %v636_v28, %v640_v19  ;;  %v500_v57 = vld [vmem:[%s11101_s12 + $0x108] sm:$0xff] }
 0x190   : > { %v1447_v33 = vld [vmem:[%s11101_s12 + $0x1ea0] sm:$0xff]  ;;  %7017 = vmatpush2.bf16.msra.mxu1 %v10262_v62  ;;  %v504_v49 = vld [vmem:[%s11101_s12 + $0x128] sm:$0xff]  ;;  %v9448_v62 = vcombine.low %v636_v28, %v640_v19 }
 0x191   : > { %v10255_v54 = vcombine.high %v1443_v50, %v1447_v33  ;;  %v1307_v38 = vld [vmem:[%s11101_s12 + $0x1a40] sm:$0xff]  ;;  %6975 = vmatprep.subr.bf16.mxu0 %v10127_v53  ;;  %v10254_v43 = vcombine.low %v1443_v50, %v1447_v33  ;;  %v628_v50 = vld [vmem:[%s11101_s12 + $0x508] sm:$0xff]  ;;  %v9313_v53 = vcombine.high %v500_v57, %v504_v49 }
 0x192   : > { %v1311_v39 = vld [vmem:[%s11101_s12 + $0x1a60] sm:$0xff]  ;;  %6976 = vmatpush2.bf16.msra.mxu0 %v10126_v42  ;;  %v632_v33 = vld [vmem:[%s11101_s12 + $0x528] sm:$0xff]  ;;  %v9312_v42 = vcombine.low %v500_v57, %v504_v49 }
 0x193   : > { %v1435_v40 = vld [vmem:[%s11101_s12 + $0x1e40] sm:$0xff]  ;;  %v10119_v44 = vcombine.high %v1307_v38, %v1311_v39  ;;  %7018 = vmatprep.subr.bf16.mxu1 %v10255_v54  ;;  %v10118_v26 = vcombine.low %v1307_v38, %v1311_v39  ;;  %v9441_v54 = vcombine.high %v628_v50, %v632_v33  ;;  %v492_v38 = vld [vmem:[%s11101_s12 + $0xc8] sm:$0xff] }
 0x194   : > { %v1439_v41 = vld [vmem:[%s11101_s12 + $0x1e60] sm:$0xff]  ;;  %7019 = vmatpush2.bf16.msra.mxu1 %v10254_v43  ;;  %v496_v39 = vld [vmem:[%s11101_s12 + $0xe8] sm:$0xff]  ;;  %v9440_v43 = vcombine.low %v628_v50, %v632_v33 }
 0x195   : > { %v10247_v45 = vcombine.high %v1435_v40, %v1439_v41  ;;  %v1299_v46 = vld [vmem:[%s11101_s12 + $0x1a00] sm:$0xff]  ;;  %6977 = vmatprep.subr.bf16.mxu0 %v10119_v44  ;;  %v10246_v55 = vcombine.low %v1435_v40, %v1439_v41  ;;  %v620_v40 = vld [vmem:[%s11101_s12 + $0x4c8] sm:$0xff]  ;;  %v9305_v44 = vcombine.high %v492_v38, %v496_v39 }
 0x196   : > { %v1303_v48 = vld [vmem:[%s11101_s12 + $0x1a20] sm:$0xff]  ;;  %6978 = vmatpush2.bf16.msra.mxu0 %v10118_v26  ;;  %v624_v41 = vld [vmem:[%s11101_s12 + $0x4e8] sm:$0xff]  ;;  %v9304_v26 = vcombine.low %v492_v38, %v496_v39 }
 0x197   : > { %v1427_v52 = vld [vmem:[%s11101_s12 + $0x1e00] sm:$0xff]  ;;  %v10111_v58 = vcombine.high %v1299_v46, %v1303_v48  ;;  %7020 = vmatprep.subr.bf16.mxu1 %v10247_v45  ;;  %v10110_v4 = vcombine.low %v1299_v46, %v1303_v48  ;;  %v9433_v45 = vcombine.high %v620_v40, %v624_v41  ;;  %v484_v46 = vld [vmem:[%s11101_s12 + $0x88] sm:$0xff] }
 0x198   : > { %v1431_v25 = vld [vmem:[%s11101_s12 + $0x1e20] sm:$0xff]  ;;  %7021 = vmatpush2.bf16.msra.mxu1 %v10246_v55  ;;  %v488_v48 = vld [vmem:[%s11101_s12 + $0xa8] sm:$0xff]  ;;  %v9432_v55 = vcombine.low %v620_v40, %v624_v41 }
 0x199   : > { %v10239_v59 = vcombine.high %v1427_v52, %v1431_v25  ;;  %6979 = vmatprep.subr.bf16.mxu0 %v10111_v58  ;;  %v10238_v5 = vcombine.low %v1427_v52, %v1431_v25  ;;  %v612_v52 = vld [vmem:[%s11101_s12 + $0x488] sm:$0xff]  ;;  %v9297_v58 = vcombine.high %v484_v46, %v488_v48 }
 0x19a   : > { %6980 = vmatpush2.bf16.msra.mxu0 %v10110_v4  ;;  %v616_v25 = vld [vmem:[%s11101_s12 + $0x4a8] sm:$0xff]  ;;  %v9296_v4 = vcombine.low %v484_v46, %v488_v48 }
 0x19b   : > { %7022 = vmatprep.subr.bf16.mxu1 %v10239_v59  ;;  %7035 = vmatprep.subr.bf16.mxu0 %v9337_v6  ;;  %v9425_v59 = vcombine.high %v612_v52, %v616_v25  ;;  %v476_v29 = vld [vmem:[%s11101_s12 + $0x48] sm:$0xff] }
 0x19c   : > { %7023 = vmatpush2.bf16.msra.mxu1 %v10238_v5  ;;  %v480_v30 = vld [vmem:[%s11101_s12 + $0x68] sm:$0xff]  ;;  %v9424_v5 = vcombine.low %v612_v52, %v616_v25 }
 0x19d   : > { %7078 = vmatprep.subr.bf16.mxu1 %v9465_v7  ;;  %6982 = vmatmul.mubr.bf16.vlgmr.msra.gmra.mxu0 %v11509_v10  ;;  %v604_v2 = vld [vmem:[%s11101_s12 + $0x448] sm:$0xff]  ;;  %v9289_v6 = vcombine.high %v476_v29, %v480_v30 }
 0x19e   : > { %7036 = vmatpush1.bf16.msra.mxu0 %v9336_v14  ;;  %7067 = vmatprep.mubr.bf16.mxu0 %v11165_v60  ;;  %v608_v3 = vld [vmem:[%s11101_s12 + $0x468] sm:$0xff]  ;;  %v9288_v14 = vcombine.low %v476_v29, %v480_v30 }
 0x19f   : > { %7025 = vmatmul.mubr.bf16.vlgmr.msra.gmra.mxu1 %v11515_v13  ;;  %7037 = vmatprep.subr.bf16.mxu0 %v9329_v16  ;;  %v9417_v7 = vcombine.high %v604_v2, %v608_v3  ;;  %v468_v8 = vld [vmem:[%s11101_s12 + $0x8] sm:$0xff] }
 0x1a0   : > { %7079 = vmatpush1.bf16.msra.mxu1 %v9464_v15  ;;  %7110 = vmatprep.mubr.bf16.mxu1 %v11177_v1  ;;  %v472_v9 = vld [vmem:[%s11101_s12 + $0x28] sm:$0xff]  ;;  %v9416_v15 = vcombine.low %v604_v2, %v608_v3 }
 0x1a1   : > { %7080 = vmatprep.subr.bf16.mxu1 %v9457_v17  ;;  %v596_v11 = vld [vmem:[%s11101_s12 + $0x408] sm:$0xff]  ;;  %v9281_v16 = vcombine.high %v468_v8, %v472_v9 }
 0x1a2   : > { %7038 = vmatpush1.bf16.msra.mxu0 %v9328_v31  ;;  %v600_v12 = vld [vmem:[%s11101_s12 + $0x428] sm:$0xff]  ;;  %v9280_v31 = vcombine.low %v468_v8, %v472_v9 }
 0x1a3   : > { %7039 = vmatprep.subr.bf16.mxu0 %v9321_v20  ;;  %v9409_v17 = vcombine.high %v596_v11, %v600_v12  ;;  %v588_v18 = vld [vmem:[%s11101_s12 + $0x3c8] sm:$0xff] }
 0x1a4   : > { %7081 = vmatpush1.bf16.msra.mxu1 %v9456_v32  ;;  %v592_v24 = vld [vmem:[%s11101_s12 + $0x3e8] sm:$0xff]  ;;  %v9408_v32 = vcombine.low %v596_v11, %v600_v12 }
 0x1a5   : > { %7082 = vmatprep.subr.bf16.mxu1 %v9449_v22  ;;  %v716_v28 = vld [vmem:[%s11101_s12 + $0x7c8] sm:$0xff]  ;;  %v9401_v20 = vcombine.high %v588_v18, %v592_v24 }
 0x1a6   : > { %7040 = vmatpush1.bf16.msra.mxu0 %v9320_v61  ;;  %v720_v19 = vld [vmem:[%s11101_s12 + $0x7e8] sm:$0xff]  ;;  %v9400_v61 = vcombine.low %v588_v18, %v592_v24 }
 0x1a7   : > { %7041 = vmatprep.subr.bf16.mxu0 %v9313_v53  ;;  %v9529_v22 = vcombine.high %v716_v28, %v720_v19  ;;  %v580_v57 = vld [vmem:[%s11101_s12 + $0x388] sm:$0xff] }
 0x1a8   : > { %7083 = vmatpush1.bf16.msra.mxu1 %v9448_v62  ;;  %v584_v49 = vld [vmem:[%s11101_s12 + $0x3a8] sm:$0xff]  ;;  %v9528_v62 = vcombine.low %v716_v28, %v720_v19 }
 0x1a9   : > { %7084 = vmatprep.subr.bf16.mxu1 %v9441_v54  ;;  %v708_v50 = vld [vmem:[%s11101_s12 + $0x788] sm:$0xff]  ;;  %v9393_v53 = vcombine.high %v580_v57, %v584_v49 }
 0x1aa   : > { %7042 = vmatpush1.bf16.msra.mxu0 %v9312_v42  ;;  %v712_v33 = vld [vmem:[%s11101_s12 + $0x7a8] sm:$0xff]  ;;  %v9392_v42 = vcombine.low %v580_v57, %v584_v49 }
 0x1ab   : > { %7043 = vmatprep.subr.bf16.mxu0 %v9305_v44  ;;  %v9521_v54 = vcombine.high %v708_v50, %v712_v33  ;;  %v572_v38 = vld [vmem:[%s11101_s12 + $0x348] sm:$0xff] }
 0x1ac   : > { %7085 = vmatpush1.bf16.msra.mxu1 %v9440_v43  ;;  %v576_v39 = vld [vmem:[%s11101_s12 + $0x368] sm:$0xff]  ;;  %v9520_v43 = vcombine.low %v708_v50, %v712_v33 }
 0x1ad   : > { %7086 = vmatprep.subr.bf16.mxu1 %v9433_v45  ;;  %v700_v40 = vld [vmem:[%s11101_s12 + $0x748] sm:$0xff]  ;;  %v9385_v44 = vcombine.high %v572_v38, %v576_v39 }
 0x1ae   : > { %7044 = vmatpush1.bf16.msra.mxu0 %v9304_v26  ;;  %v704_v41 = vld [vmem:[%s11101_s12 + $0x768] sm:$0xff]  ;;  %v9384_v26 = vcombine.low %v572_v38, %v576_v39 }
 0x1af   : > { %7045 = vmatprep.subr.bf16.mxu0 %v9297_v58  ;;  %v9513_v45 = vcombine.high %v700_v40, %v704_v41  ;;  %v564_v46 = vld [vmem:[%s11101_s12 + $0x308] sm:$0xff] }
 0x1b0   : > { %7087 = vmatpush1.bf16.msra.mxu1 %v9432_v55  ;;  %v568_v48 = vld [vmem:[%s11101_s12 + $0x328] sm:$0xff]  ;;  %v9512_v55 = vcombine.low %v700_v40, %v704_v41 }
 0x1b1   : > { %7088 = vmatprep.subr.bf16.mxu1 %v9425_v59  ;;  %v692_v52 = vld [vmem:[%s11101_s12 + $0x708] sm:$0xff]  ;;  %v9377_v58 = vcombine.high %v564_v46, %v568_v48 }
 0x1b2   : > { %7046 = vmatpush1.bf16.msra.mxu0 %v9296_v4  ;;  %v696_v25 = vld [vmem:[%s11101_s12 + $0x728] sm:$0xff]  ;;  %v9376_v4 = vcombine.low %v564_v46, %v568_v48 }
 0x1b3   : > { %7047 = vmatprep.subr.bf16.mxu0 %v9289_v6  ;;  %v9505_v59 = vcombine.high %v692_v52, %v696_v25  ;;  %v556_v29 = vld [vmem:[%s11101_s12 + $0x2c8] sm:$0xff] }
 0x1b4   : > { %7089 = vmatpush1.bf16.msra.mxu1 %v9424_v5  ;;  %v560_v30 = vld [vmem:[%s11101_s12 + $0x2e8] sm:$0xff]  ;;  %v9504_v5 = vcombine.low %v692_v52, %v696_v25 }
 0x1b5   : > { %7090 = vmatprep.subr.bf16.mxu1 %v9417_v7  ;;  %v684_v2 = vld [vmem:[%s11101_s12 + $0x6c8] sm:$0xff]  ;;  %v9369_v6 = vcombine.high %v556_v29, %v560_v30 }
 0x1b6   : > { %7048 = vmatpush1.bf16.msra.mxu0 %v9288_v14  ;;  %v688_v3 = vld [vmem:[%s11101_s12 + $0x6e8] sm:$0xff]  ;;  %v9368_v14 = vcombine.low %v556_v29, %v560_v30 }
 0x1b7   : > { %7049 = vmatprep.subr.bf16.mxu0 %v9281_v16  ;;  %v9497_v7 = vcombine.high %v684_v2, %v688_v3  ;;  %v548_v8 = vld [vmem:[%s11101_s12 + $0x288] sm:$0xff] }
 0x1b8   : > { %7091 = vmatpush1.bf16.msra.mxu1 %v9416_v15  ;;  %v552_v9 = vld [vmem:[%s11101_s12 + $0x2a8] sm:$0xff]  ;;  %v9496_v15 = vcombine.low %v684_v2, %v688_v3 }
 0x1b9   : > { %7092 = vmatprep.subr.bf16.mxu1 %v9409_v17  ;;  %v676_v11 = vld [vmem:[%s11101_s12 + $0x688] sm:$0xff]  ;;  %v9361_v16 = vcombine.high %v548_v8, %v552_v9 }
 0x1ba   : > { %7050 = vmatpush1.bf16.msra.mxu0 %v9280_v31  ;;  %v680_v12 = vld [vmem:[%s11101_s12 + $0x6a8] sm:$0xff]  ;;  %v9360_v31 = vcombine.low %v548_v8, %v552_v9 }
 0x1bb   : > { %7051 = vmatprep.subr.bf16.mxu0 %v9401_v20  ;;  %v9489_v17 = vcombine.high %v676_v11, %v680_v12  ;;  %v540_v18 = vld [vmem:[%s11101_s12 + $0x248] sm:$0xff] }
 0x1bc   : > { %7093 = vmatpush1.bf16.msra.mxu1 %v9408_v32  ;;  %v544_v24 = vld [vmem:[%s11101_s12 + $0x268] sm:$0xff]  ;;  %v9488_v32 = vcombine.low %v676_v11, %v680_v12 }
 0x1bd   : > { %7094 = vmatprep.subr.bf16.mxu1 %v9529_v22  ;;  %v668_v28 = vld [vmem:[%s11101_s12 + $0x648] sm:$0xff]  ;;  %v9353_v20 = vcombine.high %v540_v18, %v544_v24 }
 0x1be   : > { %7052 = vmatpush2.bf16.msra.mxu0 %v9400_v61  ;;  %v672_v19 = vld [vmem:[%s11101_s12 + $0x668] sm:$0xff]  ;;  %v9352_v61 = vcombine.low %v540_v18, %v544_v24 }
 0x1bf   : > { %7053 = vmatprep.subr.bf16.mxu0 %v9393_v53  ;;  %v9481_v22 = vcombine.high %v668_v28, %v672_v19  ;;  %v532_v57 = vld [vmem:[%s11101_s12 + $0x208] sm:$0xff] }
 0x1c0   : > { %7095 = vmatpush2.bf16.msra.mxu1 %v9528_v62  ;;  %v536_v49 = vld [vmem:[%s11101_s12 + $0x228] sm:$0xff]  ;;  %v9480_v62 = vcombine.low %v668_v28, %v672_v19 }
 0x1c1   : > { %7096 = vmatprep.subr.bf16.mxu1 %v9521_v54  ;;  %v660_v50 = vld [vmem:[%s11101_s12 + $0x608] sm:$0xff]  ;;  %v9345_v53 = vcombine.high %v532_v57, %v536_v49 }
 0x1c2   : > { %7054 = vmatpush2.bf16.msra.mxu0 %v9392_v42  ;;  %v664_v33 = vld [vmem:[%s11101_s12 + $0x628] sm:$0xff]  ;;  %v9344_v42 = vcombine.low %v532_v57, %v536_v49 }
 0x1c3   : > { %7055 = vmatprep.subr.bf16.mxu0 %v9385_v44  ;;  %v9473_v54 = vcombine.high %v660_v50, %v664_v33  ;;  %v780_v38 = vld [vmem:[%s11101_s12 + $0x9c8] sm:$0xff] }
 0x1c4   : > { %7097 = vmatpush2.bf16.msra.mxu1 %v9520_v43  ;;  %v784_v39 = vld [vmem:[%s11101_s12 + $0x9e8] sm:$0xff]  ;;  %v9472_v43 = vcombine.low %v660_v50, %v664_v33 }
 0x1c5   : > { %7098 = vmatprep.subr.bf16.mxu1 %v9513_v45  ;;  %v908_v40 = vld [vmem:[%s11101_s12 + $0xdc8] sm:$0xff]  ;;  %v9593_v44 = vcombine.high %v780_v38, %v784_v39 }
 0x1c6   : > { %7056 = vmatpush2.bf16.msra.mxu0 %v9384_v26  ;;  %v912_v41 = vld [vmem:[%s11101_s12 + $0xde8] sm:$0xff]  ;;  %v9592_v26 = vcombine.low %v780_v38, %v784_v39 }
 0x1c7   : > { %7057 = vmatprep.subr.bf16.mxu0 %v9377_v58  ;;  %v9721_v45 = vcombine.high %v908_v40, %v912_v41  ;;  %v772_v46 = vld [vmem:[%s11101_s12 + $0x988] sm:$0xff] }
 0x1c8   : > { %7099 = vmatpush2.bf16.msra.mxu1 %v9512_v55  ;;  %v776_v48 = vld [vmem:[%s11101_s12 + $0x9a8] sm:$0xff]  ;;  %v9720_v55 = vcombine.low %v908_v40, %v912_v41 }
 0x1c9   : > { %7100 = vmatprep.subr.bf16.mxu1 %v9505_v59  ;;  %v900_v52 = vld [vmem:[%s11101_s12 + $0xd88] sm:$0xff]  ;;  %v9585_v58 = vcombine.high %v772_v46, %v776_v48 }
 0x1ca   : > { %7058 = vmatpush2.bf16.msra.mxu0 %v9376_v4  ;;  %v904_v25 = vld [vmem:[%s11101_s12 + $0xda8] sm:$0xff]  ;;  %v9584_v4 = vcombine.low %v772_v46, %v776_v48 }
 0x1cb   : > { %7059 = vmatprep.subr.bf16.mxu0 %v9369_v6  ;;  %v9713_v59 = vcombine.high %v900_v52, %v904_v25  ;;  %v764_v29 = vld [vmem:[%s11101_s12 + $0x948] sm:$0xff] }
 0x1cc   : > { %7101 = vmatpush2.bf16.msra.mxu1 %v9504_v5  ;;  %v768_v30 = vld [vmem:[%s11101_s12 + $0x968] sm:$0xff]  ;;  %v9712_v5 = vcombine.low %v900_v52, %v904_v25 }
 0x1cd   : > { %7102 = vmatprep.subr.bf16.mxu1 %v9497_v7  ;;  %v892_v2 = vld [vmem:[%s11101_s12 + $0xd48] sm:$0xff]  ;;  %v9577_v6 = vcombine.high %v764_v29, %v768_v30 }
 0x1ce   : > { %7060 = vmatpush2.bf16.msra.mxu0 %v9368_v14  ;;  %v896_v3 = vld [vmem:[%s11101_s12 + $0xd68] sm:$0xff]  ;;  %v9576_v14 = vcombine.low %v764_v29, %v768_v30 }
 0x1cf   : > { %7061 = vmatprep.subr.bf16.mxu0 %v9361_v16  ;;  %v9705_v7 = vcombine.high %v892_v2, %v896_v3  ;;  %v756_v8 = vld [vmem:[%s11101_s12 + $0x908] sm:$0xff] }
 0x1d0   : > { %7103 = vmatpush2.bf16.msra.mxu1 %v9496_v15  ;;  %v760_v9 = vld [vmem:[%s11101_s12 + $0x928] sm:$0xff]  ;;  %v9704_v15 = vcombine.low %v892_v2, %v896_v3 }
 0x1d1   : > { %7104 = vmatprep.subr.bf16.mxu1 %v9489_v17  ;;  %v884_v11 = vld [vmem:[%s11101_s12 + $0xd08] sm:$0xff]  ;;  %v9569_v16 = vcombine.high %v756_v8, %v760_v9 }
 0x1d2   : > { %7062 = vmatpush2.bf16.msra.mxu0 %v9360_v31  ;;  %v888_v12 = vld [vmem:[%s11101_s12 + $0xd28] sm:$0xff]  ;;  %v9568_v31 = vcombine.low %v756_v8, %v760_v9 }
 0x1d3   : > { %7063 = vmatprep.subr.bf16.mxu0 %v9353_v20  ;;  %v9697_v17 = vcombine.high %v884_v11, %v888_v12  ;;  %v748_v18 = vld [vmem:[%s11101_s12 + $0x8c8] sm:$0xff] }
 0x1d4   : > { %7105 = vmatpush2.bf16.msra.mxu1 %v9488_v32  ;;  %v752_v24 = vld [vmem:[%s11101_s12 + $0x8e8] sm:$0xff]  ;;  %v9696_v32 = vcombine.low %v884_v11, %v888_v12 }
 0x1d5   : > { %7106 = vmatprep.subr.bf16.mxu1 %v9481_v22  ;;  %v876_v28 = vld [vmem:[%s11101_s12 + $0xcc8] sm:$0xff]  ;;  %v9561_v20 = vcombine.high %v748_v18, %v752_v24 }
 0x1d6   : > { %7064 = vmatpush2.bf16.msra.mxu0 %v9352_v61  ;;  %v880_v19 = vld [vmem:[%s11101_s12 + $0xce8] sm:$0xff]  ;;  %v9560_v61 = vcombine.low %v748_v18, %v752_v24 }
 0x1d7   : > { %7065 = vmatprep.subr.bf16.mxu0 %v9345_v53  ;;  %v9689_v22 = vcombine.high %v876_v28, %v880_v19  ;;  %v740_v57 = vld [vmem:[%s11101_s12 + $0x888] sm:$0xff] }
 0x1d8   : > { %7107 = vmatpush2.bf16.msra.mxu1 %v9480_v62  ;;  %v744_v49 = vld [vmem:[%s11101_s12 + $0x8a8] sm:$0xff]  ;;  %v9688_v62 = vcombine.low %v876_v28, %v880_v19 }
 0x1d9   : > { %7108 = vmatprep.subr.bf16.mxu1 %v9473_v54  ;;  %v868_v50 = vld [vmem:[%s11101_s12 + $0xc88] sm:$0xff]  ;;  %v9553_v53 = vcombine.high %v740_v57, %v744_v49 }
 0x1da   : > { %7066 = vmatpush2.bf16.msra.mxu0 %v9344_v42  ;;  %v872_v33 = vld [vmem:[%s11101_s12 + $0xca8] sm:$0xff]  ;;  %v9552_v42 = vcombine.low %v740_v57, %v744_v49 }
 0x1db   : > { %7121 = vmatprep.subr.bf16.mxu0 %v9593_v44  ;;  %v9681_v54 = vcombine.high %v868_v50, %v872_v33  ;;  %v732_v38 = vld [vmem:[%s11101_s12 + $0x848] sm:$0xff] }
 0x1dc   : > { %7109 = vmatpush2.bf16.msra.mxu1 %v9472_v43  ;;  %v736_v39 = vld [vmem:[%s11101_s12 + $0x868] sm:$0xff]  ;;  %v9680_v43 = vcombine.low %v868_v50, %v872_v33 }
 0x1dd   : > { %7164 = vmatprep.subr.bf16.mxu1 %v9721_v45  ;;  %7068 = vmatmul.mubr.bf16.vlgmr.msra.gmra.mxu0 %v11222_v23  ;;  %v860_v40 = vld [vmem:[%s11101_s12 + $0xc48] sm:$0xff]  ;;  %v9545_v44 = vcombine.high %v732_v38, %v736_v39 }
 0x1de   : > { %7122 = vmatpush1.bf16.msra.mxu0 %v9592_v26  ;;  %7153 = vmatprep.mubr.bf16.mxu0 %v11245_v34  ;;  %v864_v41 = vld [vmem:[%s11101_s12 + $0xc68] sm:$0xff]  ;;  %v9544_v26 = vcombine.low %v732_v38, %v736_v39 }
 0x1df   : > { %7111 = vmatmul.mubr.bf16.vlgmr.msra.gmra.mxu1 %v11233_v27  ;;  %7123 = vmatprep.subr.bf16.mxu0 %v9585_v58  ;;  %v9673_v45 = vcombine.high %v860_v40, %v864_v41  ;;  %v724_v46 = vld [vmem:[%s11101_s12 + $0x808] sm:$0xff] }
 0x1e0   : > { %7165 = vmatpush1.bf16.msra.mxu1 %v9720_v55  ;;  %7196 = vmatprep.mubr.bf16.mxu1 %v11252_v35  ;;  %v728_v48 = vld [vmem:[%s11101_s12 + $0x828] sm:$0xff]  ;;  %v9672_v55 = vcombine.low %v860_v40, %v864_v41 }
 0x1e1   : > { %7166 = vmatprep.subr.bf16.mxu1 %v9713_v59  ;;  %v852_v52 = vld [vmem:[%s11101_s12 + $0xc08] sm:$0xff]  ;;  %v9537_v58 = vcombine.high %v724_v46, %v728_v48 }
 0x1e2   : > { %7124 = vmatpush1.bf16.msra.mxu0 %v9584_v4  ;;  %v856_v25 = vld [vmem:[%s11101_s12 + $0xc28] sm:$0xff]  ;;  %v9536_v4 = vcombine.low %v724_v46, %v728_v48 }
 0x1e3   : > { %7125 = vmatprep.subr.bf16.mxu0 %v9577_v6  ;;  %v9665_v59 = vcombine.high %v852_v52, %v856_v25  ;;  %v844_v29 = vld [vmem:[%s11101_s12 + $0xbc8] sm:$0xff] }
 0x1e4   : > { %7167 = vmatpush1.bf16.msra.mxu1 %v9712_v5  ;;  %v848_v30 = vld [vmem:[%s11101_s12 + $0xbe8] sm:$0xff]  ;;  %v9664_v5 = vcombine.low %v852_v52, %v856_v25 }
 0x1e5   : > { %7168 = vmatprep.subr.bf16.mxu1 %v9705_v7  ;;  %v972_v2 = vld [vmem:[%s11101_s12 + $0xfc8] sm:$0xff]  ;;  %v9657_v6 = vcombine.high %v844_v29, %v848_v30 }
 0x1e6   : > { %7126 = vmatpush1.bf16.msra.mxu0 %v9576_v14  ;;  %v976_v3 = vld [vmem:[%s11101_s12 + $0xfe8] sm:$0xff]  ;;  %v9656_v14 = vcombine.low %v844_v29, %v848_v30 }
 0x1e7   : > { %7127 = vmatprep.subr.bf16.mxu0 %v9569_v16  ;;  %v9785_v7 = vcombine.high %v972_v2, %v976_v3  ;;  %v836_v8 = vld [vmem:[%s11101_s12 + $0xb88] sm:$0xff] }
 0x1e8   : > { %7169 = vmatpush1.bf16.msra.mxu1 %v9704_v15  ;;  %v840_v9 = vld [vmem:[%s11101_s12 + $0xba8] sm:$0xff]  ;;  %v9784_v15 = vcombine.low %v972_v2, %v976_v3 }
 0x1e9   : > { %7170 = vmatprep.subr.bf16.mxu1 %v9697_v17  ;;  %v964_v11 = vld [vmem:[%s11101_s12 + $0xf88] sm:$0xff]  ;;  %v9649_v16 = vcombine.high %v836_v8, %v840_v9 }
 0x1ea   : > { %7128 = vmatpush1.bf16.msra.mxu0 %v9568_v31  ;;  %v968_v12 = vld [vmem:[%s11101_s12 + $0xfa8] sm:$0xff]  ;;  %v9648_v31 = vcombine.low %v836_v8, %v840_v9 }
 0x1eb   : > { %7129 = vmatprep.subr.bf16.mxu0 %v9561_v20  ;;  %v9777_v17 = vcombine.high %v964_v11, %v968_v12  ;;  %v828_v18 = vld [vmem:[%s11101_s12 + $0xb48] sm:$0xff] }
 0x1ec   : > { %7171 = vmatpush1.bf16.msra.mxu1 %v9696_v32  ;;  %v832_v24 = vld [vmem:[%s11101_s12 + $0xb68] sm:$0xff]  ;;  %v9776_v32 = vcombine.low %v964_v11, %v968_v12 }
 0x1ed   : > { %7172 = vmatprep.subr.bf16.mxu1 %v9689_v22  ;;  %v956_v28 = vld [vmem:[%s11101_s12 + $0xf48] sm:$0xff]  ;;  %v9641_v20 = vcombine.high %v828_v18, %v832_v24 }
 0x1ee   : > { %7130 = vmatpush1.bf16.msra.mxu0 %v9560_v61  ;;  %v960_v19 = vld [vmem:[%s11101_s12 + $0xf68] sm:$0xff]  ;;  %v9640_v61 = vcombine.low %v828_v18, %v832_v24 }
 0x1ef   : > { %7131 = vmatprep.subr.bf16.mxu0 %v9553_v53  ;;  %v9769_v22 = vcombine.high %v956_v28, %v960_v19  ;;  %v820_v57 = vld [vmem:[%s11101_s12 + $0xb08] sm:$0xff] }
 0x1f0   : > { %7173 = vmatpush1.bf16.msra.mxu1 %v9688_v62  ;;  %v824_v49 = vld [vmem:[%s11101_s12 + $0xb28] sm:$0xff]  ;;  %v9768_v62 = vcombine.low %v956_v28, %v960_v19 }
 0x1f1   : > { %7174 = vmatprep.subr.bf16.mxu1 %v9681_v54  ;;  %v948_v50 = vld [vmem:[%s11101_s12 + $0xf08] sm:$0xff]  ;;  %v9633_v53 = vcombine.high %v820_v57, %v824_v49 }
 0x1f2   : > { %7132 = vmatpush1.bf16.msra.mxu0 %v9552_v42  ;;  %v952_v33 = vld [vmem:[%s11101_s12 + $0xf28] sm:$0xff]  ;;  %v9632_v42 = vcombine.low %v820_v57, %v824_v49 }
 0x1f3   : > { %7133 = vmatprep.subr.bf16.mxu0 %v9545_v44  ;;  %v9761_v54 = vcombine.high %v948_v50, %v952_v33  ;;  %v812_v38 = vld [vmem:[%s11101_s12 + $0xac8] sm:$0xff] }
 0x1f4   : > { %7175 = vmatpush1.bf16.msra.mxu1 %v9680_v43  ;;  %v816_v39 = vld [vmem:[%s11101_s12 + $0xae8] sm:$0xff]  ;;  %v9760_v43 = vcombine.low %v948_v50, %v952_v33 }
 0x1f5   : > { %7176 = vmatprep.subr.bf16.mxu1 %v9673_v45  ;;  %v940_v40 = vld [vmem:[%s11101_s12 + $0xec8] sm:$0xff]  ;;  %v9625_v44 = vcombine.high %v812_v38, %v816_v39 }
 0x1f6   : > { %7134 = vmatpush1.bf16.msra.mxu0 %v9544_v26  ;;  %v944_v41 = vld [vmem:[%s11101_s12 + $0xee8] sm:$0xff]  ;;  %v9624_v26 = vcombine.low %v812_v38, %v816_v39 }
 0x1f7   : > { %7135 = vmatprep.subr.bf16.mxu0 %v9537_v58  ;;  %v9753_v45 = vcombine.high %v940_v40, %v944_v41  ;;  %v804_v46 = vld [vmem:[%s11101_s12 + $0xa88] sm:$0xff] }
 0x1f8   : > { %7177 = vmatpush1.bf16.msra.mxu1 %v9672_v55  ;;  %v808_v48 = vld [vmem:[%s11101_s12 + $0xaa8] sm:$0xff]  ;;  %v9752_v55 = vcombine.low %v940_v40, %v944_v41 }
 0x1f9   : > { %7178 = vmatprep.subr.bf16.mxu1 %v9665_v59  ;;  %v932_v52 = vld [vmem:[%s11101_s12 + $0xe88] sm:$0xff]  ;;  %v9617_v58 = vcombine.high %v804_v46, %v808_v48 }
 0x1fa   : > { %7136 = vmatpush1.bf16.msra.mxu0 %v9536_v4  ;;  %v936_v25 = vld [vmem:[%s11101_s12 + $0xea8] sm:$0xff]  ;;  %v9616_v4 = vcombine.low %v804_v46, %v808_v48 }
 0x1fb   : > { %7137 = vmatprep.subr.bf16.mxu0 %v9657_v6  ;;  %v9745_v59 = vcombine.high %v932_v52, %v936_v25  ;;  %v796_v29 = vld [vmem:[%s11101_s12 + $0xa48] sm:$0xff] }
 0x1fc   : > { %7179 = vmatpush1.bf16.msra.mxu1 %v9664_v5  ;;  %v800_v30 = vld [vmem:[%s11101_s12 + $0xa68] sm:$0xff]  ;;  %v9744_v5 = vcombine.low %v932_v52, %v936_v25 }
 0x1fd   : > { %7180 = vmatprep.subr.bf16.mxu1 %v9785_v7  ;;  %v924_v2 = vld [vmem:[%s11101_s12 + $0xe48] sm:$0xff]  ;;  %v9609_v6 = vcombine.high %v796_v29, %v800_v30 }
 0x1fe   : > { %7138 = vmatpush2.bf16.msra.mxu0 %v9656_v14  ;;  %v928_v3 = vld [vmem:[%s11101_s12 + $0xe68] sm:$0xff]  ;;  %v9608_v14 = vcombine.low %v796_v29, %v800_v30 }
 0x1ff   : > { %7139 = vmatprep.subr.bf16.mxu0 %v9649_v16  ;;  %v9737_v7 = vcombine.high %v924_v2, %v928_v3  ;;  %v788_v8 = vld [vmem:[%s11101_s12 + $0xa08] sm:$0xff] }
 0x200   : > { %7181 = vmatpush2.bf16.msra.mxu1 %v9784_v15  ;;  %v792_v9 = vld [vmem:[%s11101_s12 + $0xa28] sm:$0xff]  ;;  %v9736_v15 = vcombine.low %v924_v2, %v928_v3 }
 0x201   : > { %7182 = vmatprep.subr.bf16.mxu1 %v9777_v17  ;;  %v916_v11 = vld [vmem:[%s11101_s12 + $0xe08] sm:$0xff]  ;;  %v9601_v16 = vcombine.high %v788_v8, %v792_v9 }
 0x202   : > { %7140 = vmatpush2.bf16.msra.mxu0 %v9648_v31  ;;  %v920_v12 = vld [vmem:[%s11101_s12 + $0xe28] sm:$0xff]  ;;  %v9600_v31 = vcombine.low %v788_v8, %v792_v9 }
 0x203   : > { %7141 = vmatprep.subr.bf16.mxu0 %v9641_v20  ;;  %v9729_v17 = vcombine.high %v916_v11, %v920_v12  ;;  %v1036_v18 = vld [vmem:[%s11101_s12 + $0x11c8] sm:$0xff] }
 0x204   : > { %7183 = vmatpush2.bf16.msra.mxu1 %v9776_v32  ;;  %v1040_v24 = vld [vmem:[%s11101_s12 + $0x11e8] sm:$0xff]  ;;  %v9728_v32 = vcombine.low %v916_v11, %v920_v12 }
 0x205   : > { %7184 = vmatprep.subr.bf16.mxu1 %v9769_v22  ;;  %v1164_v28 = vld [vmem:[%s11101_s12 + $0x15c8] sm:$0xff]  ;;  %v9849_v20 = vcombine.high %v1036_v18, %v1040_v24 }
 0x206   : > { %7142 = vmatpush2.bf16.msra.mxu0 %v9640_v61  ;;  %v1168_v19 = vld [vmem:[%s11101_s12 + $0x15e8] sm:$0xff]  ;;  %v9848_v61 = vcombine.low %v1036_v18, %v1040_v24 }
 0x207   : > { %7143 = vmatprep.subr.bf16.mxu0 %v9633_v53  ;;  %v9977_v22 = vcombine.high %v1164_v28, %v1168_v19  ;;  %v1028_v57 = vld [vmem:[%s11101_s12 + $0x1188] sm:$0xff] }
 0x208   : > { %7185 = vmatpush2.bf16.msra.mxu1 %v9768_v62  ;;  %v1032_v49 = vld [vmem:[%s11101_s12 + $0x11a8] sm:$0xff]  ;;  %v9976_v62 = vcombine.low %v1164_v28, %v1168_v19 }
 0x209   : > { %7186 = vmatprep.subr.bf16.mxu1 %v9761_v54  ;;  %v1156_v50 = vld [vmem:[%s11101_s12 + $0x1588] sm:$0xff]  ;;  %v9841_v53 = vcombine.high %v1028_v57, %v1032_v49 }
 0x20a   : > { %7144 = vmatpush2.bf16.msra.mxu0 %v9632_v42  ;;  %v1160_v33 = vld [vmem:[%s11101_s12 + $0x15a8] sm:$0xff]  ;;  %v9840_v42 = vcombine.low %v1028_v57, %v1032_v49 }
 0x20b   : > { %7145 = vmatprep.subr.bf16.mxu0 %v9625_v44  ;;  %v9969_v54 = vcombine.high %v1156_v50, %v1160_v33  ;;  %v1020_v38 = vld [vmem:[%s11101_s12 + $0x1148] sm:$0xff] }
 0x20c   : > { %7187 = vmatpush2.bf16.msra.mxu1 %v9760_v43  ;;  %v1024_v39 = vld [vmem:[%s11101_s12 + $0x1168] sm:$0xff]  ;;  %v9968_v43 = vcombine.low %v1156_v50, %v1160_v33 }
 0x20d   : > { %7188 = vmatprep.subr.bf16.mxu1 %v9753_v45  ;;  %v1148_v40 = vld [vmem:[%s11101_s12 + $0x1548] sm:$0xff]  ;;  %v9833_v44 = vcombine.high %v1020_v38, %v1024_v39 }
 0x20e   : > { %7146 = vmatpush2.bf16.msra.mxu0 %v9624_v26  ;;  %v1152_v41 = vld [vmem:[%s11101_s12 + $0x1568] sm:$0xff]  ;;  %v9832_v26 = vcombine.low %v1020_v38, %v1024_v39  ;;  %v11683_v38 = vpop.f32.mrf.mxu1 }
 0x20f   : > { %7147 = vmatprep.subr.bf16.mxu0 %v9617_v58  ;;  %v9961_v45 = vcombine.high %v1148_v40, %v1152_v41  ;;  %v1012_v46 = vld [vmem:[%s11101_s12 + $0x1108] sm:$0xff] }
 0x210   : > { %7189 = vmatpush2.bf16.msra.mxu1 %v9752_v55  ;;  %v1016_v48 = vld [vmem:[%s11101_s12 + $0x1128] sm:$0xff]  ;;  %v9960_v55 = vcombine.low %v1148_v40, %v1152_v41 }
 0x211   : > { %7190 = vmatprep.subr.bf16.mxu1 %v9745_v59  ;;  %v1140_v52 = vld [vmem:[%s11101_s12 + $0x1508] sm:$0xff]  ;;  %v9825_v58 = vcombine.high %v1012_v46, %v1016_v48 }
 0x212   : > { %7148 = vmatpush2.bf16.msra.mxu0 %v9616_v4  ;;  %v1144_v25 = vld [vmem:[%s11101_s12 + $0x1528] sm:$0xff]  ;;  %v9824_v4 = vcombine.low %v1012_v46, %v1016_v48 }
 0x213   : > { %7149 = vmatprep.subr.bf16.mxu0 %v9609_v6  ;;  %v9953_v59 = vcombine.high %v1140_v52, %v1144_v25  ;;  %v1004_v29 = vld [vmem:[%s11101_s12 + $0x10c8] sm:$0xff] }
 0x214   : > { %7191 = vmatpush2.bf16.msra.mxu1 %v9744_v5  ;;  %v1008_v30 = vld [vmem:[%s11101_s12 + $0x10e8] sm:$0xff]  ;;  %v9952_v5 = vcombine.low %v1140_v52, %v1144_v25  ;;  %v11691_v52 = vpop.f32.mrf.mxu1 }
 0x215   : > { %7192 = vmatprep.subr.bf16.mxu1 %v9737_v7  ;;  %v1132_v2 = vld [vmem:[%s11101_s12 + $0x14c8] sm:$0xff]  ;;  %v9817_v6 = vcombine.high %v1004_v29, %v1008_v30 }
 0x216   : > { %7150 = vmatpush2.bf16.msra.mxu0 %v9608_v14  ;;  %v1136_v3 = vld [vmem:[%s11101_s12 + $0x14e8] sm:$0xff]  ;;  %v9816_v14 = vcombine.low %v1004_v29, %v1008_v30 }
 0x217   : > { %7151 = vmatprep.subr.bf16.mxu0 %v9601_v16  ;;  %v9945_v7 = vcombine.high %v1132_v2, %v1136_v3  ;;  %v996_v8 = vld [vmem:[%s11101_s12 + $0x1088] sm:$0xff] }
 0x218   : > { %7193 = vmatpush2.bf16.msra.mxu1 %v9736_v15  ;;  %v1000_v9 = vld [vmem:[%s11101_s12 + $0x10a8] sm:$0xff]  ;;  %v9944_v15 = vcombine.low %v1132_v2, %v1136_v3 }
 0x219   : > { %7194 = vmatprep.subr.bf16.mxu1 %v9729_v17  ;;  %v1124_v11 = vld [vmem:[%s11101_s12 + $0x1488] sm:$0xff]  ;;  %v9809_v16 = vcombine.high %v996_v8, %v1000_v9 }
 0x21a   : > { %7152 = vmatpush2.bf16.msra.mxu0 %v9600_v31  ;;  %v1128_v12 = vld [vmem:[%s11101_s12 + $0x14a8] sm:$0xff]  ;;  %v9808_v31 = vcombine.low %v996_v8, %v1000_v9 }
 0x21b   : > { %7207 = vmatprep.subr.bf16.mxu0 %v9849_v20  ;;  %v9937_v17 = vcombine.high %v1124_v11, %v1128_v12  ;;  %v988_v18 = vld [vmem:[%s11101_s12 + $0x1048] sm:$0xff] }
 0x21c   : > { %7195 = vmatpush2.bf16.msra.mxu1 %v9728_v32  ;;  %v992_v24 = vld [vmem:[%s11101_s12 + $0x1068] sm:$0xff]  ;;  %v9936_v32 = vcombine.low %v1124_v11, %v1128_v12 }
 0x21d   : > { %7250 = vmatprep.subr.bf16.mxu1 %v9977_v22  ;;  %7154 = vmatmul.mubr.bf16.vlgmr.msra.gmra.mxu0 %v11318_v47  ;;  %v1116_v28 = vld [vmem:[%s11101_s12 + $0x1448] sm:$0xff]  ;;  %v9801_v20 = vcombine.high %v988_v18, %v992_v24 }
 0x21e   : > { %7208 = vmatpush1.bf16.msra.mxu0 %v9848_v61  ;;  %7239 = vmatprep.mubr.bf16.mxu0 %v11341_v63  ;;  %v1120_v19 = vld [vmem:[%s11101_s12 + $0x1468] sm:$0xff]  ;;  %v9800_v61 = vcombine.low %v988_v18, %v992_v24 }
 0x21f   : > { %7197 = vmatmul.mubr.bf16.vlgmr.msra.gmra.mxu1 %v11329_v51  ;;  %7209 = vmatprep.subr.bf16.mxu0 %v9841_v53  ;;  %v9929_v22 = vcombine.high %v1116_v28, %v1120_v19  ;;  %v980_v57 = vld [vmem:[%s11101_s12 + $0x1008] sm:$0xff]  ;;  %v9928_v53 = vcombine.low %v1116_v28, %v1120_v19 }
 0x220   : > { %7251 = vmatpush1.bf16.msra.mxu1 %v9976_v62  ;;  %7282 = vmatprep.mubr.bf16.mxu1 %v11348_v0  ;;  %v984_v49 = vld [vmem:[%s11101_s12 + $0x1028] sm:$0xff]  ;;  %v11681_v62 = vpop.f32.mrf.mxu0 }
 0x221   : > { %7252 = vmatprep.subr.bf16.mxu1 %v9969_v54  ;;  %v1108_v50 = vld [vmem:[%s11101_s12 + $0x1408] sm:$0xff]  ;;  %v9793_v54 = vcombine.high %v980_v57, %v984_v49 }
 0x222   : > { %7210 = vmatpush1.bf16.msra.mxu0 %v9840_v42  ;;  %v1112_v33 = vld [vmem:[%s11101_s12 + $0x1428] sm:$0xff] }
 0x223   : > { %7211 = vmatprep.subr.bf16.mxu0 %v9833_v44  ;;  %v9921_v39 = vcombine.high %v1108_v50, %v1112_v33  ;;  %v1100_v40 = vld [vmem:[%s11101_s12 + $0x13c8] sm:$0xff]  ;;  %v9792_v44 = vcombine.low %v980_v57, %v984_v49  ;;  %v9920_v46 = vcombine.low %v1108_v50, %v1112_v33 }
 0x224   : > { %7253 = vmatpush1.bf16.msra.mxu1 %v9968_v43  ;;  %v1104_v41 = vld [vmem:[%s11101_s12 + $0x13e8] sm:$0xff] }
 0x225   : > { %7254 = vmatprep.subr.bf16.mxu1 %v9961_v45  ;;  %v1228_v42 = vld [vmem:[%s11101_s12 + $0x17c8] sm:$0xff]  ;;  %v11689_v45 = vpop.f32.mrf.mxu0  ;;  %v9913_v48 = vcombine.high %v1100_v40, %v1104_v41  ;;  %v9912_v29 = vcombine.low %v1100_v40, %v1104_v41 }
 0x226   : > { %7212 = vmatpush1.bf16.msra.mxu0 %v9832_v26  ;;  %v1232_v43 = vld [vmem:[%s11101_s12 + $0x17e8] sm:$0xff] }
 0x227   : > { %7213 = vmatprep.subr.bf16.mxu0 %v9825_v58  ;;  %v10041_v25 = vcombine.high %v1228_v42, %v1232_v43  ;;  %v1092_v26 = vld [vmem:[%s11101_s12 + $0x1388] sm:$0xff]  ;;  %v11697_v30 = vpop.f32.mrf.mxu0  ;;  %v10040_v2 = vcombine.low %v1228_v42, %v1232_v43 }
 0x228   : > { %7255 = vmatpush1.bf16.msra.mxu1 %v9960_v55  ;;  %v1096_v55 = vld [vmem:[%s11101_s12 + $0x13a8] sm:$0xff] }
 0x229   : > { %7256 = vmatprep.subr.bf16.mxu1 %v9953_v59  ;;  %v1220_v58 = vld [vmem:[%s11101_s12 + $0x1788] sm:$0xff]  ;;  %v9905_v3 = vcombine.high %v1092_v26, %v1096_v55  ;;  %v9904_v11 = vcombine.low %v1092_v26, %v1096_v55  ;;  %v11705_v12 = vpop.f32.mrf.mxu0 }
 0x22a   : > { %7214 = vmatpush1.bf16.msra.mxu0 %v9824_v4  ;;  %v1224_v59 = vld [vmem:[%s11101_s12 + $0x17a8] sm:$0xff]  ;;  %v11699_v4 = vpop.f32.mrf.mxu1 }
 0x22b   : > { %7215 = vmatprep.subr.bf16.mxu0 %v9817_v6  ;;  %v1084_v6 = vld [vmem:[%s11101_s12 + $0x1348] sm:$0xff]  ;;  %v6811_v28 = vpop.f32.mrf.mxu0 }
 0x22c   : > { %7257 = vmatpush1.bf16.msra.mxu1 %v9952_v5  ;;  %v10033_v5 = vcombine.high %v1220_v58, %v1224_v59  ;;  %v1212_v8 = vld [vmem:[%s11101_s12 + $0x1748] sm:$0xff] }
 0x22d   : > { %7258 = vmatprep.subr.bf16.mxu1 %v9945_v7  ;;  %v1088_v7 = vld [vmem:[%s11101_s12 + $0x1368] sm:$0xff] }
 0x22e   : > { %7216 = vmatpush1.bf16.msra.mxu0 %v9816_v14  ;;  %v1216_v9 = vld [vmem:[%s11101_s12 + $0x1768] sm:$0xff]  ;;  %v10032_v14 = vcombine.low %v1220_v58, %v1224_v59 }
 0x22f   : > { %7217 = vmatprep.subr.bf16.mxu0 %v9809_v16  ;;  %v11707_v16 = vpop.f32.mrf.mxu1  ;;  %v1076_v18 = vld [vmem:[%s11101_s12 + $0x1308] sm:$0xff] }
 0x230   : > { %7259 = vmatpush1.bf16.msra.mxu1 %v9944_v15  ;;  %v9897_v15 = vcombine.high %v1084_v6, %v1088_v7  ;;  %v1080_v24 = vld [vmem:[%s11101_s12 + $0x1328] sm:$0xff] }
 0x231   : > { %7260 = vmatprep.subr.bf16.mxu1 %v9937_v17  ;;  %v10025_v17 = vcombine.high %v1212_v8, %v1216_v9  ;;  %v1204_v19 = vld [vmem:[%s11101_s12 + $0x1708] sm:$0xff]  ;;  %v9889_v57 = vcombine.high %v1076_v18, %v1080_v24  ;;  %v9888_v40 = vcombine.low %v1076_v18, %v1080_v24  ;;  %v6769_v18 = vadd.f32 %v11683_v38, %v11681_v62 }
 0x232   : > { %7218 = vmatpush1.bf16.msra.mxu0 %v9808_v31  ;;  %v1208_v31 = vld [vmem:[%s11101_s12 + $0x1728] sm:$0xff] }
 0x233   : > { %7219 = vmatprep.subr.bf16.mxu0 %v9801_v20  ;;  %v9896_v20 = vcombine.low %v1084_v6, %v1088_v7  ;;  %v10017_v49 = vcombine.high %v1204_v19, %v1208_v31  ;;  %v1068_v50 = vld [vmem:[%s11101_s12 + $0x12c8] sm:$0xff]  ;;  %v10016_v41 = vcombine.low %v1204_v19, %v1208_v31 }
 0x234   : > { %7261 = vmatpush1.bf16.msra.mxu1 %v9936_v32  ;;  %v11713_v32 = vpop.f32.mrf.mxu1  ;;  %v1072_v33 = vld [vmem:[%s11101_s12 + $0x12e8] sm:$0xff] }
 0x235   : > { %7262 = vmatprep.subr.bf16.mxu1 %v9929_v22  ;;  %v10024_v22 = vcombine.low %v1212_v8, %v1216_v9  ;;  %v9881_v42 = vcombine.high %v1068_v50, %v1072_v33  ;;  %v1192_v26 = vld [vmem:[%s11101_s12 + $0x16a8] sm:$0xff]  ;;  %v9880_v58 = vcombine.low %v1068_v50, %v1072_v33  ;;  %v6812_v50 = vadd.f32 %v6811_v28, %v6769_v18 }
 0x236   : > { %7220 = vmatpush1.bf16.msra.mxu0 %v9800_v61  ;;  %v6813_v61 = vpop.f32.mrf.mxu0  ;;  %v1180_v7 = vld [vmem:[%s11101_s12 + $0x1648] sm:$0xff]  ;;  %v6775_v28 = vadd.f32 %v11707_v16, %v11705_v12 }
 0x237   : > { %7221 = vmatprep.subr.bf16.mxu0 %v9793_v54  ;;  %v1200_v54 = vld [vmem:[%s11101_s12 + $0x16e8] sm:$0xff] }
 0x238   : > { %7263 = vmatpush1.bf16.msra.mxu1 %v9928_v53  ;;  %v1196_v53 = vld [vmem:[%s11101_s12 + $0x16c8] sm:$0xff] }
 0x239   : > { %7264 = vmatprep.subr.bf16.mxu1 %v9921_v39  ;;  %v11719_v39 = vpop.f32.mrf.mxu1  ;;  %v10009_v43 = vcombine.high %v1196_v53, %v1200_v54  ;;  %v10008_v59 = vcombine.low %v1196_v53, %v1200_v54  ;;  %v1184_v8 = vld [vmem:[%s11101_s12 + $0x1668] sm:$0xff]  ;;  %v6773_v54 = vadd.f32 %v11699_v4, %v11697_v30 }
 0x23a   : > { %7222 = vmatpush1.bf16.msra.mxu0 %v9792_v44  ;;  %v1060_v44 = vld [vmem:[%s11101_s12 + $0x1288] sm:$0xff]  ;;  %v9993_v19 = vcombine.high %v1180_v7, %v1184_v8  ;;  %v9992_v62 = vcombine.low %v1180_v7, %v1184_v8 }
 0x23b   : > { %7223 = vmatprep.subr.bf16.mxu0 %v9913_v48  ;;  %v6815_v48 = vpop.f32.mrf.mxu0  ;;  %v11725_v55 = vpop.f32.mrf.mxu1  ;;  %v1044_v31 = vld [vmem:[%s11101_s12 + $0x1208] sm:$0xff] }
 0x23c   : > { %7265 = vmatpush1.bf16.msra.mxu1 %v9920_v46  ;;  %v1064_v46 = vld [vmem:[%s11101_s12 + $0x12a8] sm:$0xff] }
 0x23d   : > { %7266 = vmatprep.subr.bf16.mxu1 %v10041_v25  ;;  %v1188_v25 = vld [vmem:[%s11101_s12 + $0x1688] sm:$0xff]  ;;  %v6817_v6 = vpop.f32.mrf.mxu0  ;;  %v11731_v9 = vpop.f32.mrf.mxu1 }
 0x23e   : > { %7224 = vmatpush2.bf16.msra.mxu0 %v9912_v29  ;;  %v9873_v29 = vcombine.high %v1060_v44, %v1064_v46  ;;  %v1284_v16 = vld [vmem:[%s11101_s12 + $0x1988] sm:$0xff] }
 0x23f   : > { %7225 = vmatprep.subr.bf16.mxu0 %v9905_v3  ;;  %v1052_v3 = vld [vmem:[%s11101_s12 + $0x1248] sm:$0xff]  ;;  %v6940_v24 = vpop.f32.mrf.mxu1 }
 0x240   : > { %7267 = vmatpush2.bf16.msra.mxu1 %v10040_v2  ;;  %v10001_v2 = vcombine.high %v1188_v25, %v1192_v26 }
 0x241   : > { %7268 = vmatprep.subr.bf16.mxu1 %v10033_v5  ;;  %v1056_v5 = vld [vmem:[%s11101_s12 + $0x1268] sm:$0xff] }
 0x242   : > { %7226 = vmatpush2.bf16.msra.mxu0 %v9904_v11  ;;  %v9872_v11 = vcombine.low %v1060_v44, %v1064_v46  ;;  %v9864_v33 = vcombine.low %v1052_v3, %v1056_v5  ;;  %v1296_v44 = vld [vmem:[%s11101_s12 + $0x19e8] sm:$0xff]  ;;  %v6855_v46 = vadd.f32 %v11713_v32, %v6812_v50 }
 0x243   : > { %7227 = vmatprep.subr.bf16.mxu0 %v9897_v15  ;;  %v10000_v15 = vcombine.low %v1188_v25, %v1192_v26  ;;  %v6816_v25 = vadd.f32 %v6815_v48, %v6773_v54  ;;  %v1288_v32 = vld [vmem:[%s11101_s12 + $0x19a8] sm:$0xff] }
 0x244   : > { %7269 = vmatpush2.bf16.msra.mxu1 %v10032_v14  ;;  %v6897_v14 = vpop.f32.mrf.mxu0  ;;  %v1412_v48 = vld [vmem:[%s11101_s12 + $0x1d88] sm:$0xff] }
 0x245   : > { %7270 = vmatprep.subr.bf16.mxu1 %v10025_v17  ;;  %v9865_v17 = vcombine.high %v1052_v3, %v1056_v5  ;;  %v1416_v3 = vld [vmem:[%s11101_s12 + $0x1da8] sm:$0xff]  ;;  %v6859_v5 = vadd.f32 %v11725_v55, %v6816_v25 }
 0x246   : > { %7228 = vmatpush2.bf16.msra.mxu0 %v9896_v20  ;;  %v1048_v20 = vld [vmem:[%s11101_s12 + $0x1228] sm:$0xff]  ;;  %v6899_v53 = vpop.f32.mrf.mxu0  ;;  %v10225_v55 = vcombine.high %v1412_v48, %v1416_v3 }
 0x247   : > { %7229 = vmatprep.subr.bf16.mxu0 %v9889_v57  ;;  %v1176_v57 = vld [vmem:[%s11101_s12 + $0x1628] sm:$0xff]  ;;  %v9857_v38 = vcombine.high %v1044_v31, %v1048_v20  ;;  %v9856_v30 = vcombine.low %v1044_v31, %v1048_v20 }
 0x248   : > { %7271 = vmatpush2.bf16.msra.mxu1 %v10024_v22  ;;  %v1172_v22 = vld [vmem:[%s11101_s12 + $0x1608] sm:$0xff]  ;;  %v6901_v4 = vpop.f32.mrf.mxu0 }
 0x249   : > { %7272 = vmatprep.subr.bf16.mxu1 %v10017_v49  ;;  %v6771_v49 = vadd.f32 %v11691_v52, %v11689_v45  ;;  %v1420_v45 = vld [vmem:[%s11101_s12 + $0x1dc8] sm:$0xff]  ;;  %v6902_v18 = vadd.f32 %v6901_v4, %v6859_v5 }
 0x24a   : > { %7230 = vmatpush2.bf16.msra.mxu0 %v9888_v40  ;;  %v1424_v52 = vld [vmem:[%s11101_s12 + $0x1de8] sm:$0xff] }
 0x24b   : > { %7231 = vmatprep.subr.bf16.mxu0 %v9881_v42  ;;  %v6814_v40 = vadd.f32 %v6813_v61, %v6771_v49  ;;  %v9985_v42 = vcombine.high %v1172_v22, %v1176_v57  ;;  %v9984_v61 = vcombine.low %v1172_v22, %v1176_v57  ;;  %v10233_v12 = vcombine.high %v1420_v45, %v1424_v52  ;;  %v1280_v31 = vld [vmem:[%s11101_s12 + $0x1968] sm:$0xff] }
 0x24c   : > { %7273 = vmatpush2.bf16.msra.mxu1 %v10016_v41  ;;  %v6942_v41 = vpop.f32.mrf.mxu1  ;;  %v1404_v20 = vld [vmem:[%s11101_s12 + $0x1d48] sm:$0xff]  ;;  %v10096_v49 = vcombine.low %v1284_v16, %v1288_v32 }
 0x24d   : > { %7274 = vmatprep.subr.bf16.mxu1 %v10009_v43  ;;  %v1292_v43 = vld [vmem:[%s11101_s12 + $0x19c8] sm:$0xff] }
 0x24e   : > { %7232 = vmatpush2.bf16.msra.mxu0 %v9880_v58  ;;  %v10105_v26 = vcombine.high %v1292_v43, %v1296_v44  ;;  %v6857_v58 = vadd.f32 %v11719_v39, %v6814_v40  ;;  %v10104_v8 = vcombine.low %v1292_v43, %v1296_v44  ;;  %v10232_v39 = vcombine.low %v1420_v45, %v1424_v52  ;;  %v1408_v22 = vld [vmem:[%s11101_s12 + $0x1d68] sm:$0xff] }
 0x24f   : > { %7233 = vmatprep.subr.bf16.mxu0 %v9873_v29  ;;  %v6898_v29 = vadd.f32 %v6897_v14, %v6855_v46  ;;  %v11757_v14 = vld [vmem:[%s11101_s12 + $0x1948] sm:$0xff]  ;;  %v10217_v40 = vcombine.high %v1404_v20, %v1408_v22 }
 0x250   : > { %7275 = vmatpush2.bf16.msra.mxu1 %v10008_v59  ;;  %v6818_v59 = vadd.f32 %v6817_v6, %v6775_v28  ;;  %v6900_v7 = vadd.f32 %v6899_v53, %v6857_v58  ;;  %v10097_v6 = vcombine.high %v1284_v16, %v1288_v32  ;;  %v10089_v54 = vcombine.high %v11757_v14, %v1280_v31  ;;  %v1268_v45 = vld [vmem:[%s11101_s12 + $0x1908] sm:$0xff]  ;;  %v452_v28 = vld [vmem:[#allocation2] sm:$0xff] }
 0x251   : > { %7276 = vmatprep.subr.bf16.mxu1 %v10001_v2  ;;  %v6944_v2 = vpop.f32.mrf.mxu1  ;;  %v1272_v52 = vld [vmem:[%s11101_s12 + $0x1928] sm:$0xff]  ;;  %v10088_v25 = vcombine.low %v11757_v14, %v1280_v31  ;;  %v10216_v16 = vcombine.low %v1404_v20, %v1408_v22 }
 0x252   : > { %7234 = vmatpush2.bf16.msra.mxu0 %v9872_v11  ;;  %v6903_v11 = vpop.f32.mrf.mxu0  ;;  %v6943_v50 = vadd.f32 %v6942_v41, %v6900_v7  ;;  %v1400_v4 = vld [vmem:[%s11101_s12 + $0x1d28] sm:$0xff]  ;;  %v10081_v32 = vcombine.high %v1268_v45, %v1272_v52 }
 0x253   : > { %7235 = vmatprep.subr.bf16.mxu0 %v9865_v17  ;;  %v6941_v17 = vadd.f32 %v6940_v24, %v6898_v29  ;;  %v1388_v14 = vld [vmem:[%s11101_s12 + $0x1cc8] sm:$0xff] }
 0x254   : > { %7277 = vmatpush2.bf16.msra.mxu1 %v10000_v15  ;;  %v6861_v15 = vadd.f32 %v11731_v9, %v6818_v59  ;;  %v451_v9 = vld [vmem:[#allocation2 + $0x30] sm:$0xff] }
 0x255   : > { %7278 = vmatprep.subr.bf16.mxu1 %v9993_v19  ;;  %v6946_v19 = vpop.f32.mrf.mxu1 }
 0x256   : > { %7236 = vmatpush2.bf16.msra.mxu0 %v9864_v33  ;;  %v6904_v33 = vadd.f32 %v6903_v11, %v6861_v15  ;;  %v1264_v11 = vld [vmem:[%s11101_s12 + $0x18e8] sm:$0xff] }
 0x257   : > { %7237 = vmatprep.subr.bf16.mxu0 %v9857_v38  ;;  %v10224_v38 = vcombine.low %v1412_v48, %v1416_v3  ;;  %v1392_v15 = vld [vmem:[%s11101_s12 + $0x1ce8] sm:$0xff] }
 0x258   : > { %7279 = vmatpush2.bf16.msra.mxu1 %v9992_v62  ;;  %v10201_v22 = vcombine.high %v1388_v14, %v1392_v15 }
 0x259   : > { %7280 = vmatprep.subr.bf16.mxu1 %v9985_v42  ;;  %v6945_v42 = vadd.f32 %v6944_v2, %v6902_v18  ;;  %v459_v2 = vld [vmem:[#allocation2 + $0x40] sm:$0xff] }
 0x25a   : > { %7238 = vmatpush2.bf16.msra.mxu0 %v9856_v30  ;;  %v1396_v30 = vld [vmem:[%s11101_s12 + $0x1d08] sm:$0xff] }
 0x25b   : > { %7293 = vmatprep.subr.bf16.mxu0 %v10105_v26  ;;  %v10209_v7 = vcombine.high %v1396_v30, %v1400_v4 }
 0x25c   : > { %7281 = vmatpush2.bf16.msra.mxu1 %v9984_v61  ;;  %v6947_v61 = vadd.f32 %v6946_v19, %v6904_v33  ;;  %v10080_v19 = vcombine.low %v1268_v45, %v1272_v52  ;;  %v1384_v33 = vld [vmem:[%s11101_s12 + $0x1ca8] sm:$0xff] }
 0x25d   : > { %7336 = vmatprep.subr.bf16.mxu1 %v10233_v12  ;;  %v6983_v57 = vpop.f32.mrf.mxu0  ;;  %7240 = vmatmul.mubr.bf16.vlgmr.msra.gmra.mxu0 %v11414_v21  ;;  %v1236_v52 = vld [vmem:[%s11101_s12 + $0x1808] sm:$0xff] }
 0x25e   : > { %v6984_v53 = vadd.f32 %v6983_v57, %v6941_v17  ;;  %7294 = vmatpush1.bf16.msra.mxu0 %v10104_v8  ;;  %7325 = vmatprep.mubr.bf16.mxu0 %v11437_v36  ;;  %v1260_v8 = vld [vmem:[%s11101_s12 + $0x18c8] sm:$0xff] }
 0x25f   : > { %v7026_v62 = vpop.f32.mrf.mxu1  ;;  %7283 = vmatmul.mubr.bf16.vlgmr.msra.gmra.mxu1 %v11425_v56  ;;  %v6985_v24 = vpop.f32.mrf.mxu0  ;;  %7295 = vmatprep.subr.bf16.mxu0 %v10097_v6  ;;  %v10073_v31 = vcombine.high %v1260_v8, %v1264_v11  ;;  %v1252_v57 = vld [vmem:[%s11101_s12 + $0x1888] sm:$0xff] }
 0x260   : > { %7337 = vmatpush1.bf16.msra.mxu1 %v10232_v39  ;;  %v7027_v41 = vadd.f32 %v7026_v62, %v6984_v53  ;;  %v6986_v43 = vadd.f32 %v6985_v24, %v6943_v50  ;;  %7368 = vmatprep.mubr.bf16.mxu1 %v11444_v37  ;;  %v460_v39 = vld [vmem:[#allocation2 + $0x20] sm:$0xff]  ;;  %v1380_v50 = vld [vmem:[%s11101_s12 + $0x1c88] sm:$0xff]  ;;  %v10072_v53 = vcombine.low %v1260_v8, %v1264_v11 }
 0x261   : > { %v7028_v44 = vpop.f32.mrf.mxu1  ;;  %7338 = vmatprep.subr.bf16.mxu1 %v10225_v55  ;;  %v6987_v46 = vpop.f32.mrf.mxu0  ;;  %v10208_v55 = vcombine.low %v1396_v30, %v1400_v4  ;;  %v10200_v62 = vcombine.low %v1388_v14, %v1392_v15  ;;  %v10193_v24 = vcombine.high %v1380_v50, %v1384_v33  ;;  %v1480_v8 = vld [vmem:[%s11101_s12 + $0x1fa8] sm:$0xff] }
 0x262   : > { %v8067_v26 = vadd.f32 %v7027_v41, %v451_v9  ;;  %v7029_v58 = vadd.f32 %v7028_v44, %v6986_v43  ;;  %v6988_v59 = vadd.f32 %v6987_v46, %v6945_v42  ;;  %7296 = vmatpush1.bf16.msra.mxu0 %v10096_v49  ;;  %v1256_v49 = vld [vmem:[%s11101_s12 + $0x18a8] sm:$0xff]  ;;  %v10192_v43 = vcombine.low %v1380_v50, %v1384_v33 }
 0x263   : > { %v7030_v29 = vpop.f32.mrf.mxu1  ;;  %v6989_v12 = vpop.f32.mrf.mxu0  ;;  %7297 = vmatprep.subr.bf16.mxu0 %v10089_v54  ;;  %v10065_v9 = vcombine.high %v1252_v57, %v1256_v49  ;;  %v1248_v54 = vld [vmem:[%s11101_s12 + $0x1868] sm:$0xff]  ;;  %v10064_v41 = vcombine.low %v1252_v57, %v1256_v49 }
 0x264   : > { %7339 = vmatpush1.bf16.msra.mxu1 %v10224_v38  ;;  %8083 = vst [vmem:[#allocation2 + $0x30] sm:$0xff] %v8067_v26  ;;  %v8068_v48 = vadd.f32 %v7029_v58, %v452_v28  ;;  %v7031_v3 = vadd.f32 %v7030_v29, %v6988_v59  ;;  %v6990_v5 = vadd.f32 %v6989_v12, %v6947_v61  ;;  %v1244_v38 = vld [vmem:[%s11101_s12 + $0x1848] sm:$0xff] }
 0x265   : > { %7340 = vmatprep.subr.bf16.mxu1 %v10217_v40  ;;  %v7032_v6 = vpop.f32.mrf.mxu1  ;;  %v1372_v40 = vld [vmem:[%s11101_s12 + $0x1c48] sm:$0xff]  ;;  %v10057_v44 = vcombine.high %v1244_v38, %v1248_v54  ;;  %v10056_v30 = vcombine.low %v1244_v38, %v1248_v54 }
 0x266   : > { %8084 = vst [vmem:[#allocation2] sm:$0xff] %v8068_v48  ;;  %v8075_v17 = vadd.f32 %v7031_v3, %v459_v2  ;;  %v7033_v18 = vadd.f32 %v7032_v6, %v6990_v5  ;;  %7298 = vmatpush1.bf16.msra.mxu0 %v10088_v25  ;;  %v1376_v42 = vld [vmem:[%s11101_s12 + $0x1c68] sm:$0xff] }
 0x267   : > { %7299 = vmatprep.subr.bf16.mxu0 %v10081_v32  ;;  %v10185_v45 = vcombine.high %v1372_v40, %v1376_v42  ;;  %v1240_v28 = vld [vmem:[%s11101_s12 + $0x1828] sm:$0xff]  ;;  %v10184_v4 = vcombine.low %v1372_v40, %v1376_v42 }
 0x268   : > { %7341 = vmatpush1.bf16.msra.mxu1 %v10216_v16  ;;  %8091 = vst [vmem:[#allocation2 + $0x40] sm:$0xff] %v8075_v17  ;;  %v8076_v20 = vadd.f32 %v7033_v18, %v460_v39  ;;  %v1364_v46 = vld [vmem:[%s11101_s12 + $0x1c08] sm:$0xff]  ;;  %v10049_v61 = vcombine.high %v1236_v52, %v1240_v28  ;;  %v10048_v12 = vcombine.low %v1236_v52, %v1240_v28 }
 0x269   : > { %7342 = vmatprep.subr.bf16.mxu1 %v10209_v7  ;;  %v1368_v25 = vld [vmem:[%s11101_s12 + $0x1c28] sm:$0xff] }
 0x26a   : > { %8092 = vst [vmem:[#allocation2 + $0x20] sm:$0xff] %v8076_v20  ;;  %7300 = vmatpush1.bf16.msra.mxu0 %v10080_v19  ;;  %v10177_v26 = vcombine.high %v1364_v46, %v1368_v25  ;;  %v1356_v58 = vld [vmem:[%s11101_s12 + $0x1bc8] sm:$0xff]  ;;  %v10176_v16 = vcombine.low %v1364_v46, %v1368_v25 }
 0x26b   : > { %7301 = vmatprep.subr.bf16.mxu0 %v10073_v31  ;;  %v1360_v59 = vld [vmem:[%s11101_s12 + $0x1be8] sm:$0xff] }
 0x26c   : > { %7343 = vmatpush1.bf16.msra.mxu1 %v10208_v55  ;;  %v1484_v29 = vld [vmem:[%s11101_s12 + $0x1fc8] sm:$0xff]  ;;  %v10169_v32 = vcombine.high %v1356_v58, %v1360_v59  ;;  %v10168_v11 = vcombine.low %v1356_v58, %v1360_v59 }
 0x26d   : > { %7344 = vmatprep.subr.bf16.mxu1 %v10201_v22  ;;  %v1488_v2 = vld [vmem:[%s11101_s12 + $0x1fe8] sm:$0xff] }
 0x26e   : > { %7302 = vmatpush1.bf16.msra.mxu0 %v10072_v53  ;;  %v10297_v48 = vcombine.high %v1484_v29, %v1488_v2  ;;  %v1348_v3 = vld [vmem:[%s11101_s12 + $0x1b88] sm:$0xff]  ;;  %v10296_v39 = vcombine.low %v1484_v29, %v1488_v2 }
 0x26f   : > { %7303 = vmatprep.subr.bf16.mxu0 %v10065_v9  ;;  %v1352_v5 = vld [vmem:[%s11101_s12 + $0x1ba8] sm:$0xff] }
 0x270   : > { %7345 = vmatpush1.bf16.msra.mxu1 %v10200_v62  ;;  %v1476_v7 = vld [vmem:[%s11101_s12 + $0x1f88] sm:$0xff]  ;;  %v10161_v6 = vcombine.high %v1348_v3, %v1352_v5  ;;  %v10160_v55 = vcombine.low %v1348_v3, %v1352_v5 }
 0x271   : > { %7346 = vmatprep.subr.bf16.mxu1 %v10193_v24  ;;  %v10289_v14 = vcombine.high %v1476_v7, %v1480_v8  ;;  %v1340_v15 = vld [vmem:[%s11101_s12 + $0x1b48] sm:$0xff]  ;;  %v10288_v31 = vcombine.low %v1476_v7, %v1480_v8 }
 0x272   : > { %7304 = vmatpush1.bf16.msra.mxu0 %v10064_v41  ;;  %v1344_v17 = vld [vmem:[%s11101_s12 + $0x1b68] sm:$0xff] }
 0x273   : > { %7305 = vmatprep.subr.bf16.mxu0 %v10057_v44  ;;  %v1468_v18 = vld [vmem:[%s11101_s12 + $0x1f48] sm:$0xff]  ;;  %v10153_v20 = vcombine.high %v1340_v15, %v1344_v17  ;;  %v10152_v53 = vcombine.low %v1340_v15, %v1344_v17  ;;  %v525_v15 = vld [vmem:[%s11101_s12 + $0x1d0] sm:$0xff] }
 0x274   : > { %7347 = vmatpush1.bf16.msra.mxu1 %v10192_v43  ;;  %v1472_v19 = vld [vmem:[%s11101_s12 + $0x1f68] sm:$0xff]  ;;  %v529_v17 = vld [vmem:[%s11101_s12 + $0x1f0] sm:$0xff] }
 0x275   : > { %7348 = vmatprep.subr.bf16.mxu1 %v10185_v45  ;;  %v10281_v22 = vcombine.high %v1468_v18, %v1472_v19  ;;  %v1332_v57 = vld [vmem:[%s11101_s12 + $0x1b08] sm:$0xff]  ;;  %v10280_v62 = vcombine.low %v1468_v18, %v1472_v19  ;;  %v653_v18 = vld [vmem:[%s11101_s12 + $0x5d0] sm:$0xff] }
 0x276   : > { %7306 = vmatpush1.bf16.msra.mxu0 %v10056_v30  ;;  %v1336_v49 = vld [vmem:[%s11101_s12 + $0x1b28] sm:$0xff]  ;;  %v657_v19 = vld [vmem:[%s11101_s12 + $0x5f0] sm:$0xff] }
 0x277   : > { %7307 = vmatprep.subr.bf16.mxu0 %v10049_v61  ;;  %v1460_v50 = vld [vmem:[%s11101_s12 + $0x1f08] sm:$0xff]  ;;  %v10145_v9 = vcombine.high %v1332_v57, %v1336_v49  ;;  %v10144_v41 = vcombine.low %v1332_v57, %v1336_v49  ;;  %v517_v57 = vld [vmem:[%s11101_s12 + $0x190] sm:$0xff] }
 0x278   : > { %7349 = vmatpush1.bf16.msra.mxu1 %v10184_v4  ;;  %v1464_v33 = vld [vmem:[%s11101_s12 + $0x1f28] sm:$0xff]  ;;  %v521_v49 = vld [vmem:[%s11101_s12 + $0x1b0] sm:$0xff] }
 0x279   : > { %7350 = vmatprep.subr.bf16.mxu1 %v10177_v26  ;;  %v10273_v24 = vcombine.high %v1460_v50, %v1464_v33  ;;  %v1324_v38 = vld [vmem:[%s11101_s12 + $0x1ac8] sm:$0xff]  ;;  %v10272_v43 = vcombine.low %v1460_v50, %v1464_v33  ;;  %v645_v50 = vld [vmem:[%s11101_s12 + $0x590] sm:$0xff] }
 0x27a   : > { %7308 = vmatpush1.bf16.msra.mxu0 %v10048_v12  ;;  %v1328_v54 = vld [vmem:[%s11101_s12 + $0x1ae8] sm:$0xff]  ;;  %v649_v33 = vld [vmem:[%s11101_s12 + $0x5b0] sm:$0xff] }
 0x27b   : > { %7309 = vmatprep.subr.bf16.mxu0 %v10169_v32  ;;  %v1452_v40 = vld [vmem:[%s11101_s12 + $0x1ec8] sm:$0xff]  ;;  %v10137_v44 = vcombine.high %v1324_v38, %v1328_v54  ;;  %v10136_v30 = vcombine.low %v1324_v38, %v1328_v54  ;;  %v509_v38 = vld [vmem:[%s11101_s12 + $0x150] sm:$0xff] }
 0x27c   : > { %7351 = vmatpush1.bf16.msra.mxu1 %v10176_v16  ;;  %v1456_v42 = vld [vmem:[%s11101_s12 + $0x1ee8] sm:$0xff]  ;;  %v513_v54 = vld [vmem:[%s11101_s12 + $0x170] sm:$0xff] }
 0x27d   : > { %7352 = vmatprep.subr.bf16.mxu1 %v10297_v48  ;;  %v10265_v45 = vcombine.high %v1452_v40, %v1456_v42  ;;  %v1316_v52 = vld [vmem:[%s11101_s12 + $0x1a88] sm:$0xff]  ;;  %v10264_v4 = vcombine.low %v1452_v40, %v1456_v42  ;;  %v637_v40 = vld [vmem:[%s11101_s12 + $0x550] sm:$0xff] }
 0x27e   : > { %7310 = vmatpush2.bf16.msra.mxu0 %v10168_v11  ;;  %v1320_v28 = vld [vmem:[%s11101_s12 + $0x1aa8] sm:$0xff]  ;;  %v641_v42 = vld [vmem:[%s11101_s12 + $0x570] sm:$0xff] }
 0x27f   : > { %7311 = vmatprep.subr.bf16.mxu0 %v10161_v6  ;;  %v1444_v46 = vld [vmem:[%s11101_s12 + $0x1e88] sm:$0xff]  ;;  %v10129_v61 = vcombine.high %v1316_v52, %v1320_v28  ;;  %v10128_v12 = vcombine.low %v1316_v52, %v1320_v28  ;;  %v501_v52 = vld [vmem:[%s11101_s12 + $0x110] sm:$0xff] }
 0x280   : > { %7353 = vmatpush2.bf16.msra.mxu1 %v10296_v39  ;;  %v1448_v25 = vld [vmem:[%s11101_s12 + $0x1ea8] sm:$0xff]  ;;  %v505_v28 = vld [vmem:[%s11101_s12 + $0x130] sm:$0xff] }
 0x281   : > { %7354 = vmatprep.subr.bf16.mxu1 %v10289_v14  ;;  %v10257_v26 = vcombine.high %v1444_v46, %v1448_v25  ;;  %v1308_v58 = vld [vmem:[%s11101_s12 + $0x1a48] sm:$0xff]  ;;  %v10256_v16 = vcombine.low %v1444_v46, %v1448_v25  ;;  %v629_v46 = vld [vmem:[%s11101_s12 + $0x510] sm:$0xff] }
 0x282   : > { %7312 = vmatpush2.bf16.msra.mxu0 %v10160_v55  ;;  %v1312_v59 = vld [vmem:[%s11101_s12 + $0x1a68] sm:$0xff]  ;;  %v633_v25 = vld [vmem:[%s11101_s12 + $0x530] sm:$0xff] }
 0x283   : > { %7313 = vmatprep.subr.bf16.mxu0 %v10153_v20  ;;  %v1436_v29 = vld [vmem:[%s11101_s12 + $0x1e48] sm:$0xff]  ;;  %v10121_v32 = vcombine.high %v1308_v58, %v1312_v59  ;;  %v10120_v11 = vcombine.low %v1308_v58, %v1312_v59  ;;  %v9339_v20 = vcombine.high %v525_v15, %v529_v17  ;;  %v493_v58 = vld [vmem:[%s11101_s12 + $0xd0] sm:$0xff] }
 0x284   : > { %7355 = vmatpush2.bf16.msra.mxu1 %v10288_v31  ;;  %v1440_v2 = vld [vmem:[%s11101_s12 + $0x1e68] sm:$0xff]  ;;  %v497_v59 = vld [vmem:[%s11101_s12 + $0xf0] sm:$0xff] }
 0x285   : > { %7356 = vmatprep.subr.bf16.mxu1 %v10281_v22  ;;  %v10249_v48 = vcombine.high %v1436_v29, %v1440_v2  ;;  %v1300_v3 = vld [vmem:[%s11101_s12 + $0x1a08] sm:$0xff]  ;;  %v10248_v39 = vcombine.low %v1436_v29, %v1440_v2  ;;  %v9467_v22 = vcombine.high %v653_v18, %v657_v19  ;;  %v621_v29 = vld [vmem:[%s11101_s12 + $0x4d0] sm:$0xff] }
 0x286   : > { %7314 = vmatpush2.bf16.msra.mxu0 %v10152_v53  ;;  %v1304_v5 = vld [vmem:[%s11101_s12 + $0x1a28] sm:$0xff]  ;;  %v9338_v53 = vcombine.low %v525_v15, %v529_v17  ;;  %v625_v2 = vld [vmem:[%s11101_s12 + $0x4f0] sm:$0xff] }
 0x287   : > { %7315 = vmatprep.subr.bf16.mxu0 %v10145_v9  ;;  %v1428_v7 = vld [vmem:[%s11101_s12 + $0x1e08] sm:$0xff]  ;;  %v10113_v6 = vcombine.high %v1300_v3, %v1304_v5  ;;  %v10112_v55 = vcombine.low %v1300_v3, %v1304_v5  ;;  %v9331_v9 = vcombine.high %v517_v57, %v521_v49  ;;  %v485_v3 = vld [vmem:[%s11101_s12 + $0x90] sm:$0xff] }
 0x288   : > { %7357 = vmatpush2.bf16.msra.mxu1 %v10280_v62  ;;  %v1432_v8 = vld [vmem:[%s11101_s12 + $0x1e28] sm:$0xff]  ;;  %v9466_v62 = vcombine.low %v653_v18, %v657_v19  ;;  %v489_v5 = vld [vmem:[%s11101_s12 + $0xb0] sm:$0xff] }
 0x289   : > { %7358 = vmatprep.subr.bf16.mxu1 %v10273_v24  ;;  %v10241_v14 = vcombine.high %v1428_v7, %v1432_v8  ;;  %v10240_v31 = vcombine.low %v1428_v7, %v1432_v8  ;;  %v9459_v24 = vcombine.high %v645_v50, %v649_v33  ;;  %v613_v7 = vld [vmem:[%s11101_s12 + $0x490] sm:$0xff] }
 0x28a   : > { %7316 = vmatpush2.bf16.msra.mxu0 %v10144_v41  ;;  %v9330_v41 = vcombine.low %v517_v57, %v521_v49  ;;  %v617_v8 = vld [vmem:[%s11101_s12 + $0x4b0] sm:$0xff] }
 0x28b   : > { %7317 = vmatprep.subr.bf16.mxu0 %v10137_v44  ;;  %v9323_v44 = vcombine.high %v509_v38, %v513_v54  ;;  %v477_v15 = vld [vmem:[%s11101_s12 + $0x50] sm:$0xff] }
 0x28c   : > { %7359 = vmatpush2.bf16.msra.mxu1 %v10272_v43  ;;  %v9458_v43 = vcombine.low %v645_v50, %v649_v33  ;;  %v481_v17 = vld [vmem:[%s11101_s12 + $0x70] sm:$0xff] }
 0x28d   : > { %7360 = vmatprep.subr.bf16.mxu1 %v10265_v45  ;;  %v9451_v45 = vcombine.high %v637_v40, %v641_v42  ;;  %v605_v18 = vld [vmem:[%s11101_s12 + $0x450] sm:$0xff] }
 0x28e   : > { %7318 = vmatpush2.bf16.msra.mxu0 %v10136_v30  ;;  %v9322_v30 = vcombine.low %v509_v38, %v513_v54  ;;  %v609_v19 = vld [vmem:[%s11101_s12 + $0x470] sm:$0xff] }
 0x28f   : > { %7319 = vmatprep.subr.bf16.mxu0 %v10129_v61  ;;  %v9315_v61 = vcombine.high %v501_v52, %v505_v28  ;;  %v469_v57 = vld [vmem:[%s11101_s12 + $0x10] sm:$0xff] }
 0x290   : > { %7361 = vmatpush2.bf16.msra.mxu1 %v10264_v4  ;;  %v9450_v4 = vcombine.low %v637_v40, %v641_v42  ;;  %v473_v49 = vld [vmem:[%s11101_s12 + $0x30] sm:$0xff] }
 0x291   : > { %7362 = vmatprep.subr.bf16.mxu1 %v10257_v26  ;;  %v9443_v26 = vcombine.high %v629_v46, %v633_v25  ;;  %v597_v50 = vld [vmem:[%s11101_s12 + $0x410] sm:$0xff] }
 0x292   : > { %7320 = vmatpush2.bf16.msra.mxu0 %v10128_v12  ;;  %v9314_v12 = vcombine.low %v501_v52, %v505_v28  ;;  %v601_v33 = vld [vmem:[%s11101_s12 + $0x430] sm:$0xff] }
 0x293   : > { %7321 = vmatprep.subr.bf16.mxu0 %v10121_v32  ;;  %v9307_v32 = vcombine.high %v493_v58, %v497_v59  ;;  %v589_v38 = vld [vmem:[%s11101_s12 + $0x3d0] sm:$0xff] }
 0x294   : > { %7363 = vmatpush2.bf16.msra.mxu1 %v10256_v16  ;;  %v9442_v16 = vcombine.low %v629_v46, %v633_v25  ;;  %v593_v54 = vld [vmem:[%s11101_s12 + $0x3f0] sm:$0xff] }
 0x295   : > { %7364 = vmatprep.subr.bf16.mxu1 %v10249_v48  ;;  %v9435_v48 = vcombine.high %v621_v29, %v625_v2  ;;  %v717_v40 = vld [vmem:[%s11101_s12 + $0x7d0] sm:$0xff] }
 0x296   : > { %7322 = vmatpush2.bf16.msra.mxu0 %v10120_v11  ;;  %v9306_v11 = vcombine.low %v493_v58, %v497_v59  ;;  %v721_v42 = vld [vmem:[%s11101_s12 + $0x7f0] sm:$0xff] }
 0x297   : > { %7323 = vmatprep.subr.bf16.mxu0 %v10113_v6  ;;  %v9299_v6 = vcombine.high %v485_v3, %v489_v5  ;;  %v581_v52 = vld [vmem:[%s11101_s12 + $0x390] sm:$0xff] }
 0x298   : > { %7365 = vmatpush2.bf16.msra.mxu1 %v10248_v39  ;;  %v9434_v39 = vcombine.low %v621_v29, %v625_v2  ;;  %v585_v28 = vld [vmem:[%s11101_s12 + $0x3b0] sm:$0xff] }
 0x299   : > { %7366 = vmatprep.subr.bf16.mxu1 %v10241_v14  ;;  %v9427_v14 = vcombine.high %v613_v7, %v617_v8  ;;  %v709_v46 = vld [vmem:[%s11101_s12 + $0x790] sm:$0xff] }
 0x29a   : > { %7324 = vmatpush2.bf16.msra.mxu0 %v10112_v55  ;;  %v9298_v55 = vcombine.low %v485_v3, %v489_v5  ;;  %v713_v25 = vld [vmem:[%s11101_s12 + $0x7b0] sm:$0xff] }
 0x29b   : > { %7379 = vmatprep.subr.bf16.mxu0 %v9339_v20  ;;  %v9291_v20 = vcombine.high %v477_v15, %v481_v17  ;;  %v573_v58 = vld [vmem:[%s11101_s12 + $0x350] sm:$0xff] }
 0x29c   : > { %7367 = vmatpush2.bf16.msra.mxu1 %v10240_v31  ;;  %v9426_v31 = vcombine.low %v613_v7, %v617_v8  ;;  %v577_v59 = vld [vmem:[%s11101_s12 + $0x370] sm:$0xff] }
 0x29d   : > { %7422 = vmatprep.subr.bf16.mxu1 %v9467_v22  ;;  %7326 = vmatmul.mubr.bf16.vlgmr.msra.gmra.mxu0 %v11509_v10  ;;  %v9419_v22 = vcombine.high %v605_v18, %v609_v19  ;;  %v701_v29 = vld [vmem:[%s11101_s12 + $0x750] sm:$0xff] }
 0x29e   : > { %7380 = vmatpush1.bf16.msra.mxu0 %v9338_v53  ;;  %7411 = vmatprep.mubr.bf16.mxu0 %v11165_v60  ;;  %v9290_v53 = vcombine.low %v477_v15, %v481_v17  ;;  %v705_v2 = vld [vmem:[%s11101_s12 + $0x770] sm:$0xff] }
 0x29f   : > { %7369 = vmatmul.mubr.bf16.vlgmr.msra.gmra.mxu1 %v11515_v13  ;;  %7381 = vmatprep.subr.bf16.mxu0 %v9331_v9  ;;  %v9283_v9 = vcombine.high %v469_v57, %v473_v49  ;;  %v565_v3 = vld [vmem:[%s11101_s12 + $0x310] sm:$0xff] }
 0x2a0   : > { %7423 = vmatpush1.bf16.msra.mxu1 %v9466_v62  ;;  %7454 = vmatprep.mubr.bf16.mxu1 %v11177_v1  ;;  %v9418_v62 = vcombine.low %v605_v18, %v609_v19  ;;  %v569_v5 = vld [vmem:[%s11101_s12 + $0x330] sm:$0xff] }
 0x2a1   : > { %7424 = vmatprep.subr.bf16.mxu1 %v9459_v24  ;;  %v9411_v24 = vcombine.high %v597_v50, %v601_v33  ;;  %v693_v7 = vld [vmem:[%s11101_s12 + $0x710] sm:$0xff] }
 0x2a2   : > { %7382 = vmatpush1.bf16.msra.mxu0 %v9330_v41  ;;  %v9282_v41 = vcombine.low %v469_v57, %v473_v49  ;;  %v697_v8 = vld [vmem:[%s11101_s12 + $0x730] sm:$0xff] }
 0x2a3   : > { %7383 = vmatprep.subr.bf16.mxu0 %v9323_v44  ;;  %v9403_v44 = vcombine.high %v589_v38, %v593_v54  ;;  %v557_v15 = vld [vmem:[%s11101_s12 + $0x2d0] sm:$0xff] }
 0x2a4   : > { %7425 = vmatpush1.bf16.msra.mxu1 %v9458_v43  ;;  %v9410_v43 = vcombine.low %v597_v50, %v601_v33  ;;  %v561_v17 = vld [vmem:[%s11101_s12 + $0x2f0] sm:$0xff] }
 0x2a5   : > { %7426 = vmatprep.subr.bf16.mxu1 %v9451_v45  ;;  %v9531_v45 = vcombine.high %v717_v40, %v721_v42  ;;  %v685_v18 = vld [vmem:[%s11101_s12 + $0x6d0] sm:$0xff] }
 0x2a6   : > { %7384 = vmatpush1.bf16.msra.mxu0 %v9322_v30  ;;  %v9402_v30 = vcombine.low %v589_v38, %v593_v54  ;;  %v689_v19 = vld [vmem:[%s11101_s12 + $0x6f0] sm:$0xff] }
 0x2a7   : > { %7385 = vmatprep.subr.bf16.mxu0 %v9315_v61  ;;  %v9395_v61 = vcombine.high %v581_v52, %v585_v28  ;;  %v549_v57 = vld [vmem:[%s11101_s12 + $0x290] sm:$0xff] }
 0x2a8   : > { %7427 = vmatpush1.bf16.msra.mxu1 %v9450_v4  ;;  %v9530_v4 = vcombine.low %v717_v40, %v721_v42  ;;  %v553_v49 = vld [vmem:[%s11101_s12 + $0x2b0] sm:$0xff] }
 0x2a9   : > { %7428 = vmatprep.subr.bf16.mxu1 %v9443_v26  ;;  %v9523_v26 = vcombine.high %v709_v46, %v713_v25  ;;  %v677_v50 = vld [vmem:[%s11101_s12 + $0x690] sm:$0xff] }
 0x2aa   : > { %7386 = vmatpush1.bf16.msra.mxu0 %v9314_v12  ;;  %v9394_v12 = vcombine.low %v581_v52, %v585_v28  ;;  %v681_v33 = vld [vmem:[%s11101_s12 + $0x6b0] sm:$0xff] }
 0x2ab   : > { %7387 = vmatprep.subr.bf16.mxu0 %v9307_v32  ;;  %v9387_v32 = vcombine.high %v573_v58, %v577_v59  ;;  %v541_v38 = vld [vmem:[%s11101_s12 + $0x250] sm:$0xff] }
 0x2ac   : > { %7429 = vmatpush1.bf16.msra.mxu1 %v9442_v16  ;;  %v9522_v16 = vcombine.low %v709_v46, %v713_v25  ;;  %v545_v54 = vld [vmem:[%s11101_s12 + $0x270] sm:$0xff] }
 0x2ad   : > { %7430 = vmatprep.subr.bf16.mxu1 %v9435_v48  ;;  %v9515_v48 = vcombine.high %v701_v29, %v705_v2  ;;  %v669_v40 = vld [vmem:[%s11101_s12 + $0x650] sm:$0xff] }
 0x2ae   : > { %7388 = vmatpush1.bf16.msra.mxu0 %v9306_v11  ;;  %v9386_v11 = vcombine.low %v573_v58, %v577_v59  ;;  %v673_v42 = vld [vmem:[%s11101_s12 + $0x670] sm:$0xff] }
 0x2af   : > { %7389 = vmatprep.subr.bf16.mxu0 %v9299_v6  ;;  %v9379_v6 = vcombine.high %v565_v3, %v569_v5  ;;  %v533_v52 = vld [vmem:[%s11101_s12 + $0x210] sm:$0xff] }
 0x2b0   : > { %7431 = vmatpush1.bf16.msra.mxu1 %v9434_v39  ;;  %v9514_v39 = vcombine.low %v701_v29, %v705_v2  ;;  %v537_v28 = vld [vmem:[%s11101_s12 + $0x230] sm:$0xff] }
 0x2b1   : > { %7432 = vmatprep.subr.bf16.mxu1 %v9427_v14  ;;  %v9507_v14 = vcombine.high %v693_v7, %v697_v8  ;;  %v661_v46 = vld [vmem:[%s11101_s12 + $0x610] sm:$0xff] }
 0x2b2   : > { %7390 = vmatpush1.bf16.msra.mxu0 %v9298_v55  ;;  %v9378_v55 = vcombine.low %v565_v3, %v569_v5  ;;  %v665_v25 = vld [vmem:[%s11101_s12 + $0x630] sm:$0xff] }
 0x2b3   : > { %7391 = vmatprep.subr.bf16.mxu0 %v9291_v20  ;;  %v9371_v20 = vcombine.high %v557_v15, %v561_v17  ;;  %v781_v58 = vld [vmem:[%s11101_s12 + $0x9d0] sm:$0xff] }
 0x2b4   : > { %7433 = vmatpush1.bf16.msra.mxu1 %v9426_v31  ;;  %v9506_v31 = vcombine.low %v693_v7, %v697_v8  ;;  %v785_v59 = vld [vmem:[%s11101_s12 + $0x9f0] sm:$0xff] }
 0x2b5   : > { %7434 = vmatprep.subr.bf16.mxu1 %v9419_v22  ;;  %v9499_v22 = vcombine.high %v685_v18, %v689_v19  ;;  %v909_v29 = vld [vmem:[%s11101_s12 + $0xdd0] sm:$0xff] }
 0x2b6   : > { %7392 = vmatpush1.bf16.msra.mxu0 %v9290_v53  ;;  %v9370_v53 = vcombine.low %v557_v15, %v561_v17  ;;  %v913_v2 = vld [vmem:[%s11101_s12 + $0xdf0] sm:$0xff] }
 0x2b7   : > { %7393 = vmatprep.subr.bf16.mxu0 %v9283_v9  ;;  %v9363_v9 = vcombine.high %v549_v57, %v553_v49  ;;  %v773_v3 = vld [vmem:[%s11101_s12 + $0x990] sm:$0xff] }
 0x2b8   : > { %7435 = vmatpush1.bf16.msra.mxu1 %v9418_v62  ;;  %v9498_v62 = vcombine.low %v685_v18, %v689_v19  ;;  %v777_v5 = vld [vmem:[%s11101_s12 + $0x9b0] sm:$0xff] }
 0x2b9   : > { %7436 = vmatprep.subr.bf16.mxu1 %v9411_v24  ;;  %v9491_v24 = vcombine.high %v677_v50, %v681_v33  ;;  %v901_v7 = vld [vmem:[%s11101_s12 + $0xd90] sm:$0xff] }
 0x2ba   : > { %7394 = vmatpush1.bf16.msra.mxu0 %v9282_v41  ;;  %v9362_v41 = vcombine.low %v549_v57, %v553_v49  ;;  %v905_v8 = vld [vmem:[%s11101_s12 + $0xdb0] sm:$0xff] }
 0x2bb   : > { %7395 = vmatprep.subr.bf16.mxu0 %v9403_v44  ;;  %v9355_v44 = vcombine.high %v541_v38, %v545_v54  ;;  %v765_v15 = vld [vmem:[%s11101_s12 + $0x950] sm:$0xff] }
 0x2bc   : > { %7437 = vmatpush1.bf16.msra.mxu1 %v9410_v43  ;;  %v9490_v43 = vcombine.low %v677_v50, %v681_v33  ;;  %v769_v17 = vld [vmem:[%s11101_s12 + $0x970] sm:$0xff] }
 0x2bd   : > { %7438 = vmatprep.subr.bf16.mxu1 %v9531_v45  ;;  %v9483_v45 = vcombine.high %v669_v40, %v673_v42  ;;  %v893_v18 = vld [vmem:[%s11101_s12 + $0xd50] sm:$0xff] }
 0x2be   : > { %7396 = vmatpush2.bf16.msra.mxu0 %v9402_v30  ;;  %v9354_v30 = vcombine.low %v541_v38, %v545_v54  ;;  %v897_v19 = vld [vmem:[%s11101_s12 + $0xd70] sm:$0xff] }
 0x2bf   : > { %7397 = vmatprep.subr.bf16.mxu0 %v9395_v61  ;;  %v9347_v61 = vcombine.high %v533_v52, %v537_v28  ;;  %v757_v57 = vld [vmem:[%s11101_s12 + $0x910] sm:$0xff] }
 0x2c0   : > { %7439 = vmatpush2.bf16.msra.mxu1 %v9530_v4  ;;  %v9482_v4 = vcombine.low %v669_v40, %v673_v42  ;;  %v761_v49 = vld [vmem:[%s11101_s12 + $0x930] sm:$0xff] }
 0x2c1   : > { %7440 = vmatprep.subr.bf16.mxu1 %v9523_v26  ;;  %v9475_v26 = vcombine.high %v661_v46, %v665_v25  ;;  %v885_v50 = vld [vmem:[%s11101_s12 + $0xd10] sm:$0xff] }
 0x2c2   : > { %7398 = vmatpush2.bf16.msra.mxu0 %v9394_v12  ;;  %v9346_v12 = vcombine.low %v533_v52, %v537_v28  ;;  %v889_v33 = vld [vmem:[%s11101_s12 + $0xd30] sm:$0xff] }
 0x2c3   : > { %7399 = vmatprep.subr.bf16.mxu0 %v9387_v32  ;;  %v9595_v32 = vcombine.high %v781_v58, %v785_v59  ;;  %v749_v38 = vld [vmem:[%s11101_s12 + $0x8d0] sm:$0xff] }
 0x2c4   : > { %7441 = vmatpush2.bf16.msra.mxu1 %v9522_v16  ;;  %v9474_v16 = vcombine.low %v661_v46, %v665_v25  ;;  %v753_v54 = vld [vmem:[%s11101_s12 + $0x8f0] sm:$0xff] }
 0x2c5   : > { %7442 = vmatprep.subr.bf16.mxu1 %v9515_v48  ;;  %v9723_v48 = vcombine.high %v909_v29, %v913_v2  ;;  %v877_v40 = vld [vmem:[%s11101_s12 + $0xcd0] sm:$0xff] }
 0x2c6   : > { %7400 = vmatpush2.bf16.msra.mxu0 %v9386_v11  ;;  %v9594_v11 = vcombine.low %v781_v58, %v785_v59  ;;  %v881_v42 = vld [vmem:[%s11101_s12 + $0xcf0] sm:$0xff] }
 0x2c7   : > { %7401 = vmatprep.subr.bf16.mxu0 %v9379_v6  ;;  %v9587_v6 = vcombine.high %v773_v3, %v777_v5  ;;  %v741_v52 = vld [vmem:[%s11101_s12 + $0x890] sm:$0xff] }
 0x2c8   : > { %7443 = vmatpush2.bf16.msra.mxu1 %v9514_v39  ;;  %v9722_v39 = vcombine.low %v909_v29, %v913_v2  ;;  %v745_v28 = vld [vmem:[%s11101_s12 + $0x8b0] sm:$0xff] }
 0x2c9   : > { %7444 = vmatprep.subr.bf16.mxu1 %v9507_v14  ;;  %v9715_v14 = vcombine.high %v901_v7, %v905_v8  ;;  %v869_v46 = vld [vmem:[%s11101_s12 + $0xc90] sm:$0xff] }
 0x2ca   : > { %7402 = vmatpush2.bf16.msra.mxu0 %v9378_v55  ;;  %v9586_v55 = vcombine.low %v773_v3, %v777_v5  ;;  %v873_v25 = vld [vmem:[%s11101_s12 + $0xcb0] sm:$0xff] }
 0x2cb   : > { %7403 = vmatprep.subr.bf16.mxu0 %v9371_v20  ;;  %v9579_v20 = vcombine.high %v765_v15, %v769_v17  ;;  %v733_v58 = vld [vmem:[%s11101_s12 + $0x850] sm:$0xff] }
 0x2cc   : > { %7445 = vmatpush2.bf16.msra.mxu1 %v9506_v31  ;;  %v9714_v31 = vcombine.low %v901_v7, %v905_v8  ;;  %v737_v59 = vld [vmem:[%s11101_s12 + $0x870] sm:$0xff] }
 0x2cd   : > { %7446 = vmatprep.subr.bf16.mxu1 %v9499_v22  ;;  %v9707_v22 = vcombine.high %v893_v18, %v897_v19  ;;  %v861_v29 = vld [vmem:[%s11101_s12 + $0xc50] sm:$0xff] }
 0x2ce   : > { %7404 = vmatpush2.bf16.msra.mxu0 %v9370_v53  ;;  %v9578_v53 = vcombine.low %v765_v15, %v769_v17  ;;  %v865_v2 = vld [vmem:[%s11101_s12 + $0xc70] sm:$0xff] }
 0x2cf   : > { %7405 = vmatprep.subr.bf16.mxu0 %v9363_v9  ;;  %v9571_v9 = vcombine.high %v757_v57, %v761_v49  ;;  %v725_v3 = vld [vmem:[%s11101_s12 + $0x810] sm:$0xff] }
 0x2d0   : > { %7447 = vmatpush2.bf16.msra.mxu1 %v9498_v62  ;;  %v9706_v62 = vcombine.low %v893_v18, %v897_v19  ;;  %v729_v5 = vld [vmem:[%s11101_s12 + $0x830] sm:$0xff] }
 0x2d1   : > { %7448 = vmatprep.subr.bf16.mxu1 %v9491_v24  ;;  %v9699_v24 = vcombine.high %v885_v50, %v889_v33  ;;  %v853_v7 = vld [vmem:[%s11101_s12 + $0xc10] sm:$0xff] }
 0x2d2   : > { %7406 = vmatpush2.bf16.msra.mxu0 %v9362_v41  ;;  %v9570_v41 = vcombine.low %v757_v57, %v761_v49  ;;  %v857_v8 = vld [vmem:[%s11101_s12 + $0xc30] sm:$0xff] }
 0x2d3   : > { %7407 = vmatprep.subr.bf16.mxu0 %v9355_v44  ;;  %v9563_v44 = vcombine.high %v749_v38, %v753_v54  ;;  %v845_v15 = vld [vmem:[%s11101_s12 + $0xbd0] sm:$0xff] }
 0x2d4   : > { %7449 = vmatpush2.bf16.msra.mxu1 %v9490_v43  ;;  %v9698_v43 = vcombine.low %v885_v50, %v889_v33  ;;  %v849_v17 = vld [vmem:[%s11101_s12 + $0xbf0] sm:$0xff] }
 0x2d5   : > { %7450 = vmatprep.subr.bf16.mxu1 %v9483_v45  ;;  %v9691_v45 = vcombine.high %v877_v40, %v881_v42  ;;  %v973_v18 = vld [vmem:[%s11101_s12 + $0xfd0] sm:$0xff] }
 0x2d6   : > { %7408 = vmatpush2.bf16.msra.mxu0 %v9354_v30  ;;  %v9562_v30 = vcombine.low %v749_v38, %v753_v54  ;;  %v977_v19 = vld [vmem:[%s11101_s12 + $0xff0] sm:$0xff] }
 0x2d7   : > { %7409 = vmatprep.subr.bf16.mxu0 %v9347_v61  ;;  %v9555_v61 = vcombine.high %v741_v52, %v745_v28  ;;  %v837_v57 = vld [vmem:[%s11101_s12 + $0xb90] sm:$0xff] }
 0x2d8   : > { %7451 = vmatpush2.bf16.msra.mxu1 %v9482_v4  ;;  %v9690_v4 = vcombine.low %v877_v40, %v881_v42  ;;  %v841_v49 = vld [vmem:[%s11101_s12 + $0xbb0] sm:$0xff] }
 0x2d9   : > { %7452 = vmatprep.subr.bf16.mxu1 %v9475_v26  ;;  %v9683_v26 = vcombine.high %v869_v46, %v873_v25  ;;  %v965_v50 = vld [vmem:[%s11101_s12 + $0xf90] sm:$0xff] }
 0x2da   : > { %7410 = vmatpush2.bf16.msra.mxu0 %v9346_v12  ;;  %v9554_v12 = vcombine.low %v741_v52, %v745_v28  ;;  %v969_v33 = vld [vmem:[%s11101_s12 + $0xfb0] sm:$0xff] }
 0x2db   : > { %7465 = vmatprep.subr.bf16.mxu0 %v9595_v32  ;;  %v9547_v32 = vcombine.high %v733_v58, %v737_v59  ;;  %v829_v38 = vld [vmem:[%s11101_s12 + $0xb50] sm:$0xff] }
 0x2dc   : > { %7453 = vmatpush2.bf16.msra.mxu1 %v9474_v16  ;;  %v9682_v16 = vcombine.low %v869_v46, %v873_v25  ;;  %v833_v54 = vld [vmem:[%s11101_s12 + $0xb70] sm:$0xff] }
 0x2dd   : > { %7508 = vmatprep.subr.bf16.mxu1 %v9723_v48  ;;  %7412 = vmatmul.mubr.bf16.vlgmr.msra.gmra.mxu0 %v11222_v23  ;;  %v9675_v48 = vcombine.high %v861_v29, %v865_v2  ;;  %v957_v40 = vld [vmem:[%s11101_s12 + $0xf50] sm:$0xff] }
 0x2de   : > { %7466 = vmatpush1.bf16.msra.mxu0 %v9594_v11  ;;  %7497 = vmatprep.mubr.bf16.mxu0 %v11245_v34  ;;  %v9546_v11 = vcombine.low %v733_v58, %v737_v59  ;;  %v961_v42 = vld [vmem:[%s11101_s12 + $0xf70] sm:$0xff] }
 0x2df   : > { %7455 = vmatmul.mubr.bf16.vlgmr.msra.gmra.mxu1 %v11233_v27  ;;  %7467 = vmatprep.subr.bf16.mxu0 %v9587_v6  ;;  %v9539_v6 = vcombine.high %v725_v3, %v729_v5  ;;  %v821_v52 = vld [vmem:[%s11101_s12 + $0xb10] sm:$0xff] }
 0x2e0   : > { %7509 = vmatpush1.bf16.msra.mxu1 %v9722_v39  ;;  %7540 = vmatprep.mubr.bf16.mxu1 %v11252_v35  ;;  %v9674_v39 = vcombine.low %v861_v29, %v865_v2  ;;  %v825_v28 = vld [vmem:[%s11101_s12 + $0xb30] sm:$0xff] }
 0x2e1   : > { %7510 = vmatprep.subr.bf16.mxu1 %v9715_v14  ;;  %v9667_v14 = vcombine.high %v853_v7, %v857_v8  ;;  %v949_v46 = vld [vmem:[%s11101_s12 + $0xf10] sm:$0xff] }
 0x2e2   : > { %7468 = vmatpush1.bf16.msra.mxu0 %v9586_v55  ;;  %v9538_v55 = vcombine.low %v725_v3, %v729_v5  ;;  %v953_v25 = vld [vmem:[%s11101_s12 + $0xf30] sm:$0xff] }
 0x2e3   : > { %7469 = vmatprep.subr.bf16.mxu0 %v9579_v20  ;;  %v9659_v20 = vcombine.high %v845_v15, %v849_v17  ;;  %v813_v58 = vld [vmem:[%s11101_s12 + $0xad0] sm:$0xff] }
 0x2e4   : > { %7511 = vmatpush1.bf16.msra.mxu1 %v9714_v31  ;;  %v9666_v31 = vcombine.low %v853_v7, %v857_v8  ;;  %v817_v59 = vld [vmem:[%s11101_s12 + $0xaf0] sm:$0xff] }
 0x2e5   : > { %7512 = vmatprep.subr.bf16.mxu1 %v9707_v22  ;;  %v9787_v22 = vcombine.high %v973_v18, %v977_v19  ;;  %v941_v29 = vld [vmem:[%s11101_s12 + $0xed0] sm:$0xff] }
 0x2e6   : > { %7470 = vmatpush1.bf16.msra.mxu0 %v9578_v53  ;;  %v9658_v53 = vcombine.low %v845_v15, %v849_v17  ;;  %v945_v2 = vld [vmem:[%s11101_s12 + $0xef0] sm:$0xff] }
 0x2e7   : > { %7471 = vmatprep.subr.bf16.mxu0 %v9571_v9  ;;  %v9651_v9 = vcombine.high %v837_v57, %v841_v49  ;;  %v805_v3 = vld [vmem:[%s11101_s12 + $0xa90] sm:$0xff] }
 0x2e8   : > { %7513 = vmatpush1.bf16.msra.mxu1 %v9706_v62  ;;  %v9786_v62 = vcombine.low %v973_v18, %v977_v19  ;;  %v809_v5 = vld [vmem:[%s11101_s12 + $0xab0] sm:$0xff] }
 0x2e9   : > { %7514 = vmatprep.subr.bf16.mxu1 %v9699_v24  ;;  %v9779_v24 = vcombine.high %v965_v50, %v969_v33  ;;  %v933_v7 = vld [vmem:[%s11101_s12 + $0xe90] sm:$0xff] }
 0x2ea   : > { %7472 = vmatpush1.bf16.msra.mxu0 %v9570_v41  ;;  %v9650_v41 = vcombine.low %v837_v57, %v841_v49  ;;  %v937_v8 = vld [vmem:[%s11101_s12 + $0xeb0] sm:$0xff] }
 0x2eb   : > { %7473 = vmatprep.subr.bf16.mxu0 %v9563_v44  ;;  %v9643_v44 = vcombine.high %v829_v38, %v833_v54  ;;  %v797_v15 = vld [vmem:[%s11101_s12 + $0xa50] sm:$0xff] }
 0x2ec   : > { %7515 = vmatpush1.bf16.msra.mxu1 %v9698_v43  ;;  %v9778_v43 = vcombine.low %v965_v50, %v969_v33  ;;  %v801_v17 = vld [vmem:[%s11101_s12 + $0xa70] sm:$0xff] }
 0x2ed   : > { %7516 = vmatprep.subr.bf16.mxu1 %v9691_v45  ;;  %v9771_v45 = vcombine.high %v957_v40, %v961_v42  ;;  %v925_v18 = vld [vmem:[%s11101_s12 + $0xe50] sm:$0xff] }
 0x2ee   : > { %7474 = vmatpush1.bf16.msra.mxu0 %v9562_v30  ;;  %v9642_v30 = vcombine.low %v829_v38, %v833_v54  ;;  %v929_v19 = vld [vmem:[%s11101_s12 + $0xe70] sm:$0xff] }
 0x2ef   : > { %7475 = vmatprep.subr.bf16.mxu0 %v9555_v61  ;;  %v9635_v61 = vcombine.high %v821_v52, %v825_v28  ;;  %v789_v57 = vld [vmem:[%s11101_s12 + $0xa10] sm:$0xff] }
 0x2f0   : > { %7517 = vmatpush1.bf16.msra.mxu1 %v9690_v4  ;;  %v9770_v4 = vcombine.low %v957_v40, %v961_v42  ;;  %v793_v49 = vld [vmem:[%s11101_s12 + $0xa30] sm:$0xff] }
 0x2f1   : > { %7518 = vmatprep.subr.bf16.mxu1 %v9683_v26  ;;  %v9763_v26 = vcombine.high %v949_v46, %v953_v25  ;;  %v917_v50 = vld [vmem:[%s11101_s12 + $0xe10] sm:$0xff] }
 0x2f2   : > { %7476 = vmatpush1.bf16.msra.mxu0 %v9554_v12  ;;  %v9634_v12 = vcombine.low %v821_v52, %v825_v28  ;;  %v921_v33 = vld [vmem:[%s11101_s12 + $0xe30] sm:$0xff] }
 0x2f3   : > { %7477 = vmatprep.subr.bf16.mxu0 %v9547_v32  ;;  %v9627_v32 = vcombine.high %v813_v58, %v817_v59  ;;  %v1037_v38 = vld [vmem:[%s11101_s12 + $0x11d0] sm:$0xff] }
 0x2f4   : > { %7519 = vmatpush1.bf16.msra.mxu1 %v9682_v16  ;;  %v9762_v16 = vcombine.low %v949_v46, %v953_v25  ;;  %v1041_v54 = vld [vmem:[%s11101_s12 + $0x11f0] sm:$0xff] }
 0x2f5   : > { %7520 = vmatprep.subr.bf16.mxu1 %v9675_v48  ;;  %v9755_v48 = vcombine.high %v941_v29, %v945_v2  ;;  %v1165_v40 = vld [vmem:[%s11101_s12 + $0x15d0] sm:$0xff] }
 0x2f6   : > { %7478 = vmatpush1.bf16.msra.mxu0 %v9546_v11  ;;  %v9626_v11 = vcombine.low %v813_v58, %v817_v59  ;;  %v1169_v42 = vld [vmem:[%s11101_s12 + $0x15f0] sm:$0xff] }
 0x2f7   : > { %7479 = vmatprep.subr.bf16.mxu0 %v9539_v6  ;;  %v9619_v6 = vcombine.high %v805_v3, %v809_v5  ;;  %v1029_v52 = vld [vmem:[%s11101_s12 + $0x1190] sm:$0xff] }
 0x2f8   : > { %7521 = vmatpush1.bf16.msra.mxu1 %v9674_v39  ;;  %v9754_v39 = vcombine.low %v941_v29, %v945_v2  ;;  %v1033_v28 = vld [vmem:[%s11101_s12 + $0x11b0] sm:$0xff] }
 0x2f9   : > { %7522 = vmatprep.subr.bf16.mxu1 %v9667_v14  ;;  %v9747_v14 = vcombine.high %v933_v7, %v937_v8  ;;  %v1157_v46 = vld [vmem:[%s11101_s12 + $0x1590] sm:$0xff] }
 0x2fa   : > { %7480 = vmatpush1.bf16.msra.mxu0 %v9538_v55  ;;  %v9618_v55 = vcombine.low %v805_v3, %v809_v5  ;;  %v1161_v25 = vld [vmem:[%s11101_s12 + $0x15b0] sm:$0xff] }
 0x2fb   : > { %7481 = vmatprep.subr.bf16.mxu0 %v9659_v20  ;;  %v9611_v20 = vcombine.high %v797_v15, %v801_v17  ;;  %v1021_v58 = vld [vmem:[%s11101_s12 + $0x1150] sm:$0xff] }
 0x2fc   : > { %7523 = vmatpush1.bf16.msra.mxu1 %v9666_v31  ;;  %v9746_v31 = vcombine.low %v933_v7, %v937_v8  ;;  %v1025_v59 = vld [vmem:[%s11101_s12 + $0x1170] sm:$0xff] }
 0x2fd   : > { %7524 = vmatprep.subr.bf16.mxu1 %v9787_v22  ;;  %v9739_v22 = vcombine.high %v925_v18, %v929_v19  ;;  %v1149_v29 = vld [vmem:[%s11101_s12 + $0x1550] sm:$0xff] }
 0x2fe   : > { %7482 = vmatpush2.bf16.msra.mxu0 %v9658_v53  ;;  %v9610_v53 = vcombine.low %v797_v15, %v801_v17  ;;  %v1153_v2 = vld [vmem:[%s11101_s12 + $0x1570] sm:$0xff] }
 0x2ff   : > { %7483 = vmatprep.subr.bf16.mxu0 %v9651_v9  ;;  %v9603_v9 = vcombine.high %v789_v57, %v793_v49  ;;  %v1013_v3 = vld [vmem:[%s11101_s12 + $0x1110] sm:$0xff] }
 0x300   : > { %7525 = vmatpush2.bf16.msra.mxu1 %v9786_v62  ;;  %v9738_v62 = vcombine.low %v925_v18, %v929_v19  ;;  %v1017_v5 = vld [vmem:[%s11101_s12 + $0x1130] sm:$0xff] }
 0x301   : > { %7526 = vmatprep.subr.bf16.mxu1 %v9779_v24  ;;  %v9731_v24 = vcombine.high %v917_v50, %v921_v33  ;;  %v1141_v7 = vld [vmem:[%s11101_s12 + $0x1510] sm:$0xff] }
 0x302   : > { %7484 = vmatpush2.bf16.msra.mxu0 %v9650_v41  ;;  %v9602_v41 = vcombine.low %v789_v57, %v793_v49  ;;  %v1145_v8 = vld [vmem:[%s11101_s12 + $0x1530] sm:$0xff] }
 0x303   : > { %7485 = vmatprep.subr.bf16.mxu0 %v9643_v44  ;;  %v9851_v44 = vcombine.high %v1037_v38, %v1041_v54  ;;  %v1005_v15 = vld [vmem:[%s11101_s12 + $0x10d0] sm:$0xff] }
 0x304   : > { %7527 = vmatpush2.bf16.msra.mxu1 %v9778_v43  ;;  %v9730_v43 = vcombine.low %v917_v50, %v921_v33  ;;  %v1009_v17 = vld [vmem:[%s11101_s12 + $0x10f0] sm:$0xff] }
 0x305   : > { %7528 = vmatprep.subr.bf16.mxu1 %v9771_v45  ;;  %v9979_v45 = vcombine.high %v1165_v40, %v1169_v42  ;;  %v1133_v18 = vld [vmem:[%s11101_s12 + $0x14d0] sm:$0xff] }
 0x306   : > { %7486 = vmatpush2.bf16.msra.mxu0 %v9642_v30  ;;  %v9850_v30 = vcombine.low %v1037_v38, %v1041_v54  ;;  %v1137_v19 = vld [vmem:[%s11101_s12 + $0x14f0] sm:$0xff] }
 0x307   : > { %7487 = vmatprep.subr.bf16.mxu0 %v9635_v61  ;;  %v9843_v61 = vcombine.high %v1029_v52, %v1033_v28  ;;  %v997_v57 = vld [vmem:[%s11101_s12 + $0x1090] sm:$0xff] }
 0x308   : > { %7529 = vmatpush2.bf16.msra.mxu1 %v9770_v4  ;;  %v9978_v4 = vcombine.low %v1165_v40, %v1169_v42  ;;  %v1001_v49 = vld [vmem:[%s11101_s12 + $0x10b0] sm:$0xff] }
 0x309   : > { %7530 = vmatprep.subr.bf16.mxu1 %v9763_v26  ;;  %v9971_v26 = vcombine.high %v1157_v46, %v1161_v25  ;;  %v1125_v50 = vld [vmem:[%s11101_s12 + $0x1490] sm:$0xff] }
 0x30a   : > { %7488 = vmatpush2.bf16.msra.mxu0 %v9634_v12  ;;  %v9842_v12 = vcombine.low %v1029_v52, %v1033_v28  ;;  %v1129_v33 = vld [vmem:[%s11101_s12 + $0x14b0] sm:$0xff] }
 0x30b   : > { %7489 = vmatprep.subr.bf16.mxu0 %v9627_v32  ;;  %v9835_v32 = vcombine.high %v1021_v58, %v1025_v59  ;;  %v989_v38 = vld [vmem:[%s11101_s12 + $0x1050] sm:$0xff] }
 0x30c   : > { %7531 = vmatpush2.bf16.msra.mxu1 %v9762_v16  ;;  %v9970_v16 = vcombine.low %v1157_v46, %v1161_v25  ;;  %v993_v54 = vld [vmem:[%s11101_s12 + $0x1070] sm:$0xff] }
 0x30d   : > { %7532 = vmatprep.subr.bf16.mxu1 %v9755_v48  ;;  %v9963_v48 = vcombine.high %v1149_v29, %v1153_v2  ;;  %v1117_v40 = vld [vmem:[%s11101_s12 + $0x1450] sm:$0xff] }
 0x30e   : > { %7490 = vmatpush2.bf16.msra.mxu0 %v9626_v11  ;;  %v9834_v11 = vcombine.low %v1021_v58, %v1025_v59  ;;  %v1121_v42 = vld [vmem:[%s11101_s12 + $0x1470] sm:$0xff]  ;;  %v11995_v58 = vpop.f32.mrf.mxu1 }
 0x30f   : > { %7491 = vmatprep.subr.bf16.mxu0 %v9619_v6  ;;  %v9827_v6 = vcombine.high %v1013_v3, %v1017_v5  ;;  %v981_v52 = vld [vmem:[%s11101_s12 + $0x1010] sm:$0xff] }
 0x310   : > { %7533 = vmatpush2.bf16.msra.mxu1 %v9754_v39  ;;  %v9962_v39 = vcombine.low %v1149_v29, %v1153_v2  ;;  %v985_v28 = vld [vmem:[%s11101_s12 + $0x1030] sm:$0xff] }
 0x311   : > { %7534 = vmatprep.subr.bf16.mxu1 %v9747_v14  ;;  %v9955_v14 = vcombine.high %v1141_v7, %v1145_v8  ;;  %v1109_v46 = vld [vmem:[%s11101_s12 + $0x1410] sm:$0xff] }
 0x312   : > { %7492 = vmatpush2.bf16.msra.mxu0 %v9618_v55  ;;  %v9826_v55 = vcombine.low %v1013_v3, %v1017_v5  ;;  %v1113_v25 = vld [vmem:[%s11101_s12 + $0x1430] sm:$0xff] }
 0x313   : > { %7493 = vmatprep.subr.bf16.mxu0 %v9611_v20  ;;  %v9819_v20 = vcombine.high %v1005_v15, %v1009_v17  ;;  %v9923_v59 = vcombine.high %v1109_v46, %v1113_v25  ;;  %v1101_v29 = vld [vmem:[%s11101_s12 + $0x13d0] sm:$0xff]  ;;  %v9922_v3 = vcombine.low %v1109_v46, %v1113_v25 }
 0x314   : > { %7535 = vmatpush2.bf16.msra.mxu1 %v9746_v31  ;;  %v9954_v31 = vcombine.low %v1141_v7, %v1145_v8  ;;  %v1105_v2 = vld [vmem:[%s11101_s12 + $0x13f0] sm:$0xff]  ;;  %v12003_v7 = vpop.f32.mrf.mxu1 }
 0x315   : > { %7536 = vmatprep.subr.bf16.mxu1 %v9739_v22  ;;  %v9947_v22 = vcombine.high %v1133_v18, %v1137_v19  ;;  %v9915_v5 = vcombine.high %v1101_v29, %v1105_v2  ;;  %v1069_v46 = vld [vmem:[%s11101_s12 + $0x12d0] sm:$0xff] }
 0x316   : > { %7494 = vmatpush2.bf16.msra.mxu0 %v9610_v53  ;;  %v9818_v53 = vcombine.low %v1005_v15, %v1009_v17  ;;  %v9914_v15 = vcombine.low %v1101_v29, %v1105_v2  ;;  %v1073_v25 = vld [vmem:[%s11101_s12 + $0x12f0] sm:$0xff] }
 0x317   : > { %7495 = vmatprep.subr.bf16.mxu0 %v9603_v9  ;;  %v9811_v9 = vcombine.high %v997_v57, %v1001_v49 }
 0x318   : > { %7537 = vmatpush2.bf16.msra.mxu1 %v9738_v62  ;;  %v9946_v62 = vcombine.low %v1133_v18, %v1137_v19 }
 0x319   : > { %7538 = vmatprep.subr.bf16.mxu1 %v9731_v24  ;;  %v9939_v24 = vcombine.high %v1125_v50, %v1129_v33 }
 0x31a   : > { %7496 = vmatpush2.bf16.msra.mxu0 %v9602_v41  ;;  %v9810_v41 = vcombine.low %v997_v57, %v1001_v49  ;;  %v1213_v57 = vld [vmem:[%s11101_s12 + $0x1750] sm:$0xff] }
 0x31b   : > { %7551 = vmatprep.subr.bf16.mxu0 %v9851_v44  ;;  %v9803_v44 = vcombine.high %v989_v38, %v993_v54  ;;  %v1217_v49 = vld [vmem:[%s11101_s12 + $0x1770] sm:$0xff] }
 0x31c   : > { %7539 = vmatpush2.bf16.msra.mxu1 %v9730_v43  ;;  %v9938_v43 = vcombine.low %v1125_v50, %v1129_v33 }
 0x31d   : > { %7594 = vmatprep.subr.bf16.mxu1 %v9979_v45  ;;  %7498 = vmatmul.mubr.bf16.vlgmr.msra.gmra.mxu0 %v11318_v47  ;;  %v9931_v45 = vcombine.high %v1117_v40, %v1121_v42 }
 0x31e   : > { %7552 = vmatpush1.bf16.msra.mxu0 %v9850_v30  ;;  %7583 = vmatprep.mubr.bf16.mxu0 %v11341_v63  ;;  %v9802_v30 = vcombine.low %v989_v38, %v993_v54  ;;  %v1077_v38 = vld [vmem:[%s11101_s12 + $0x1310] sm:$0xff] }
 0x31f   : > { %7541 = vmatmul.mubr.bf16.vlgmr.msra.gmra.mxu1 %v11329_v51  ;;  %7553 = vmatprep.subr.bf16.mxu0 %v9843_v61  ;;  %v9930_v61 = vcombine.low %v1117_v40, %v1121_v42  ;;  %v1081_v54 = vld [vmem:[%s11101_s12 + $0x1330] sm:$0xff] }
 0x320   : > { %7595 = vmatpush1.bf16.msra.mxu1 %v9978_v4  ;;  %7626 = vmatprep.mubr.bf16.mxu1 %v11348_v0  ;;  %v11993_v4 = vpop.f32.mrf.mxu0  ;;  %v1205_v42 = vld [vmem:[%s11101_s12 + $0x1710] sm:$0xff]  ;;  %v9890_v29 = vcombine.low %v1077_v38, %v1081_v54 }
 0x321   : > { %7596 = vmatprep.subr.bf16.mxu1 %v9971_v26  ;;  %v9795_v26 = vcombine.high %v981_v52, %v985_v28 }
 0x322   : > { %7554 = vmatpush1.bf16.msra.mxu0 %v9842_v12  ;;  %v1229_v12 = vld [vmem:[%s11101_s12 + $0x17d0] sm:$0xff] }
 0x323   : > { %7555 = vmatprep.subr.bf16.mxu0 %v9835_v32  ;;  %v9794_v32 = vcombine.low %v981_v52, %v985_v28  ;;  %v9891_v52 = vcombine.high %v1077_v38, %v1081_v54  ;;  %v7113_v38 = vadd.f32 %v11995_v58, %v11993_v4 }
 0x324   : > { %7597 = vmatpush1.bf16.msra.mxu1 %v9970_v16  ;;  %v1233_v16 = vld [vmem:[%s11101_s12 + $0x17f0] sm:$0xff] }
 0x325   : > { %7598 = vmatprep.subr.bf16.mxu1 %v9963_v48  ;;  %v12001_v48 = vpop.f32.mrf.mxu0  ;;  %v10043_v8 = vcombine.high %v1229_v12, %v1233_v16  ;;  %v10042_v18 = vcombine.low %v1229_v12, %v1233_v16  ;;  %v9883_v12 = vcombine.high %v1069_v46, %v1073_v25 }
 0x326   : > { %7556 = vmatpush1.bf16.msra.mxu0 %v9834_v11  ;;  %v1093_v11 = vld [vmem:[%s11101_s12 + $0x1390] sm:$0xff] }
 0x327   : > { %7557 = vmatprep.subr.bf16.mxu0 %v9827_v6  ;;  %v1221_v6 = vld [vmem:[%s11101_s12 + $0x1790] sm:$0xff]  ;;  %v12009_v17 = vpop.f32.mrf.mxu0 }
 0x328   : > { %7599 = vmatpush1.bf16.msra.mxu1 %v9962_v39  ;;  %v1097_v39 = vld [vmem:[%s11101_s12 + $0x13b0] sm:$0xff] }
 0x329   : > { %7600 = vmatprep.subr.bf16.mxu1 %v9955_v14  ;;  %v1225_v14 = vld [vmem:[%s11101_s12 + $0x17b0] sm:$0xff]  ;;  %v9907_v19 = vcombine.high %v1093_v11, %v1097_v39  ;;  %v9906_v50 = vcombine.low %v1093_v11, %v1097_v39  ;;  %v12017_v33 = vpop.f32.mrf.mxu0 }
 0x32a   : > { %7558 = vmatpush1.bf16.msra.mxu0 %v9826_v55  ;;  %v12011_v55 = vpop.f32.mrf.mxu1  ;;  %v1193_v11 = vld [vmem:[%s11101_s12 + $0x16b0] sm:$0xff] }
 0x32b   : > { %7559 = vmatprep.subr.bf16.mxu0 %v9819_v20  ;;  %v1085_v20 = vld [vmem:[%s11101_s12 + $0x1350] sm:$0xff]  ;;  %v7155_v40 = vpop.f32.mrf.mxu0 }
 0x32c   : > { %7601 = vmatpush1.bf16.msra.mxu1 %v9954_v31  ;;  %v10035_v31 = vcombine.high %v1221_v6, %v1225_v14 }
 0x32d   : > { %7602 = vmatprep.subr.bf16.mxu1 %v9947_v22  ;;  %v1089_v22 = vld [vmem:[%s11101_s12 + $0x1370] sm:$0xff] }
 0x32e   : > { %7560 = vmatpush1.bf16.msra.mxu0 %v9818_v53  ;;  %v10034_v53 = vcombine.low %v1221_v6, %v1225_v14  ;;  %v9882_v6 = vcombine.low %v1069_v46, %v1073_v25  ;;  %v7156_v46 = vadd.f32 %v7155_v40, %v7113_v38 }
 0x32f   : > { %7561 = vmatprep.subr.bf16.mxu0 %v9811_v9  ;;  %v12019_v9 = vpop.f32.mrf.mxu1 }
 0x330   : > { %7603 = vmatpush1.bf16.msra.mxu1 %v9946_v62  ;;  %v9899_v62 = vcombine.high %v1085_v20, %v1089_v22  ;;  %v7119_v40 = vadd.f32 %v12019_v9, %v12017_v33  ;;  %v1285_v9 = vld [vmem:[%s11101_s12 + $0x1990] sm:$0xff] }
 0x331   : > { %7604 = vmatprep.subr.bf16.mxu1 %v9939_v24  ;;  %v10027_v24 = vcombine.high %v1213_v57, %v1217_v49 }
 0x332   : > { %7562 = vmatpush1.bf16.msra.mxu0 %v9810_v41  ;;  %v1209_v41 = vld [vmem:[%s11101_s12 + $0x1730] sm:$0xff] }
 0x333   : > { %7563 = vmatprep.subr.bf16.mxu0 %v9803_v44  ;;  %v9898_v44 = vcombine.low %v1085_v20, %v1089_v22  ;;  %v10019_v28 = vcombine.high %v1205_v42, %v1209_v41  ;;  %v10018_v2 = vcombine.low %v1205_v42, %v1209_v41  ;;  %v1181_v22 = vld [vmem:[%s11101_s12 + $0x1650] sm:$0xff] }
 0x334   : > { %7605 = vmatpush1.bf16.msra.mxu1 %v9938_v43  ;;  %v12025_v43 = vpop.f32.mrf.mxu1  ;;  %v1045_v41 = vld [vmem:[%s11101_s12 + $0x1210] sm:$0xff] }
 0x335   : > { %7606 = vmatprep.subr.bf16.mxu1 %v9931_v45  ;;  %v10026_v45 = vcombine.low %v1213_v57, %v1217_v49  ;;  %v1185_v57 = vld [vmem:[%s11101_s12 + $0x1670] sm:$0xff] }
 0x336   : > { %7564 = vmatpush1.bf16.msra.mxu0 %v9802_v30  ;;  %v7157_v30 = vpop.f32.mrf.mxu0  ;;  %v9995_v42 = vcombine.high %v1181_v22, %v1185_v57  ;;  %v9994_v4 = vcombine.low %v1181_v22, %v1185_v57 }
 0x337   : > { %7565 = vmatprep.subr.bf16.mxu0 %v9795_v26  ;;  %v1201_v26 = vld [vmem:[%s11101_s12 + $0x16f0] sm:$0xff] }
 0x338   : > { %7607 = vmatpush1.bf16.msra.mxu1 %v9930_v61  ;;  %v1197_v61 = vld [vmem:[%s11101_s12 + $0x16d0] sm:$0xff] }
 0x339   : > { %7608 = vmatprep.subr.bf16.mxu1 %v9923_v59  ;;  %v12031_v59 = vpop.f32.mrf.mxu1  ;;  %v10011_v16 = vcombine.high %v1197_v61, %v1201_v26  ;;  %v10010_v14 = vcombine.low %v1197_v61, %v1201_v26  ;;  %v7117_v26 = vadd.f32 %v12011_v55, %v12009_v17 }
 0x33a   : > { %7566 = vmatpush1.bf16.msra.mxu0 %v9794_v32  ;;  %v1061_v32 = vld [vmem:[%s11101_s12 + $0x1290] sm:$0xff] }
 0x33b   : > { %7567 = vmatprep.subr.bf16.mxu0 %v9915_v5  ;;  %v7159_v5 = vpop.f32.mrf.mxu0  ;;  %v12037_v39 = vpop.f32.mrf.mxu1 }
 0x33c   : > { %7609 = vmatpush1.bf16.msra.mxu1 %v9922_v3  ;;  %v1065_v3 = vld [vmem:[%s11101_s12 + $0x12b0] sm:$0xff] }
 0x33d   : > { %7610 = vmatprep.subr.bf16.mxu1 %v10043_v8  ;;  %v1189_v8 = vld [vmem:[%s11101_s12 + $0x1690] sm:$0xff]  ;;  %v7161_v20 = vpop.f32.mrf.mxu0  ;;  %v12043_v49 = vpop.f32.mrf.mxu1 }
 0x33e   : > { %7568 = vmatpush2.bf16.msra.mxu0 %v9914_v15  ;;  %v9875_v15 = vcombine.high %v1061_v32, %v1065_v3 }
 0x33f   : > { %7569 = vmatprep.subr.bf16.mxu0 %v9907_v19  ;;  %v1053_v19 = vld [vmem:[%s11101_s12 + $0x1250] sm:$0xff]  ;;  %v7284_v54 = vpop.f32.mrf.mxu1 }
 0x340   : > { %7611 = vmatpush2.bf16.msra.mxu1 %v10042_v18  ;;  %v10003_v18 = vcombine.high %v1189_v8, %v1193_v11 }
 0x341   : > { %7612 = vmatprep.subr.bf16.mxu1 %v10035_v31  ;;  %v1057_v31 = vld [vmem:[%s11101_s12 + $0x1270] sm:$0xff] }
 0x342   : > { %7570 = vmatpush2.bf16.msra.mxu0 %v9906_v50  ;;  %v9874_v50 = vcombine.low %v1061_v32, %v1065_v3  ;;  %v9866_v25 = vcombine.low %v1053_v19, %v1057_v31  ;;  %v1297_v32 = vld [vmem:[%s11101_s12 + $0x19f0] sm:$0xff]  ;;  %v7199_v3 = vadd.f32 %v12025_v43, %v7156_v46 }
 0x343   : > { %7571 = vmatprep.subr.bf16.mxu0 %v9899_v62  ;;  %v10002_v62 = vcombine.low %v1189_v8, %v1193_v11  ;;  %v7160_v8 = vadd.f32 %v7159_v5, %v7117_v26  ;;  %v1289_v43 = vld [vmem:[%s11101_s12 + $0x19b0] sm:$0xff] }
 0x344   : > { %7613 = vmatpush2.bf16.msra.mxu1 %v10034_v53  ;;  %v7241_v53 = vpop.f32.mrf.mxu0  ;;  %v1413_v5 = vld [vmem:[%s11101_s12 + $0x1d90] sm:$0xff] }
 0x345   : > { %7614 = vmatprep.subr.bf16.mxu1 %v10027_v24  ;;  %v9867_v24 = vcombine.high %v1053_v19, %v1057_v31  ;;  %v1417_v19 = vld [vmem:[%s11101_s12 + $0x1db0] sm:$0xff]  ;;  %v7203_v31 = vadd.f32 %v12037_v39, %v7160_v8 }
 0x346   : > { %7572 = vmatpush2.bf16.msra.mxu0 %v9898_v44  ;;  %v1049_v44 = vld [vmem:[%s11101_s12 + $0x1230] sm:$0xff]  ;;  %v7243_v61 = vpop.f32.mrf.mxu0  ;;  %v10227_v39 = vcombine.high %v1413_v5, %v1417_v19 }
 0x347   : > { %7573 = vmatprep.subr.bf16.mxu0 %v9891_v52  ;;  %v1177_v52 = vld [vmem:[%s11101_s12 + $0x1630] sm:$0xff]  ;;  %v9859_v58 = vcombine.high %v1045_v41, %v1049_v44  ;;  %v9858_v17 = vcombine.low %v1045_v41, %v1049_v44 }
 0x348   : > { %7615 = vmatpush2.bf16.msra.mxu1 %v10026_v45  ;;  %v1173_v45 = vld [vmem:[%s11101_s12 + $0x1610] sm:$0xff]  ;;  %v7245_v55 = vpop.f32.mrf.mxu0 }
 0x349   : > { %7616 = vmatprep.subr.bf16.mxu1 %v10019_v28  ;;  %v7115_v28 = vadd.f32 %v12003_v7, %v12001_v48  ;;  %v1421_v48 = vld [vmem:[%s11101_s12 + $0x1dd0] sm:$0xff]  ;;  %v7246_v38 = vadd.f32 %v7245_v55, %v7203_v31 }
 0x34a   : > { %7574 = vmatpush2.bf16.msra.mxu0 %v9890_v29  ;;  %v1425_v7 = vld [vmem:[%s11101_s12 + $0x1df0] sm:$0xff] }
 0x34b   : > { %7575 = vmatprep.subr.bf16.mxu0 %v9883_v12  ;;  %v7158_v29 = vadd.f32 %v7157_v30, %v7115_v28  ;;  %v9987_v12 = vcombine.high %v1173_v45, %v1177_v52  ;;  %v9986_v30 = vcombine.low %v1173_v45, %v1177_v52  ;;  %v10235_v33 = vcombine.high %v1421_v48, %v1425_v7  ;;  %v1281_v41 = vld [vmem:[%s11101_s12 + $0x1970] sm:$0xff] }
 0x34c   : > { %7617 = vmatpush2.bf16.msra.mxu1 %v10018_v2  ;;  %v7286_v2 = vpop.f32.mrf.mxu1  ;;  %v1405_v44 = vld [vmem:[%s11101_s12 + $0x1d50] sm:$0xff]  ;;  %v10098_v28 = vcombine.low %v1285_v9, %v1289_v43 }
 0x34d   : > { %7618 = vmatprep.subr.bf16.mxu1 %v10011_v16  ;;  %v1293_v16 = vld [vmem:[%s11101_s12 + $0x19d0] sm:$0xff] }
 0x34e   : > { %7576 = vmatpush2.bf16.msra.mxu0 %v9882_v6  ;;  %v10107_v11 = vcombine.high %v1293_v16, %v1297_v32  ;;  %v7201_v6 = vadd.f32 %v12031_v59, %v7158_v29  ;;  %v10106_v57 = vcombine.low %v1293_v16, %v1297_v32  ;;  %v10234_v59 = vcombine.low %v1421_v48, %v1425_v7  ;;  %v1409_v45 = vld [vmem:[%s11101_s12 + $0x1d70] sm:$0xff] }
 0x34f   : > { %7577 = vmatprep.subr.bf16.mxu0 %v9875_v15  ;;  %v7242_v15 = vadd.f32 %v7241_v53, %v7199_v3  ;;  %v12069_v53 = vld [vmem:[%s11101_s12 + $0x1950] sm:$0xff]  ;;  %v10219_v29 = vcombine.high %v1405_v44, %v1409_v45 }
 0x350   : > { %7619 = vmatpush2.bf16.msra.mxu1 %v10010_v14  ;;  %v7162_v14 = vadd.f32 %v7161_v20, %v7119_v40  ;;  %v7244_v22 = vadd.f32 %v7243_v61, %v7201_v6  ;;  %v10099_v20 = vcombine.high %v1285_v9, %v1289_v43  ;;  %v10091_v26 = vcombine.high %v12069_v53, %v1281_v41  ;;  %v1269_v48 = vld [vmem:[%s11101_s12 + $0x1910] sm:$0xff]  ;;  %v454_v40 = vld [vmem:[#allocation2 + $0x18] sm:$0xff] }
 0x351   : > { %7620 = vmatprep.subr.bf16.mxu1 %v10003_v18  ;;  %v7288_v18 = vpop.f32.mrf.mxu1  ;;  %v1273_v7 = vld [vmem:[%s11101_s12 + $0x1930] sm:$0xff]  ;;  %v10090_v8 = vcombine.low %v12069_v53, %v1281_v41  ;;  %v10218_v9 = vcombine.low %v1405_v44, %v1409_v45 }
 0x352   : > { %7578 = vmatpush2.bf16.msra.mxu0 %v9874_v50  ;;  %v7247_v50 = vpop.f32.mrf.mxu0  ;;  %v7287_v46 = vadd.f32 %v7286_v2, %v7244_v22  ;;  %v1401_v55 = vld [vmem:[%s11101_s12 + $0x1d30] sm:$0xff]  ;;  %v10083_v43 = vcombine.high %v1269_v48, %v1273_v7 }
 0x353   : > { %7579 = vmatprep.subr.bf16.mxu0 %v9867_v24  ;;  %v7285_v24 = vadd.f32 %v7284_v54, %v7242_v15  ;;  %v1389_v53 = vld [vmem:[%s11101_s12 + $0x1cd0] sm:$0xff] }
 0x354   : > { %7621 = vmatpush2.bf16.msra.mxu1 %v10002_v62  ;;  %v7205_v62 = vadd.f32 %v12043_v49, %v7162_v14  ;;  %v453_v49 = vld [vmem:[#allocation2 + $0x58] sm:$0xff] }
 0x355   : > { %7622 = vmatprep.subr.bf16.mxu1 %v9995_v42  ;;  %v7290_v42 = vpop.f32.mrf.mxu1 }
 0x356   : > { %7580 = vmatpush2.bf16.msra.mxu0 %v9866_v25  ;;  %v7248_v25 = vadd.f32 %v7247_v50, %v7205_v62  ;;  %v1265_v50 = vld [vmem:[%s11101_s12 + $0x18f0] sm:$0xff] }
 0x357   : > { %7581 = vmatprep.subr.bf16.mxu0 %v9859_v58  ;;  %v10226_v58 = vcombine.low %v1413_v5, %v1417_v19  ;;  %v1393_v62 = vld [vmem:[%s11101_s12 + $0x1cf0] sm:$0xff] }
 0x358   : > { %7623 = vmatpush2.bf16.msra.mxu1 %v9994_v4  ;;  %v10203_v45 = vcombine.high %v1389_v53, %v1393_v62 }
 0x359   : > { %7624 = vmatprep.subr.bf16.mxu1 %v9987_v12  ;;  %v7289_v12 = vadd.f32 %v7288_v18, %v7246_v38  ;;  %v461_v18 = vld [vmem:[#allocation2 + $0x10] sm:$0xff] }
 0x35a   : > { %7582 = vmatpush2.bf16.msra.mxu0 %v9858_v17  ;;  %v1397_v17 = vld [vmem:[%s11101_s12 + $0x1d10] sm:$0xff] }
 0x35b   : > { %7637 = vmatprep.subr.bf16.mxu0 %v10107_v11  ;;  %v10211_v22 = vcombine.high %v1397_v17, %v1401_v55 }
 0x35c   : > { %7625 = vmatpush2.bf16.msra.mxu1 %v9986_v30  ;;  %v7291_v30 = vadd.f32 %v7290_v42, %v7248_v25  ;;  %v10082_v42 = vcombine.low %v1269_v48, %v1273_v7  ;;  %v1385_v25 = vld [vmem:[%s11101_s12 + $0x1cb0] sm:$0xff] }
 0x35d   : > { %7680 = vmatprep.subr.bf16.mxu1 %v10235_v33  ;;  %v7327_v52 = vpop.f32.mrf.mxu0  ;;  %7584 = vmatmul.mubr.bf16.vlgmr.msra.gmra.mxu0 %v11414_v21  ;;  %v1237_v7 = vld [vmem:[%s11101_s12 + $0x1810] sm:$0xff] }
 0x35e   : > { %v7328_v61 = vadd.f32 %v7327_v52, %v7285_v24  ;;  %7638 = vmatpush1.bf16.msra.mxu0 %v10106_v57  ;;  %7669 = vmatprep.mubr.bf16.mxu0 %v11437_v36  ;;  %v1261_v57 = vld [vmem:[%s11101_s12 + $0x18d0] sm:$0xff] }
 0x35f   : > { %v7370_v4 = vpop.f32.mrf.mxu1  ;;  %7627 = vmatmul.mubr.bf16.vlgmr.msra.gmra.mxu1 %v11425_v56  ;;  %v7329_v54 = vpop.f32.mrf.mxu0  ;;  %7639 = vmatprep.subr.bf16.mxu0 %v10099_v20  ;;  %v10075_v41 = vcombine.high %v1261_v57, %v1265_v50  ;;  %v1253_v52 = vld [vmem:[%s11101_s12 + $0x1890] sm:$0xff] }
 0x360   : > { %7681 = vmatpush1.bf16.msra.mxu1 %v10234_v59  ;;  %v7371_v2 = vadd.f32 %v7370_v4, %v7328_v61  ;;  %v7330_v16 = vadd.f32 %v7329_v54, %v7287_v46  ;;  %7712 = vmatprep.mubr.bf16.mxu1 %v11444_v37  ;;  %v462_v59 = vld [vmem:[#allocation2 + $0x38] sm:$0xff]  ;;  %v1381_v46 = vld [vmem:[%s11101_s12 + $0x1c90] sm:$0xff]  ;;  %v10074_v61 = vcombine.low %v1261_v57, %v1265_v50 }
 0x361   : > { %v7372_v32 = vpop.f32.mrf.mxu1  ;;  %7682 = vmatprep.subr.bf16.mxu1 %v10227_v39  ;;  %v7331_v3 = vpop.f32.mrf.mxu0  ;;  %v10210_v39 = vcombine.low %v1397_v17, %v1401_v55  ;;  %v10202_v4 = vcombine.low %v1389_v53, %v1393_v62  ;;  %v10195_v54 = vcombine.high %v1381_v46, %v1385_v25  ;;  %v1481_v57 = vld [vmem:[%s11101_s12 + $0x1fb0] sm:$0xff] }
 0x362   : > { %v8069_v11 = vadd.f32 %v7371_v2, %v453_v49  ;;  %v7373_v6 = vadd.f32 %v7372_v32, %v7330_v16  ;;  %v7332_v14 = vadd.f32 %v7331_v3, %v7289_v12  ;;  %7640 = vmatpush1.bf16.msra.mxu0 %v10098_v28  ;;  %v1257_v28 = vld [vmem:[%s11101_s12 + $0x18b0] sm:$0xff]  ;;  %v10194_v16 = vcombine.low %v1381_v46, %v1385_v25 }
 0x363   : > { %v7374_v15 = vpop.f32.mrf.mxu1  ;;  %v7333_v33 = vpop.f32.mrf.mxu0  ;;  %7641 = vmatprep.subr.bf16.mxu0 %v10091_v26  ;;  %v10067_v49 = vcombine.high %v1253_v52, %v1257_v28  ;;  %v1249_v26 = vld [vmem:[%s11101_s12 + $0x1870] sm:$0xff]  ;;  %v10066_v2 = vcombine.low %v1253_v52, %v1257_v28 }
 0x364   : > { %7683 = vmatpush1.bf16.msra.mxu1 %v10226_v58  ;;  %8085 = vst [vmem:[#allocation2 + $0x58] sm:$0xff] %v8069_v11  ;;  %v8070_v5 = vadd.f32 %v7373_v6, %v454_v40  ;;  %v7375_v19 = vadd.f32 %v7374_v15, %v7332_v14  ;;  %v7334_v31 = vadd.f32 %v7333_v33, %v7291_v30  ;;  %v1245_v58 = vld [vmem:[%s11101_s12 + $0x1850] sm:$0xff] }
 0x365   : > { %7684 = vmatprep.subr.bf16.mxu1 %v10219_v29  ;;  %v7376_v20 = vpop.f32.mrf.mxu1  ;;  %v1373_v29 = vld [vmem:[%s11101_s12 + $0x1c50] sm:$0xff]  ;;  %v10059_v32 = vcombine.high %v1245_v58, %v1249_v26  ;;  %v10058_v17 = vcombine.low %v1245_v58, %v1249_v26 }
 0x366   : > { %8086 = vst [vmem:[#allocation2 + $0x18] sm:$0xff] %v8070_v5  ;;  %v8077_v24 = vadd.f32 %v7375_v19, %v461_v18  ;;  %v7377_v38 = vadd.f32 %v7376_v20, %v7334_v31  ;;  %7642 = vmatpush1.bf16.msra.mxu0 %v10090_v8  ;;  %v1377_v12 = vld [vmem:[%s11101_s12 + $0x1c70] sm:$0xff] }
 0x367   : > { %7643 = vmatprep.subr.bf16.mxu0 %v10083_v43  ;;  %v10187_v48 = vcombine.high %v1373_v29, %v1377_v12  ;;  %v1241_v40 = vld [vmem:[%s11101_s12 + $0x1830] sm:$0xff]  ;;  %v10186_v55 = vcombine.low %v1373_v29, %v1377_v12 }
 0x368   : > { %7685 = vmatpush1.bf16.msra.mxu1 %v10218_v9  ;;  %8093 = vst [vmem:[#allocation2 + $0x10] sm:$0xff] %v8077_v24  ;;  %v8078_v44 = vadd.f32 %v7377_v38, %v462_v59  ;;  %v1365_v3 = vld [vmem:[%s11101_s12 + $0x1c10] sm:$0xff]  ;;  %v10051_v30 = vcombine.high %v1237_v7, %v1241_v40  ;;  %v10050_v33 = vcombine.low %v1237_v7, %v1241_v40 }
 0x369   : > { %7686 = vmatprep.subr.bf16.mxu1 %v10211_v22  ;;  %v1369_v8 = vld [vmem:[%s11101_s12 + $0x1c30] sm:$0xff] }
 0x36a   : > { %8094 = vst [vmem:[#allocation2 + $0x38] sm:$0xff] %v8078_v44  ;;  %7644 = vmatpush1.bf16.msra.mxu0 %v10082_v42  ;;  %v10179_v11 = vcombine.high %v1365_v3, %v1369_v8  ;;  %v1357_v6 = vld [vmem:[%s11101_s12 + $0x1bd0] sm:$0xff]  ;;  %v10178_v9 = vcombine.low %v1365_v3, %v1369_v8 }
 0x36b   : > { %7645 = vmatprep.subr.bf16.mxu0 %v10075_v41  ;;  %v1361_v14 = vld [vmem:[%s11101_s12 + $0x1bf0] sm:$0xff] }
 0x36c   : > { %7687 = vmatpush1.bf16.msra.mxu1 %v10210_v39  ;;  %v1485_v15 = vld [vmem:[%s11101_s12 + $0x1fd0] sm:$0xff]  ;;  %v10171_v43 = vcombine.high %v1357_v6, %v1361_v14  ;;  %v10170_v50 = vcombine.low %v1357_v6, %v1361_v14 }
 0x36d   : > { %7688 = vmatprep.subr.bf16.mxu1 %v10203_v45  ;;  %v1489_v18 = vld [vmem:[%s11101_s12 + $0x1ff0] sm:$0xff] }
 0x36e   : > { %7646 = vmatpush1.bf16.msra.mxu0 %v10074_v61  ;;  %v10299_v5 = vcombine.high %v1485_v15, %v1489_v18  ;;  %v1349_v19 = vld [vmem:[%s11101_s12 + $0x1b90] sm:$0xff]  ;;  %v10298_v59 = vcombine.low %v1485_v15, %v1489_v18 }
 0x36f   : > { %7647 = vmatprep.subr.bf16.mxu0 %v10067_v49  ;;  %v1353_v31 = vld [vmem:[%s11101_s12 + $0x1bb0] sm:$0xff] }
 0x370   : > { %7689 = vmatpush1.bf16.msra.mxu1 %v10202_v4  ;;  %v1477_v22 = vld [vmem:[%s11101_s12 + $0x1f90] sm:$0xff]  ;;  %v10163_v20 = vcombine.high %v1349_v19, %v1353_v31  ;;  %v10162_v39 = vcombine.low %v1349_v19, %v1353_v31 }
 0x371   : > { %7690 = vmatprep.subr.bf16.mxu1 %v10195_v54  ;;  %v10291_v53 = vcombine.high %v1477_v22, %v1481_v57  ;;  %v1341_v62 = vld [vmem:[%s11101_s12 + $0x1b50] sm:$0xff]  ;;  %v10290_v41 = vcombine.low %v1477_v22, %v1481_v57 }
 0x372   : > { %7648 = vmatpush1.bf16.msra.mxu0 %v10066_v2  ;;  %v1345_v24 = vld [vmem:[%s11101_s12 + $0x1b70] sm:$0xff] }
 0x373   : > { %7649 = vmatprep.subr.bf16.mxu0 %v10059_v32  ;;  %v1469_v38 = vld [vmem:[%s11101_s12 + $0x1f50] sm:$0xff]  ;;  %v10155_v44 = vcombine.high %v1341_v62, %v1345_v24  ;;  %v10154_v61 = vcombine.low %v1341_v62, %v1345_v24  ;;  %v526_v62 = vld [vmem:[%s11101_s12 + $0x1d8] sm:$0xff] }
 0x374   : > { %7691 = vmatpush1.bf16.msra.mxu1 %v10194_v16  ;;  %v1473_v42 = vld [vmem:[%s11101_s12 + $0x1f70] sm:$0xff]  ;;  %v530_v24 = vld [vmem:[%s11101_s12 + $0x1f8] sm:$0xff] }
 0x375   : > { %7692 = vmatprep.subr.bf16.mxu1 %v10187_v48  ;;  %v10283_v45 = vcombine.high %v1469_v38, %v1473_v42  ;;  %v1333_v52 = vld [vmem:[%s11101_s12 + $0x1b10] sm:$0xff]  ;;  %v10282_v4 = vcombine.low %v1469_v38, %v1473_v42  ;;  %v654_v38 = vld [vmem:[%s11101_s12 + $0x5d8] sm:$0xff] }
 0x376   : > { %7650 = vmatpush1.bf16.msra.mxu0 %v10058_v17  ;;  %v1337_v28 = vld [vmem:[%s11101_s12 + $0x1b30] sm:$0xff]  ;;  %v658_v42 = vld [vmem:[%s11101_s12 + $0x5f8] sm:$0xff] }
 0x377   : > { %7651 = vmatprep.subr.bf16.mxu0 %v10051_v30  ;;  %v1461_v46 = vld [vmem:[%s11101_s12 + $0x1f10] sm:$0xff]  ;;  %v10147_v49 = vcombine.high %v1333_v52, %v1337_v28  ;;  %v10146_v2 = vcombine.low %v1333_v52, %v1337_v28  ;;  %v518_v52 = vld [vmem:[%s11101_s12 + $0x198] sm:$0xff] }
 0x378   : > { %7693 = vmatpush1.bf16.msra.mxu1 %v10186_v55  ;;  %v1465_v25 = vld [vmem:[%s11101_s12 + $0x1f30] sm:$0xff]  ;;  %v522_v28 = vld [vmem:[%s11101_s12 + $0x1b8] sm:$0xff] }
 0x379   : > { %7694 = vmatprep.subr.bf16.mxu1 %v10179_v11  ;;  %v10275_v54 = vcombine.high %v1461_v46, %v1465_v25  ;;  %v1325_v58 = vld [vmem:[%s11101_s12 + $0x1ad0] sm:$0xff]  ;;  %v10274_v16 = vcombine.low %v1461_v46, %v1465_v25  ;;  %v646_v46 = vld [vmem:[%s11101_s12 + $0x598] sm:$0xff] }
 0x37a   : > { %7652 = vmatpush1.bf16.msra.mxu0 %v10050_v33  ;;  %v1329_v26 = vld [vmem:[%s11101_s12 + $0x1af0] sm:$0xff]  ;;  %v650_v25 = vld [vmem:[%s11101_s12 + $0x5b8] sm:$0xff] }
 0x37b   : > { %7653 = vmatprep.subr.bf16.mxu0 %v10171_v43  ;;  %v1453_v29 = vld [vmem:[%s11101_s12 + $0x1ed0] sm:$0xff]  ;;  %v10139_v32 = vcombine.high %v1325_v58, %v1329_v26  ;;  %v10138_v17 = vcombine.low %v1325_v58, %v1329_v26  ;;  %v510_v58 = vld [vmem:[%s11101_s12 + $0x158] sm:$0xff] }
 0x37c   : > { %7695 = vmatpush1.bf16.msra.mxu1 %v10178_v9  ;;  %v1457_v12 = vld [vmem:[%s11101_s12 + $0x1ef0] sm:$0xff]  ;;  %v514_v26 = vld [vmem:[%s11101_s12 + $0x178] sm:$0xff] }
 0x37d   : > { %7696 = vmatprep.subr.bf16.mxu1 %v10299_v5  ;;  %v10267_v48 = vcombine.high %v1453_v29, %v1457_v12  ;;  %v1317_v7 = vld [vmem:[%s11101_s12 + $0x1a90] sm:$0xff]  ;;  %v10266_v55 = vcombine.low %v1453_v29, %v1457_v12  ;;  %v638_v29 = vld [vmem:[%s11101_s12 + $0x558] sm:$0xff] }
 0x37e   : > { %7654 = vmatpush2.bf16.msra.mxu0 %v10170_v50  ;;  %v1321_v40 = vld [vmem:[%s11101_s12 + $0x1ab0] sm:$0xff]  ;;  %v642_v12 = vld [vmem:[%s11101_s12 + $0x578] sm:$0xff] }
 0x37f   : > { %7655 = vmatprep.subr.bf16.mxu0 %v10163_v20  ;;  %v1445_v3 = vld [vmem:[%s11101_s12 + $0x1e90] sm:$0xff]  ;;  %v10131_v30 = vcombine.high %v1317_v7, %v1321_v40  ;;  %v10130_v33 = vcombine.low %v1317_v7, %v1321_v40  ;;  %v502_v7 = vld [vmem:[%s11101_s12 + $0x118] sm:$0xff] }
 0x380   : > { %7697 = vmatpush2.bf16.msra.mxu1 %v10298_v59  ;;  %v1449_v8 = vld [vmem:[%s11101_s12 + $0x1eb0] sm:$0xff]  ;;  %v506_v40 = vld [vmem:[%s11101_s12 + $0x138] sm:$0xff] }
 0x381   : > { %7698 = vmatprep.subr.bf16.mxu1 %v10291_v53  ;;  %v10259_v11 = vcombine.high %v1445_v3, %v1449_v8  ;;  %v1309_v6 = vld [vmem:[%s11101_s12 + $0x1a50] sm:$0xff]  ;;  %v10258_v9 = vcombine.low %v1445_v3, %v1449_v8  ;;  %v630_v3 = vld [vmem:[%s11101_s12 + $0x518] sm:$0xff] }
 0x382   : > { %7656 = vmatpush2.bf16.msra.mxu0 %v10162_v39  ;;  %v1313_v14 = vld [vmem:[%s11101_s12 + $0x1a70] sm:$0xff]  ;;  %v634_v8 = vld [vmem:[%s11101_s12 + $0x538] sm:$0xff] }
 0x383   : > { %7657 = vmatprep.subr.bf16.mxu0 %v10155_v44  ;;  %v1437_v15 = vld [vmem:[%s11101_s12 + $0x1e50] sm:$0xff]  ;;  %v10123_v43 = vcombine.high %v1309_v6, %v1313_v14  ;;  %v10122_v50 = vcombine.low %v1309_v6, %v1313_v14  ;;  %v9341_v44 = vcombine.high %v526_v62, %v530_v24  ;;  %v494_v6 = vld [vmem:[%s11101_s12 + $0xd8] sm:$0xff] }
 0x384   : > { %7699 = vmatpush2.bf16.msra.mxu1 %v10290_v41  ;;  %v1441_v18 = vld [vmem:[%s11101_s12 + $0x1e70] sm:$0xff]  ;;  %v498_v14 = vld [vmem:[%s11101_s12 + $0xf8] sm:$0xff] }
 0x385   : > { %7700 = vmatprep.subr.bf16.mxu1 %v10283_v45  ;;  %v10251_v5 = vcombine.high %v1437_v15, %v1441_v18  ;;  %v1301_v19 = vld [vmem:[%s11101_s12 + $0x1a10] sm:$0xff]  ;;  %v10250_v59 = vcombine.low %v1437_v15, %v1441_v18  ;;  %v9469_v45 = vcombine.high %v654_v38, %v658_v42  ;;  %v622_v15 = vld [vmem:[%s11101_s12 + $0x4d8] sm:$0xff]  ;;  %v9316_v18 = vcombine.low %v502_v7, %v506_v40 }
 0x386   : > { %7658 = vmatpush2.bf16.msra.mxu0 %v10154_v61  ;;  %v1305_v31 = vld [vmem:[%s11101_s12 + $0x1a30] sm:$0xff]  ;;  %v9340_v61 = vcombine.low %v526_v62, %v530_v24  ;;  %v606_v62 = vld [vmem:[%s11101_s12 + $0x458] sm:$0xff] }
 0x387   : > { %7659 = vmatprep.subr.bf16.mxu0 %v10147_v49  ;;  %v1429_v22 = vld [vmem:[%s11101_s12 + $0x1e10] sm:$0xff]  ;;  %v10115_v20 = vcombine.high %v1301_v19, %v1305_v31  ;;  %v10114_v39 = vcombine.low %v1301_v19, %v1305_v31  ;;  %v9333_v49 = vcombine.high %v518_v52, %v522_v28  ;;  %v614_v19 = vld [vmem:[%s11101_s12 + $0x498] sm:$0xff] }
 0x388   : > { %7701 = vmatpush2.bf16.msra.mxu1 %v10282_v4  ;;  %v1433_v57 = vld [vmem:[%s11101_s12 + $0x1e30] sm:$0xff]  ;;  %v9468_v4 = vcombine.low %v654_v38, %v658_v42  ;;  %v618_v31 = vld [vmem:[%s11101_s12 + $0x4b8] sm:$0xff] }
 0x389   : > { %7702 = vmatprep.subr.bf16.mxu1 %v10275_v54  ;;  %v10243_v53 = vcombine.high %v1429_v22, %v1433_v57  ;;  %v10242_v41 = vcombine.low %v1429_v22, %v1433_v57  ;;  %v9461_v54 = vcombine.high %v646_v46, %v650_v25  ;;  %v9308_v22 = vcombine.low %v494_v6, %v498_v14  ;;  %v610_v24 = vld [vmem:[%s11101_s12 + $0x478] sm:$0xff] }
 0x38a   : > { %7660 = vmatpush2.bf16.msra.mxu0 %v10146_v2  ;;  %v9332_v2 = vcombine.low %v518_v52, %v522_v28  ;;  %v9428_v42 = vcombine.low %v614_v19, %v618_v31  ;;  %v598_v52 = vld [vmem:[%s11101_s12 + $0x418] sm:$0xff] }
 0x38b   : > { %7661 = vmatprep.subr.bf16.mxu0 %v10139_v32  ;;  %v9325_v32 = vcombine.high %v510_v58, %v514_v26  ;;  %v602_v28 = vld [vmem:[%s11101_s12 + $0x438] sm:$0xff] }
 0x38c   : > { %7703 = vmatpush2.bf16.msra.mxu1 %v10274_v16  ;;  %v9460_v16 = vcombine.low %v646_v46, %v650_v25  ;;  %v9420_v25 = vcombine.low %v606_v62, %v610_v24 }
 0x38d   : > { %7704 = vmatprep.subr.bf16.mxu1 %v10267_v48  ;;  %v9453_v48 = vcombine.high %v638_v29, %v642_v12 }
 0x38e   : > { %7662 = vmatpush2.bf16.msra.mxu0 %v10138_v17  ;;  %v9324_v17 = vcombine.low %v510_v58, %v514_v26  ;;  %v718_v58 = vld [vmem:[%s11101_s12 + $0x7d8] sm:$0xff] }
 0x38f   : > { %7663 = vmatprep.subr.bf16.mxu0 %v10131_v30  ;;  %v9317_v30 = vcombine.high %v502_v7, %v506_v40  ;;  %v722_v26 = vld [vmem:[%s11101_s12 + $0x7f8] sm:$0xff] }
 0x390   : > { %7705 = vmatpush2.bf16.msra.mxu1 %v10266_v55  ;;  %v9452_v55 = vcombine.low %v638_v29, %v642_v12  ;;  %v9412_v12 = vcombine.low %v598_v52, %v602_v28  ;;  %v710_v7 = vld [vmem:[%s11101_s12 + $0x798] sm:$0xff] }
 0x391   : > { %7706 = vmatprep.subr.bf16.mxu1 %v10259_v11  ;;  %v9445_v11 = vcombine.high %v630_v3, %v634_v8  ;;  %v714_v40 = vld [vmem:[%s11101_s12 + $0x7b8] sm:$0xff] }
 0x392   : > { %7664 = vmatpush2.bf16.msra.mxu0 %v10130_v33  ;;  %v9309_v33 = vcombine.high %v494_v6, %v498_v14  ;;  %v702_v6 = vld [vmem:[%s11101_s12 + $0x758] sm:$0xff] }
 0x393   : > { %7665 = vmatprep.subr.bf16.mxu0 %v10123_v43  ;;  %v486_v43 = vld [vmem:[%s11101_s12 + $0x98] sm:$0xff] }
 0x394   : > { %7707 = vmatpush2.bf16.msra.mxu1 %v10258_v9  ;;  %v706_v14 = vld [vmem:[%s11101_s12 + $0x778] sm:$0xff] }
 0x395   : > { %7708 = vmatprep.subr.bf16.mxu1 %v10251_v5  ;;  %v490_v5 = vld [vmem:[%s11101_s12 + $0xb8] sm:$0xff] }
 0x396   : > { %7666 = vmatpush2.bf16.msra.mxu0 %v10122_v50  ;;  %v9301_v50 = vcombine.high %v486_v43, %v490_v5  ;;  %v9300_v38 = vcombine.low %v486_v43, %v490_v5  ;;  %v694_v43 = vld [vmem:[%s11101_s12 + $0x718] sm:$0xff] }
 0x397   : > { %7667 = vmatprep.subr.bf16.mxu0 %v10115_v20  ;;  %v478_v20 = vld [vmem:[%s11101_s12 + $0x58] sm:$0xff] }
 0x398   : > { %7709 = vmatpush2.bf16.msra.mxu1 %v10250_v59  ;;  %v9429_v59 = vcombine.high %v614_v19, %v618_v31  ;;  %v698_v5 = vld [vmem:[%s11101_s12 + $0x738] sm:$0xff]  ;;  %v9516_v31 = vcombine.low %v702_v6, %v706_v14 }
 0x399   : > { %7710 = vmatprep.subr.bf16.mxu1 %v10243_v53  ;;  %v482_v53 = vld [vmem:[%s11101_s12 + $0x78] sm:$0xff] }
 0x39a   : > { %7668 = vmatpush2.bf16.msra.mxu0 %v10114_v39  ;;  %v9293_v39 = vcombine.high %v478_v20, %v482_v53  ;;  %v9292_v46 = vcombine.low %v478_v20, %v482_v53  ;;  %v686_v20 = vld [vmem:[%s11101_s12 + $0x6d8] sm:$0xff] }
 0x39b   : > { %7723 = vmatprep.subr.bf16.mxu0 %v9341_v44  ;;  %v470_v44 = vld [vmem:[%s11101_s12 + $0x18] sm:$0xff] }
 0x39c   : > { %7711 = vmatpush2.bf16.msra.mxu1 %v10242_v41  ;;  %v9421_v41 = vcombine.high %v606_v62, %v610_v24  ;;  %v690_v53 = vld [vmem:[%s11101_s12 + $0x6f8] sm:$0xff]  ;;  %v9508_v24 = vcombine.low %v694_v43, %v698_v5 }
 0x39d   : > { %7766 = vmatprep.subr.bf16.mxu1 %v9469_v45  ;;  %7670 = vmatmul.mubr.bf16.vlgmr.msra.gmra.mxu0 %v11509_v10  ;;  %v474_v45 = vld [vmem:[%s11101_s12 + $0x38] sm:$0xff] }
 0x39e   : > { %7724 = vmatpush1.bf16.msra.mxu0 %v9340_v61  ;;  %7755 = vmatprep.mubr.bf16.mxu0 %v11165_v60  ;;  %v626_v60 = vld [vmem:[%s11101_s12 + $0x4f8] sm:$0xff]  ;;  %v9285_v61 = vcombine.high %v470_v44, %v474_v45  ;;  %v9284_v29 = vcombine.low %v470_v44, %v474_v45 }
 0x39f   : > { %7713 = vmatmul.mubr.bf16.vlgmr.msra.gmra.mxu1 %v11515_v13  ;;  %7725 = vmatprep.subr.bf16.mxu0 %v9333_v49  ;;  %v9437_v9 = vcombine.high %v622_v15, %v626_v60  ;;  %v9436_v57 = vcombine.low %v622_v15, %v626_v60  ;;  %v590_v49 = vld [vmem:[%s11101_s12 + $0x3d8] sm:$0xff]  ;;  %v9524_v60 = vcombine.low %v710_v7, %v714_v40 }
 0x3a0   : > { %7767 = vmatpush1.bf16.msra.mxu1 %v9468_v4  ;;  %7798 = vmatprep.mubr.bf16.mxu1 %v11177_v1  ;;  %v9444_v1 = vcombine.low %v630_v3, %v634_v8  ;;  %v9413_v4 = vcombine.high %v598_v52, %v602_v28  ;;  %v9532_v8 = vcombine.low %v718_v58, %v722_v26  ;;  %v678_v44 = vld [vmem:[%s11101_s12 + $0x698] sm:$0xff] }
 0x3a1   : > { %7768 = vmatprep.subr.bf16.mxu1 %v9461_v54  ;;  %v594_v54 = vld [vmem:[%s11101_s12 + $0x3f8] sm:$0xff]  ;;  %v9500_v28 = vcombine.low %v686_v20, %v690_v53 }
 0x3a2   : > { %7726 = vmatpush1.bf16.msra.mxu0 %v9332_v2  ;;  %v9405_v2 = vcombine.high %v590_v49, %v594_v54  ;;  %v9404_v3 = vcombine.low %v590_v49, %v594_v54  ;;  %v682_v45 = vld [vmem:[%s11101_s12 + $0x6b8] sm:$0xff] }
 0x3a3   : > { %7727 = vmatprep.subr.bf16.mxu0 %v9325_v32  ;;  %v582_v32 = vld [vmem:[%s11101_s12 + $0x398] sm:$0xff] }
 0x3a4   : > { %7769 = vmatpush1.bf16.msra.mxu1 %v9460_v16  ;;  %v9533_v16 = vcombine.high %v718_v58, %v722_v26  ;;  %v670_v49 = vld [vmem:[%s11101_s12 + $0x658] sm:$0xff]  ;;  %v9492_v26 = vcombine.low %v678_v44, %v682_v45 }
 0x3a5   : > { %7770 = vmatprep.subr.bf16.mxu1 %v9453_v48  ;;  %v586_v48 = vld [vmem:[%s11101_s12 + $0x3b8] sm:$0xff] }
 0x3a6   : > { %7728 = vmatpush1.bf16.msra.mxu0 %v9324_v17  ;;  %v9397_v17 = vcombine.high %v582_v32, %v586_v48  ;;  %v9396_v15 = vcombine.low %v582_v32, %v586_v48  ;;  %v674_v54 = vld [vmem:[%s11101_s12 + $0x678] sm:$0xff] }
 0x3a7   : > { %7729 = vmatprep.subr.bf16.mxu0 %v9317_v30  ;;  %v574_v30 = vld [vmem:[%s11101_s12 + $0x358] sm:$0xff] }
 0x3a8   : > { %7771 = vmatpush1.bf16.msra.mxu1 %v9452_v55  ;;  %v9525_v55 = vcombine.high %v710_v7, %v714_v40  ;;  %v662_v32 = vld [vmem:[%s11101_s12 + $0x618] sm:$0xff]  ;;  %v9484_v40 = vcombine.low %v670_v49, %v674_v54 }
 0x3a9   : > { %7772 = vmatprep.subr.bf16.mxu1 %v9445_v11  ;;  %v578_v11 = vld [vmem:[%s11101_s12 + $0x378] sm:$0xff] }
 0x3aa   : > { %7730 = vmatpush1.bf16.msra.mxu0 %v9316_v18  ;;  %v9389_v18 = vcombine.high %v574_v30, %v578_v11  ;;  %v9388_v19 = vcombine.low %v574_v30, %v578_v11  ;;  %v666_v48 = vld [vmem:[%s11101_s12 + $0x638] sm:$0xff] }
 0x3ab   : > { %7731 = vmatprep.subr.bf16.mxu0 %v9309_v33  ;;  %v566_v33 = vld [vmem:[%s11101_s12 + $0x318] sm:$0xff] }
 0x3ac   : > { %7773 = vmatpush1.bf16.msra.mxu1 %v9444_v1  ;;  %v9517_v1 = vcombine.high %v702_v6, %v706_v14  ;;  %v910_v30 = vld [vmem:[%s11101_s12 + $0xdd8] sm:$0xff]  ;;  %v9476_v14 = vcombine.low %v662_v32, %v666_v48 }
 0x3ad   : > { %7774 = vmatprep.subr.bf16.mxu1 %v9437_v9  ;;  %v570_v9 = vld [vmem:[%s11101_s12 + $0x338] sm:$0xff] }
 0x3ae   : > { %7732 = vmatpush1.bf16.msra.mxu0 %v9308_v22  ;;  %v9381_v22 = vcombine.high %v566_v33, %v570_v9  ;;  %v9380_v62 = vcombine.low %v566_v33, %v570_v9  ;;  %v914_v11 = vld [vmem:[%s11101_s12 + $0xdf8] sm:$0xff] }
 0x3af   : > { %7733 = vmatprep.subr.bf16.mxu0 %v9301_v50  ;;  %v558_v50 = vld [vmem:[%s11101_s12 + $0x2d8] sm:$0xff] }
 0x3b0   : > { %7775 = vmatpush1.bf16.msra.mxu1 %v9436_v57  ;;  %v9509_v57 = vcombine.high %v694_v43, %v698_v5  ;;  %v902_v33 = vld [vmem:[%s11101_s12 + $0xd98] sm:$0xff]  ;;  %v9724_v5 = vcombine.low %v910_v30, %v914_v11 }
 0x3b1   : > { %7776 = vmatprep.subr.bf16.mxu1 %v9429_v59  ;;  %v562_v59 = vld [vmem:[%s11101_s12 + $0x2f8] sm:$0xff] }
 0x3b2   : > { %7734 = vmatpush1.bf16.msra.mxu0 %v9300_v38  ;;  %v9373_v38 = vcombine.high %v558_v50, %v562_v59  ;;  %v9372_v52 = vcombine.low %v558_v50, %v562_v59  ;;  %v906_v9 = vld [vmem:[%s11101_s12 + $0xdb8] sm:$0xff] }
 0x3b3   : > { %7735 = vmatprep.subr.bf16.mxu0 %v9293_v39  ;;  %v550_v39 = vld [vmem:[%s11101_s12 + $0x298] sm:$0xff] }
 0x3b4   : > { %7777 = vmatpush1.bf16.msra.mxu1 %v9428_v42  ;;  %v9501_v42 = vcombine.high %v686_v20, %v690_v53  ;;  %v894_v50 = vld [vmem:[%s11101_s12 + $0xd58] sm:$0xff]  ;;  %v9716_v53 = vcombine.low %v902_v33, %v906_v9 }
 0x3b5   : > { %7778 = vmatprep.subr.bf16.mxu1 %v9421_v41  ;;  %v554_v41 = vld [vmem:[%s11101_s12 + $0x2b8] sm:$0xff] }
 0x3b6   : > { %7736 = vmatpush1.bf16.msra.mxu0 %v9292_v46  ;;  %v9365_v46 = vcombine.high %v550_v39, %v554_v41  ;;  %v9364_v58 = vcombine.low %v550_v39, %v554_v41  ;;  %v898_v59 = vld [vmem:[%s11101_s12 + $0xd78] sm:$0xff] }
 0x3b7   : > { %7737 = vmatprep.subr.bf16.mxu0 %v9285_v61  ;;  %v542_v61 = vld [vmem:[%s11101_s12 + $0x258] sm:$0xff]  ;;  %v9708_v41 = vcombine.low %v894_v50, %v898_v59 }
 0x3b8   : > { %7779 = vmatpush1.bf16.msra.mxu1 %v9420_v25  ;;  %v9493_v25 = vcombine.high %v678_v44, %v682_v45  ;;  %v890_v39 = vld [vmem:[%s11101_s12 + $0xd38] sm:$0xff] }
 0x3b9   : > { %7780 = vmatprep.subr.bf16.mxu1 %v9413_v4  ;;  %v546_v4 = vld [vmem:[%s11101_s12 + $0x278] sm:$0xff] }
 0x3ba   : > { %7738 = vmatpush1.bf16.msra.mxu0 %v9284_v29  ;;  %v9357_v29 = vcombine.high %v542_v61, %v546_v4  ;;  %v9356_v7 = vcombine.low %v542_v61, %v546_v4 }
 0x3bb   : > { %7739 = vmatprep.subr.bf16.mxu0 %v9405_v2  ;;  %v534_v2 = vld [vmem:[%s11101_s12 + $0x218] sm:$0xff] }
 0x3bc   : > { %7781 = vmatpush1.bf16.msra.mxu1 %v9412_v12  ;;  %v9485_v12 = vcombine.high %v670_v49, %v674_v54  ;;  %v742_v49 = vld [vmem:[%s11101_s12 + $0x898] sm:$0xff] }
 0x3bd   : > { %7782 = vmatprep.subr.bf16.mxu1 %v9533_v16  ;;  %v538_v16 = vld [vmem:[%s11101_s12 + $0x238] sm:$0xff] }
 0x3be   : > { %7740 = vmatpush2.bf16.msra.mxu0 %v9404_v3  ;;  %v9349_v3 = vcombine.high %v534_v2, %v538_v16  ;;  %v9348_v6 = vcombine.low %v534_v2, %v538_v16  ;;  %v746_v54 = vld [vmem:[%s11101_s12 + $0x8b8] sm:$0xff] }
 0x3bf   : > { %7741 = vmatprep.subr.bf16.mxu0 %v9397_v17  ;;  %v782_v17 = vld [vmem:[%s11101_s12 + $0x9d8] sm:$0xff]  ;;  %v9557_v2 = vcombine.high %v742_v49, %v746_v54 }
 0x3c0   : > { %7783 = vmatpush2.bf16.msra.mxu1 %v9532_v8  ;;  %v9477_v8 = vcombine.high %v662_v32, %v666_v48  ;;  %v734_v32 = vld [vmem:[%s11101_s12 + $0x858] sm:$0xff] }
 0x3c1   : > { %7784 = vmatprep.subr.bf16.mxu1 %v9525_v55  ;;  %v786_v55 = vld [vmem:[%s11101_s12 + $0x9f8] sm:$0xff] }
 0x3c2   : > { %7742 = vmatpush2.bf16.msra.mxu0 %v9396_v15  ;;  %v9597_v15 = vcombine.high %v782_v17, %v786_v55  ;;  %v9596_v43 = vcombine.low %v782_v17, %v786_v55  ;;  %v738_v48 = vld [vmem:[%s11101_s12 + $0x878] sm:$0xff] }
 0x3c3   : > { %7743 = vmatprep.subr.bf16.mxu0 %v9389_v18  ;;  %v774_v18 = vld [vmem:[%s11101_s12 + $0x998] sm:$0xff]  ;;  %v9549_v17 = vcombine.high %v734_v32, %v738_v48 }
 0x3c4   : > { %7785 = vmatpush2.bf16.msra.mxu1 %v9524_v60  ;;  %v9725_v60 = vcombine.high %v910_v30, %v914_v11  ;;  %v726_v30 = vld [vmem:[%s11101_s12 + $0x818] sm:$0xff] }
 0x3c5   : > { %7786 = vmatprep.subr.bf16.mxu1 %v9517_v1  ;;  %v778_v1 = vld [vmem:[%s11101_s12 + $0x9b8] sm:$0xff] }
 0x3c6   : > { %7744 = vmatpush2.bf16.msra.mxu0 %v9388_v19  ;;  %v9589_v19 = vcombine.high %v774_v18, %v778_v1  ;;  %v9588_v20 = vcombine.low %v774_v18, %v778_v1  ;;  %v730_v11 = vld [vmem:[%s11101_s12 + $0x838] sm:$0xff] }
 0x3c7   : > { %7745 = vmatprep.subr.bf16.mxu0 %v9381_v22  ;;  %v766_v22 = vld [vmem:[%s11101_s12 + $0x958] sm:$0xff]  ;;  %v9541_v18 = vcombine.high %v726_v30, %v730_v11 }
 0x3c8   : > { %7787 = vmatpush2.bf16.msra.mxu1 %v9516_v31  ;;  %v9717_v31 = vcombine.high %v902_v33, %v906_v9  ;;  %v846_v33 = vld [vmem:[%s11101_s12 + $0xbd8] sm:$0xff] }
 0x3c9   : > { %7788 = vmatprep.subr.bf16.mxu1 %v9509_v57  ;;  %v770_v57 = vld [vmem:[%s11101_s12 + $0x978] sm:$0xff] }
 0x3ca   : > { %7746 = vmatpush2.bf16.msra.mxu0 %v9380_v62  ;;  %v9581_v62 = vcombine.high %v766_v22, %v770_v57  ;;  %v850_v9 = vld [vmem:[%s11101_s12 + $0xbf8] sm:$0xff] }
 0x3cb   : > { %7747 = vmatprep.subr.bf16.mxu0 %v9373_v38  ;;  %v758_v38 = vld [vmem:[%s11101_s12 + $0x918] sm:$0xff] }
 0x3cc   : > { %7789 = vmatpush2.bf16.msra.mxu1 %v9508_v24  ;;  %v9709_v24 = vcombine.high %v894_v50, %v898_v59  ;;  %v838_v50 = vld [vmem:[%s11101_s12 + $0xb98] sm:$0xff] }
 0x3cd   : > { %7790 = vmatprep.subr.bf16.mxu1 %v9501_v42  ;;  %v762_v42 = vld [vmem:[%s11101_s12 + $0x938] sm:$0xff] }
 0x3ce   : > { %7748 = vmatpush2.bf16.msra.mxu0 %v9372_v52  ;;  %v9573_v44 = vcombine.high %v758_v38, %v762_v42  ;;  %v750_v52 = vld [vmem:[%s11101_s12 + $0x8d8] sm:$0xff] }
 0x3cf   : > { %7749 = vmatprep.subr.bf16.mxu0 %v9365_v46  ;;  %v878_v46 = vld [vmem:[%s11101_s12 + $0xcd8] sm:$0xff] }
 0x3d0   : > { %7791 = vmatpush2.bf16.msra.mxu1 %v9500_v28  ;;  %v754_v28 = vld [vmem:[%s11101_s12 + $0x8f8] sm:$0xff] }
 0x3d1   : > { %7792 = vmatprep.subr.bf16.mxu1 %v9493_v25  ;;  %v9572_v25 = vcombine.low %v758_v38, %v762_v42  ;;  %v9565_v61 = vcombine.high %v750_v52, %v754_v28  ;;  %v842_v59 = vld [vmem:[%s11101_s12 + $0xbb8] sm:$0xff] }
 0x3d2   : > { %7750 = vmatpush2.bf16.msra.mxu0 %v9364_v58  ;;  %v870_v58 = vld [vmem:[%s11101_s12 + $0xc98] sm:$0xff]  ;;  %v9653_v38 = vcombine.high %v838_v50, %v842_v59 }
 0x3d3   : > { %7751 = vmatprep.subr.bf16.mxu0 %v9357_v29  ;;  %v9564_v29 = vcombine.low %v750_v52, %v754_v28 }
 0x3d4   : > { %7793 = vmatpush2.bf16.msra.mxu1 %v9492_v26  ;;  %v874_v26 = vld [vmem:[%s11101_s12 + $0xcb8] sm:$0xff] }
 0x3d5   : > { %7794 = vmatprep.subr.bf16.mxu1 %v9485_v12  ;;  %v9685_v16 = vcombine.high %v870_v58, %v874_v26 }
 0x3d6   : > { %7752 = vmatpush2.bf16.msra.mxu0 %v9356_v7  ;;  %v862_v7 = vld [vmem:[%s11101_s12 + $0xc58] sm:$0xff] }
 0x3d7   : > { %7753 = vmatprep.subr.bf16.mxu0 %v9349_v3  ;;  %v9556_v3 = vcombine.low %v742_v49, %v746_v54 }
 0x3d8   : > { %7795 = vmatpush2.bf16.msra.mxu1 %v9484_v40  ;;  %v866_v40 = vld [vmem:[%s11101_s12 + $0xc78] sm:$0xff] }
 0x3d9   : > { %7796 = vmatprep.subr.bf16.mxu1 %v9477_v8  ;;  %v9684_v8 = vcombine.low %v870_v58, %v874_v26  ;;  %v9677_v55 = vcombine.high %v862_v7, %v866_v40  ;;  %v814_v58 = vld [vmem:[%s11101_s12 + $0xad8] sm:$0xff] }
 0x3da   : > { %7754 = vmatpush2.bf16.msra.mxu0 %v9348_v6  ;;  %v854_v6 = vld [vmem:[%s11101_s12 + $0xc18] sm:$0xff] }
 0x3db   : > { %7809 = vmatprep.subr.bf16.mxu0 %v9597_v15  ;;  %v9548_v15 = vcombine.low %v734_v32, %v738_v48  ;;  %v818_v26 = vld [vmem:[%s11101_s12 + $0xaf8] sm:$0xff] }
 0x3dc   : > { %7797 = vmatpush2.bf16.msra.mxu1 %v9476_v14  ;;  %v858_v14 = vld [vmem:[%s11101_s12 + $0xc38] sm:$0xff]  ;;  %v9629_v32 = vcombine.high %v814_v58, %v818_v26 }
 0x3dd   : > { %7852 = vmatprep.subr.bf16.mxu1 %v9725_v60  ;;  %7756 = vmatmul.mubr.bf16.vlgmr.msra.gmra.mxu0 %v11222_v23  ;;  %v886_v23 = vld [vmem:[%s11101_s12 + $0xd18] sm:$0xff]  ;;  %v9676_v60 = vcombine.low %v862_v7, %v866_v40  ;;  %v9669_v1 = vcombine.high %v854_v6, %v858_v14 }
 0x3de   : > { %7810 = vmatpush1.bf16.msra.mxu0 %v9596_v43  ;;  %7841 = vmatprep.mubr.bf16.mxu0 %v11245_v34  ;;  %v9701_v45 = vcombine.high %v886_v23, %v890_v39  ;;  %v882_v34 = vld [vmem:[%s11101_s12 + $0xcf8] sm:$0xff] }
 0x3df   : > { %7799 = vmatmul.mubr.bf16.vlgmr.msra.gmra.mxu1 %v11233_v27  ;;  %7811 = vmatprep.subr.bf16.mxu0 %v9589_v19  ;;  %v9580_v27 = vcombine.low %v766_v22, %v770_v57  ;;  %v9693_v4 = vcombine.high %v878_v46, %v882_v34  ;;  %v9692_v12 = vcombine.low %v878_v46, %v882_v34  ;;  %v974_v43 = vld [vmem:[%s11101_s12 + $0xfd8] sm:$0xff] }
 0x3e0   : > { %7853 = vmatpush1.bf16.msra.mxu1 %v9724_v5  ;;  %7884 = vmatprep.mubr.bf16.mxu1 %v11252_v35  ;;  %v9700_v35 = vcombine.low %v886_v23, %v890_v39  ;;  %v978_v5 = vld [vmem:[%s11101_s12 + $0xff8] sm:$0xff]  ;;  %v9540_v19 = vcombine.low %v726_v30, %v730_v11  ;;  %v9661_v22 = vcombine.high %v846_v33, %v850_v9 }
 0x3e1   : > { %7854 = vmatprep.subr.bf16.mxu1 %v9717_v31  ;;  %v9668_v31 = vcombine.low %v854_v6, %v858_v14  ;;  %v9789_v57 = vcombine.high %v974_v43, %v978_v5  ;;  %v830_v23 = vld [vmem:[%s11101_s12 + $0xb58] sm:$0xff] }
 0x3e2   : > { %7812 = vmatpush1.bf16.msra.mxu0 %v9588_v20  ;;  %v966_v20 = vld [vmem:[%s11101_s12 + $0xf98] sm:$0xff] }
 0x3e3   : > { %7813 = vmatprep.subr.bf16.mxu0 %v9581_v62  ;;  %v9660_v62 = vcombine.low %v846_v33, %v850_v9  ;;  %v834_v39 = vld [vmem:[%s11101_s12 + $0xb78] sm:$0xff] }
 0x3e4   : > { %7855 = vmatpush1.bf16.msra.mxu1 %v9716_v53  ;;  %v970_v53 = vld [vmem:[%s11101_s12 + $0xfb8] sm:$0xff]  ;;  %v9645_v52 = vcombine.high %v830_v23, %v834_v39 }
 0x3e5   : > { %7856 = vmatprep.subr.bf16.mxu1 %v9709_v24  ;;  %v9788_v24 = vcombine.low %v974_v43, %v978_v5  ;;  %v9781_v42 = vcombine.high %v966_v20, %v970_v53  ;;  %v822_v46 = vld [vmem:[%s11101_s12 + $0xb18] sm:$0xff] }
 0x3e6   : > { %7814 = vmatpush1.bf16.msra.mxu0 %v9580_v27  ;;  %v958_v27 = vld [vmem:[%s11101_s12 + $0xf58] sm:$0xff] }
 0x3e7   : > { %7815 = vmatprep.subr.bf16.mxu0 %v9573_v44  ;;  %v9652_v44 = vcombine.low %v838_v50, %v842_v59  ;;  %v826_v34 = vld [vmem:[%s11101_s12 + $0xb38] sm:$0xff] }
 0x3e8   : > { %7857 = vmatpush1.bf16.msra.mxu1 %v9708_v41  ;;  %v962_v41 = vld [vmem:[%s11101_s12 + $0xf78] sm:$0xff]  ;;  %v9637_v49 = vcombine.high %v822_v46, %v826_v34 }
 0x3e9   : > { %7858 = vmatprep.subr.bf16.mxu1 %v9701_v45  ;;  %v9780_v45 = vcombine.low %v966_v20, %v970_v53  ;;  %v9773_v28 = vcombine.high %v958_v27, %v962_v41  ;;  %v806_v7 = vld [vmem:[%s11101_s12 + $0xa98] sm:$0xff] }
 0x3ea   : > { %7816 = vmatpush1.bf16.msra.mxu0 %v9572_v25  ;;  %v950_v25 = vld [vmem:[%s11101_s12 + $0xf18] sm:$0xff] }
 0x3eb   : > { %7817 = vmatprep.subr.bf16.mxu0 %v9565_v61  ;;  %v9644_v61 = vcombine.low %v830_v23, %v834_v39  ;;  %v810_v40 = vld [vmem:[%s11101_s12 + $0xab8] sm:$0xff] }
 0x3ec   : > { %7859 = vmatpush1.bf16.msra.mxu1 %v9700_v35  ;;  %v954_v35 = vld [vmem:[%s11101_s12 + $0xf38] sm:$0xff]  ;;  %v9621_v30 = vcombine.high %v806_v7, %v810_v40 }
 0x3ed   : > { %7860 = vmatprep.subr.bf16.mxu1 %v9693_v4  ;;  %v9772_v4 = vcombine.low %v958_v27, %v962_v41  ;;  %v9765_v54 = vcombine.high %v950_v25, %v954_v35  ;;  %v798_v6 = vld [vmem:[%s11101_s12 + $0xa58] sm:$0xff] }
 0x3ee   : > { %7818 = vmatpush1.bf16.msra.mxu0 %v9564_v29  ;;  %v942_v29 = vld [vmem:[%s11101_s12 + $0xed8] sm:$0xff] }
 0x3ef   : > { %7819 = vmatprep.subr.bf16.mxu0 %v9557_v2  ;;  %v9636_v2 = vcombine.low %v822_v46, %v826_v34  ;;  %v802_v14 = vld [vmem:[%s11101_s12 + $0xa78] sm:$0xff] }
 0x3f0   : > { %7861 = vmatpush1.bf16.msra.mxu1 %v9692_v12  ;;  %v946_v12 = vld [vmem:[%s11101_s12 + $0xef8] sm:$0xff]  ;;  %v9613_v33 = vcombine.high %v798_v6, %v802_v14 }
 0x3f1   : > { %7862 = vmatprep.subr.bf16.mxu1 %v9685_v16  ;;  %v9764_v16 = vcombine.low %v950_v25, %v954_v35  ;;  %v9757_v48 = vcombine.high %v942_v29, %v946_v12  ;;  %v790_v43 = vld [vmem:[%s11101_s12 + $0xa18] sm:$0xff] }
 0x3f2   : > { %7820 = vmatpush1.bf16.msra.mxu0 %v9556_v3  ;;  %v934_v3 = vld [vmem:[%s11101_s12 + $0xe98] sm:$0xff] }
 0x3f3   : > { %7821 = vmatprep.subr.bf16.mxu0 %v9549_v17  ;;  %v9628_v17 = vcombine.low %v814_v58, %v818_v26  ;;  %v794_v5 = vld [vmem:[%s11101_s12 + $0xa38] sm:$0xff] }
 0x3f4   : > { %7863 = vmatpush1.bf16.msra.mxu1 %v9684_v8  ;;  %v938_v8 = vld [vmem:[%s11101_s12 + $0xeb8] sm:$0xff]  ;;  %v9605_v50 = vcombine.high %v790_v43, %v794_v5 }
 0x3f5   : > { %7864 = vmatprep.subr.bf16.mxu1 %v9677_v55  ;;  %v9756_v55 = vcombine.low %v942_v29, %v946_v12  ;;  %v9749_v11 = vcombine.high %v934_v3, %v938_v8  ;;  %v1038_v20 = vld [vmem:[%s11101_s12 + $0x11d8] sm:$0xff] }
 0x3f6   : > { %7822 = vmatpush1.bf16.msra.mxu0 %v9548_v15  ;;  %v926_v15 = vld [vmem:[%s11101_s12 + $0xe58] sm:$0xff] }
 0x3f7   : > { %7823 = vmatprep.subr.bf16.mxu0 %v9541_v18  ;;  %v9620_v18 = vcombine.low %v806_v7, %v810_v40  ;;  %v1042_v53 = vld [vmem:[%s11101_s12 + $0x11f8] sm:$0xff] }
 0x3f8   : > { %7865 = vmatpush1.bf16.msra.mxu1 %v9676_v60  ;;  %v930_v60 = vld [vmem:[%s11101_s12 + $0xe78] sm:$0xff]  ;;  %v9853_v23 = vcombine.high %v1038_v20, %v1042_v53 }
 0x3f9   : > { %7866 = vmatprep.subr.bf16.mxu1 %v9669_v1  ;;  %v9748_v1 = vcombine.low %v934_v3, %v938_v8  ;;  %v9741_v9 = vcombine.high %v926_v15, %v930_v60  ;;  %v1030_v27 = vld [vmem:[%s11101_s12 + $0x1198] sm:$0xff] }
 0x3fa   : > { %7824 = vmatpush1.bf16.msra.mxu0 %v9540_v19  ;;  %v918_v19 = vld [vmem:[%s11101_s12 + $0xe18] sm:$0xff] }
 0x3fb   : > { %7825 = vmatprep.subr.bf16.mxu0 %v9661_v22  ;;  %v9612_v22 = vcombine.low %v798_v6, %v802_v14  ;;  %v1034_v41 = vld [vmem:[%s11101_s12 + $0x11b8] sm:$0xff] }
 0x3fc   : > { %7867 = vmatpush1.bf16.msra.mxu1 %v9668_v31  ;;  %v922_v31 = vld [vmem:[%s11101_s12 + $0xe38] sm:$0xff]  ;;  %v9845_v46 = vcombine.high %v1030_v27, %v1034_v41 }
 0x3fd   : > { %7868 = vmatprep.subr.bf16.mxu1 %v9789_v57  ;;  %v9740_v57 = vcombine.low %v926_v15, %v930_v60  ;;  %v9733_v59 = vcombine.high %v918_v19, %v922_v31  ;;  %v1022_v25 = vld [vmem:[%s11101_s12 + $0x1158] sm:$0xff] }
 0x3fe   : > { %7826 = vmatpush2.bf16.msra.mxu0 %v9660_v62  ;;  %v1166_v62 = vld [vmem:[%s11101_s12 + $0x15d8] sm:$0xff] }
 0x3ff   : > { %7827 = vmatprep.subr.bf16.mxu0 %v9653_v38  ;;  %v9604_v38 = vcombine.low %v790_v43, %v794_v5  ;;  %v1026_v35 = vld [vmem:[%s11101_s12 + $0x1178] sm:$0xff] }
 0x400   : > { %7869 = vmatpush2.bf16.msra.mxu1 %v9788_v24  ;;  %v1170_v24 = vld [vmem:[%s11101_s12 + $0x15f8] sm:$0xff]  ;;  %v9837_v58 = vcombine.high %v1022_v25, %v1026_v35 }
 0x401   : > { %7870 = vmatprep.subr.bf16.mxu1 %v9781_v42  ;;  %v9732_v42 = vcombine.low %v918_v19, %v922_v31  ;;  %v9981_v39 = vcombine.high %v1166_v62, %v1170_v24  ;;  %v1014_v29 = vld [vmem:[%s11101_s12 + $0x1118] sm:$0xff] }
 0x402   : > { %7828 = vmatpush2.bf16.msra.mxu0 %v9652_v44  ;;  %v1158_v44 = vld [vmem:[%s11101_s12 + $0x1598] sm:$0xff] }
 0x403   : > { %7829 = vmatprep.subr.bf16.mxu0 %v9645_v52  ;;  %v9852_v52 = vcombine.low %v1038_v20, %v1042_v53  ;;  %v1018_v12 = vld [vmem:[%s11101_s12 + $0x1138] sm:$0xff] }
 0x404   : > { %7871 = vmatpush2.bf16.msra.mxu1 %v9780_v45  ;;  %v1162_v45 = vld [vmem:[%s11101_s12 + $0x15b8] sm:$0xff]  ;;  %v9828_v8 = vcombine.low %v1014_v29, %v1018_v12 }
 0x405   : > { %7872 = vmatprep.subr.bf16.mxu1 %v9773_v28  ;;  %v9980_v28 = vcombine.low %v1166_v62, %v1170_v24  ;;  %v9973_v34 = vcombine.high %v1158_v44, %v1162_v45  ;;  %v1006_v7 = vld [vmem:[%s11101_s12 + $0x10d8] sm:$0xff]  ;;  %v12305_v24 = vpop.f32.mrf.mxu0 }
 0x406   : > { %7830 = vmatpush2.bf16.msra.mxu0 %v9644_v61  ;;  %v1150_v61 = vld [vmem:[%s11101_s12 + $0x1558] sm:$0xff] }
 0x407   : > { %7831 = vmatprep.subr.bf16.mxu0 %v9637_v49  ;;  %v9844_v49 = vcombine.low %v1030_v27, %v1034_v41  ;;  %v1010_v40 = vld [vmem:[%s11101_s12 + $0x10f8] sm:$0xff] }
 0x408   : > { %7873 = vmatpush2.bf16.msra.mxu1 %v9772_v4  ;;  %v1154_v4 = vld [vmem:[%s11101_s12 + $0x1578] sm:$0xff]  ;;  %v9820_v15 = vcombine.low %v1006_v7, %v1010_v40 }
 0x409   : > { %7874 = vmatprep.subr.bf16.mxu1 %v9765_v54  ;;  %v9972_v54 = vcombine.low %v1158_v44, %v1162_v45  ;;  %v9965_v26 = vcombine.high %v1150_v61, %v1154_v4  ;;  %v1134_v3 = vld [vmem:[%s11101_s12 + $0x14d8] sm:$0xff] }
 0x40a   : > { %7832 = vmatpush2.bf16.msra.mxu0 %v9636_v2  ;;  %v1146_v2 = vld [vmem:[%s11101_s12 + $0x1538] sm:$0xff] }
 0x40b   : > { %7833 = vmatprep.subr.bf16.mxu0 %v9629_v32  ;;  %v9829_v32 = vcombine.high %v1014_v29, %v1018_v12  ;;  %v1126_v6 = vld [vmem:[%s11101_s12 + $0x1498] sm:$0xff] }
 0x40c   : > { %7875 = vmatpush2.bf16.msra.mxu1 %v9764_v16  ;;  %v9964_v16 = vcombine.low %v1150_v61, %v1154_v4  ;;  %v1130_v14 = vld [vmem:[%s11101_s12 + $0x14b8] sm:$0xff] }
 0x40d   : > { %7876 = vmatprep.subr.bf16.mxu1 %v9757_v48  ;;  %v1118_v43 = vld [vmem:[%s11101_s12 + $0x1458] sm:$0xff]  ;;  %v9940_v31 = vcombine.low %v1126_v6, %v1130_v14 }
 0x40e   : > { %7834 = vmatpush2.bf16.msra.mxu0 %v9628_v17  ;;  %v9821_v17 = vcombine.high %v1006_v7, %v1010_v40  ;;  %v1122_v5 = vld [vmem:[%s11101_s12 + $0x1478] sm:$0xff] }
 0x40f   : > { %7835 = vmatprep.subr.bf16.mxu0 %v9621_v30  ;;  %v998_v30 = vld [vmem:[%s11101_s12 + $0x1098] sm:$0xff] }
 0x410   : > { %7877 = vmatpush2.bf16.msra.mxu1 %v9756_v55  ;;  %v1110_v20 = vld [vmem:[%s11101_s12 + $0x1418] sm:$0xff] }
 0x411   : > { %7878 = vmatprep.subr.bf16.mxu1 %v9749_v11  ;;  %v1002_v11 = vld [vmem:[%s11101_s12 + $0x10b8] sm:$0xff] }
 0x412   : > { %7836 = vmatpush2.bf16.msra.mxu0 %v9620_v18  ;;  %v9813_v18 = vcombine.high %v998_v30, %v1002_v11  ;;  %v9812_v19 = vcombine.low %v998_v30, %v1002_v11  ;;  %v1114_v53 = vld [vmem:[%s11101_s12 + $0x1438] sm:$0xff] }
 0x413   : > { %7837 = vmatprep.subr.bf16.mxu0 %v9613_v33  ;;  %v990_v33 = vld [vmem:[%s11101_s12 + $0x1058] sm:$0xff] }
 0x414   : > { %7879 = vmatpush2.bf16.msra.mxu1 %v9748_v1  ;;  %v9941_v1 = vcombine.high %v1126_v6, %v1130_v14  ;;  %v1102_v27 = vld [vmem:[%s11101_s12 + $0x13d8] sm:$0xff] }
 0x415   : > { %7880 = vmatprep.subr.bf16.mxu1 %v9741_v9  ;;  %v994_v9 = vld [vmem:[%s11101_s12 + $0x1078] sm:$0xff] }
 0x416   : > { %7838 = vmatpush2.bf16.msra.mxu0 %v9612_v22  ;;  %v9805_v22 = vcombine.high %v990_v33, %v994_v9  ;;  %v9804_v62 = vcombine.low %v990_v33, %v994_v9  ;;  %v1106_v41 = vld [vmem:[%s11101_s12 + $0x13f8] sm:$0xff] }
 0x417   : > { %7839 = vmatprep.subr.bf16.mxu0 %v9605_v50  ;;  %v982_v50 = vld [vmem:[%s11101_s12 + $0x1018] sm:$0xff] }
 0x418   : > { %7881 = vmatpush2.bf16.msra.mxu1 %v9740_v57  ;;  %v9933_v57 = vcombine.high %v1118_v43, %v1122_v5  ;;  %v1230_v44 = vld [vmem:[%s11101_s12 + $0x17d8] sm:$0xff] }
 0x419   : > { %7882 = vmatprep.subr.bf16.mxu1 %v9733_v59  ;;  %v986_v59 = vld [vmem:[%s11101_s12 + $0x1038] sm:$0xff] }
 0x41a   : > { %7840 = vmatpush2.bf16.msra.mxu0 %v9604_v38  ;;  %v9932_v38 = vcombine.low %v1118_v43, %v1122_v5  ;;  %v1234_v45 = vld [vmem:[%s11101_s12 + $0x17f8] sm:$0xff] }
 0x41b   : > { %7895 = vmatprep.subr.bf16.mxu0 %v9853_v23  ;;  %v12307_v23 = vpop.f32.mrf.mxu1  ;;  %v1094_v61 = vld [vmem:[%s11101_s12 + $0x1398] sm:$0xff]  ;;  %v10044_v29 = vcombine.low %v1230_v44, %v1234_v45 }
 0x41c   : > { %7883 = vmatpush2.bf16.msra.mxu1 %v9732_v42  ;;  %v9797_v42 = vcombine.high %v982_v50, %v986_v59  ;;  %v1098_v4 = vld [vmem:[%s11101_s12 + $0x13b8] sm:$0xff] }
 0x41d   : > { %7938 = vmatprep.subr.bf16.mxu1 %v9981_v39  ;;  %7842 = vmatmul.mubr.bf16.vlgmr.msra.gmra.mxu0 %v11318_v47  ;;  %v1142_v47 = vld [vmem:[%s11101_s12 + $0x1518] sm:$0xff]  ;;  %v9925_v39 = vcombine.high %v1110_v20, %v1114_v53  ;;  %v9909_v12 = vcombine.high %v1094_v61, %v1098_v4  ;;  %v9908_v7 = vcombine.low %v1094_v61, %v1098_v4 }
 0x41e   : > { %7896 = vmatpush1.bf16.msra.mxu0 %v9852_v52  ;;  %7927 = vmatprep.mubr.bf16.mxu0 %v11341_v63  ;;  %v9957_v48 = vcombine.high %v1142_v47, %v1146_v2  ;;  %v1138_v63 = vld [vmem:[%s11101_s12 + $0x14f8] sm:$0xff]  ;;  %v9796_v52 = vcombine.low %v982_v50, %v986_v59 }
 0x41f   : > { %7885 = vmatmul.mubr.bf16.vlgmr.msra.gmra.mxu1 %v11329_v51  ;;  %7897 = vmatprep.subr.bf16.mxu0 %v9845_v46  ;;  %v9836_v51 = vcombine.low %v1022_v25, %v1026_v35  ;;  %v9949_v55 = vcombine.high %v1134_v3, %v1138_v63  ;;  %v9948_v60 = vcombine.low %v1134_v3, %v1138_v63  ;;  %v12315_v25 = vpop.f32.mrf.mxu1  ;;  %v1206_v11 = vld [vmem:[%s11101_s12 + $0x1718] sm:$0xff] }
 0x420   : > { %7939 = vmatpush1.bf16.msra.mxu1 %v9980_v28  ;;  %7970 = vmatprep.mubr.bf16.mxu1 %v11348_v0  ;;  %v9956_v0 = vcombine.low %v1142_v47, %v1146_v2  ;;  %v12313_v28 = vpop.f32.mrf.mxu0  ;;  %v9924_v46 = vcombine.low %v1110_v20, %v1114_v53  ;;  %v10045_v35 = vcombine.high %v1230_v44, %v1234_v45  ;;  %v1210_v6 = vld [vmem:[%s11101_s12 + $0x1738] sm:$0xff] }
 0x421   : > { %7940 = vmatprep.subr.bf16.mxu1 %v9973_v34  ;;  %v9917_v34 = vcombine.high %v1102_v27, %v1106_v41  ;;  %v12323_v47 = vpop.f32.mrf.mxu1  ;;  %v1070_v33 = vld [vmem:[%s11101_s12 + $0x12d8] sm:$0xff] }
 0x422   : > { %7898 = vmatpush1.bf16.msra.mxu0 %v9844_v49  ;;  %v1222_v49 = vld [vmem:[%s11101_s12 + $0x1798] sm:$0xff] }
 0x423   : > { %7899 = vmatprep.subr.bf16.mxu0 %v9837_v58  ;;  %v9916_v58 = vcombine.low %v1102_v27, %v1106_v41  ;;  %v1074_v9 = vld [vmem:[%s11101_s12 + $0x12f8] sm:$0xff] }
 0x424   : > { %7941 = vmatpush1.bf16.msra.mxu1 %v9972_v54  ;;  %v1226_v54 = vld [vmem:[%s11101_s12 + $0x17b8] sm:$0xff]  ;;  %v9885_v50 = vcombine.high %v1070_v33, %v1074_v9  ;;  %v9884_v27 = vcombine.low %v1070_v33, %v1074_v9 }
 0x425   : > { %7942 = vmatprep.subr.bf16.mxu1 %v9965_v26  ;;  %v12321_v26 = vpop.f32.mrf.mxu0  ;;  %v10037_v2 = vcombine.high %v1222_v49, %v1226_v54  ;;  %v10036_v3 = vcombine.low %v1222_v49, %v1226_v54  ;;  %v1198_v5 = vld [vmem:[%s11101_s12 + $0x16d8] sm:$0xff] }
 0x426   : > { %7900 = vmatpush1.bf16.msra.mxu0 %v9836_v51  ;;  %v1086_v51 = vld [vmem:[%s11101_s12 + $0x1358] sm:$0xff] }
 0x427   : > { %7901 = vmatprep.subr.bf16.mxu0 %v9829_v32  ;;  %v1214_v32 = vld [vmem:[%s11101_s12 + $0x1758] sm:$0xff]  ;;  %v12329_v40 = vpop.f32.mrf.mxu0 }
 0x428   : > { %7943 = vmatpush1.bf16.msra.mxu1 %v9964_v16  ;;  %v1090_v16 = vld [vmem:[%s11101_s12 + $0x1378] sm:$0xff] }
 0x429   : > { %7944 = vmatprep.subr.bf16.mxu1 %v9957_v48  ;;  %v1218_v48 = vld [vmem:[%s11101_s12 + $0x1778] sm:$0xff]  ;;  %v9901_v63 = vcombine.high %v1086_v51, %v1090_v16  ;;  %v7499_v30 = vpop.f32.mrf.mxu0 }
 0x42a   : > { %7902 = vmatpush1.bf16.msra.mxu0 %v9828_v8  ;;  %v12331_v8 = vpop.f32.mrf.mxu1  ;;  %v1062_v20 = vld [vmem:[%s11101_s12 + $0x1298] sm:$0xff] }
 0x42b   : > { %7903 = vmatprep.subr.bf16.mxu0 %v9821_v17  ;;  %v1078_v17 = vld [vmem:[%s11101_s12 + $0x1318] sm:$0xff]  ;;  %v7501_v43 = vpop.f32.mrf.mxu0 }
 0x42c   : > { %7945 = vmatpush1.bf16.msra.mxu1 %v9956_v0  ;;  %v10029_v0 = vcombine.high %v1214_v32, %v1218_v48  ;;  %v12337_v14 = vpop.f32.mrf.mxu1  ;;  %v1066_v53 = vld [vmem:[%s11101_s12 + $0x12b8] sm:$0xff] }
 0x42d   : > { %7946 = vmatprep.subr.bf16.mxu1 %v9949_v55  ;;  %v1082_v55 = vld [vmem:[%s11101_s12 + $0x1338] sm:$0xff]  ;;  %v9877_v44 = vcombine.high %v1062_v20, %v1066_v53  ;;  %v9876_v49 = vcombine.low %v1062_v20, %v1066_v53 }
 0x42e   : > { %7904 = vmatpush1.bf16.msra.mxu0 %v9820_v15  ;;  %v9900_v15 = vcombine.low %v1086_v51, %v1090_v16  ;;  %v1186_v61 = vld [vmem:[%s11101_s12 + $0x1678] sm:$0xff] }
 0x42f   : > { %7905 = vmatprep.subr.bf16.mxu0 %v9813_v18  ;;  %v9893_v18 = vcombine.high %v1078_v17, %v1082_v55  ;;  %v1046_v16 = vld [vmem:[%s11101_s12 + $0x1218] sm:$0xff] }
 0x430   : > { %7947 = vmatpush1.bf16.msra.mxu1 %v9948_v60  ;;  %v10028_v60 = vcombine.low %v1214_v32, %v1218_v48  ;;  %v1050_v32 = vld [vmem:[%s11101_s12 + $0x1238] sm:$0xff] }
 0x431   : > { %7948 = vmatprep.subr.bf16.mxu1 %v9941_v1  ;;  %v10021_v1 = vcombine.high %v1206_v11, %v1210_v6  ;;  %v1174_v48 = vld [vmem:[%s11101_s12 + $0x1618] sm:$0xff] }
 0x432   : > { %7906 = vmatpush1.bf16.msra.mxu0 %v9812_v19  ;;  %v1202_v19 = vld [vmem:[%s11101_s12 + $0x16f8] sm:$0xff] }
 0x433   : > { %7907 = vmatprep.subr.bf16.mxu0 %v9805_v22  ;;  %v9892_v22 = vcombine.low %v1078_v17, %v1082_v55  ;;  %v10013_v59 = vcombine.high %v1198_v5, %v1202_v19  ;;  %v10012_v41 = vcombine.low %v1198_v5, %v1202_v19  ;;  %v7461_v55 = vadd.f32 %v12323_v47, %v12321_v26 }
 0x434   : > { %7949 = vmatpush1.bf16.msra.mxu1 %v9940_v31  ;;  %v12343_v31 = vpop.f32.mrf.mxu1  ;;  %v9860_v26 = vcombine.low %v1046_v16, %v1050_v32 }
 0x435   : > { %7950 = vmatprep.subr.bf16.mxu1 %v9933_v57  ;;  %v10020_v57 = vcombine.low %v1206_v11, %v1210_v6 }
 0x436   : > { %7908 = vmatpush1.bf16.msra.mxu0 %v9804_v62  ;;  %v7503_v62 = vpop.f32.mrf.mxu0 }
 0x437   : > { %7909 = vmatprep.subr.bf16.mxu0 %v9797_v42  ;;  %v1194_v42 = vld [vmem:[%s11101_s12 + $0x16b8] sm:$0xff]  ;;  %v7504_v33 = vadd.f32 %v7503_v62, %v7461_v55 }
 0x438   : > { %7951 = vmatpush1.bf16.msra.mxu1 %v9932_v38  ;;  %v1190_v38 = vld [vmem:[%s11101_s12 + $0x1698] sm:$0xff] }
 0x439   : > { %7952 = vmatprep.subr.bf16.mxu1 %v9925_v39  ;;  %v12349_v39 = vpop.f32.mrf.mxu1  ;;  %v10005_v45 = vcombine.high %v1190_v38, %v1194_v42  ;;  %v1402_v55 = vld [vmem:[%s11101_s12 + $0x1d38] sm:$0xff] }
 0x43a   : > { %7910 = vmatpush1.bf16.msra.mxu0 %v9796_v52  ;;  %v1054_v52 = vld [vmem:[%s11101_s12 + $0x1258] sm:$0xff]  ;;  %v7547_v20 = vadd.f32 %v12349_v39, %v7504_v33 }
 0x43b   : > { %7911 = vmatprep.subr.bf16.mxu0 %v9917_v34  ;;  %v7505_v34 = vpop.f32.mrf.mxu0  ;;  %v12355_v4 = vpop.f32.mrf.mxu1 }
 0x43c   : > { %7953 = vmatpush1.bf16.msra.mxu1 %v9924_v46  ;;  %v1058_v46 = vld [vmem:[%s11101_s12 + $0x1278] sm:$0xff] }
 0x43d   : > { %7954 = vmatprep.subr.bf16.mxu1 %v10045_v35  ;;  %v1182_v35 = vld [vmem:[%s11101_s12 + $0x1658] sm:$0xff]  ;;  %v7585_v54 = vpop.f32.mrf.mxu0 }
 0x43e   : > { %7912 = vmatpush2.bf16.msra.mxu0 %v9916_v58  ;;  %v10004_v58 = vcombine.low %v1190_v38, %v1194_v42  ;;  %v9997_v51 = vcombine.high %v1182_v35, %v1186_v61 }
 0x43f   : > { %7913 = vmatprep.subr.bf16.mxu0 %v9909_v12  ;;  %v7457_v12 = vadd.f32 %v12307_v23, %v12305_v24  ;;  %v7587_v17 = vpop.f32.mrf.mxu0  ;;  %v9996_v24 = vcombine.low %v1182_v35, %v1186_v61  ;;  %v9861_v23 = vcombine.high %v1046_v16, %v1050_v32  ;;  %v1410_v35 = vld [vmem:[%s11101_s12 + $0x1d78] sm:$0xff] }
 0x440   : > { %7955 = vmatpush2.bf16.msra.mxu1 %v10044_v29  ;;  %v9869_v29 = vcombine.high %v1054_v52, %v1058_v46 }
 0x441   : > { %7956 = vmatprep.subr.bf16.mxu1 %v10037_v2  ;;  %v7628_v2 = vpop.f32.mrf.mxu1  ;;  %v7589_v47 = vpop.f32.mrf.mxu0 }
 0x442   : > { %7914 = vmatpush2.bf16.msra.mxu0 %v9908_v7  ;;  %v1178_v7 = vld [vmem:[%s11101_s12 + $0x1638] sm:$0xff] }
 0x443   : > { %7915 = vmatprep.subr.bf16.mxu0 %v9901_v63  ;;  %v7500_v63 = vadd.f32 %v7499_v30, %v7457_v12  ;;  %v7630_v6 = vpop.f32.mrf.mxu1  ;;  %v7463_v30 = vadd.f32 %v12331_v8, %v12329_v40  ;;  %v9988_v9 = vcombine.low %v1174_v48, %v1178_v7  ;;  %v1286_v8 = vld [vmem:[%s11101_s12 + $0x1998] sm:$0xff]  ;;  %v7591_v38 = vpop.f32.mrf.mxu0 }
 0x444   : > { %7957 = vmatpush2.bf16.msra.mxu1 %v10036_v3  ;;  %v7459_v3 = vadd.f32 %v12315_v25, %v12313_v28  ;;  %v1422_v28 = vld [vmem:[%s11101_s12 + $0x1dd8] sm:$0xff] }
 0x445   : > { %7958 = vmatprep.subr.bf16.mxu1 %v10029_v0  ;;  %v9868_v0 = vcombine.low %v1054_v52, %v1058_v46  ;;  %v1426_v25 = vld [vmem:[%s11101_s12 + $0x1df8] sm:$0xff]  ;;  %v7506_v19 = vadd.f32 %v7505_v34, %v7463_v30 }
 0x446   : > { %7916 = vmatpush2.bf16.msra.mxu0 %v9900_v15  ;;  %v7502_v11 = vadd.f32 %v7501_v43, %v7459_v3  ;;  %v9989_v15 = vcombine.high %v1174_v48, %v1178_v7  ;;  %v10237_v40 = vcombine.high %v1422_v28, %v1426_v25  ;;  %v1282_v46 = vld [vmem:[%s11101_s12 + $0x1978] sm:$0xff] }
 0x447   : > { %7917 = vmatprep.subr.bf16.mxu0 %v9893_v18  ;;  %v1298_v18 = vld [vmem:[%s11101_s12 + $0x19f8] sm:$0xff] }
 0x448   : > { %7959 = vmatpush2.bf16.msra.mxu1 %v10028_v60  ;;  %v1294_v60 = vld [vmem:[%s11101_s12 + $0x19d8] sm:$0xff]  ;;  %v7545_v5 = vadd.f32 %v12343_v31, %v7502_v11  ;;  %v10236_v31 = vcombine.low %v1422_v28, %v1426_v25  ;;  %v463_v28 = vld [vmem:[#allocation2 + $0x60] sm:$0xff] }
 0x449   : > { %7960 = vmatprep.subr.bf16.mxu1 %v10021_v1  ;;  %v7543_v1 = vadd.f32 %v12337_v14, %v7500_v63  ;;  %v10109_v43 = vcombine.high %v1294_v60, %v1298_v18  ;;  %v1290_v14 = vld [vmem:[%s11101_s12 + $0x19b8] sm:$0xff]  ;;  %v10108_v62 = vcombine.low %v1294_v60, %v1298_v18 }
 0x44a   : > { %7918 = vmatpush2.bf16.msra.mxu0 %v9892_v22  ;;  %v7588_v53 = vadd.f32 %v7587_v17, %v7545_v5  ;;  %v10101_v42 = vcombine.high %v1286_v8, %v1290_v14  ;;  %v1406_v34 = vld [vmem:[%s11101_s12 + $0x1d58] sm:$0xff] }
 0x44b   : > { %7919 = vmatprep.subr.bf16.mxu0 %v9885_v50  ;;  %v7586_v22 = vadd.f32 %v7585_v54, %v7543_v1  ;;  %v1414_v50 = vld [vmem:[%s11101_s12 + $0x1d98] sm:$0xff]  ;;  %v10220_v25 = vcombine.low %v1406_v34, %v1410_v35 }
 0x44c   : > { %7961 = vmatpush2.bf16.msra.mxu1 %v10020_v57  ;;  %v7632_v57 = vpop.f32.mrf.mxu1  ;;  %v7631_v54 = vadd.f32 %v7630_v6, %v7588_v53  ;;  %v1270_v63 = vld [vmem:[%s11101_s12 + $0x1918] sm:$0xff] }
 0x44d   : > { %7962 = vmatprep.subr.bf16.mxu1 %v10013_v59  ;;  %v1418_v59 = vld [vmem:[%s11101_s12 + $0x1db8] sm:$0xff] }
 0x44e   : > { %7920 = vmatpush2.bf16.msra.mxu0 %v9884_v27  ;;  %v12381_v27 = vld [vmem:[%s11101_s12 + $0x1958] sm:$0xff]  ;;  %v7634_v52 = vpop.f32.mrf.mxu1  ;;  %v10229_v39 = vcombine.high %v1414_v50, %v1418_v59 }
 0x44f   : > { %7921 = vmatprep.subr.bf16.mxu0 %v9877_v44  ;;  %v7629_v44 = vadd.f32 %v7628_v2, %v7586_v22  ;;  %v10093_v16 = vcombine.high %v12381_v27, %v1282_v46  ;;  %v1394_v22 = vld [vmem:[%s11101_s12 + $0x1cf8] sm:$0xff] }
 0x450   : > { %7963 = vmatpush2.bf16.msra.mxu1 %v10012_v41  ;;  %v7549_v41 = vadd.f32 %v12355_v4, %v7506_v19  ;;  %v455_v4 = vld [vmem:[#allocation2 + $0x50] sm:$0xff]  ;;  %v1390_v19 = vld [vmem:[%s11101_s12 + $0x1cd8] sm:$0xff] }
 0x451   : > { %7964 = vmatprep.subr.bf16.mxu1 %v10005_v45  ;;  %v7590_v45 = vadd.f32 %v7589_v47, %v7547_v20  ;;  %v1262_v47 = vld [vmem:[%s11101_s12 + $0x18d8] sm:$0xff]  ;;  %v10205_v20 = vcombine.high %v1390_v19, %v1394_v22 }
 0x452   : > { %7922 = vmatpush2.bf16.msra.mxu0 %v9876_v49  ;;  %v10100_v49 = vcombine.low %v1286_v8, %v1290_v14  ;;  %v1254_v53 = vld [vmem:[%s11101_s12 + $0x1898] sm:$0xff] }
 0x453   : > { %7923 = vmatprep.subr.bf16.mxu0 %v9869_v29  ;;  %v7633_v32 = vadd.f32 %v7632_v57, %v7590_v45  ;;  %v1246_v45 = vld [vmem:[%s11101_s12 + $0x1858] sm:$0xff] }
 0x454   : > { %7965 = vmatpush2.bf16.msra.mxu1 %v10004_v58  ;;  %v7592_v58 = vadd.f32 %v7591_v38, %v7549_v41  ;;  %v1382_v38 = vld [vmem:[%s11101_s12 + $0x1c98] sm:$0xff] }
 0x455   : > { %7966 = vmatprep.subr.bf16.mxu1 %v9997_v51  ;;  %v10228_v51 = vcombine.low %v1414_v50, %v1418_v59 }
 0x456   : > { %7924 = vmatpush2.bf16.msra.mxu0 %v9868_v0  ;;  %v1274_v0 = vld [vmem:[%s11101_s12 + $0x1938] sm:$0xff]  ;;  %v7635_v11 = vadd.f32 %v7634_v52, %v7592_v58 }
 0x457   : > { %7925 = vmatprep.subr.bf16.mxu0 %v9861_v23  ;;  %v1398_v23 = vld [vmem:[%s11101_s12 + $0x1d18] sm:$0xff]  ;;  %v10085_v30 = vcombine.high %v1270_v63, %v1274_v0  ;;  %v10084_v8 = vcombine.low %v1270_v63, %v1274_v0 }
 0x458   : > { %7967 = vmatpush2.bf16.msra.mxu1 %v9996_v24  ;;  %v10092_v24 = vcombine.low %v12381_v27, %v1282_v46  ;;  %v10212_v14 = vcombine.low %v1398_v23, %v1402_v55  ;;  %v10204_v27 = vcombine.low %v1390_v19, %v1394_v22  ;;  %v1250_v52 = vld [vmem:[%s11101_s12 + $0x1878] sm:$0xff] }
 0x459   : > { %7968 = vmatprep.subr.bf16.mxu1 %v9989_v15  ;;  %v1378_v46 = vld [vmem:[%s11101_s12 + $0x1c78] sm:$0xff] }
 0x45a   : > { %7926 = vmatpush2.bf16.msra.mxu0 %v9860_v26  ;;  %v10213_v26 = vcombine.high %v1398_v23, %v1402_v55  ;;  %v1242_v58 = vld [vmem:[%s11101_s12 + $0x1838] sm:$0xff] }
 0x45b   : > { %7981 = vmatprep.subr.bf16.mxu0 %v10109_v43  ;;  %v464_v43 = vld [vmem:[#allocation2 + $0x70] sm:$0xff]  ;;  %v1478_v23 = vld [vmem:[%s11101_s12 + $0x1f98] sm:$0xff] }
 0x45c   : > { %7969 = vmatpush2.bf16.msra.mxu1 %v9988_v9  ;;  %v1266_v9 = vld [vmem:[%s11101_s12 + $0x18f8] sm:$0xff] }
 0x45d   : > { %8024 = vmatprep.subr.bf16.mxu1 %v10237_v40  ;;  %v7671_v61 = vpop.f32.mrf.mxu0  ;;  %7928 = vmatmul.mubr.bf16.vlgmr.msra.gmra.mxu0 %v11414_v21  ;;  %v10221_v21 = vcombine.high %v1406_v34, %v1410_v35  ;;  %v10077_v50 = vcombine.high %v1262_v47, %v1266_v9  ;;  %v1482_v55 = vld [vmem:[%s11101_s12 + $0x1fb8] sm:$0xff] }
 0x45e   : > { %v7672_v29 = vadd.f32 %v7671_v61, %v7629_v44  ;;  %7982 = vmatpush1.bf16.msra.mxu0 %v10108_v62  ;;  %8013 = vmatprep.mubr.bf16.mxu0 %v11437_v36  ;;  %v1258_v62 = vld [vmem:[%s11101_s12 + $0x18b8] sm:$0xff]  ;;  %v10061_v61 = vcombine.high %v1246_v45, %v1250_v52 }
 0x45f   : > { %v7714_v12 = vpop.f32.mrf.mxu1  ;;  %7971 = vmatmul.mubr.bf16.vlgmr.msra.gmra.mxu1 %v11425_v56  ;;  %v7673_v2 = vpop.f32.mrf.mxu0  ;;  %7983 = vmatprep.subr.bf16.mxu0 %v10101_v42  ;;  %v456_v56 = vld [vmem:[#allocation2 + $0x68] sm:$0xff]  ;;  %v10076_v42 = vcombine.low %v1262_v47, %v1266_v9  ;;  %v10069_v41 = vcombine.high %v1254_v53, %v1258_v62  ;;  %v10068_v34 = vcombine.low %v1254_v53, %v1258_v62  ;;  %v1338_v47 = vld [vmem:[%s11101_s12 + $0x1b38] sm:$0xff] }
 0x460   : > { %8025 = vmatpush1.bf16.msra.mxu1 %v10236_v31  ;;  %v7715_v48 = vadd.f32 %v7714_v12, %v7672_v29  ;;  %v7674_v7 = vadd.f32 %v7673_v2, %v7631_v54  ;;  %8056 = vmatprep.mubr.bf16.mxu1 %v11444_v37  ;;  %v1386_v31 = vld [vmem:[%s11101_s12 + $0x1cb8] sm:$0xff] }
 0x461   : > { %v7716_v3 = vpop.f32.mrf.mxu1  ;;  %8026 = vmatprep.subr.bf16.mxu1 %v10229_v39  ;;  %v7675_v17 = vpop.f32.mrf.mxu0  ;;  %v10197_v44 = vcombine.high %v1382_v38, %v1386_v31  ;;  %v1374_v39 = vld [vmem:[%s11101_s12 + $0x1c58] sm:$0xff]  ;;  %v10196_v35 = vcombine.low %v1382_v38, %v1386_v31 }
 0x462   : > { %v8071_v6 = vadd.f32 %v7715_v48, %v455_v4  ;;  %v7717_v15 = vadd.f32 %v7716_v3, %v7674_v7  ;;  %v7676_v60 = vadd.f32 %v7675_v17, %v7633_v32  ;;  %7984 = vmatpush1.bf16.msra.mxu0 %v10100_v49  ;;  %v10189_v49 = vcombine.high %v1374_v39, %v1378_v46  ;;  %v1238_v54 = vld [vmem:[%s11101_s12 + $0x1818] sm:$0xff] }
 0x463   : > { %v7718_v18 = vpop.f32.mrf.mxu1  ;;  %v7677_v36 = vpop.f32.mrf.mxu0  ;;  %7985 = vmatprep.subr.bf16.mxu0 %v10093_v16  ;;  %v1366_v29 = vld [vmem:[%s11101_s12 + $0x1c18] sm:$0xff]  ;;  %v10060_v4 = vcombine.low %v1246_v45, %v1250_v52  ;;  %v10188_v2 = vcombine.low %v1374_v39, %v1378_v46  ;;  %v10052_v3 = vcombine.low %v1238_v54, %v1242_v58 }
 0x464   : > { %8027 = vmatpush1.bf16.msra.mxu1 %v10228_v51  ;;  %8087 = vst [vmem:[#allocation2 + $0x50] sm:$0xff] %v8071_v6  ;;  %v8072_v1 = vadd.f32 %v7717_v15, %v456_v56  ;;  %v7719_v33 = vadd.f32 %v7718_v18, %v7676_v60  ;;  %v7678_v37 = vadd.f32 %v7677_v36, %v7635_v11  ;;  %v1370_v12 = vld [vmem:[%s11101_s12 + $0x1c38] sm:$0xff] }
 0x465   : > { %8028 = vmatprep.subr.bf16.mxu1 %v10221_v21  ;;  %v7720_v5 = vpop.f32.mrf.mxu1  ;;  %v10053_v51 = vcombine.high %v1238_v54, %v1242_v58  ;;  %v10181_v16 = vcombine.high %v1366_v29, %v1370_v12  ;;  %v1358_v21 = vld [vmem:[%s11101_s12 + $0x1bd8] sm:$0xff]  ;;  %v10180_v63 = vcombine.low %v1366_v29, %v1370_v12  ;;  %v10293_v60 = vcombine.high %v1478_v23, %v1482_v55 }
 0x466   : > { %8088 = vst [vmem:[#allocation2 + $0x68] sm:$0xff] %v8072_v1  ;;  %v8079_v57 = vadd.f32 %v7719_v33, %v463_v28  ;;  %v7721_v40 = vadd.f32 %v7720_v5, %v7678_v37  ;;  %7986 = vmatpush1.bf16.msra.mxu0 %v10092_v24  ;;  %v1362_v32 = vld [vmem:[%s11101_s12 + $0x1bf8] sm:$0xff]  ;;  %v10292_v1 = vcombine.low %v1478_v23, %v1482_v55 }
 0x467   : > { %7987 = vmatprep.subr.bf16.mxu0 %v10085_v30  ;;  %v1486_v48 = vld [vmem:[%s11101_s12 + $0x1fd8] sm:$0xff]  ;;  %v10173_v0 = vcombine.high %v1358_v21, %v1362_v32  ;;  %v10172_v11 = vcombine.low %v1358_v21, %v1362_v32 }
 0x468   : > { %8029 = vmatpush1.bf16.msra.mxu1 %v10220_v25  ;;  %8095 = vst [vmem:[#allocation2 + $0x60] sm:$0xff] %v8079_v57  ;;  %v8080_v59 = vadd.f32 %v7721_v40, %v464_v43  ;;  %v1490_v7 = vld [vmem:[%s11101_s12 + $0x1ff8] sm:$0xff] }
 0x469   : > { %8030 = vmatprep.subr.bf16.mxu1 %v10213_v26  ;;  %v10301_v56 = vcombine.high %v1486_v48, %v1490_v7  ;;  %v1350_v17 = vld [vmem:[%s11101_s12 + $0x1b98] sm:$0xff]  ;;  %v10300_v6 = vcombine.low %v1486_v48, %v1490_v7 }
 0x46a   : > { %8096 = vst [vmem:[#allocation2 + $0x70] sm:$0xff] %v8080_v59  ;;  %7988 = vmatpush1.bf16.msra.mxu0 %v10084_v8  ;;  %v1354_v24 = vld [vmem:[%s11101_s12 + $0x1bb8] sm:$0xff] }
 0x46b   : > { %7989 = vmatprep.subr.bf16.mxu0 %v10077_v50  ;;  %v10165_v15 = vcombine.high %v1350_v17, %v1354_v24  ;;  %v1342_v18 = vld [vmem:[%s11101_s12 + $0x1b58] sm:$0xff]  ;;  %v10164_v30 = vcombine.low %v1350_v17, %v1354_v24 }
 0x46c   : > { %8031 = vmatpush1.bf16.msra.mxu1 %v10212_v14  ;;  %v1346_v28 = vld [vmem:[%s11101_s12 + $0x1b78] sm:$0xff] }
 0x46d   : > { %8032 = vmatprep.subr.bf16.mxu1 %v10205_v20  ;;  %v1470_v36 = vld [vmem:[%s11101_s12 + $0x1f58] sm:$0xff]  ;;  %v10157_v33 = vcombine.high %v1342_v18, %v1346_v28  ;;  %v10156_v5 = vcombine.low %v1342_v18, %v1346_v28 }
 0x46e   : > { %7990 = vmatpush1.bf16.msra.mxu0 %v10076_v42  ;;  %v1474_v25 = vld [vmem:[%s11101_s12 + $0x1f78] sm:$0xff] }
 0x46f   : > { %7991 = vmatprep.subr.bf16.mxu0 %v10069_v41  ;;  %v10285_v37 = vcombine.high %v1470_v36, %v1474_v25  ;;  %v1334_v26 = vld [vmem:[%s11101_s12 + $0x1b18] sm:$0xff]  ;;  %v10284_v19 = vcombine.low %v1470_v36, %v1474_v25 }
 0x470   : > { %8033 = vmatpush1.bf16.msra.mxu1 %v10204_v27  ;;  %v1462_v9 = vld [vmem:[%s11101_s12 + $0x1f18] sm:$0xff]  ;;  %v10149_v22 = vcombine.high %v1334_v26, %v1338_v47  ;;  %v10148_v59 = vcombine.low %v1334_v26, %v1338_v47 }
 0x471   : > { %8034 = vmatprep.subr.bf16.mxu1 %v10197_v44  ;;  %v1466_v43 = vld [vmem:[%s11101_s12 + $0x1f38] sm:$0xff] }
 0x472   : > { %7992 = vmatpush1.bf16.msra.mxu0 %v10068_v34  ;;  %v10277_v57 = vcombine.high %v1462_v9, %v1466_v43  ;;  %v1326_v40 = vld [vmem:[%s11101_s12 + $0x1ad8] sm:$0xff]  ;;  %v10276_v20 = vcombine.low %v1462_v9, %v1466_v43 }
 0x473   : > { %7993 = vmatprep.subr.bf16.mxu0 %v10061_v61  ;;  %v1330_v8 = vld [vmem:[%s11101_s12 + $0x1af8] sm:$0xff] }
 0x474   : > { %8035 = vmatpush1.bf16.msra.mxu1 %v10196_v35  ;;  %v1454_v14 = vld [vmem:[%s11101_s12 + $0x1ed8] sm:$0xff]  ;;  %v10141_v53 = vcombine.high %v1326_v40, %v1330_v8  ;;  %v10140_v41 = vcombine.low %v1326_v40, %v1330_v8 }
 0x475   : > { %8036 = vmatprep.subr.bf16.mxu1 %v10189_v49  ;;  %v1458_v50 = vld [vmem:[%s11101_s12 + $0x1ef8] sm:$0xff] }
 0x476   : > { %7994 = vmatpush1.bf16.msra.mxu0 %v10060_v4  ;;  %v10269_v62 = vcombine.high %v1454_v14, %v1458_v50  ;;  %v1318_v38 = vld [vmem:[%s11101_s12 + $0x1a98] sm:$0xff]  ;;  %v10268_v44 = vcombine.low %v1454_v14, %v1458_v50 }
 0x477   : > { %7995 = vmatprep.subr.bf16.mxu0 %v10053_v51  ;;  %v1322_v31 = vld [vmem:[%s11101_s12 + $0x1ab8] sm:$0xff] }
 0x478   : > { %8037 = vmatpush1.bf16.msra.mxu1 %v10188_v2  ;;  %v1446_v42 = vld [vmem:[%s11101_s12 + $0x1e98] sm:$0xff]  ;;  %v10133_v45 = vcombine.high %v1318_v38, %v1322_v31  ;;  %v10132_v61 = vcombine.low %v1318_v38, %v1322_v31 }
 0x479   : > { %8038 = vmatprep.subr.bf16.mxu1 %v10181_v16  ;;  %v1450_v27 = vld [vmem:[%s11101_s12 + $0x1eb8] sm:$0xff] }
 0x47a   : > { %7996 = vmatpush1.bf16.msra.mxu0 %v10052_v3  ;;  %v10261_v52 = vcombine.high %v1446_v42, %v1450_v27  ;;  %v1310_v39 = vld [vmem:[%s11101_s12 + $0x1a58] sm:$0xff]  ;;  %v10260_v49 = vcombine.low %v1446_v42, %v1450_v27 }
 0x47b   : > { %7997 = vmatprep.subr.bf16.mxu0 %v10173_v0  ;;  %v1314_v46 = vld [vmem:[%s11101_s12 + $0x1a78] sm:$0xff] }
 0x47c   : > { %8039 = vmatpush1.bf16.msra.mxu1 %v10180_v63  ;;  %v1438_v34 = vld [vmem:[%s11101_s12 + $0x1e58] sm:$0xff]  ;;  %v10125_v54 = vcombine.high %v1310_v39, %v1314_v46  ;;  %v10124_v51 = vcombine.low %v1310_v39, %v1314_v46 }
 0x47d   : > { %8040 = vmatprep.subr.bf16.mxu1 %v10301_v56  ;;  %v1442_v35 = vld [vmem:[%s11101_s12 + $0x1e78] sm:$0xff] }
 0x47e   : > { %7998 = vmatpush2.bf16.msra.mxu0 %v10172_v11  ;;  %v10253_v58 = vcombine.high %v1438_v34, %v1442_v35  ;;  %v1302_v29 = vld [vmem:[%s11101_s12 + $0x1a18] sm:$0xff]  ;;  %v10252_v16 = vcombine.low %v1438_v34, %v1442_v35 }
 0x47f   : > { %7999 = vmatprep.subr.bf16.mxu0 %v10165_v15  ;;  %v1306_v12 = vld [vmem:[%s11101_s12 + $0x1a38] sm:$0xff] }
 0x480   : > { %8041 = vmatpush2.bf16.msra.mxu1 %v10300_v6  ;;  %v1430_v4 = vld [vmem:[%s11101_s12 + $0x1e18] sm:$0xff]  ;;  %v10117_v21 = vcombine.high %v1302_v29, %v1306_v12  ;;  %v10116_v48 = vcombine.low %v1302_v29, %v1306_v12 }
 0x481   : > { %8042 = vmatprep.subr.bf16.mxu1 %v10293_v60  ;;  %v1434_v2 = vld [vmem:[%s11101_s12 + $0x1e38] sm:$0xff] }
 0x482   : > { %8000 = vmatpush2.bf16.msra.mxu0 %v10164_v30  ;;  %v10245_v32 = vcombine.high %v1430_v4, %v1434_v2  ;;  %v10244_v7 = vcombine.low %v1430_v4, %v1434_v2 }
 0x483   : > { %8001 = vmatprep.subr.bf16.mxu0 %v10157_v33 }
 0x484   : > { %8043 = vmatpush2.bf16.msra.mxu1 %v10292_v1 }
 0x485   : > { %8044 = vmatprep.subr.bf16.mxu1 %v10285_v37 }
 0x486   : > { %8002 = vmatpush2.bf16.msra.mxu0 %v10156_v5 }
 0x487   : > { %8003 = vmatprep.subr.bf16.mxu0 %v10149_v22 }
 0x488   : > { %8045 = vmatpush2.bf16.msra.mxu1 %v10284_v19 }
 0x489   : > { %8046 = vmatprep.subr.bf16.mxu1 %v10277_v57 }
 0x48a   : > { %8004 = vmatpush2.bf16.msra.mxu0 %v10148_v59 }
 0x48b   : > { %8005 = vmatprep.subr.bf16.mxu0 %v10141_v53 }
 0x48c   : > { %8047 = vmatpush2.bf16.msra.mxu1 %v10276_v20 }
 0x48d   : > { %8048 = vmatprep.subr.bf16.mxu1 %v10269_v62 }
 0x48e   : > { %8006 = vmatpush2.bf16.msra.mxu0 %v10140_v41 }
 0x48f   : > { %8007 = vmatprep.subr.bf16.mxu0 %v10133_v45 }
 0x490   : > { %8049 = vmatpush2.bf16.msra.mxu1 %v10268_v44 }
 0x491   : > { %8050 = vmatprep.subr.bf16.mxu1 %v10261_v52  ;;  %v457_v52 = vld [vmem:[#allocation2 + $0x8] sm:$0xff] }
 0x492   : > { %8008 = vmatpush2.bf16.msra.mxu0 %v10132_v61 }
 0x493   : > { %8009 = vmatprep.subr.bf16.mxu0 %v10125_v54 }
 0x494   : > { %8051 = vmatpush2.bf16.msra.mxu1 %v10260_v49  ;;  %v458_v49 = vld [vmem:[#allocation2 + $0x48] sm:$0xff] }
 0x495   : > { %8052 = vmatprep.subr.bf16.mxu1 %v10253_v58 }
 0x496   : > { %8010 = vmatpush2.bf16.msra.mxu0 %v10124_v51  ;;  %v465_v51 = vld [vmem:[#allocation2 + $0x78] sm:$0xff] }
 0x497   : > { %8011 = vmatprep.subr.bf16.mxu0 %v10117_v21 }
 0x498   : > { %8053 = vmatpush2.bf16.msra.mxu1 %v10252_v16 }
 0x499   : > { %8054 = vmatprep.subr.bf16.mxu1 %v10245_v32 }
 0x49a   : > { %8012 = vmatpush2.bf16.msra.mxu0 %v10116_v48 }
 0x49c   : > { %8055 = vmatpush2.bf16.msra.mxu1 %v10244_v7  ;;  %v466_v7 = vld [vmem:[#allocation2 + $0x28] sm:$0xff] }
 0x49d   : > { %8014 = vmatmul.mubr.bf16.vlgmr.msra.gmra.mxu0 %v11509_v10  ;;  %v7757_v3 = vpop.f32.mrf.mxu0 }
 0x49f   : > { %8057 = vmatmul.mubr.bf16.vlgmr.msra.gmra.mxu1 %v11515_v13  ;;  %v7800_v63 = vpop.f32.mrf.mxu1  ;;  %v7759_v0 = vpop.f32.mrf.mxu0 }
 0x4a0   : > { %v7801_v30 = vadd.f32 %v7800_v63, %v7757_v3 }
 0x4a1   : > { %v7802_v56 = vpop.f32.mrf.mxu1  ;;  %v7761_v17 = vpop.f32.mrf.mxu0 }
 0x4a2   : > { %v7803_v1 = vadd.f32 %v7802_v56, %v7759_v0 }
 0x4a3   : > { %v7804_v24 = vpop.f32.mrf.mxu1  ;;  %v7763_v23 = vpop.f32.mrf.mxu0 }
 0x4a4   : > { %v7805_v26 = vadd.f32 %v7804_v24, %v7761_v17 }
 0x4a5   : > { %v7806_v55 = vpop.f32.mrf.mxu1 }
 0x4a6   : > { %v7807_v43 = vadd.f32 %v7806_v55, %v7763_v23 }
 0x4dd   : > { %v7843_v11 = vpop.f32.mrf.mxu0 }
 0x4de   : > { %v7844_v33 = vadd.f32 %v7843_v11, %v7801_v30 }
 0x4df   : > { %v7886_v6 = vpop.f32.mrf.mxu1  ;;  %v7845_v15 = vpop.f32.mrf.mxu0 }
 0x4e0   : > { %v7846_v47 = vadd.f32 %v7845_v15, %v7803_v1  ;;  %v7887_v5 = vadd.f32 %v7886_v6, %v7844_v33 }
 0x4e1   : > { %v7888_v60 = vpop.f32.mrf.mxu1  ;;  %v7847_v18 = vpop.f32.mrf.mxu0 }
 0x4e2   : > { %v7848_v19 = vadd.f32 %v7847_v18, %v7805_v26  ;;  %v7889_v57 = vadd.f32 %v7888_v60, %v7846_v47 }
 0x4e3   : > { %v7890_v28 = vpop.f32.mrf.mxu1  ;;  %v7849_v36 = vpop.f32.mrf.mxu0 }
 0x4e4   : > { %v7850_v40 = vadd.f32 %v7849_v36, %v7807_v43  ;;  %v7891_v50 = vadd.f32 %v7890_v28, %v7848_v19 }
 0x4e5   : > { %v7892_v25 = vpop.f32.mrf.mxu1 }
 0x4e6   : > { %v7893_v53 = vadd.f32 %v7892_v25, %v7850_v40 }
 0x51d   : > { %v7929_v10 = vpop.f32.mrf.mxu0 }
 0x51e   : > { %v7930_v8 = vadd.f32 %v7929_v10, %v7887_v5 }
 0x51f   : > { %v7972_v13 = vpop.f32.mrf.mxu1  ;;  %v7931_v37 = vpop.f32.mrf.mxu0 }
 0x520   : > { %v7932_v59 = vadd.f32 %v7931_v37, %v7889_v57  ;;  %v7973_v62 = vadd.f32 %v7972_v13, %v7930_v8 }
 0x521   : > { %v7974_v9 = vpop.f32.mrf.mxu1  ;;  %v7933_v22 = vpop.f32.mrf.mxu0 }
 0x522   : > { %v7934_v38 = vadd.f32 %v7933_v22, %v7891_v50  ;;  %v7975_v27 = vadd.f32 %v7974_v9, %v7932_v59 }
 0x523   : > { %v7976_v14 = vpop.f32.mrf.mxu1  ;;  %v7935_v20 = vpop.f32.mrf.mxu0 }
 0x524   : > { %v7936_v41 = vadd.f32 %v7935_v20, %v7893_v53  ;;  %v7977_v46 = vadd.f32 %v7976_v14, %v7934_v38 }
 0x525   : > { %v7978_v31 = vpop.f32.mrf.mxu1 }
 0x526   : > { %v7979_v58 = vadd.f32 %v7978_v31, %v7936_v41 }
 0x55d   : > { %v8015_v42 = vpop.f32.mrf.mxu0 }
 0x55e   : > { %v8016_v44 = vadd.f32 %v8015_v42, %v7973_v62 }
 0x55f   : > { %v8058_v45 = vpop.f32.mrf.mxu1  ;;  %v8017_v39 = vpop.f32.mrf.mxu0 }
 0x560   : > { %v8059_v34 = vadd.f32 %v8058_v45, %v8016_v44  ;;  %v8018_v35 = vadd.f32 %v8017_v39, %v7975_v27 }
 0x561   : > { %v8060_v61 = vpop.f32.mrf.mxu1  ;;  %v8019_v54 = vpop.f32.mrf.mxu0 }
 0x562   : > { %v8073_v29 = vadd.f32 %v8059_v34, %v457_v52  ;;  %v8061_v12 = vadd.f32 %v8060_v61, %v8018_v35  ;;  %v8020_v4 = vadd.f32 %v8019_v54, %v7977_v46 }
 0x563   : > { %v8062_v2 = vpop.f32.mrf.mxu1  ;;  %v8021_v16 = vpop.f32.mrf.mxu0 }
 0x564   : > { %8089 = vst [vmem:[#allocation2 + $0x8] sm:$0xff] %v8073_v29  ;;  %v8074_v21 = vadd.f32 %v8061_v12, %v458_v49  ;;  %v8063_v32 = vadd.f32 %v8062_v2, %v8020_v4  ;;  %v8022_v48 = vadd.f32 %v8021_v16, %v7979_v58 }
 0x565   : > { %v8064_v3 = vpop.f32.mrf.mxu1 }
 0x566   : > { %8090 = vst [vmem:[#allocation2 + $0x48] sm:$0xff] %v8074_v21  ;;  %v8081_v63 = vadd.f32 %v8063_v32, %v465_v51  ;;  %v8065_v0 = vadd.f32 %v8064_v3, %v8022_v48  ;;  %8102 = sbr.rel (%p10302_p8) target bundleno = 1661 (0x67d), region = 84 }
 0x568   : > { %8097 = vst [vmem:[#allocation2 + $0x78] sm:$0xff] %v8081_v63  ;;  %v8082_v56 = vadd.f32 %v8065_v0, %v466_v7 }
 0x56a   : > { %8098 = vst [vmem:[#allocation2 + $0x28] sm:$0xff] %v8082_v56 }
 0x56b   : > { %v10586_v17 = vld [vmem:[#allocation14 + $0x78] sm:$0xff]   ;;  %v10590_v11 = vld [vmem:[#allocation14 + $0x70] sm:$0xff]   ;;  %v10594_v18 = vld [vmem:[#allocation14 + $0x68] sm:$0xff]   ;;  %v8124_v57 = vlaneseq  ;;  %vm8327_vm1 = vcmask 7168  }
 0x56c   : > { %v10587_v24 = vld [vmem:[#allocation14 + $0xf8] sm:$0xff]   ;;  %10376 = vmatprep.subr.bf16.mxu0 %v10586_v17  ;;  %v10591_v6 = vld [vmem:[#allocation14 + $0xf0] sm:$0xff]   ;;  %v10595_v28 = vld [vmem:[#allocation14 + $0xe8] sm:$0xff]  }
 0x56d   : > { %v10588_v23 = vld [vmem:[#allocation14 + $0x38] sm:$0xff]   ;;  %10398 = vmatprep.subr.bf16.mxu1 %v10587_v24  ;;  %v10592_v15 = vld [vmem:[#allocation14 + $0x30] sm:$0xff]   ;;  %v10596_v36 = vld [vmem:[#allocation14 + $0x28] sm:$0xff]   ;;  %v8125_v59 = vshrl.u32 %v8124_v57, 7 }
 0x56e   : > { %v10589_v55 = vld [vmem:[#allocation14 + $0xb8] sm:$0xff]   ;;  %10377 = vmatpush3.bf16.msra.mxu0 %v10588_v23  ;;  %v10593_v60 = vld [vmem:[#allocation14 + $0xb0] sm:$0xff]   ;;  %v10597_v25 = vld [vmem:[#allocation14 + $0xa8] sm:$0xff]  }
 0x56f   : > { %10399 = vmatpush3.bf16.msra.mxu1 %v10589_v55  ;;  %10378 = vmatprep.subr.bf16.mxu0 %v10590_v11  ;;  %v10598_v10 = vld [vmem:[#allocation14 + $0x60] sm:$0xff]   ;;  %v10602_v33 = vld [vmem:[#allocation14 + $0x58] sm:$0xff]   ;;  %v10606_v9 = vld [vmem:[#allocation14 + $0x50] sm:$0xff]   ;;  %v12449_v38 = vsub.s32 0, %v8125_v59  ;;  %v12451_v31 = vsub.s32 2, %v8125_v59  ;;  %v12455_v27 = vsub.s32 4, %v8125_v59 }
 0x570   : > { %10400 = vmatprep.subr.bf16.mxu1 %v10591_v6  ;;  %v10599_v30 = vld [vmem:[#allocation14 + $0xe0] sm:$0xff]   ;;  %v10603_v37 = vld [vmem:[#allocation14 + $0xd8] sm:$0xff]   ;;  %v10607_v43 = vld [vmem:[#allocation14 + $0xd0] sm:$0xff]   ;;  %v12457_v41 = vsub.s32 6, %v8125_v59 }
 0x571   : > { %v10600_v13 = vld [vmem:[#allocation14 + $0x20] sm:$0xff]   ;;  %v10604_v26 = vld [vmem:[#allocation14 + $0x18] sm:$0xff]   ;;  %v10608_v5 = vld [vmem:[#allocation14 + $0x10] sm:$0xff]  }
 0x572   : > { %10379 = vmatpush3.bf16.msra.mxu0 %v10592_v15  ;;  %v10601_v1 = vld [vmem:[#allocation14 + $0xa0] sm:$0xff]   ;;  %v10605_v47 = vld [vmem:[#allocation14 + $0x98] sm:$0xff]   ;;  %v10609_v19 = vld [vmem:[#allocation14 + $0x90] sm:$0xff]  }
 0x573   : > { %10401 = vmatpush3.bf16.msra.mxu1 %v10593_v60  ;;  %10380 = vmatprep.subr.bf16.mxu0 %v10594_v18  ;;  %v10610_v22 = vld [vmem:[#allocation14 + $0x48] sm:$0xff]   ;;  %v10614_v50 = vld [vmem:[#allocation14 + $0x40] sm:$0xff]   ;;  %v12453_v42 = vld [vmem:[#allocation11] sm:$0xff] }
 0x574   : > { %10402 = vmatprep.subr.bf16.mxu1 %v10595_v28  ;;  %v10611_v40 = vld [vmem:[#allocation14 + $0xc8] sm:$0xff]   ;;  %v10615_v20 = vld [vmem:[#allocation14 + $0xc0] sm:$0xff]   ;;  %v8120_v44 = vunpack.c.l.bf16 %v12453_v42  ;;  %v8104_v52 = vld [vmem:[#allocation2] sm:$0xff] }
 0x575   : > { %v10612_v8 = vld [vmem:[#allocation14 + $0x8] sm:$0xff]   ;;  %v10616_v53 = vld [vmem:[#allocation14] sm:$0xff]   ;;  %v8111_v39 = vld [vmem:[#allocation2 + $0x40] sm:$0xff] }
 0x576   : > { %10381 = vmatpush3.bf16.msra.mxu0 %v10596_v36  ;;  %v10613_v14 = vld [vmem:[#allocation14 + $0x88] sm:$0xff]   ;;  %v10617_v62 = vld [vmem:[#allocation14 + $0x80] sm:$0xff]   ;;  %v8112_v46 = vld [vmem:[#allocation2 + $0x20] sm:$0xff]  ;;  %v8127_v34 = vrot.slane %v8120_v44, %v12449_v38  ;;  %v8131_v35 = vrot.slane %v8120_v44, %v12451_v31  ;;  %v8135_v29 = vrot.slane %v8120_v44, %v12455_v27  ;;  %v8139_v12 = vrot.slane %v8120_v44, %v12457_v41 }
 0x577   : > { %10403 = vmatpush3.bf16.msra.mxu1 %v10597_v25  ;;  %10382 = vmatprep.subr.bf16.mxu0 %v10598_v10  ;;  %v8103_v45 = vld [vmem:[#allocation2 + $0x30] sm:$0xff]  ;;  %v8105_v61 = vld [vmem:[#allocation2 + $0x58] sm:$0xff]  ;;  %v10618_v58 = vld [vmem:[#allocation14 + $0x178] sm:$0xff]  }
 0x578   : > { %10404 = vmatprep.subr.bf16.mxu1 %v10599_v30  ;;  %v8106_v49 = vld [vmem:[#allocation2 + $0x18] sm:$0xff]  ;;  %v8113_v54 = vld [vmem:[#allocation2 + $0x10] sm:$0xff]  ;;  %v10619_v4 = vld [vmem:[#allocation14 + $0x1f8] sm:$0xff]   ;;  %v8167_v2 = vrot.slane %v8127_v34, %v12449_v38  ;;  %v8171_v51 = vrot.slane %v8131_v35, %v12449_v38  ;;  %v8175_v21 = vrot.slane %v8135_v29, %v12449_v38  ;;  %v8179_v32 = vrot.slane %v8139_v12, %v12449_v38 }
 0x579   : > { %v8114_v16 = vld [vmem:[#allocation2 + $0x38] sm:$0xff]  ;;  %v8214_v0 = vld [vmem:[#allocation12] sm:$0xff]  ;;  %v10622_v18 = vld [vmem:[#allocation14 + $0x170] sm:$0xff]  }
 0x57a   : > { %10383 = vmatpush3.bf16.msra.mxu0 %v10600_v13  ;;  %v8196_v48 = vadd.f32 %v8167_v2, %v8103_v45  ;;  %v8197_v7 = vadd.f32 %v8171_v51, %v8104_v52  ;;  %v8204_v3 = vadd.f32 %v8167_v2, %v8111_v39  ;;  %v8205_v63 = vadd.f32 %v8171_v51, %v8112_v46  ;;  %v10620_v55 = vld [vmem:[#allocation14 + $0x138] sm:$0xff]   ;;  %v10623_v25 = vld [vmem:[#allocation14 + $0x1f0] sm:$0xff]  }
 0x57b   : > { %10405 = vmatpush3.bf16.msra.mxu1 %v10601_v1  ;;  %10384 = vmatprep.subr.bf16.mxu0 %v10602_v33  ;;  %v8198_v56 = vadd.f32 %v8175_v21, %v8105_v61  ;;  %v12468_v17 = vadd.f32 %v8179_v32, %v8106_v49  ;;  %v8206_v24 = vadd.f32 %v8175_v21, %v8113_v54  ;;  %v8215_v11 = vunpack.c.l.bf16 %v8214_v0  ;;  %v10621_v15 = vld [vmem:[#allocation14 + $0x1b8] sm:$0xff]   ;;  %v10624_v10 = vld [vmem:[#allocation14 + $0x130] sm:$0xff]   ;;  %v10626_v33 = vld [vmem:[#allocation14 + $0x168] sm:$0xff]  }
 0x57c   : > { %10406 = vmatprep.subr.bf16.mxu1 %v10603_v37  ;;  %v12470_v23 = vadd.f32 %v8179_v32, %v8114_v16  ;;  %v8333_v6 = vpack.c.bf16 %v8205_v63, %v8197_v7  ;;  %v8332_v28 = vpack.c.bf16 %v8204_v3, %v8196_v48  ;;  %v10625_v1 = vld [vmem:[#allocation14 + $0x1b0] sm:$0xff]   ;;  %v10627_v37 = vld [vmem:[#allocation14 + $0x1e8] sm:$0xff]   ;;  %v10634_v44 = vld [vmem:[#allocation14 + $0x158] sm:$0xff]   ;;  %v12483_v46 = vunpack.c.h.bf16 %v8214_v0 }
 0x57d   : > { %v8334_v36 = vpack.c.bf16 %v8206_v24, %v8198_v56  ;;  %v8222_v30 = vrot.slane %v8215_v11, %v12449_v38  ;;  %v8226_v13 = vrot.slane %v8215_v11, %v12451_v31  ;;  %v8234_v57 = vrot.slane %v8215_v11, %v12457_v41  ;;  %v10635_v45 = vld [vmem:[#allocation14 + $0x1d8] sm:$0xff]   ;;  %v10639_v29 = vld [vmem:[#allocation14 + $0x1d0] sm:$0xff]   ;;  %v10642_v0 = vld [vmem:[#allocation14 + $0x148] sm:$0xff]  }
 0x57e   : > { %10385 = vmatpush3.bf16.msra.mxu0 %v10604_v26  ;;  %v8335_v60 = vpack.c.bf16 %v12470_v23, %v12468_v17  ;;  %8884 = vmatprep.mubr.bf16.mxu0 %v8333_v6  ;;  %v8230_v26 = vrot.slane %v8215_v11, %v12455_v27  ;;  %v10636_v39 = vld [vmem:[#allocation14 + $0x118] sm:$0xff]   ;;  %v10640_v16 = vld [vmem:[#allocation14 + $0x110] sm:$0xff]   ;;  %v10644_v11 = vld [vmem:[#allocation14 + $0x108] sm:$0xff]  }
 0x57f   : > { %10407 = vmatpush3.bf16.msra.mxu1 %v10605_v47  ;;  %10386 = vmatprep.subr.bf16.mxu0 %v10606_v9  ;;  %v10628_v47 = vld [vmem:[#allocation14 + $0x128] sm:$0xff]   ;;  %v8262_v9 = vrot.slane %v8222_v30, %v12449_v38  ;;  %v8274_v52 = vrot.slane %v8234_v57, %v12449_v38  ;;  %v10637_v54 = vld [vmem:[#allocation14 + $0x198] sm:$0xff]  }
 0x580   : > { %10408 = vmatprep.subr.bf16.mxu1 %v10607_v43  ;;  %8925 = vmatprep.mubr.bf16.mxu1 %v8335_v60  ;;  %v8266_v43 = vrot.slane %v8226_v13, %v12449_v38  ;;  %v10645_v6 = vld [vmem:[#allocation14 + $0x188] sm:$0xff]  }
 0x581   : > { %v8299_v59 = vmul.f32 %v8262_v9, %v8204_v3  ;;  %v8294_v2 = vmul.f32 %v8274_v52, %v12468_v17  ;;  %v8302_v51 = vmul.f32 %v8274_v52, %v12470_v23  ;;  %v8238_v3 = vrot.slane %v12483_v46, %v12449_v38 }
 0x582   : > { %10387 = vmatpush3.bf16.msra.mxu0 %v10608_v5  ;;  %v10629_v5 = vld [vmem:[#allocation14 + $0x1a8] sm:$0xff]   ;;  %v8246_v17 = vrot.slane %v12483_v46, %v12455_v27 }
 0x583   : > { %10409 = vmatpush3.bf16.msra.mxu1 %v10609_v19  ;;  %10388 = vmatprep.subr.bf16.mxu0 %v10610_v22  ;;  %v10630_v19 = vld [vmem:[#allocation14 + $0x160] sm:$0xff]  }
 0x584   : > { %10410 = vmatprep.subr.bf16.mxu1 %v10611_v40  ;;  %v10631_v22 = vld [vmem:[#allocation14 + $0x1e0] sm:$0xff]   ;;  %v8270_v40 = vrot.slane %v8230_v26, %v12449_v38 }
 0x585   : > { %v8107_v26 = vld [vmem:[#allocation2 + $0x50] sm:$0xff] }
 0x586   : > { %10389 = vmatpush3.bf16.msra.mxu0 %v10612_v8  ;;  %v10632_v8 = vld [vmem:[#allocation14 + $0x120] sm:$0xff]   ;;  %v8293_v61 = vmul.f32 %v8270_v40, %v8198_v56  ;;  %v8301_v49 = vmul.f32 %v8270_v40, %v8206_v24  ;;  %v10643_v24 = vld [vmem:[#allocation14 + $0x1c8] sm:$0xff]  }
 0x587   : > { %10411 = vmatpush3.bf16.msra.mxu1 %v10613_v14  ;;  %10390 = vmatprep.subr.bf16.mxu0 %v10614_v50  ;;  %v8291_v14 = vmul.f32 %v8262_v9, %v8196_v48  ;;  %v8292_v50 = vmul.f32 %v8266_v43, %v8197_v7  ;;  %v10641_v7 = vld [vmem:[#allocation14 + $0x190] sm:$0xff]  }
 0x588   : > { %10412 = vmatprep.subr.bf16.mxu1 %v10615_v20  ;;  %v8300_v20 = vmul.f32 %v8266_v43, %v8205_v63  ;;  %v8242_v63 = vrot.slane %v12483_v46, %v12451_v31  ;;  %v8115_v43 = vld [vmem:[#allocation2 + $0x60] sm:$0xff] }
 0x589   : > { %v8307_v34 = vadd.f32 %v8292_v50, %v8291_v14 }
 0x58a   : > { %10391 = vmatpush3.bf16.msra.mxu0 %v10616_v53  ;;  %v10633_v53 = vld [vmem:[#allocation14 + $0x1a0] sm:$0xff]   ;;  %v8316_v35 = vadd.f32 %v8300_v20, %v8299_v59  ;;  %v8282_v30 = vrot.slane %v8242_v63, %v12449_v38 }
 0x58b   : > { %10413 = vmatpush3.bf16.msra.mxu1 %v10617_v62  ;;  %10420 = vmatprep.subr.bf16.mxu0 %v10618_v58  ;;  %v8121_v62 = vunpack.c.h.bf16 %v12453_v42  ;;  %v10638_v58 = vld [vmem:[#allocation14 + $0x150] sm:$0xff]   ;;  %v8308_v32 = vadd.f32 %v8307_v34, %v8293_v61 }
 0x58c   : > { %10442 = vmatprep.subr.bf16.mxu1 %v10619_v4  ;;  %v8317_v48 = vadd.f32 %v8316_v35, %v8301_v49 }
 0x58d   : > { %8885 = vmatmul.mubr.bf16.vlgmr.msra.gmra.mxu0 %v8332_v28  ;;  %v8147_v42 = vrot.slane %v8121_v62, %v12451_v31  ;;  %v8155_v12 = vrot.slane %v8121_v62, %v12457_v41  ;;  %v8143_v4 = vrot.slane %v8121_v62, %v12449_v38  ;;  %v8151_v21 = vrot.slane %v8121_v62, %v12455_v27  ;;  %v10646_v28 = vld [vmem:[#allocation14 + $0x140] sm:$0xff]  }
 0x58e   : > { %8926 = vmatmul.mubr.bf16.vlgmr.msra.gmra.mxu1 %v8334_v36  ;;  %10421 = vmatpush3.bf16.msra.mxu0 %v10620_v55  ;;  %v8250_v31 = vrot.slane %v12483_v46, %v12457_v41  ;;  %v8309_v60 = vadd.f32 %v8308_v32, %v8294_v2  ;;  %v10647_v36 = vld [vmem:[#allocation14 + $0x1c0] sm:$0xff]   ;;  %v8213_v32 = vld [vmem:[#allocation3 + $0x8] sm:$0xff] }
 0x58f   : > { %10443 = vmatpush3.bf16.msra.mxu1 %v10621_v15  ;;  %10422 = vmatprep.subr.bf16.mxu0 %v10622_v18  ;;  %v8187_v56 = vrot.slane %v8147_v42, %v12449_v38  ;;  %v8195_v23 = vrot.slane %v8155_v12, %v12449_v38  ;;  %v8183_v55 = vrot.slane %v8143_v4, %v12449_v38  ;;  %v8116_v27 = vld [vmem:[#allocation2 + $0x70] sm:$0xff] }
 0x590   : > { %10444 = vmatprep.subr.bf16.mxu1 %v10623_v25  ;;  %v8191_v15 = vrot.slane %v8151_v21, %v12449_v38  ;;  %v8318_v18 = vadd.f32 %v8317_v48, %v8302_v51  ;;  %v8108_v25 = vld [vmem:[#allocation2 + $0x68] sm:$0xff]  ;;  %v8290_v14 = vrot.slane %v8250_v31, %v12449_v38  ;;  %v10648_v62 = vld [vmem:[#allocation14 + $0x100] sm:$0xff]   ;;  %v8212_v51 = vld [vmem:[#allocation3] sm:$0xff] }
 0x591   : > { %v8201_v13 = vadd.f32 %v8187_v56, %v8108_v25  ;;  %v8208_v40 = vadd.f32 %v8183_v55, %v8115_v43 }
 0x592   : > { %10423 = vmatpush3.bf16.msra.mxu0 %v10624_v10  ;;  %v8278_v10 = vrot.slane %v8238_v3, %v12449_v38 }
 0x593   : > { %10445 = vmatpush3.bf16.msra.mxu1 %v10625_v1  ;;  %10424 = vmatprep.subr.bf16.mxu0 %v10626_v33  ;;  %v8209_v1 = vadd.f32 %v8187_v56, %v8116_v27  ;;  %v8110_v33 = vld [vmem:[#allocation2 + $0x48] sm:$0xff] }
 0x594   : > { %10446 = vmatprep.subr.bf16.mxu1 %v10627_v37  ;;  %v8118_v37 = vld [vmem:[#allocation2 + $0x28] sm:$0xff]  ;;  %v8203_v41 = vadd.f32 %v8195_v23, %v8110_v33  ;;  %v8330_v33 = vld [vmem:[#allocation4] sm:$0xff] }
 0x595   : > { %v8211_v9 = vadd.f32 %v8195_v23, %v8118_v37  ;;  %v8337_v57 = vpack.c.bf16 %v8209_v1, %v8201_v13  ;;  %v8304_v46 = vmul.f32 %v8282_v30, %v8209_v1 }
 0x596   : > { %10425 = vmatpush3.bf16.msra.mxu0 %v10628_v47  ;;  %v8286_v47 = vrot.slane %v8246_v17, %v12449_v38  ;;  %v8298_v35 = vmul.f32 %v8290_v14, %v8203_v41 }
 0x597   : > { %10447 = vmatpush3.bf16.msra.mxu1 %v10629_v5  ;;  %10426 = vmatprep.subr.bf16.mxu0 %v10630_v19  ;;  %v8200_v5 = vadd.f32 %v8183_v55, %v8107_v26  ;;  %v8109_v19 = vld [vmem:[#allocation2 + $0x8] sm:$0xff]  ;;  %v8339_v50 = vpack.c.bf16 %v8211_v9, %v8203_v41  ;;  %v8306_v42 = vmul.f32 %v8290_v14, %v8211_v9 }
 0x598   : > { %10448 = vmatprep.subr.bf16.mxu1 %v10631_v22  ;;  %v8117_v22 = vld [vmem:[#allocation2 + $0x78] sm:$0xff]  ;;  %8966 = vmatprep.mubr.bf16.mxu0 %v8337_v57 }
 0x599   : > { %v8210_v59 = vadd.f32 %v8191_v15, %v8117_v22  ;;  %v8295_v20 = vmul.f32 %v8278_v10, %v8200_v5  ;;  %9007 = vmatprep.mubr.bf16.mxu1 %v8339_v50  ;;  %v8336_v34 = vpack.c.bf16 %v8208_v40, %v8200_v5  ;;  %v8331_v22 = vld [vmem:[#allocation4 + $0x8] sm:$0xff] }
 0x59a   : > { %10427 = vmatpush3.bf16.msra.mxu0 %v10632_v8  ;;  %v8202_v8 = vadd.f32 %v8191_v15, %v8109_v19 }
 0x59b   : > { %10449 = vmatpush3.bf16.msra.mxu1 %v10633_v53  ;;  %10428 = vmatprep.subr.bf16.mxu0 %v10634_v44  ;;  %v8296_v53 = vmul.f32 %v8282_v30, %v8201_v13  ;;  %v10649_v44 = vld [vmem:[#allocation14 + $0x180] sm:$0xff]   ;;  %v8310_v52 = vadd.f32 %v8309_v60, %v8295_v20  ;;  %v8305_v49 = vmul.f32 %v8286_v47, %v8210_v59 }
 0x59c   : > { %10450 = vmatprep.subr.bf16.mxu1 %v10635_v45  ;;  %v8297_v45 = vmul.f32 %v8286_v47, %v8202_v8  ;;  %v8338_v61 = vpack.c.bf16 %v8210_v59, %v8202_v8 }
 0x59d   : > { %v8311_v38 = vadd.f32 %v8310_v52, %v8296_v53 }
 0x59e   : > { %10429 = vmatpush3.bf16.msra.mxu0 %v10636_v39  ;;  %v8303_v39 = vmul.f32 %v8278_v10, %v8208_v40 }
 0x59f   : > { %10451 = vmatpush3.bf16.msra.mxu1 %v10637_v54  ;;  %10430 = vmatprep.subr.bf16.mxu0 %v10638_v58  ;;  %v8312_v58 = vadd.f32 %v8311_v38, %v8297_v45 }
 0x5a0   : > { %10452 = vmatprep.subr.bf16.mxu1 %v10639_v29  ;;  %v8319_v54 = vadd.f32 %v8318_v18, %v8303_v39 }
 0x5a1   : > { %v8313_v12 = vadd.f32 %v8312_v58, %v8298_v35 }
 0x5a2   : > { %10431 = vmatpush3.bf16.msra.mxu0 %v10640_v16  ;;  %v8320_v29 = vadd.f32 %v8319_v54, %v8304_v46 }
 0x5a3   : > { %10453 = vmatpush3.bf16.msra.mxu1 %v10641_v7  ;;  %10432 = vmatprep.subr.bf16.mxu0 %v10642_v0 }
 0x5a4   : > { %10454 = vmatprep.subr.bf16.mxu1 %v10643_v24  ;;  %v8321_v4 = vadd.f32 %v8320_v29, %v8305_v49  ;;  %8314 = vadd.xlane.f32.xlu0 %v8313_v12 }
 0x5a6   : > { %10433 = vmatpush3.bf16.msra.mxu0 %v10644_v11  ;;  %v8322_v2 = vadd.f32 %v8321_v4, %v8306_v42 }
 0x5a7   : > { %10455 = vmatpush3.bf16.msra.mxu1 %v10645_v6  ;;  %10434 = vmatprep.subr.bf16.mxu0 %v10646_v28 }
 0x5a8   : > { %10456 = vmatprep.subr.bf16.mxu1 %v10647_v36  ;;  %8323 = vadd.xlane.f32.xlu0 %v8322_v2 }
 0x5aa   : > { %10435 = vmatpush3.bf16.msra.mxu0 %v10648_v62 }
 0x5ab   : > { %10457 = vmatpush3.bf16.msra.mxu1 %v10649_v44 }
 0x5ad   : > { %8967 = vmatmul.mubr.bf16.vlgmr.msra.gmra.mxu0 %v8336_v34 }
 0x5ae   : > { %9008 = vmatmul.mubr.bf16.vlgmr.msra.gmra.mxu1 %v8338_v61 }
 0x62d   : > { %v8315_v16 = vpop.xlane.xlu0 %8314 }
 0x62e   : > { %v8325_v21 = vadd.f32 %v8315_v16, %v8212_v51 }
 0x630   : > { %8328 = vst.msk [vmem:[#allocation3] sm:$0xff] %vm8327_vm1, %v8325_v21 }
 0x631   : > { %v8324_v48 = vpop.xlane.xlu0 %8323 }
 0x632   : > { %v8326_v7 = vadd.f32 %v8324_v48, %v8213_v32 }
 0x634   : > { %8329 = vst.msk [vmem:[#allocation3 + $0x8] sm:$0xff] %vm8327_vm1, %v8326_v7 }
 0x64d   : > { %v10392_v3 = vpop.f32.mrf.mxu0 }
 0x64e   : > { %v10414_v63 = vpop.f32.mrf.mxu1 }
 0x64f   : > { %v10393_v0 = vpop.f32.mrf.mxu0 }
 0x650   : > { %v10415_v56 = vpop.f32.mrf.mxu1  ;;  %v10394_v11 = vadd.f32 %v10393_v0, %v10392_v3 }
 0x651   : > { %v10395_v17 = vpop.f32.mrf.mxu0  ;;  %v10416_v6 = vadd.f32 %v10415_v56, %v10414_v63 }
 0x652   : > { %v10417_v24 = vpop.f32.mrf.mxu1 }
 0x653   : > { %v10396_v23 = vpop.f32.mrf.mxu0  ;;  %v8928_v28 = vadd.f32 %v10416_v6, %v10394_v11 }
 0x654   : > { %v10418_v55 = vpop.f32.mrf.mxu1  ;;  %v10397_v36 = vadd.f32 %v10396_v23, %v10395_v17 }
 0x655   : > { %v10419_v25 = vadd.f32 %v10418_v55, %v10417_v24 }
 0x657   : > { %v8931_v47 = vadd.f32 %v10419_v25, %v10397_v36 }
 0x66d   : > { %v10436_v15 = vpop.f32.mrf.mxu0 }
 0x66e   : > { %v10458_v31 = vpop.f32.mrf.mxu1 }
 0x66f   : > { %v10437_v60 = vpop.f32.mrf.mxu0 }
 0x670   : > { %v10459_v18 = vpop.f32.mrf.mxu1  ;;  %v10438_v27 = vadd.f32 %v10437_v60, %v10436_v15 }
 0x671   : > { %v10439_v10 = vpop.f32.mrf.mxu0  ;;  %v10460_v1 = vadd.f32 %v10459_v18, %v10458_v31 }
 0x672   : > { %v10461_v30 = vpop.f32.mrf.mxu1  ;;  %v8969_v13 = vadd.f32 %v10438_v27, %v8928_v28 }
 0x673   : > { %v10440_v37 = vpop.f32.mrf.mxu0 }
 0x674   : > { %v10462_v26 = vpop.f32.mrf.mxu1  ;;  %v9010_v41 = vadd.f32 %v10460_v1, %v8969_v13  ;;  %v10441_v9 = vadd.f32 %v10440_v37, %v10439_v10 }
 0x675   : > { %v10463_v19 = vadd.f32 %v10462_v26, %v10461_v30 }
 0x676   : > { %v9016_v43 = vadd.f32 %v9010_v41, %v8330_v33  ;;  %v8972_v5 = vadd.f32 %v10441_v9, %v8931_v47 }
 0x678   : > { %9018 = vst [vmem:[#allocation4] sm:$0xff] %v9016_v43  ;;  %v9013_v57 = vadd.f32 %v10463_v19, %v8972_v5 }
 0x67a   : > { %v9017_v40 = vadd.f32 %v9013_v57, %v8331_v22 }
 0x67c   : > { %9019 = vst [vmem:[#allocation4 + $0x8] sm:$0xff] %v9017_v40 }
 0x67d PF: > { %9023 = sbr.rel (!%p8099_p4) target bundleno = 1878 (0x756), region = 88  ;;  %s9025_s26 = sld [smem:[#allocation5]] (%p8099_p4)  ;;  %v10927_v8 = vmov (%p8099_p4), 0   ;;  %v9024_v14 = vld [vmem:[#allocation3] sm:$0xff] (%p8099_p4)  ;;  %vm9030_vm2 = vcmask (%p8099_p4), 1024   ;;  %vm9067_vm3 = vcmask (%p8099_p4), 3074  }
 0x67e   : > { %10650 = vset.pattern.permute.xlu0 (%p8099_p4), %v10927_v8  ;;  %vm9057_vm4 = vcmask (%p8099_p4), 1041408   ;;  %v9028_v43 = vld [vmem:[#allocation15] sm:$0x1] (%p8099_p4) }
 0x67f   : > { %v9090_v18 = vld [vmem:[#allocation4 + $0x2] sm:$0x3] (%p8099_p4)  ;;  %v9050_v27 = vld [vmem:[#allocation4] sm:$0x3] (%p8099_p4)  ;;  %v9029_v22 = vunpack.c.l.bf16 (%p8099_p4), %v9028_v43 }
 0x680   : > { %v9097_v28 = vrot.slane (%p8099_p4), %v9090_v18, 6 }
 0x683   : > { %v9026_v50 = vstv %s9025_s26 }
 0x684   : > { %v9027_v59 = vadd.f32 %v9026_v50, %v9024_v14 }
 0x686   : > { %v9068_v20 = vsel %vm9067_vm3, %v9027_v59, -inf  ;;  %v9031_v53 = vsel %vm9030_vm2, %v9027_v59, -inf }
 0x687   : > { %v9069_v62 = vrot.slane %v9068_v20, 4  ;;  %v9032_v44 = vrot.slane %v9031_v53, 4 }
 0x689   : > { %v9070_v45 = vmax.f32 %v9068_v20, %v9069_v62  ;;  %v9033_v52 = vmax.f32 %v9031_v53, %v9032_v44 }
 0x68b   : > { %v9071_v39 = vrot.slane %v9070_v45, 2  ;;  %v9034_v46 = vrot.slane %v9033_v52, 2 }
 0x68d   : > { %v9072_v34 = vmax.f32 %v9070_v45, %v9071_v39  ;;  %v9035_v35 = vmax.f32 %v9033_v52, %v9034_v46 }
 0x68f   : > { %v9073_v61 = vrot.slane %v9072_v34, 1  ;;  %v9036_v38 = vrot.slane %v9035_v35, 1 }
 0x691   : > { %v9074_v49 = vmax.f32 %v9072_v34, %v9073_v61  ;;  %v9037_v54 = vmax.f32 %v9035_v35, %v9036_v38 }
 0x693   : > { %v9075_v58 = vsub.f32 %v9027_v59, %v9074_v49  ;;  %v9038_v42 = vsub.f32 %v9027_v59, %v9037_v54 }
 0x695   : > { %v9076_v29 = vmul.f32 1.442695, %v9075_v58  ;;  %v9039_v12 = vmul.f32 1.442695, %v9038_v42 }
 0x697   : > { %10651 = vpow2.f32 %v9076_v29 }
 0x698   : > { %10653 = vpow2.f32 %v9039_v12 }
 0x6a4   : > { %v10652_v4 = vpop.eup %10651 }
 0x6a5   : > { %v10654_v2 = vpop.eup %10653  ;;  %v9079_v51 = vrot.slane %v10652_v4, 2 }
 0x6a6   : > { %v9041_v16 = vsel %vm9030_vm2, %v10654_v2, 0.0 }
 0x6a7   : > { %v9081_v21 = vsel %vm9030_vm2, %v9079_v51, 0.0  ;;  %v9042_v32 = vrot.slane %v9041_v16, 4 }
 0x6a8   : > { %v9082_v48 = vrot.slane %v9081_v21, 4 }
 0x6a9   : > { %v9043_v7 = vadd.f32 %v9042_v32, %v9041_v16 }
 0x6aa   : > { %v9083_v3 = vadd.f32 %v9082_v48, %v9081_v21 }
 0x6ab   : > { %v9044_v63 = vrot.slane %v9043_v7, 2 }
 0x6ac   : > { %v9084_v0 = vrot.slane %v9083_v3, 2 }
 0x6ad   : > { %v9045_v56 = vadd.f32 %v9044_v63, %v9043_v7 }
 0x6ae   : > { %v9085_v17 = vadd.f32 %v9084_v0, %v9083_v3 }
 0x6af   : > { %v9046_v24 = vrot.slane %v9045_v56, 1 }
 0x6b0   : > { %v9086_v23 = vrot.slane %v9085_v17, 1 }
 0x6b1   : > { %v9047_v55 = vadd.f32 %v9046_v24, %v9045_v56 }
 0x6b2   : > { %v9087_v11 = vadd.f32 %v9086_v23, %v9085_v17 }
 0x6b3   : > { %10655 = vrcp.f32 %v9047_v55 }
 0x6b4   : > { %10657 = vrcp.f32 %v9087_v11 }
 0x6c0   : > { %v10656_v6 = vpop.eup %10655 }
 0x6c1   : > { %v10658_v15 = vpop.eup %10657  ;;  %v9049_v60 = vmul.f32 %v10656_v6, %v10654_v2 }
 0x6c2   : > { %v9089_v31 = vmul.f32 %v10658_v15, %v10652_v4 }
 0x6c4   : > { %9093 = vperm.xlu0 %10650, %v9089_v31  }
 0x6c8   : > { %9053 = vperm.xlu0 %10650, %v9049_v60  }
 0x73f   : > { %v9094_v36 = vpop.permute.xlu0 %9093 }
 0x740   : > { %v9099_v25 = vmul.f32 %v9097_v28, %v9094_v36 }
 0x742   : > { %v9101_v10 = vrot.slane %v9099_v25, 2 }
 0x743   : > { %v9054_v30 = vpop.permute.xlu0 %9053 }
 0x744   : > { %v9103_v13 = vsel %vm9057_vm4, %v9101_v10, 0.0  ;;  %v9056_v1 = vmul.f32 %v9054_v30, %v9050_v27 }
 0x745   : > { %v9104_v33 = vrot.slane %v9103_v13, 4 }
 0x746   : > { %v9058_v37 = vsel %vm9057_vm4, %v9056_v1, 0.0 }
 0x747   : > { %v9105_v26 = vadd.f32 %v9104_v33, %v9103_v13  ;;  %v9059_v47 = vrot.slane %v9058_v37, 4 }
 0x749   : > { %v9106_v41 = vrot.slane %v9105_v26, 2  ;;  %v9060_v9 = vadd.f32 %v9059_v47, %v9058_v37 }
 0x74b   : > { %v9107_v5 = vadd.f32 %v9106_v41, %v9105_v26  ;;  %v9061_v19 = vrot.slane %v9060_v9, 2 }
 0x74d   : > { %v9108_v57 = vrot.slane %v9107_v5, 1  ;;  %v9062_v40 = vadd.f32 %v9061_v19, %v9060_v9 }
 0x74f   : > { %v9109_v8 = vadd.f32 %v9108_v57, %v9107_v5  ;;  %v9063_v14 = vrot.slane %v9062_v40, 1 }
 0x751   : > { %v9110_v50 = vadd.f32 %v9109_v8, %v9029_v22  ;;  %v9064_v59 = vadd.f32 %v9063_v14, %v9062_v40 }
 0x753   : > { %9111 = vst [vmem:[#allocation17 + $0x1] sm:$0x1] %v9110_v50  ;;  %v9065_v20 = vadd.f32 %v9064_v59, %v9029_v22 }
 0x755   : > { %9066 = vst [vmem:[#allocation17] sm:$0x1] %v9065_v20 }
 0x756 PF: > { %p10521_p5 = scmp.eq.s32.totalorder %s11001_s6, 1  ;;  %s10928_s29 = smov [#allocation17]  }
 0x757   : > { %s9119_s11 = sshll.u32 %s10928_s29, 4  ;;  %s9120_s11 = int_to_ptr.vmem [resolvable:$true] %s9119_s11 }
 0x758   : > { %s10817_s13 = scalar_lea.vmem %s9120_s11, 32  ;;  %p10824_p12 = scmp.lt.s32.totalorder %s9120_s11, %s9120_s11 }
 0x759   : > { %p10818_p9 = scmp.ne.s32.totalorder %s9120_s11, %s10817_s13  ;;  %p10825_p7 = scmp.lt.s32.totalorder %s10817_s13, %s10817_s13 }
 0x75b   : > { %p10819_p10 = pnand %p10818_p9, %p10521_p5  ;;  %p10826_p13 = por %p10825_p7, %p10824_p12 }
 0x75d   : > { %p10820_p11 = pneg %p10819_p10 }
 0x75f   : > { %p10827_p0 = pnand %p10826_p13, %p10820_p11 }
 0x761   : > { %10830 = shalt.err (!%p10827_p0)
}
 0x762   : > { %10487 = dma.vmem_to_hbm [thread:$0]  (%p10521_p5), %s9120_s11, 32, %s12549_s7, [#allocation8]  }
 0x763   : > { %10886 = dma.done.wait (%p10521_p5), [#allocation8], 32  }
 0x764   : > { %10888 = vsyncadd (%p10521_p5), [#allocation8], 4294967264 }
 0x765 PF: > { %s25_s8 = sadd.s32 1, %s10911_s8   ;;  %s12568_s26 = smov %s10895_s27 }
 0x766   : > { %p22_p2 = scmp.ge.s32.totalorder %s25_s8, 4   ;;  %s12569_s27 = smov %s10899_s28 }
 0x767   : > { %s12570_s28 = smov %s11080_s20  ;;  %s12571_s29 = smov %s10907_s30 }
 0x768   : > { %s12572_s30 = smov %s12574_s18  ;;  %24 = sbr.rel (!%p22_p2) target bundleno = 10 (0xa), region = 126 }
 0x76d   :  { %9132 = vsyncpa [#allocation7], 1 }
 0x76e   :  { %9134 = vsyncpa [#allocation7 + $0x1], 1 }
 0x76f   :  { %9135 = vsyncpa [#allocation10], 1 }
 0x770   :  { %9137 = vsyncpa [#allocation10 + $0x1], 1 }
 0x771   :  { %9138 = vsyncpa [#allocation13], 1 }
 0x772   :  { %9139 = vsyncpa [#allocation16], 1 }
 0x773   :  { %9140 = vsyncpa [#allocation8], 1 }
 0x774   :  { %9142 = vsyncpa [#allocation8 + $0x1], 1 }

</bundles_post_ra>
